<compile_context>
chip_gen: v5e
topology: v5e:2x2
jax: 0.10.0
libtpu: 0.0.40
codegen_flags: <defaults>
</compile_context>

<pallas_src>
import numpy as np

import jax
import jax.numpy as jnp
from jax.experimental import pallas as pl
from jax.experimental.pallas import tpu as pltpu


# ---------------------------------------------------------------------------
# Fixed architecture (28x28 single-channel input => flatten = 4*4*16 = 256)
#   28 -conv(8)-> 21 -conv(8)-> 14 -conv(5)-> 10 -conv(3)-> 8 -pool(2)-> 4
# ---------------------------------------------------------------------------
_IMG = 28
_CONV_KS = (8, 8, 5, 3)
_N_CLASSES = 10


def _round_up(n, m):
    return ((n + m - 1) // m) * m


def init_params(key, h1=8, h2=16, h3=16, h4=16, h_lin=300):
    """PyTorch-layout parameters (Conv2d: [Cout,Cin,KH,KW]; Linear: [out,in])."""
    def _uniform(k, shape, fan_in):
        bound = 1.0 / float(fan_in) ** 0.5
        return jax.random.uniform(k, shape, jnp.float32, -bound, bound)

    ks = jax.random.split(key, 12)
    return {
        "conv1_w": _uniform(ks[0], (h1, 1, 8, 8), 1 * 8 * 8),
        "conv1_b": _uniform(ks[1], (h1,), 1 * 8 * 8),
        "conv2_w": _uniform(ks[2], (h2, h1, 8, 8), h1 * 8 * 8),
        "conv2_b": _uniform(ks[3], (h2,), h1 * 8 * 8),
        "conv3_w": _uniform(ks[4], (h3, h2, 5, 5), h2 * 5 * 5),
        "conv3_b": _uniform(ks[5], (h3,), h2 * 5 * 5),
        "conv4_w": _uniform(ks[6], (h4, h3, 3, 3), h3 * 3 * 3),
        "conv4_b": _uniform(ks[7], (h4,), h3 * 3 * 3),
        "lin1_w": _uniform(ks[8], (h_lin, 4 * 4 * h4), 4 * 4 * h4),
        "lin1_b": _uniform(ks[9], (h_lin,), 4 * 4 * h4),
        "lin2_w": _uniform(ks[10], (10, h_lin), h_lin),
        "lin2_b": _uniform(ks[11], (10,), h_lin),
    }


# ---------------------------------------------------------------------------
# One-time host-side weight preparation (Toeplitz expansion, permutes, padding)
# ---------------------------------------------------------------------------
def _toeplitz_conv_weight(w, w_in):
    """[Cout,Cin,KH,KW] -> [KH, W*Cin, OW*Cout] banded matrices so that a conv
    over a channels-last activation row [W*Cin] is  sum_i act_row(h+i) @ wt[i]."""
    w = np.asarray(jax.device_get(w), np.float32)
    cout, cin, kh, kw = w.shape
    ow = w_in - kw + 1
    wk = np.transpose(w, (2, 3, 1, 0))                     # [KH, KW, Cin, Cout]
    wt = np.zeros((kh, w_in * cin, ow * cout), np.float32)
    for i in range(kh):
        for j in range(kw):
            for o in range(ow):
                r = (o + j) * cin
                c = o * cout
                wt[i, r:r + cin, c:c + cout] = wk[i, j]
    return wt


def _bias_row(b, ow):
    b = np.asarray(jax.device_get(b), np.float32)
    return np.tile(b, ow)[None, :]                         # [1, OW*Cout]


def prepare_params(params, compute_dtype=jnp.bfloat16):
    """Convert PyTorch-layout params into kernel-ready (VMEM-resident) weights."""
    kp = {}

    # conv1: fold the KH taps into the contraction dim (Cin == 1) -> one matmul
    # against the H-only-im2col'd input of width KH*W = 224.
    wt1 = _toeplitz_conv_weight(params["conv1_w"], _IMG)   # [8, 28, 21*8]
    kh1, win1, n1 = wt1.shape
    kp["w1"] = jnp.asarray(wt1.reshape(kh1 * win1, n1), compute_dtype)  # [224,168]
    w_in = _IMG - _CONV_KS[0] + 1                          # 21
    kp["b1"] = jnp.asarray(_bias_row(params["conv1_b"], w_in))

    # conv2..4: per-tap banded (block-Toeplitz) weights.
    for idx, k in zip((2, 3, 4), _CONV_KS[1:]):
        ow = w_in - k + 1
        kp[f"w{idx}"] = jnp.asarray(
            _toeplitz_conv_weight(params[f"conv{idx}_w"], w_in), compute_dtype)
        kp[f"b{idx}"] = jnp.asarray(_bias_row(params[f"conv{idx}_b"], ow))
        w_in = ow                                          # 14, 10, 8

    # Linear1: remap torch's (C, PH, PW) flatten order onto the kernel's
    # un-compacted pooled layout.  The kernel produces flat[:, k] with
    #   k = ph*(W4*C4) + (2*pw)*C4 + c     (valid lanes; odd-ow lanes are
    # finite don't-cares) so the corresponding rows carry the torch weights and
    # every other row stays zero -> no lane compaction needed in the kernel.
    c4 = params["conv4_w"].shape[0]                        # 16
    p = w_in // 2                                          # 4
    slab_w = w_in * c4                                     # 128
    k_flat = p * slab_w                                    # 512
    h_lin = params["lin1_w"].shape[0]                      # 300
    h_lin_pad = _round_up(h_lin, 128)                      # 384
    l1 = np.asarray(jax.device_get(params["lin1_w"]), np.float32)   # [300, 256]
    wl1 = np.zeros((k_flat, h_lin_pad), np.float32)
    for c in range(c4):
        for ph in range(p):
            for pw in range(p):
                t = c * (p * p) + ph * p + pw              # torch flat index
                kk = ph * slab_w + (2 * pw) * c4 + c       # kernel lane index
                wl1[kk, :h_lin] = l1[:, t]
    kp["wl1"] = jnp.asarray(wl1, compute_dtype)
    bl1 = np.zeros((1, h_lin_pad), np.float32)
    bl1[0, :h_lin] = np.asarray(jax.device_get(params["lin1_b"]), np.float32)
    kp["bl1"] = jnp.asarray(bl1)

    # Linear2: pad N (10 -> 128 lanes) and K (300 -> 384) with zeros so both
    # the matmul and the output store are full-width.
    l2 = np.asarray(jax.device_get(params["lin2_w"]), np.float32)   # [10, 300]
    n_cls = l2.shape[0]
    wl2 = np.zeros((h_lin_pad, 128), np.float32)
    wl2[:h_lin, :n_cls] = l2.T
    kp["wl2"] = jnp.asarray(wl2, compute_dtype)
    bl2 = np.zeros((1, 128), np.float32)
    bl2[0, :n_cls] = np.asarray(jax.device_get(params["lin2_b"]), np.float32)
    kp["bl2"] = jnp.asarray(bl2)
    return kp


# ---------------------------------------------------------------------------
# The fused Pallas kernel (one batch tile per grid step, batched matmuls)
# ---------------------------------------------------------------------------
def _fused_forward_kernel(x_ref, w1, b1, w2, b2, w3, b3, w4, b4,
                          wl1, bl1, wl2, bl2, o_ref):
    # x_ref: [21, TB, 224] bf16 — H-only im2col of the 28x28 input.
    oh1, tb, k1 = x_ref.shape

    # ---- conv1 (+ReLU): taps folded into K on the host => one matmul -------
    a = jnp.dot(x_ref[...].reshape(oh1 * tb, k1), w1[...],
                preferred_element_type=jnp.float32)
    a = jnp.maximum(a + b1[...], 0.0).reshape(oh1, tb, w1.shape[1])  # [21,TB,168]

    # ---- conv2..4 (+ReLU): KH batched MXU matmuls each ----------------------
    def conv_relu(act, wt_ref, brow_ref):
        kh, wc, n = wt_ref.shape
        oh = act.shape[0] - kh + 1
        a16 = act.astype(wt_ref.dtype)                     # one bf16 cast / layer
        acc = jnp.dot(a16[0:oh].reshape(oh * tb, wc), wt_ref[0],
                      preferred_element_type=jnp.float32)
        for i in range(1, kh):                             # TODO(synk): on v7x,
            # accumulating into a VMEM f32 scratch could keep the sum in the MRB.
            acc = acc + jnp.dot(a16[i:i + oh].reshape(oh * tb, wc), wt_ref[i],
                                preferred_element_type=jnp.float32)
        return jnp.maximum(acc + brow_ref[...], 0.0).reshape(oh, tb, n)

    a = conv_relu(a, w2, b2)                               # [14, TB, 14*16]
    a = conv_relu(a, w3, b3)                               # [10, TB, 10*16]
    a = conv_relu(a, w4, b4)                               # [ 8, TB,  8*16]

    # ---- MaxPool2d(2) + flatten (vectorized, lane-dense) --------------------
    hh = a.shape[0]                                        # 8
    c4 = a.shape[2] // hh                                  # 16
    p = hh // 2                                            # 4
    slabs = []
    for ph in range(p):
        r = jnp.maximum(a[2 * ph], a[2 * ph + 1])                    # H-pool, [TB,128]
        r_rot = jnp.concatenate([r[:, c4:], r[:, :c4]], axis=-1)     # lanes <<= 16
        slabs.append(jnp.maximum(r, r_rot))                          # W-pool @ even-ow lanes
    # [TB, 512]: valid pooled values at even-ow lanes; the other lanes are
    # finite don't-cares that hit zero rows of wl1.
    flat = jnp.concatenate(slabs, axis=-1)

    # ---- classifier (padded to lane width) ----------------------------------
    h = jnp.dot(flat.astype(wl1.dtype), wl1[...],
                preferred_element_type=jnp.float32)
    h = jnp.maximum(h + bl1[...], 0.0)                     # [TB, 384]
    o_ref[...] = jnp.dot(h.astype(wl2.dtype), wl2[...],
                         preferred_element_type=jnp.float32) + bl2[...]


def cnn_model3_forward(kparams, x, *, batch_tile=128):
    """x: [B, 1, 28, 28] f32 (NCHW, like PyTorch).  Returns [B, 10] f32 logits."""
    b = x.shape[0]
    assert x.shape[1:] == (1, _IMG, _IMG), x.shape
    assert batch_tile % 8 == 0, "batch_tile must be a multiple of 8 (sublanes)"

    kh1 = _CONV_KS[0]
    oh1 = _IMG - kh1 + 1                                   # 21
    xs = x.reshape(b, _IMG, _IMG).astype(jnp.float32)
    # Cheap XLA-side H-only im2col for conv1 (Cin == 1): [B, 21, 8*28].
    x_im = jnp.concatenate([xs[:, i:i + oh1, :] for i in range(kh1)], axis=-1)

    tb = min(batch_tile, _round_up(b, 8))                  # sublane-aligned tile
    b_pad = _round_up(b, tb)
    if b_pad != b:
        x_im = jnp.pad(x_im, ((0, b_pad - b), (0, 0), (0, 0)))
    # Batch on the sublane axis; bf16 halves the input DMA.
    x_k = x_im.transpose(1, 0, 2).astype(jnp.bfloat16)     # [21, B_pad, 224]

    weight_names = ("w1", "b1", "w2", "b2", "w3", "b3", "w4", "b4",
                    "wl1", "bl1", "wl2", "bl2")
    weights = [kparams[n] for n in weight_names]
    n_out_pad = kparams["wl2"].shape[1]                    # 128 (lane-padded)

    def _resident(arr):                                    # weights stay in VMEM
        zeros = (0,) * arr.ndim
        return pl.BlockSpec(arr.shape, lambda g: zeros)

    out = pl.pallas_call(
        _fused_forward_kernel,
        grid=(b_pad // tb,),
        in_specs=[pl.BlockSpec((oh1, tb, x_k.shape[2]), lambda g: (0, g, 0))]
        + [_resident(w) for w in weights],
        out_specs=pl.BlockSpec((tb, n_out_pad), lambda g: (g, 0)),
        out_shape=jax.ShapeDtypeStruct((b_pad, n_out_pad), jnp.float32),
        compiler_params=pltpu.CompilerParams(
            dimension_semantics=("parallel",),
            vmem_limit_bytes=48 * 1024 * 1024),
    )(x_k, *weights)
    return out[:b, :_N_CLASSES]


# ---------------------------------------------------------------------------
# Pure-JAX reference (matches the PyTorch module) for a correctness check.
# ---------------------------------------------------------------------------
def _reference_forward(params, x):
    def conv(z, w, bias):
        z = jax.lax.conv_general_dilated(
            z, w, window_strides=(1, 1), padding="VALID",
            dimension_numbers=("NCHW", "OIHW", "NCHW"))
        return jax.nn.relu(z + bias[None, :, None, None])

    z = conv(x, params["conv1_w"], params["conv1_b"])
    z = conv(z, params["conv2_w"], params["conv2_b"])
    z = conv(z, params["conv3_w"], params["conv3_b"])
    z = conv(z, params["conv4_w"], params["conv4_b"])
    n, c, h, w = z.shape
    z = z.reshape(n, c, h // 2, 2, w // 2, 2).max(axis=(3, 5))
    z = z.reshape(n, -1)                                   # torch.flatten order
    z = jax.nn.relu(z @ params["lin1_w"].T + params["lin1_b"])
    return z @ params["lin2_w"].T + params["lin2_b"]


# ---------------------------------------------------------------------------
if __name__ == "__main__":
    root = jax.random.PRNGKey(0)
    k_params, k_x1, k_x2 = jax.random.split(root, 3)

    params = init_params(k_params)
    kparams = prepare_params(params)

    # Architecture fixes spatial size to 28x28 (so flatten -> 4*4*16 = 256).
    # 1) Small batch (padded up to one 8-row tile).
    x1 = jax.random.normal(k_x1, (2, 1, _IMG, _IMG), dtype=jnp.float32)
    out1 = jax.block_until_ready(cnn_model3_forward(kparams, x1))
    assert out1.shape == (2, _N_CLASSES), out1.shape
    ref1 = jax.block_until_ready(_reference_forward(params, x1))
    np.testing.assert_allclose(np.asarray(out1), np.asarray(ref1),
                               rtol=5e-2, atol=5e-2)

    # 2) Multi-grid-step path (batch padding + "parallel" batch grid).
    x2 = jax.random.normal(k_x2, (20, 1, _IMG, _IMG), dtype=jnp.float32)
    out2 = jax.block_until_ready(cnn_model3_forward(kparams, x2, batch_tile=8))
    assert out2.shape == (20, _N_CLASSES), out2.shape
    ref2 = jax.block_until_ready(_reference_forward(params, x2))
    np.testing.assert_allclose(np.asarray(out2), np.asarray(ref2),
                               rtol=5e-2, atol=5e-2)

    print("KERNEL_OK")
</pallas_src>

<mosaic_0001>
module attributes {stable_mosaic.version = 11 : i64} {
  func.func @_fused_forward_kernel(%arg0: i32, %arg1: memref<21x8x224xbf16, #tpu.memory_space<vmem>>, %arg2: memref<224x168xbf16, #tpu.memory_space<vmem>>, %arg3: memref<1x168xf32, #tpu.memory_space<vmem>>, %arg4: memref<8x168x224xbf16, #tpu.memory_space<vmem>>, %arg5: memref<1x224xf32, #tpu.memory_space<vmem>>, %arg6: memref<5x224x160xbf16, #tpu.memory_space<vmem>>, %arg7: memref<1x160xf32, #tpu.memory_space<vmem>>, %arg8: memref<3x160x128xbf16, #tpu.memory_space<vmem>>, %arg9: memref<1x128xf32, #tpu.memory_space<vmem>>, %arg10: memref<512x384xbf16, #tpu.memory_space<vmem>>, %arg11: memref<1x384xf32, #tpu.memory_space<vmem>>, %arg12: memref<384x128xbf16, #tpu.memory_space<vmem>>, %arg13: memref<1x128xf32, #tpu.memory_space<vmem>>, %arg14: memref<8x128xf32, #tpu.memory_space<vmem>>) attributes {dimension_semantics = [#tpu.dimension_semantics<parallel>], iteration_bounds = array<i64: 1>, scalar_prefetch = 0 : i64, scratch_operands = 0 : i64, tpu.core_type = #tpu.core_type<tc>, window_params = [{transform_indices = @transform_0, window_bounds = array<i64: 21, 8, 224>}, {pipeline_mode = #tpu.pipeline_mode<synchronous>, transform_indices = @transform_1, window_bounds = array<i64: 224, 168>}, {pipeline_mode = #tpu.pipeline_mode<synchronous>, transform_indices = @transform_2, window_bounds = array<i64: 1, 168>}, {pipeline_mode = #tpu.pipeline_mode<synchronous>, transform_indices = @transform_3, window_bounds = array<i64: 8, 168, 224>}, {pipeline_mode = #tpu.pipeline_mode<synchronous>, transform_indices = @transform_4, window_bounds = array<i64: 1, 224>}, {pipeline_mode = #tpu.pipeline_mode<synchronous>, transform_indices = @transform_5, window_bounds = array<i64: 5, 224, 160>}, {pipeline_mode = #tpu.pipeline_mode<synchronous>, transform_indices = @transform_6, window_bounds = array<i64: 1, 160>}, {pipeline_mode = #tpu.pipeline_mode<synchronous>, transform_indices = @transform_7, window_bounds = array<i64: 3, 160, 128>}, {pipeline_mode = #tpu.pipeline_mode<synchronous>, transform_indices = @transform_8, window_bounds = array<i64: 1, 128>}, {pipeline_mode = #tpu.pipeline_mode<synchronous>, transform_indices = @transform_9, window_bounds = array<i64: 512, 384>}, {pipeline_mode = #tpu.pipeline_mode<synchronous>, transform_indices = @transform_10, window_bounds = array<i64: 1, 384>}, {pipeline_mode = #tpu.pipeline_mode<synchronous>, transform_indices = @transform_11, window_bounds = array<i64: 384, 128>}, {pipeline_mode = #tpu.pipeline_mode<synchronous>, transform_indices = @transform_12, window_bounds = array<i64: 1, 128>}, {transform_indices = @transform_13, window_bounds = array<i64: 8, 128>}]} {
    %c0 = arith.constant 0 : index
    %c0_0 = arith.constant 0 : index
    %c0_1 = arith.constant 0 : index
    %0 = vector.load %arg1[%c0, %c0_0, %c0_1] : memref<21x8x224xbf16, #tpu.memory_space<vmem>>, vector<21x8x224xbf16>
    %1 = vector.shape_cast %0 : vector<21x8x224xbf16> to vector<168x224xbf16>
    %c0_2 = arith.constant 0 : index
    %c0_3 = arith.constant 0 : index
    %2 = vector.load %arg2[%c0_2, %c0_3] : memref<224x168xbf16, #tpu.memory_space<vmem>>, vector<224x168xbf16>
    %cst = arith.constant dense<0.000000e+00> : vector<168x168xf32>
    %3 = tpu.matmul %1, %2, %cst {dimension_numbers = #tpu.dot_dimension_numbers<[1], [0], [0], [1], [0, 0, 1, 1], [], []>} : vector<168x224xbf16>, vector<224x168xbf16>, vector<168x168xf32> -> vector<168x168xf32>
    %c0_4 = arith.constant 0 : index
    %c0_5 = arith.constant 0 : index
    %4 = vector.load %arg3[%c0_4, %c0_5] : memref<1x168xf32, #tpu.memory_space<vmem>>, vector<1x168xf32>
    %5 = vector.broadcast %4 : vector<1x168xf32> to vector<168x168xf32>
    %6 = arith.addf %3, %5 : vector<168x168xf32>
    %cst_6 = arith.constant 0.000000e+00 : f32
    %7 = vector.broadcast %cst_6 : f32 to vector<168x168xf32>
    %8 = arith.maximumf %6, %7 : vector<168x168xf32>
    %9 = vector.shape_cast %8 : vector<168x168xf32> to vector<21x8x168xf32>
    %10 = arith.truncf %9 : vector<21x8x168xf32> to vector<21x8x168xbf16>
    %11 = vector.extract_strided_slice %10 {offsets = [0, 0, 0], sizes = [14, 8, 168], strides = [1, 1, 1]} : vector<21x8x168xbf16> to vector<14x8x168xbf16>
    %12 = vector.shape_cast %11 : vector<14x8x168xbf16> to vector<112x168xbf16>
    %c0_7 = arith.constant 0 : index
    %c0_8 = arith.constant 0 : index
    %c0_9 = arith.constant 0 : index
    %13 = vector.load %arg4[%c0_7, %c0_8, %c0_9] : memref<8x168x224xbf16, #tpu.memory_space<vmem>>, vector<1x168x224xbf16>
    %14 = vector.shape_cast %13 : vector<1x168x224xbf16> to vector<168x224xbf16>
    %cst_10 = arith.constant dense<0.000000e+00> : vector<112x224xf32>
    %15 = tpu.matmul %12, %14, %cst_10 {dimension_numbers = #tpu.dot_dimension_numbers<[1], [0], [0], [1], [0, 0, 1, 1], [], []>} : vector<112x168xbf16>, vector<168x224xbf16>, vector<112x224xf32> -> vector<112x224xf32>
    %16 = vector.extract_strided_slice %10 {offsets = [1, 0, 0], sizes = [14, 8, 168], strides = [1, 1, 1]} : vector<21x8x168xbf16> to vector<14x8x168xbf16>
    %17 = vector.shape_cast %16 : vector<14x8x168xbf16> to vector<112x168xbf16>
    %c1 = arith.constant 1 : index
    %c0_11 = arith.constant 0 : index
    %c0_12 = arith.constant 0 : index
    %18 = vector.load %arg4[%c1, %c0_11, %c0_12] : memref<8x168x224xbf16, #tpu.memory_space<vmem>>, vector<1x168x224xbf16>
    %19 = vector.shape_cast %18 : vector<1x168x224xbf16> to vector<168x224xbf16>
    %cst_13 = arith.constant dense<0.000000e+00> : vector<112x224xf32>
    %20 = tpu.matmul %17, %19, %cst_13 {dimension_numbers = #tpu.dot_dimension_numbers<[1], [0], [0], [1], [0, 0, 1, 1], [], []>} : vector<112x168xbf16>, vector<168x224xbf16>, vector<112x224xf32> -> vector<112x224xf32>
    %21 = arith.addf %15, %20 : vector<112x224xf32>
    %22 = vector.extract_strided_slice %10 {offsets = [2, 0, 0], sizes = [14, 8, 168], strides = [1, 1, 1]} : vector<21x8x168xbf16> to vector<14x8x168xbf16>
    %23 = vector.shape_cast %22 : vector<14x8x168xbf16> to vector<112x168xbf16>
    %c2 = arith.constant 2 : index
    %c0_14 = arith.constant 0 : index
    %c0_15 = arith.constant 0 : index
    %24 = vector.load %arg4[%c2, %c0_14, %c0_15] : memref<8x168x224xbf16, #tpu.memory_space<vmem>>, vector<1x168x224xbf16>
    %25 = vector.shape_cast %24 : vector<1x168x224xbf16> to vector<168x224xbf16>
    %cst_16 = arith.constant dense<0.000000e+00> : vector<112x224xf32>
    %26 = tpu.matmul %23, %25, %cst_16 {dimension_numbers = #tpu.dot_dimension_numbers<[1], [0], [0], [1], [0, 0, 1, 1], [], []>} : vector<112x168xbf16>, vector<168x224xbf16>, vector<112x224xf32> -> vector<112x224xf32>
    %27 = arith.addf %21, %26 : vector<112x224xf32>
    %28 = vector.extract_strided_slice %10 {offsets = [3, 0, 0], sizes = [14, 8, 168], strides = [1, 1, 1]} : vector<21x8x168xbf16> to vector<14x8x168xbf16>
    %29 = vector.shape_cast %28 : vector<14x8x168xbf16> to vector<112x168xbf16>
    %c3 = arith.constant 3 : index
    %c0_17 = arith.constant 0 : index
    %c0_18 = arith.constant 0 : index
    %30 = vector.load %arg4[%c3, %c0_17, %c0_18] : memref<8x168x224xbf16, #tpu.memory_space<vmem>>, vector<1x168x224xbf16>
    %31 = vector.shape_cast %30 : vector<1x168x224xbf16> to vector<168x224xbf16>
    %cst_19 = arith.constant dense<0.000000e+00> : vector<112x224xf32>
    %32 = tpu.matmul %29, %31, %cst_19 {dimension_numbers = #tpu.dot_dimension_numbers<[1], [0], [0], [1], [0, 0, 1, 1], [], []>} : vector<112x168xbf16>, vector<168x224xbf16>, vector<112x224xf32> -> vector<112x224xf32>
    %33 = arith.addf %27, %32 : vector<112x224xf32>
    %34 = vector.extract_strided_slice %10 {offsets = [4, 0, 0], sizes = [14, 8, 168], strides = [1, 1, 1]} : vector<21x8x168xbf16> to vector<14x8x168xbf16>
    %35 = vector.shape_cast %34 : vector<14x8x168xbf16> to vector<112x168xbf16>
    %c4 = arith.constant 4 : index
    %c0_20 = arith.constant 0 : index
    %c0_21 = arith.constant 0 : index
    %36 = vector.load %arg4[%c4, %c0_20, %c0_21] : memref<8x168x224xbf16, #tpu.memory_space<vmem>>, vector<1x168x224xbf16>
    %37 = vector.shape_cast %36 : vector<1x168x224xbf16> to vector<168x224xbf16>
    %cst_22 = arith.constant dense<0.000000e+00> : vector<112x224xf32>
    %38 = tpu.matmul %35, %37, %cst_22 {dimension_numbers = #tpu.dot_dimension_numbers<[1], [0], [0], [1], [0, 0, 1, 1], [], []>} : vector<112x168xbf16>, vector<168x224xbf16>, vector<112x224xf32> -> vector<112x224xf32>
    %39 = arith.addf %33, %38 : vector<112x224xf32>
    %40 = vector.extract_strided_slice %10 {offsets = [5, 0, 0], sizes = [14, 8, 168], strides = [1, 1, 1]} : vector<21x8x168xbf16> to vector<14x8x168xbf16>
    %41 = vector.shape_cast %40 : vector<14x8x168xbf16> to vector<112x168xbf16>
    %c5 = arith.constant 5 : index
    %c0_23 = arith.constant 0 : index
    %c0_24 = arith.constant 0 : index
    %42 = vector.load %arg4[%c5, %c0_23, %c0_24] : memref<8x168x224xbf16, #tpu.memory_space<vmem>>, vector<1x168x224xbf16>
    %43 = vector.shape_cast %42 : vector<1x168x224xbf16> to vector<168x224xbf16>
    %cst_25 = arith.constant dense<0.000000e+00> : vector<112x224xf32>
    %44 = tpu.matmul %41, %43, %cst_25 {dimension_numbers = #tpu.dot_dimension_numbers<[1], [0], [0], [1], [0, 0, 1, 1], [], []>} : vector<112x168xbf16>, vector<168x224xbf16>, vector<112x224xf32> -> vector<112x224xf32>
    %45 = arith.addf %39, %44 : vector<112x224xf32>
    %46 = vector.extract_strided_slice %10 {offsets = [6, 0, 0], sizes = [14, 8, 168], strides = [1, 1, 1]} : vector<21x8x168xbf16> to vector<14x8x168xbf16>
    %47 = vector.shape_cast %46 : vector<14x8x168xbf16> to vector<112x168xbf16>
    %c6 = arith.constant 6 : index
    %c0_26 = arith.constant 0 : index
    %c0_27 = arith.constant 0 : index
    %48 = vector.load %arg4[%c6, %c0_26, %c0_27] : memref<8x168x224xbf16, #tpu.memory_space<vmem>>, vector<1x168x224xbf16>
    %49 = vector.shape_cast %48 : vector<1x168x224xbf16> to vector<168x224xbf16>
    %cst_28 = arith.constant dense<0.000000e+00> : vector<112x224xf32>
    %50 = tpu.matmul %47, %49, %cst_28 {dimension_numbers = #tpu.dot_dimension_numbers<[1], [0], [0], [1], [0, 0, 1, 1], [], []>} : vector<112x168xbf16>, vector<168x224xbf16>, vector<112x224xf32> -> vector<112x224xf32>
    %51 = arith.addf %45, %50 : vector<112x224xf32>
    %52 = vector.extract_strided_slice %10 {offsets = [7, 0, 0], sizes = [14, 8, 168], strides = [1, 1, 1]} : vector<21x8x168xbf16> to vector<14x8x168xbf16>
    %53 = vector.shape_cast %52 : vector<14x8x168xbf16> to vector<112x168xbf16>
    %c7 = arith.constant 7 : index
    %c0_29 = arith.constant 0 : index
    %c0_30 = arith.constant 0 : index
    %54 = vector.load %arg4[%c7, %c0_29, %c0_30] : memref<8x168x224xbf16, #tpu.memory_space<vmem>>, vector<1x168x224xbf16>
    %55 = vector.shape_cast %54 : vector<1x168x224xbf16> to vector<168x224xbf16>
    %cst_31 = arith.constant dense<0.000000e+00> : vector<112x224xf32>
    %56 = tpu.matmul %53, %55, %cst_31 {dimension_numbers = #tpu.dot_dimension_numbers<[1], [0], [0], [1], [0, 0, 1, 1], [], []>} : vector<112x168xbf16>, vector<168x224xbf16>, vector<112x224xf32> -> vector<112x224xf32>
    %57 = arith.addf %51, %56 : vector<112x224xf32>
    %c0_32 = arith.constant 0 : index
    %c0_33 = arith.constant 0 : index
    %58 = vector.load %arg5[%c0_32, %c0_33] : memref<1x224xf32, #tpu.memory_space<vmem>>, vector<1x224xf32>
    %59 = vector.broadcast %58 : vector<1x224xf32> to vector<112x224xf32>
    %60 = arith.addf %57, %59 : vector<112x224xf32>
    %cst_34 = arith.constant 0.000000e+00 : f32
    %61 = vector.broadcast %cst_34 : f32 to vector<112x224xf32>
    %62 = arith.maximumf %60, %61 : vector<112x224xf32>
    %63 = vector.shape_cast %62 : vector<112x224xf32> to vector<14x8x224xf32>
    %64 = arith.truncf %63 : vector<14x8x224xf32> to vector<14x8x224xbf16>
    %65 = vector.extract_strided_slice %64 {offsets = [0, 0, 0], sizes = [10, 8, 224], strides = [1, 1, 1]} : vector<14x8x224xbf16> to vector<10x8x224xbf16>
    %66 = vector.shape_cast %65 : vector<10x8x224xbf16> to vector<80x224xbf16>
    %c0_35 = arith.constant 0 : index
    %c0_36 = arith.constant 0 : index
    %c0_37 = arith.constant 0 : index
    %67 = vector.load %arg6[%c0_35, %c0_36, %c0_37] : memref<5x224x160xbf16, #tpu.memory_space<vmem>>, vector<1x224x160xbf16>
    %68 = vector.shape_cast %67 : vector<1x224x160xbf16> to vector<224x160xbf16>
    %cst_38 = arith.constant dense<0.000000e+00> : vector<80x160xf32>
    %69 = tpu.matmul %66, %68, %cst_38 {dimension_numbers = #tpu.dot_dimension_numbers<[1], [0], [0], [1], [0, 0, 1, 1], [], []>} : vector<80x224xbf16>, vector<224x160xbf16>, vector<80x160xf32> -> vector<80x160xf32>
    %70 = vector.extract_strided_slice %64 {offsets = [1, 0, 0], sizes = [10, 8, 224], strides = [1, 1, 1]} : vector<14x8x224xbf16> to vector<10x8x224xbf16>
    %71 = vector.shape_cast %70 : vector<10x8x224xbf16> to vector<80x224xbf16>
    %c1_39 = arith.constant 1 : index
    %c0_40 = arith.constant 0 : index
    %c0_41 = arith.constant 0 : index
    %72 = vector.load %arg6[%c1_39, %c0_40, %c0_41] : memref<5x224x160xbf16, #tpu.memory_space<vmem>>, vector<1x224x160xbf16>
    %73 = vector.shape_cast %72 : vector<1x224x160xbf16> to vector<224x160xbf16>
    %cst_42 = arith.constant dense<0.000000e+00> : vector<80x160xf32>
    %74 = tpu.matmul %71, %73, %cst_42 {dimension_numbers = #tpu.dot_dimension_numbers<[1], [0], [0], [1], [0, 0, 1, 1], [], []>} : vector<80x224xbf16>, vector<224x160xbf16>, vector<80x160xf32> -> vector<80x160xf32>
    %75 = arith.addf %69, %74 : vector<80x160xf32>
    %76 = vector.extract_strided_slice %64 {offsets = [2, 0, 0], sizes = [10, 8, 224], strides = [1, 1, 1]} : vector<14x8x224xbf16> to vector<10x8x224xbf16>
    %77 = vector.shape_cast %76 : vector<10x8x224xbf16> to vector<80x224xbf16>
    %c2_43 = arith.constant 2 : index
    %c0_44 = arith.constant 0 : index
    %c0_45 = arith.constant 0 : index
    %78 = vector.load %arg6[%c2_43, %c0_44, %c0_45] : memref<5x224x160xbf16, #tpu.memory_space<vmem>>, vector<1x224x160xbf16>
    %79 = vector.shape_cast %78 : vector<1x224x160xbf16> to vector<224x160xbf16>
    %cst_46 = arith.constant dense<0.000000e+00> : vector<80x160xf32>
    %80 = tpu.matmul %77, %79, %cst_46 {dimension_numbers = #tpu.dot_dimension_numbers<[1], [0], [0], [1], [0, 0, 1, 1], [], []>} : vector<80x224xbf16>, vector<224x160xbf16>, vector<80x160xf32> -> vector<80x160xf32>
    %81 = arith.addf %75, %80 : vector<80x160xf32>
    %82 = vector.extract_strided_slice %64 {offsets = [3, 0, 0], sizes = [10, 8, 224], strides = [1, 1, 1]} : vector<14x8x224xbf16> to vector<10x8x224xbf16>
    %83 = vector.shape_cast %82 : vector<10x8x224xbf16> to vector<80x224xbf16>
    %c3_47 = arith.constant 3 : index
    %c0_48 = arith.constant 0 : index
    %c0_49 = arith.constant 0 : index
    %84 = vector.load %arg6[%c3_47, %c0_48, %c0_49] : memref<5x224x160xbf16, #tpu.memory_space<vmem>>, vector<1x224x160xbf16>
    %85 = vector.shape_cast %84 : vector<1x224x160xbf16> to vector<224x160xbf16>
    %cst_50 = arith.constant dense<0.000000e+00> : vector<80x160xf32>
    %86 = tpu.matmul %83, %85, %cst_50 {dimension_numbers = #tpu.dot_dimension_numbers<[1], [0], [0], [1], [0, 0, 1, 1], [], []>} : vector<80x224xbf16>, vector<224x160xbf16>, vector<80x160xf32> -> vector<80x160xf32>
    %87 = arith.addf %81, %86 : vector<80x160xf32>
    %88 = vector.extract_strided_slice %64 {offsets = [4, 0, 0], sizes = [10, 8, 224], strides = [1, 1, 1]} : vector<14x8x224xbf16> to vector<10x8x224xbf16>
    %89 = vector.shape_cast %88 : vector<10x8x224xbf16> to vector<80x224xbf16>
    %c4_51 = arith.constant 4 : index
    %c0_52 = arith.constant 0 : index
    %c0_53 = arith.constant 0 : index
    %90 = vector.load %arg6[%c4_51, %c0_52, %c0_53] : memref<5x224x160xbf16, #tpu.memory_space<vmem>>, vector<1x224x160xbf16>
    %91 = vector.shape_cast %90 : vector<1x224x160xbf16> to vector<224x160xbf16>
    %cst_54 = arith.constant dense<0.000000e+00> : vector<80x160xf32>
    %92 = tpu.matmul %89, %91, %cst_54 {dimension_numbers = #tpu.dot_dimension_numbers<[1], [0], [0], [1], [0, 0, 1, 1], [], []>} : vector<80x224xbf16>, vector<224x160xbf16>, vector<80x160xf32> -> vector<80x160xf32>
    %93 = arith.addf %87, %92 : vector<80x160xf32>
    %c0_55 = arith.constant 0 : index
    %c0_56 = arith.constant 0 : index
    %94 = vector.load %arg7[%c0_55, %c0_56] : memref<1x160xf32, #tpu.memory_space<vmem>>, vector<1x160xf32>
    %95 = vector.broadcast %94 : vector<1x160xf32> to vector<80x160xf32>
    %96 = arith.addf %93, %95 : vector<80x160xf32>
    %cst_57 = arith.constant 0.000000e+00 : f32
    %97 = vector.broadcast %cst_57 : f32 to vector<80x160xf32>
    %98 = arith.maximumf %96, %97 : vector<80x160xf32>
    %99 = vector.shape_cast %98 : vector<80x160xf32> to vector<10x8x160xf32>
    %100 = arith.truncf %99 : vector<10x8x160xf32> to vector<10x8x160xbf16>
    %101 = vector.extract_strided_slice %100 {offsets = [0, 0, 0], sizes = [8, 8, 160], strides = [1, 1, 1]} : vector<10x8x160xbf16> to vector<8x8x160xbf16>
    %102 = vector.shape_cast %101 : vector<8x8x160xbf16> to vector<64x160xbf16>
    %c0_58 = arith.constant 0 : index
    %c0_59 = arith.constant 0 : index
    %c0_60 = arith.constant 0 : index
    %103 = vector.load %arg8[%c0_58, %c0_59, %c0_60] : memref<3x160x128xbf16, #tpu.memory_space<vmem>>, vector<1x160x128xbf16>
    %104 = vector.shape_cast %103 : vector<1x160x128xbf16> to vector<160x128xbf16>
    %cst_61 = arith.constant dense<0.000000e+00> : vector<64x128xf32>
    %105 = tpu.matmul %102, %104, %cst_61 {dimension_numbers = #tpu.dot_dimension_numbers<[1], [0], [0], [1], [0, 0, 1, 1], [], []>} : vector<64x160xbf16>, vector<160x128xbf16>, vector<64x128xf32> -> vector<64x128xf32>
    %106 = vector.extract_strided_slice %100 {offsets = [1, 0, 0], sizes = [8, 8, 160], strides = [1, 1, 1]} : vector<10x8x160xbf16> to vector<8x8x160xbf16>
    %107 = vector.shape_cast %106 : vector<8x8x160xbf16> to vector<64x160xbf16>
    %c1_62 = arith.constant 1 : index
    %c0_63 = arith.constant 0 : index
    %c0_64 = arith.constant 0 : index
    %108 = vector.load %arg8[%c1_62, %c0_63, %c0_64] : memref<3x160x128xbf16, #tpu.memory_space<vmem>>, vector<1x160x128xbf16>
    %109 = vector.shape_cast %108 : vector<1x160x128xbf16> to vector<160x128xbf16>
    %cst_65 = arith.constant dense<0.000000e+00> : vector<64x128xf32>
    %110 = tpu.matmul %107, %109, %cst_65 {dimension_numbers = #tpu.dot_dimension_numbers<[1], [0], [0], [1], [0, 0, 1, 1], [], []>} : vector<64x160xbf16>, vector<160x128xbf16>, vector<64x128xf32> -> vector<64x128xf32>
    %111 = arith.addf %105, %110 : vector<64x128xf32>
    %112 = vector.extract_strided_slice %100 {offsets = [2, 0, 0], sizes = [8, 8, 160], strides = [1, 1, 1]} : vector<10x8x160xbf16> to vector<8x8x160xbf16>
    %113 = vector.shape_cast %112 : vector<8x8x160xbf16> to vector<64x160xbf16>
    %c2_66 = arith.constant 2 : index
    %c0_67 = arith.constant 0 : index
    %c0_68 = arith.constant 0 : index
    %114 = vector.load %arg8[%c2_66, %c0_67, %c0_68] : memref<3x160x128xbf16, #tpu.memory_space<vmem>>, vector<1x160x128xbf16>
    %115 = vector.shape_cast %114 : vector<1x160x128xbf16> to vector<160x128xbf16>
    %cst_69 = arith.constant dense<0.000000e+00> : vector<64x128xf32>
    %116 = tpu.matmul %113, %115, %cst_69 {dimension_numbers = #tpu.dot_dimension_numbers<[1], [0], [0], [1], [0, 0, 1, 1], [], []>} : vector<64x160xbf16>, vector<160x128xbf16>, vector<64x128xf32> -> vector<64x128xf32>
    %117 = arith.addf %111, %116 : vector<64x128xf32>
    %c0_70 = arith.constant 0 : index
    %c0_71 = arith.constant 0 : index
    %118 = vector.load %arg9[%c0_70, %c0_71] : memref<1x128xf32, #tpu.memory_space<vmem>>, vector<1x128xf32>
    %119 = vector.broadcast %118 : vector<1x128xf32> to vector<64x128xf32>
    %120 = arith.addf %117, %119 : vector<64x128xf32>
    %cst_72 = arith.constant 0.000000e+00 : f32
    %121 = vector.broadcast %cst_72 : f32 to vector<64x128xf32>
    %122 = arith.maximumf %120, %121 : vector<64x128xf32>
    %123 = vector.shape_cast %122 : vector<64x128xf32> to vector<8x8x128xf32>
    %124 = vector.extract_strided_slice %123 {offsets = [0, 0, 0], sizes = [1, 8, 128], strides = [1, 1, 1]} : vector<8x8x128xf32> to vector<1x8x128xf32>
    %125 = vector.shape_cast %124 : vector<1x8x128xf32> to vector<8x128xf32>
    %126 = vector.extract_strided_slice %123 {offsets = [1, 0, 0], sizes = [1, 8, 128], strides = [1, 1, 1]} : vector<8x8x128xf32> to vector<1x8x128xf32>
    %127 = vector.shape_cast %126 : vector<1x8x128xf32> to vector<8x128xf32>
    %128 = arith.maximumf %125, %127 : vector<8x128xf32>
    %129 = vector.extract_strided_slice %128 {offsets = [0, 16], sizes = [8, 112], strides = [1, 1]} : vector<8x128xf32> to vector<8x112xf32>
    %130 = vector.extract_strided_slice %128 {offsets = [0, 0], sizes = [8, 16], strides = [1, 1]} : vector<8x128xf32> to vector<8x16xf32>
    %131 = tpu.concatenate %129, %130 in 1 : vector<8x112xf32>, vector<8x16xf32> -> vector<8x128xf32>
    %132 = arith.maximumf %128, %131 : vector<8x128xf32>
    %133 = vector.extract_strided_slice %123 {offsets = [2, 0, 0], sizes = [1, 8, 128], strides = [1, 1, 1]} : vector<8x8x128xf32> to vector<1x8x128xf32>
    %134 = vector.shape_cast %133 : vector<1x8x128xf32> to vector<8x128xf32>
    %135 = vector.extract_strided_slice %123 {offsets = [3, 0, 0], sizes = [1, 8, 128], strides = [1, 1, 1]} : vector<8x8x128xf32> to vector<1x8x128xf32>
    %136 = vector.shape_cast %135 : vector<1x8x128xf32> to vector<8x128xf32>
    %137 = arith.maximumf %134, %136 : vector<8x128xf32>
    %138 = vector.extract_strided_slice %137 {offsets = [0, 16], sizes = [8, 112], strides = [1, 1]} : vector<8x128xf32> to vector<8x112xf32>
    %139 = vector.extract_strided_slice %137 {offsets = [0, 0], sizes = [8, 16], strides = [1, 1]} : vector<8x128xf32> to vector<8x16xf32>
    %140 = tpu.concatenate %138, %139 in 1 : vector<8x112xf32>, vector<8x16xf32> -> vector<8x128xf32>
    %141 = arith.maximumf %137, %140 : vector<8x128xf32>
    %142 = vector.extract_strided_slice %123 {offsets = [4, 0, 0], sizes = [1, 8, 128], strides = [1, 1, 1]} : vector<8x8x128xf32> to vector<1x8x128xf32>
    %143 = vector.shape_cast %142 : vector<1x8x128xf32> to vector<8x128xf32>
    %144 = vector.extract_strided_slice %123 {offsets = [5, 0, 0], sizes = [1, 8, 128], strides = [1, 1, 1]} : vector<8x8x128xf32> to vector<1x8x128xf32>
    %145 = vector.shape_cast %144 : vector<1x8x128xf32> to vector<8x128xf32>
    %146 = arith.maximumf %143, %145 : vector<8x128xf32>
    %147 = vector.extract_strided_slice %146 {offsets = [0, 16], sizes = [8, 112], strides = [1, 1]} : vector<8x128xf32> to vector<8x112xf32>
    %148 = vector.extract_strided_slice %146 {offsets = [0, 0], sizes = [8, 16], strides = [1, 1]} : vector<8x128xf32> to vector<8x16xf32>
    %149 = tpu.concatenate %147, %148 in 1 : vector<8x112xf32>, vector<8x16xf32> -> vector<8x128xf32>
    %150 = arith.maximumf %146, %149 : vector<8x128xf32>
    %151 = vector.extract_strided_slice %123 {offsets = [6, 0, 0], sizes = [1, 8, 128], strides = [1, 1, 1]} : vector<8x8x128xf32> to vector<1x8x128xf32>
    %152 = vector.shape_cast %151 : vector<1x8x128xf32> to vector<8x128xf32>
    %153 = vector.extract_strided_slice %123 {offsets = [7, 0, 0], sizes = [1, 8, 128], strides = [1, 1, 1]} : vector<8x8x128xf32> to vector<1x8x128xf32>
    %154 = vector.shape_cast %153 : vector<1x8x128xf32> to vector<8x128xf32>
    %155 = arith.maximumf %152, %154 : vector<8x128xf32>
    %156 = vector.extract_strided_slice %155 {offsets = [0, 16], sizes = [8, 112], strides = [1, 1]} : vector<8x128xf32> to vector<8x112xf32>
    %157 = vector.extract_strided_slice %155 {offsets = [0, 0], sizes = [8, 16], strides = [1, 1]} : vector<8x128xf32> to vector<8x16xf32>
    %158 = tpu.concatenate %156, %157 in 1 : vector<8x112xf32>, vector<8x16xf32> -> vector<8x128xf32>
    %159 = arith.maximumf %155, %158 : vector<8x128xf32>
    %160 = tpu.concatenate %132, %141, %150, %159 in 1 : vector<8x128xf32>, vector<8x128xf32>, vector<8x128xf32>, vector<8x128xf32> -> vector<8x512xf32>
    %161 = arith.truncf %160 : vector<8x512xf32> to vector<8x512xbf16>
    %c0_73 = arith.constant 0 : index
    %c0_74 = arith.constant 0 : index
    %162 = vector.load %arg10[%c0_73, %c0_74] : memref<512x384xbf16, #tpu.memory_space<vmem>>, vector<512x384xbf16>
    %cst_75 = arith.constant dense<0.000000e+00> : vector<8x384xf32>
    %163 = tpu.matmul %161, %162, %cst_75 {dimension_numbers = #tpu.dot_dimension_numbers<[1], [0], [0], [1], [0, 0, 1, 1], [], []>} : vector<8x512xbf16>, vector<512x384xbf16>, vector<8x384xf32> -> vector<8x384xf32>
    %c0_76 = arith.constant 0 : index
    %c0_77 = arith.constant 0 : index
    %164 = vector.load %arg11[%c0_76, %c0_77] : memref<1x384xf32, #tpu.memory_space<vmem>>, vector<1x384xf32>
    %165 = vector.broadcast %164 : vector<1x384xf32> to vector<8x384xf32>
    %166 = arith.addf %163, %165 : vector<8x384xf32>
    %cst_78 = arith.constant 0.000000e+00 : f32
    %167 = vector.broadcast %cst_78 : f32 to vector<8x384xf32>
    %168 = arith.maximumf %166, %167 : vector<8x384xf32>
    %169 = arith.truncf %168 : vector<8x384xf32> to vector<8x384xbf16>
    %c0_79 = arith.constant 0 : index
    %c0_80 = arith.constant 0 : index
    %170 = vector.load %arg12[%c0_79, %c0_80] : memref<384x128xbf16, #tpu.memory_space<vmem>>, vector<384x128xbf16>
    %cst_81 = arith.constant dense<0.000000e+00> : vector<8x128xf32>
    %171 = tpu.matmul %169, %170, %cst_81 {dimension_numbers = #tpu.dot_dimension_numbers<[1], [0], [0], [1], [0, 0, 1, 1], [], []>} : vector<8x384xbf16>, vector<384x128xbf16>, vector<8x128xf32> -> vector<8x128xf32>
    %c0_82 = arith.constant 0 : index
    %c0_83 = arith.constant 0 : index
    %172 = vector.load %arg13[%c0_82, %c0_83] : memref<1x128xf32, #tpu.memory_space<vmem>>, vector<1x128xf32>
    %173 = vector.broadcast %172 : vector<1x128xf32> to vector<8x128xf32>
    %174 = arith.addf %171, %173 : vector<8x128xf32>
    %c0_84 = arith.constant 0 : index
    %c0_85 = arith.constant 0 : index
    %175 = vector.load %arg14[%c0_84, %c0_85] : memref<8x128xf32, #tpu.memory_space<vmem>>, vector<8x128xf32>
    tpu.vector_store %arg14[%c0_84, %c0_85], %174 {strides = array<i32>} : memref<8x128xf32, #tpu.memory_space<vmem>>, vector<8x128xf32>,
    return
  }
  func.func @transform_0(%arg0: i32) -> (i32, i32, i32) {
    %c0_i32 = arith.constant 0 : i32
    %c0_i32_0 = arith.constant 0 : i32
    %c0_i32_1 = arith.constant 0 : i32
    return %c0_i32, %arg0, %c0_i32_0 : i32, i32, i32
  }
  func.func @transform_1(%arg0: i32) -> (i32, i32) {
    %c0_i32 = arith.constant 0 : i32
    %c0_i32_0 = arith.constant 0 : i32
    %c0_i32_1 = arith.constant 0 : i32
    return %c0_i32, %c0_i32_0 : i32, i32
  }
  func.func @transform_2(%arg0: i32) -> (i32, i32) {
    %c0_i32 = arith.constant 0 : i32
    %c0_i32_0 = arith.constant 0 : i32
    %c0_i32_1 = arith.constant 0 : i32
    return %c0_i32, %c0_i32_0 : i32, i32
  }
  func.func @transform_3(%arg0: i32) -> (i32, i32, i32) {
    %c0_i32 = arith.constant 0 : i32
    %c0_i32_0 = arith.constant 0 : i32
    %c0_i32_1 = arith.constant 0 : i32
    %c0_i32_2 = arith.constant 0 : i32
    return %c0_i32, %c0_i32_0, %c0_i32_1 : i32, i32, i32
  }
  func.func @transform_4(%arg0: i32) -> (i32, i32) {
    %c0_i32 = arith.constant 0 : i32
    %c0_i32_0 = arith.constant 0 : i32
    %c0_i32_1 = arith.constant 0 : i32
    return %c0_i32, %c0_i32_0 : i32, i32
  }
  func.func @transform_5(%arg0: i32) -> (i32, i32, i32) {
    %c0_i32 = arith.constant 0 : i32
    %c0_i32_0 = arith.constant 0 : i32
    %c0_i32_1 = arith.constant 0 : i32
    %c0_i32_2 = arith.constant 0 : i32
    return %c0_i32, %c0_i32_0, %c0_i32_1 : i32, i32, i32
  }
  func.func @transform_6(%arg0: i32) -> (i32, i32) {
    %c0_i32 = arith.constant 0 : i32
    %c0_i32_0 = arith.constant 0 : i32
    %c0_i32_1 = arith.constant 0 : i32
    return %c0_i32, %c0_i32_0 : i32, i32
  }
  func.func @transform_7(%arg0: i32) -> (i32, i32, i32) {
    %c0_i32 = arith.constant 0 : i32
    %c0_i32_0 = arith.constant 0 : i32
    %c0_i32_1 = arith.constant 0 : i32
    %c0_i32_2 = arith.constant 0 : i32
    return %c0_i32, %c0_i32_0, %c0_i32_1 : i32, i32, i32
  }
  func.func @transform_8(%arg0: i32) -> (i32, i32) {
    %c0_i32 = arith.constant 0 : i32
    %c0_i32_0 = arith.constant 0 : i32
    %c0_i32_1 = arith.constant 0 : i32
    return %c0_i32, %c0_i32_0 : i32, i32
  }
  func.func @transform_9(%arg0: i32) -> (i32, i32) {
    %c0_i32 = arith.constant 0 : i32
    %c0_i32_0 = arith.constant 0 : i32
    %c0_i32_1 = arith.constant 0 : i32
    return %c0_i32, %c0_i32_0 : i32, i32
  }
  func.func @transform_10(%arg0: i32) -> (i32, i32) {
    %c0_i32 = arith.constant 0 : i32
    %c0_i32_0 = arith.constant 0 : i32
    %c0_i32_1 = arith.constant 0 : i32
    return %c0_i32, %c0_i32_0 : i32, i32
  }
  func.func @transform_11(%arg0: i32) -> (i32, i32) {
    %c0_i32 = arith.constant 0 : i32
    %c0_i32_0 = arith.constant 0 : i32
    %c0_i32_1 = arith.constant 0 : i32
    return %c0_i32, %c0_i32_0 : i32, i32
  }
  func.func @transform_12(%arg0: i32) -> (i32, i32) {
    %c0_i32 = arith.constant 0 : i32
    %c0_i32_0 = arith.constant 0 : i32
    %c0_i32_1 = arith.constant 0 : i32
    return %c0_i32, %c0_i32_0 : i32, i32
  }
  func.func @transform_13(%arg0: i32) -> (i32, i32) {
    %c0_i32 = arith.constant 0 : i32
    %c0_i32_0 = arith.constant 0 : i32
    return %arg0, %c0_i32 : i32, i32
  }
}

</mosaic_0001>

<bundles_post_ra>
// kernel: tpu_custom_call.1
= control target key start
LH: loop header
LB: loop body
LE: loop exit
PB: predicated region body
PF: predicated region fallthrough
CT: control target
= control target key end

     0   :  { %18 = vsyncpa [#allocation3], 0  ;;  %s14573_s0 = inlined_call_operand.hbm [shape: bf16[21,8,224], index: 0, kind: input, shape index: {}]   ;;  %s14574_s1 = inlined_call_operand.vmem [shape: bf16[224,168], index: 1, kind: input, shape index: {}]   ;;  %s14575_s2 = inlined_call_operand.vmem [shape: f32[1,168], index: 2, kind: input, shape index: {}]   ;;  %s14576_s3 = inlined_call_operand.vmem [shape: bf16[8,168,224], index: 3, kind: input, shape index: {}]   ;;  %s14577_s4 = inlined_call_operand.vmem [shape: f32[1,224], index: 4, kind: input, shape index: {}]   ;;  %s14578_s5 = inlined_call_operand.vmem [shape: bf16[5,224,160], index: 5, kind: input, shape index: {}]   ;;  %s14579_s6 = inlined_call_operand.vmem [shape: f32[1,160], index: 6, kind: input, shape index: {}]   ;;  %s14580_s7 = inlined_call_operand.hbm [shape: bf16[3,160,128], index: 7, kind: input, shape index: {}]   ;;  %s14581_s8 = inlined_call_operand.vmem [shape: f32[1,128], index: 8, kind: input, shape index: {}]   ;;  %s14582_s9 = inlined_call_operand.vmem [shape: bf16[512,384], index: 9, kind: input, shape index: {}]   ;;  %s14583_s10 = inlined_call_operand.vmem [shape: f32[1,384], index: 10, kind: input, shape index: {}]   ;;  %s14584_s11 = inlined_call_operand.vmem [shape: bf16[384,128], index: 11, kind: input, shape index: {}]   ;;  %s14585_s12 = inlined_call_operand.hbm [shape: f32[1,128], index: 12, kind: input, shape index: {}]   ;;  %s14586_s13 = inlined_call_operand.hbm [shape: f32[8,128], index: 13, kind: output, shape index: {}]  }
   0x1   :  { %19 = vsyncpa [#allocation6], 0  ;;  %s50_s27 = sshll.u32 %s14580_s7, 4  ;;  %s51_s27 = int_to_ptr.hbm [resolvable:$true] %s50_s27 }
   0x2   :  { %20 = vsyncpa [#allocation4], 0  ;;  %s10070_s28 = smov [#allocation5]   ;;  %s25_s15 = sshll.u32 %s14573_s0, 4  ;;  %s26_s15 = int_to_ptr.hbm [resolvable:$true] %s25_s15 }
   0x3   :  { %s52_s29 = sshll.u32 %s10070_s28, 4  ;;  %s10071_s16 = smov 64   ;;  %s53_s29 = int_to_ptr.vmem [resolvable:$true] %s52_s29 }
   0x4   :  { %s10072_s17 = smov 4   ;;  %s10073_s18 = smov [#allocation2]  }
   0x5   :  { %58 = dma.hbm_to_vmem [thread:$0]  %s51_s27, 3840, %s53_s29, [#allocation6], %s10071_s16, %s10071_s16, %s10072_s17  }
   0x6   :  { %s27_s19 = sshll.u32 %s10073_s18, 4  ;;  %s10074_s20 = smov 128   ;;  %s28_s19 = int_to_ptr.vmem [resolvable:$true] %s27_s19 }
   0x7   :  { %s10075_s21 = smov 8   ;;  %s72_s23 = sshll.u32 %s14585_s12, 4  ;;  %s73_s23 = int_to_ptr.hbm [resolvable:$true] %s72_s23 }
   0x8   :  { %33 = dma.hbm_to_vmem [thread:$0]  %s26_s15, 2688, %s28_s19, [#allocation3], %s10074_s20, %s10074_s20, %s10075_s21  }
   0x9   :  { %s10076_s24 = smov [#allocation7]  }
   0xa   :  { %s74_s25 = sshll.u32 %s10076_s24, 4  ;;  %s75_s25 = int_to_ptr.vmem [resolvable:$true] %s74_s25 }
   0xb   :  { %77 = dma.hbm_to_vmem [thread:$0]  %s73_s23, 16, %s75_s25, [#allocation6]  }
   0xc   :  { %10064 = dma.done.wait [#allocation3], 2688  }
   0xd   :  { %10065 = vsyncadd [#allocation3], 4294964608 }
   0xe   :  { %10066 = dma.done.wait [#allocation6], 3856  }
   0xf   :  { %10067 = vsyncadd [#allocation6], 4294963440  ;;  %v7150_v0 = vld [vmem:[%s14574_s1 + $0x70] sm:$0xf]  ;;  %v9494_v1 = vld [vmem:[%s14574_s1 + $0x74] sm:$0xf0] }
  0x10   :  { %v7198_v2 = vld [vmem:[%s14574_s1 + $0xd0] sm:$0xf]  ;;  %v7151_v3 = vor.u32 %v9494_v1, %v7150_v0  ;;  %v9506_v4 = vld [vmem:[%s14574_s1 + $0xd4] sm:$0xf0]  ;;  %v9493_v5 = vld [vmem:[%s14574_s1 + $0x74] sm:$0xf] }
  0x11   :  { %v7152_v6 = vld [vmem:[%s14574_s1 + $0x78] sm:$0xf0]  ;;  %v7199_v7 = vor.u32 %v9506_v4, %v7198_v2  ;;  %v9505_v9 = vld [vmem:[%s14574_s1 + $0xd4] sm:$0xf]  ;;  %v7142_v11 = vld [vmem:[%s14574_s1 + $0x60] sm:$0xf] }
  0x12   :  { %v7155_v8 = vor.u32 %v9493_v5, %v7152_v6  ;;  %v7200_v10 = vld [vmem:[%s14574_s1 + $0xd8] sm:$0xf0]  ;;  %416 = vmatpush.bf16.msra.mxu0 %v7151_v3  ;;  %v9492_v13 = vld [vmem:[%s14574_s1 + $0x64] sm:$0xf0]  ;;  %v7190_v14 = vld [vmem:[%s14574_s1 + $0xc0] sm:$0xf] }
  0x13   :  { %v7203_v12 = vor.u32 %v9505_v9, %v7200_v10  ;;  %v9504_v15 = vld [vmem:[%s14574_s1 + $0xc4] sm:$0xf0]  ;;  %481 = vmatpush.bf16.msra.mxu1 %v7199_v7  ;;  %v7143_v16 = vor.u32 %v9492_v13, %v7142_v11  ;;  %v9491_v18 = vld [vmem:[%s14574_s1 + $0x64] sm:$0xf]  ;;  %v7144_v19 = vld [vmem:[%s14574_s1 + $0x68] sm:$0xf0] }
  0x14   :  { %542 = vmatpush.bf16.msra.mxu2 %v7155_v8  ;;  %v7191_v17 = vor.u32 %v9504_v15, %v7190_v14  ;;  %v9503_v20 = vld [vmem:[%s14574_s1 + $0xc4] sm:$0xf]  ;;  %v7147_v21 = vor.u32 %v9491_v18, %v7144_v19  ;;  %v7192_v22 = vld [vmem:[%s14574_s1 + $0xc8] sm:$0xf0]  ;;  %v7134_v23 = vld [vmem:[%s14574_s1 + $0x50] sm:$0xf] }
  0x15   :  { %607 = vmatpush.bf16.msra.mxu3 %v7203_v12  ;;  %v9490_v24 = vld [vmem:[%s14574_s1 + $0x54] sm:$0xf0]  ;;  %v7195_v25 = vor.u32 %v9503_v20, %v7192_v22  ;;  %v7182_v26 = vld [vmem:[%s14574_s1 + $0xb0] sm:$0xf]  ;;  %v9489_v28 = vld [vmem:[%s14574_s1 + $0x54] sm:$0xf] }
  0x16   :  { %v9502_v27 = vld [vmem:[%s14574_s1 + $0xb4] sm:$0xf0]  ;;  %417 = vmatpush.bf16.msra.mxu0 %v7143_v16  ;;  %v7135_v29 = vor.u32 %v9490_v24, %v7134_v23  ;;  %v7136_v30 = vld [vmem:[%s14574_s1 + $0x58] sm:$0xf0]  ;;  %v9501_v31 = vld [vmem:[%s14574_s1 + $0xb4] sm:$0xf] }
  0x17   :  { %v7184_v32 = vld [vmem:[%s14574_s1 + $0xb8] sm:$0xf0]  ;;  %482 = vmatpush.bf16.msra.mxu1 %v7191_v17  ;;  %v7183_v33 = vor.u32 %v9502_v27, %v7182_v26  ;;  %v7139_v34 = vor.u32 %v9489_v28, %v7136_v30  ;;  %v7126_v35 = vld [vmem:[%s14574_s1 + $0x40] sm:$0xf]  ;;  %v9488_v36 = vld [vmem:[%s14574_s1 + $0x44] sm:$0xf0] }
  0x18   :  { %543 = vmatpush.bf16.msra.mxu2 %v7147_v21  ;;  %v7174_v37 = vld [vmem:[%s14574_s1 + $0xa0] sm:$0xf]  ;;  %v7187_v38 = vor.u32 %v9501_v31, %v7184_v32  ;;  %v9500_v39 = vld [vmem:[%s14574_s1 + $0xa4] sm:$0xf0]  ;;  %v9487_v40 = vld [vmem:[%s14574_s1 + $0x44] sm:$0xf]  ;;  %v7127_v44 = vor.u32 %v9488_v36, %v7126_v35 }
  0x19   :  { %608 = vmatpush.bf16.msra.mxu3 %v7195_v25  ;;  %v7128_v41 = vld [vmem:[%s14574_s1 + $0x48] sm:$0xf0]  ;;  %v9499_v42 = vld [vmem:[%s14574_s1 + $0xa4] sm:$0xf]  ;;  %v7175_v45 = vor.u32 %v9500_v39, %v7174_v37  ;;  %v7118_v47 = vld [vmem:[%s14574_s1 + $0x30] sm:$0xf] }
  0x1a   :  { %v7176_v43 = vld [vmem:[%s14574_s1 + $0xa8] sm:$0xf0]  ;;  %418 = vmatpush.bf16.msra.mxu0 %v7135_v29  ;;  %v7131_v46 = vor.u32 %v9487_v40, %v7128_v41  ;;  %v9486_v48 = vld [vmem:[%s14574_s1 + $0x34] sm:$0xf0]  ;;  %v7166_v49 = vld [vmem:[%s14574_s1 + $0x90] sm:$0xf] }
  0x1b   :  { %483 = vmatpush.bf16.msra.mxu1 %v7183_v33  ;;  %v7179_v50 = vor.u32 %v9499_v42, %v7176_v43  ;;  %v9498_v51 = vld [vmem:[%s14574_s1 + $0x94] sm:$0xf0]  ;;  %v9485_v52 = vld [vmem:[%s14574_s1 + $0x34] sm:$0xf]  ;;  %v7120_v53 = vld [vmem:[%s14574_s1 + $0x38] sm:$0xf0]  ;;  %v7119_v56 = vor.u32 %v9486_v48, %v7118_v47 }
  0x1c   :  { %544 = vmatpush.bf16.msra.mxu2 %v7139_v34  ;;  %v9497_v54 = vld [vmem:[%s14574_s1 + $0x94] sm:$0xf]  ;;  %v7168_v55 = vld [vmem:[%s14574_s1 + $0x98] sm:$0xf0]  ;;  %v7167_v57 = vor.u32 %v9498_v51, %v7166_v49  ;;  %v7123_v58 = vor.u32 %v9485_v52, %v7120_v53  ;;  %v7110_v59 = vld [vmem:[%s14574_s1 + $0x20] sm:$0xf] }
  0x1d   :  { %609 = vmatpush.bf16.msra.mxu3 %v7187_v38  ;;  %v9484_v60 = vld [vmem:[%s14574_s1 + $0x24] sm:$0xf0]  ;;  %v7158_v61 = vld [vmem:[%s14574_s1 + $0x80] sm:$0xf]  ;;  %v7171_v62 = vor.u32 %v9497_v54, %v7168_v55  ;;  %v9483_v0 = vld [vmem:[%s14574_s1 + $0x24] sm:$0xf] }
  0x1e   :  { %419 = vmatpush.bf16.msra.mxu0 %v7127_v44  ;;  %v9496_v63 = vld [vmem:[%s14574_s1 + $0x84] sm:$0xf0]  ;;  %v7112_v1 = vld [vmem:[%s14574_s1 + $0x28] sm:$0xf0]  ;;  %v9495_v2 = vld [vmem:[%s14574_s1 + $0x84] sm:$0xf]  ;;  %v7111_v5 = vor.u32 %v9484_v60, %v7110_v59 }
  0x1f   :  { %484 = vmatpush.bf16.msra.mxu1 %v7175_v45  ;;  %v7160_v3 = vld [vmem:[%s14574_s1 + $0x88] sm:$0xf0]  ;;  %v9459_v4 = vld [vmem:[#allocation2 + $0x4] sm:$0xf]  ;;  %v7102_v7 = vld [vmem:[%s14574_s1 + $0x10] sm:$0xf]  ;;  %v7159_v9 = vor.u32 %v9496_v63, %v7158_v61  ;;  %v7115_v10 = vor.u32 %v9483_v0, %v7112_v1 }
  0x20   :  { %545 = vmatpush.bf16.msra.mxu2 %v7131_v46  ;;  %v7016_v6 = vld [vmem:[#allocation2 + $0x8] sm:$0xf0]  ;;  %v9482_v8 = vld [vmem:[%s14574_s1 + $0x14] sm:$0xf0]  ;;  %v9542_v13 = vld [vmem:[%s14576_s3 + $0x11c] sm:$0xf0]  ;;  %v7163_v14 = vor.u32 %v9495_v2, %v7160_v3 }
  0x21   :  { %610 = vmatpush.bf16.msra.mxu3 %v7179_v50  ;;  %v7246_v11 = vld [vmem:[%s14576_s3 + $0x148] sm:$0xff]  ;;  %v7305_v12 = vld [vmem:[%s14576_s3 + $0x118] sm:$0xf]  ;;  %v9481_v15 = vld [vmem:[%s14574_s1 + $0x14] sm:$0xf]  ;;  %vm382_vm0 = vcmask 785408   ;;  %v7019_v20 = vor.u32 %v9459_v4, %v7016_v6  ;;  %v7103_v21 = vor.u32 %v9482_v8, %v7102_v7 }
  0x22   :  { %420 = vmatpush.bf16.msra.mxu0 %v7119_v56  ;;  %v7104_v16 = vld [vmem:[%s14574_s1 + $0x18] sm:$0xf0]  ;;  %v898_v17 = vunpack.c.l.b16 %v7246_v11  ;;  %v7306_v18 = vor.u32 %v9542_v13, %v7305_v12  ;;  %vm964_vm1 = vcmask 1043456   ;;  %v899_v19 = vunpack.c.h.b16 %v7246_v11  ;;  %v7094_v22 = vld [vmem:[%s14574_s1] sm:$0xf] }
  0x23   :  { %485 = vmatpush.bf16.msra.mxu1 %v7167_v57  ;;  %v9480_v23 = vld [vmem:[%s14574_s1 + $0x4] sm:$0xf0]  ;;  %v7107_v25 = vor.u32 %v9481_v15, %v7104_v16  ;;  %v9479_v26 = vld [vmem:[%s14574_s1 + $0x4] sm:$0xf]  ;;  %v7096_v27 = vld [vmem:[%s14574_s1 + $0x8] sm:$0xf0] }
  0x24   :  { %546 = vmatpush.bf16.msra.mxu2 %v7123_v58  ;;  %v920_v24 = vpack.c.b16 %v898_v17, %v898_v17  ;;  %v9541_v29 = vld [vmem:[%s14576_s3 + $0x11c] sm:$0xf]  ;;  %v7307_v30 = vld [vmem:[%s14576_s3 + $0x120] sm:$0xf0]  ;;  %v921_v31 = vpack.c.b16 %v899_v19, %v899_v19  ;;  %v7095_v32 = vor.u32 %v9480_v23, %v7094_v22  ;;  %v7014_v33 = vld [vmem:[#allocation2] sm:$0xf]  ;;  %v7099_v35 = vor.u32 %v9479_v26, %v7096_v27 }
  0x25   :  { %611 = vmatpush.bf16.msra.mxu3 %v7171_v62  ;;  %v9460_v34 = vld [vmem:[#allocation2 + $0x4] sm:$0xf0]  ;;  %v7310_v36 = vor.u32 %v9541_v29, %v7307_v30  ;;  %v9540_v38 = vld [vmem:[%s14576_s3 + $0x10c] sm:$0xf0]  ;;  %v9539_v40 = vld [vmem:[%s14576_s3 + $0x10c] sm:$0xf] }
  0x26   :  { %421 = vmatpush.bf16.msra.mxu0 %v7111_v5  ;;  %v966_v28 = vsel %vm964_vm1, %v920_v24, 0  ;;  %v7297_v37 = vld [vmem:[%s14576_s3 + $0x108] sm:$0xf]  ;;  %v7299_v41 = vld [vmem:[%s14576_s3 + $0x110] sm:$0xf0]  ;;  %v7015_v42 = vor.u32 %v9460_v34, %v7014_v33  ;;  %v969_v43 = vsel %vm964_vm1, %v921_v31, 0 }
  0x27   :  { %486 = vmatpush.bf16.msra.mxu1 %v7159_v9  ;;  %v7298_v39 = vor.u32 %v9540_v38, %v7297_v37  ;;  %v7302_v44 = vor.u32 %v9539_v40, %v7299_v41  ;;  %v9461_v45 = vld [vmem:[#allocation2 + $0x14] sm:$0xf]  ;;  %v7024_v46 = vld [vmem:[#allocation2 + $0x18] sm:$0xf0]  ;;  %v7022_v48 = vld [vmem:[#allocation2 + $0x10] sm:$0xf] }
  0x28   :  { %547 = vmatpush.bf16.msra.mxu2 %v7115_v10  ;;  %v7027_v47 = vor.u32 %v9461_v45, %v7024_v46  ;;  %v9462_v49 = vld [vmem:[#allocation2 + $0x14] sm:$0xf0]  ;;  %v9538_v52 = vld [vmem:[%s14576_s3 + $0xfc] sm:$0xf0]  ;;  %v9537_v53 = vld [vmem:[%s14576_s3 + $0xfc] sm:$0xf] }
  0x29   :  { %612 = vmatpush.bf16.msra.mxu3 %v7163_v14  ;;  %v7023_v50 = vor.u32 %v9462_v49, %v7022_v48  ;;  %v7289_v51 = vld [vmem:[%s14576_s3 + $0xf8] sm:$0xf]  ;;  %v9463_v54 = vld [vmem:[#allocation2 + $0x24] sm:$0xf]  ;;  %v7032_v55 = vld [vmem:[#allocation2 + $0x28] sm:$0xf0] }
  0x2a   :  { %7204 = vmatmul.msk.bf16.vlgmr.msra.gmra.mxu1 %vm382_vm0, %v7019_v20  ;;  %422 = vmatpush.bf16.msra.mxu0 %v7103_v21  ;;  %v7290_v56 = vor.u32 %v9538_v52, %v7289_v51  ;;  %v7291_v57 = vld [vmem:[%s14576_s3 + $0x100] sm:$0xf0]  ;;  %v7035_v59 = vor.u32 %v9463_v54, %v7032_v55  ;;  %v7030_v60 = vld [vmem:[#allocation2 + $0x20] sm:$0xf]  ;;  %v9464_v61 = vld [vmem:[#allocation2 + $0x24] sm:$0xf0] }
  0x2b   :  { %971 = vmatpush.bf16.msrb.mxu1 %v7306_v18  ;;  %v7294_v58 = vor.u32 %v9537_v53, %v7291_v57  ;;  %v7321_v62 = vld [vmem:[%s14576_s3 + $0x138] sm:$0xf]  ;;  %v9546_v63 = vld [vmem:[%s14576_s3 + $0x13c] sm:$0xf0]  ;;  %v9545_v0 = vld [vmem:[%s14576_s3 + $0x13c] sm:$0xf]  ;;  %v7031_v3 = vor.u32 %v9464_v61, %v7030_v60 }
  0x2c   :  { %7215 = vmatmul.msk.bf16.vlgmr.msra.gmra.mxu3 %vm382_vm0, %v7019_v20  ;;  %548 = vmatpush.bf16.msra.mxu2 %v7107_v25  ;;  %v7322_v1 = vor.u32 %v9546_v63, %v7321_v62  ;;  %v7323_v2 = vld [vmem:[%s14576_s3 + $0x140] sm:$0xf0]  ;;  %v9465_v5 = vld [vmem:[#allocation2 + $0x34] sm:$0xf]  ;;  %v7040_v6 = vld [vmem:[#allocation2 + $0x38] sm:$0xf0] }
  0x2d   :  { %1020 = vmatpush.bf16.msrb.mxu3 %v966_v28  ;;  %v7326_v4 = vor.u32 %v9545_v0, %v7323_v2  ;;  %v7043_v7 = vor.u32 %v9465_v5, %v7040_v6  ;;  %v7038_v8 = vld [vmem:[#allocation2 + $0x30] sm:$0xf]  ;;  %v9466_v9 = vld [vmem:[#allocation2 + $0x34] sm:$0xf0]  ;;  %v7281_v10 = vld [vmem:[%s14576_s3 + $0xe8] sm:$0xf] }
  0x2e   :  { %423 = vmatpush.bf16.msra.mxu0 %v7095_v32  ;;  %v9536_v11 = vld [vmem:[%s14576_s3 + $0xec] sm:$0xf0]  ;;  %v9535_v12 = vld [vmem:[%s14576_s3 + $0xec] sm:$0xf]  ;;  %v7283_v14 = vld [vmem:[%s14576_s3 + $0xf0] sm:$0xf0]  ;;  %v7039_v15 = vor.u32 %v9466_v9, %v7038_v8 }
  0x2f   :  { %972 = vmatpush.bf16.msrb.mxu1 %v7298_v39  ;;  %v7282_v13 = vor.u32 %v9536_v11, %v7281_v10  ;;  %v7286_v16 = vor.u32 %v9535_v12, %v7283_v14  ;;  %v9467_v17 = vld [vmem:[#allocation2 + $0x44] sm:$0xf]  ;;  %v7048_v18 = vld [vmem:[#allocation2 + $0x48] sm:$0xf0]  ;;  %v7046_v20 = vld [vmem:[#allocation2 + $0x40] sm:$0xf] }
  0x30   :  { %549 = vmatpush.bf16.msra.mxu2 %v7099_v35  ;;  %v7051_v19 = vor.u32 %v9467_v17, %v7048_v18  ;;  %v9468_v21 = vld [vmem:[#allocation2 + $0x44] sm:$0xf0]  ;;  %v7273_v22 = vld [vmem:[%s14576_s3 + $0xd8] sm:$0xf]  ;;  %v9534_v23 = vld [vmem:[%s14576_s3 + $0xdc] sm:$0xf0] }
  0x31   :  { %424 = vmatmul.bf16.vlgmr.msra.gmra.mxu0 %v7015_v42  ;;  %1021 = vmatpush.bf16.msrb.mxu3 %v7322_v1  ;;  %v9533_v24 = vld [vmem:[%s14576_s3 + $0xdc] sm:$0xf]  ;;  %v7274_v25 = vor.u32 %v9534_v23, %v7273_v22  ;;  %v7275_v26 = vld [vmem:[%s14576_s3 + $0xe0] sm:$0xf0]  ;;  %v7047_v27 = vor.u32 %v9468_v21, %v7046_v20  ;;  %v9469_v29 = vld [vmem:[#allocation2 + $0x54] sm:$0xf] }
  0x32   :  { %1059 = vmatpush.bf16.msrb.mxu0 %v7310_v36  ;;  %v7278_v28 = vor.u32 %v9533_v24, %v7275_v26  ;;  %v7056_v30 = vld [vmem:[#allocation2 + $0x58] sm:$0xf0]  ;;  %v7054_v32 = vld [vmem:[#allocation2 + $0x50] sm:$0xf]  ;;  %v9470_v33 = vld [vmem:[#allocation2 + $0x54] sm:$0xf0] }
  0x33   :  { %550 = vmatmul.bf16.vlgmr.msra.gmra.mxu2 %v7015_v42  ;;  %973 = vmatpush.bf16.msrb.mxu1 %v7290_v56  ;;  %v7059_v31 = vor.u32 %v9469_v29, %v7056_v30  ;;  %v7055_v34 = vor.u32 %v9470_v33, %v7054_v32  ;;  %v7265_v35 = vld [vmem:[%s14576_s3 + $0xc8] sm:$0xf]  ;;  %v9532_v36 = vld [vmem:[%s14576_s3 + $0xcc] sm:$0xf0]  ;;  %v9531_v37 = vld [vmem:[%s14576_s3 + $0xcc] sm:$0xf] }
  0x34   :  { %1108 = vmatpush.bf16.msrb.mxu2 %v969_v43  ;;  %v9471_v38 = vld [vmem:[#allocation2 + $0x64] sm:$0xf]  ;;  %v7064_v39 = vld [vmem:[#allocation2 + $0x68] sm:$0xf0]  ;;  %v7266_v40 = vor.u32 %v9532_v36, %v7265_v35  ;;  %v7267_v41 = vld [vmem:[%s14576_s3 + $0xd0] sm:$0xf0] }
  0x35   :  { %v7270_v42 = vor.u32 %v9531_v37, %v7267_v41  ;;  %v7067_v43 = vor.u32 %v9471_v38, %v7064_v39  ;;  %v9544_v45 = vld [vmem:[%s14576_s3 + $0x12c] sm:$0xf0]  ;;  %v9543_v46 = vld [vmem:[%s14576_s3 + $0x12c] sm:$0xf]  ;;  %v7315_v48 = vld [vmem:[%s14576_s3 + $0x130] sm:$0xf0] }
  0x36   :  { %1060 = vmatpush.bf16.msrb.mxu0 %v7302_v44  ;;  %v7313_v44 = vld [vmem:[%s14576_s3 + $0x128] sm:$0xf]  ;;  %v7318_v49 = vor.u32 %v9543_v46, %v7315_v48  ;;  %v9473_v53 = vld [vmem:[#allocation2 + $0x74] sm:$0xf]  ;;  %v7072_v54 = vld [vmem:[#allocation2 + $0x78] sm:$0xf0] }
  0x37   :  { %974 = vmatpush.bf16.msrb.mxu1 %v7282_v13  ;;  %v9472_v51 = vld [vmem:[#allocation2 + $0x64] sm:$0xf0]  ;;  %v7075_v55 = vor.u32 %v9473_v53, %v7072_v54  ;;  %v7070_v56 = vld [vmem:[#allocation2 + $0x70] sm:$0xf]  ;;  %v9474_v57 = vld [vmem:[#allocation2 + $0x74] sm:$0xf0] }
  0x38   :  { %1109 = vmatpush.bf16.msrb.mxu2 %v7326_v4  ;;  %v9530_v60 = vld [vmem:[%s14576_s3 + $0xbc] sm:$0xf0]  ;;  %v9529_v61 = vld [vmem:[%s14576_s3 + $0xbc] sm:$0xf]  ;;  %v7259_v63 = vld [vmem:[%s14576_s3 + $0xc0] sm:$0xf0] }
  0x39   :  { %v7262_v0 = vor.u32 %v9529_v61, %v7259_v63  ;;  %v9475_v1 = vld [vmem:[#allocation2 + $0x84] sm:$0xf]  ;;  %v7080_v2 = vld [vmem:[#allocation2 + $0x88] sm:$0xf0]  ;;  %v140_v5 = vld [vmem:[%s14575_s2] sm:$0x3] }
  0x3a   :  { %7205 = vmatmul.msk.bf16.gmra.mxu1 %vm382_vm0, %v7027_v47  ;;  %1061 = vmatpush.bf16.msrb.mxu0 %v7294_v58  ;;  %v7071_v58 = vor.u32 %v9474_v57, %v7070_v56  ;;  %v7078_v6 = vld [vmem:[#allocation2 + $0x80] sm:$0xf]  ;;  %v10460_v8 = vperm.slane %v140_v5, 0  ;;  %v7088_v17 = vld [vmem:[#allocation2 + $0x98] sm:$0xf0]  ;;  %vm942_vm2 = vcmask 326656  }
  0x3b   :  { %975 = vmatpush.bf16.msrb.mxu1 %v7274_v25  ;;  %v9528_v20 = vld [vmem:[%s14576_s3 + $0xac] sm:$0xf0]  ;;  %v9527_v26 = vld [vmem:[%s14576_s3 + $0xac] sm:$0xf]  ;;  %v9478_v35 = vld [vmem:[#allocation2 + $0x94] sm:$0xf0] }
  0x3c   :  { %7216 = vmatmul.msk.bf16.gmra.mxu3 %vm382_vm0, %v7027_v47  ;;  %v7314_v47 = vor.u32 %v9544_v45, %v7313_v44  ;;  %1110 = vmatpush.bf16.msrb.mxu2 %v7318_v49  ;;  %vm5528_vm3 = vcmask 261120  }
  0x3e   :  { %1062 = vmatpush.bf16.msrb.mxu0 %v7286_v16  ;;  %1022 = vmatpush.bf16.msrb.mxu3 %v7314_v47  ;;  %v9477_v16 = vld [vmem:[#allocation2 + $0x94] sm:$0xf] }
  0x3f   :  { %976 = vmatpush.bf16.msrb.mxu1 %v7266_v40  ;;  %v7091_v24 = vor.u32 %v9477_v16, %v7088_v17 }
  0x41   :  { %429 = vmatmul.bf16.gmra.mxu0 %v7023_v50 }
  0x42   :  { %1063 = vmatpush.bf16.msrb.mxu0 %v7278_v28 }
  0x43   :  { %555 = vmatmul.bf16.gmra.mxu2 %v7023_v50  ;;  %v7062_v50 = vld [vmem:[#allocation2 + $0x60] sm:$0xf] }
  0x44   :  { %v7063_v52 = vor.u32 %v9472_v51, %v7062_v50 }
  0x46   :  { %1064 = vmatpush.bf16.msrb.mxu0 %v7270_v42 }
  0x4a   :  { %7206 = vmatmul.msk.bf16.gmra.mxu1 %vm382_vm0, %v7035_v59  ;;  %1065 = vmatpush.bf16.msrb.mxu0 %v7262_v0  ;;  %v751_v0 = vld [vmem:[%s14576_s3 + $0xa0] sm:$0xff] }
  0x4c   :  { %7217 = vmatmul.msk.bf16.gmra.mxu3 %vm382_vm0, %v7035_v59  ;;  %v7257_v59 = vld [vmem:[%s14576_s3 + $0xb8] sm:$0xf] }
  0x4d   :  { %v7258_v62 = vor.u32 %v9530_v60, %v7257_v59 }
  0x4f   :  { %977 = vmatpush.bf16.msrb.mxu1 %v7258_v62 }
  0x51   :  { %434 = vmatmul.bf16.gmra.mxu0 %v7031_v3 }
  0x53   :  { %560 = vmatmul.bf16.gmra.mxu2 %v7031_v3  ;;  %v7083_v3 = vor.u32 %v9475_v1, %v7080_v2  ;;  %v1232_v2 = vunpack.c.l.b16 %v751_v0 }
  0x5a   :  { %7207 = vmatmul.msk.bf16.gmra.mxu1 %vm382_vm0, %v7043_v7 }
  0x5c   :  { %7218 = vmatmul.msk.bf16.gmra.mxu3 %vm382_vm0, %v7043_v7  ;;  %v9476_v7 = vld [vmem:[#allocation2 + $0x84] sm:$0xf0] }
  0x5d   :  { %v7079_v9 = vor.u32 %v9476_v7, %v7078_v6  ;;  %v1254_v6 = vpack.c.b16 %v1232_v2, %v1232_v2 }
  0x61   :  { %439 = vmatmul.bf16.gmra.mxu0 %v7039_v15 }
  0x63   :  { %565 = vmatmul.bf16.gmra.mxu2 %v7039_v15  ;;  %v10463_v15 = vperm.slane %v140_v5, 1 }
  0x6a   :  { %7208 = vmatmul.msk.bf16.gmra.mxu1 %vm382_vm0, %v7051_v19 }
  0x6c   :  { %7219 = vmatmul.msk.bf16.gmra.mxu3 %vm382_vm0, %v7051_v19  ;;  %v7249_v19 = vld [vmem:[%s14576_s3 + $0xa8] sm:$0xf] }
  0x6d   :  { %v7250_v25 = vor.u32 %v9528_v20, %v7249_v19 }
  0x6f   :  { %978 = vmatpush.bf16.msrb.mxu1 %v7250_v25  ;;  %v9521_v25 = vld [vmem:[%s14576_s3 + $0x74] sm:$0xf] }
  0x71   :  { %444 = vmatmul.bf16.gmra.mxu0 %v7047_v27 }
  0x73   :  { %570 = vmatmul.bf16.gmra.mxu2 %v7047_v27  ;;  %v7251_v27 = vld [vmem:[%s14576_s3 + $0xb0] sm:$0xf0] }
  0x74   :  { %v7254_v29 = vor.u32 %v9527_v26, %v7251_v27  ;;  %v7401_v27 = vld [vmem:[%s14576_s3 + $0x78] sm:$0xf0] }
  0x76   :  { %1066 = vmatpush.bf16.msrb.mxu0 %v7254_v29 }
  0x7a   :  { %7209 = vmatmul.msk.bf16.gmra.mxu1 %vm382_vm0, %v7059_v31 }
  0x7c   :  { %7220 = vmatmul.msk.bf16.gmra.mxu3 %vm382_vm0, %v7059_v31 }
  0x81   :  { %449 = vmatmul.bf16.gmra.mxu0 %v7055_v34 }
  0x83   :  { %575 = vmatmul.bf16.gmra.mxu2 %v7055_v34  ;;  %v7086_v34 = vld [vmem:[#allocation2 + $0x90] sm:$0xf] }
  0x84   :  { %v7087_v38 = vor.u32 %v9478_v35, %v7086_v34 }
  0x8a   :  { %7210 = vmatmul.msk.bf16.gmra.mxu1 %vm382_vm0, %v7067_v43 }
  0x8c   :  { %7221 = vmatmul.msk.bf16.gmra.mxu3 %vm382_vm0, %v7067_v43  ;;  %v111_v43 = vld [vmem:[#allocation2 + $0xa0] sm:$0xff] }
  0x8d   :  { %v208_v46 = vunpack.c.h.b16 %v111_v43  ;;  %v207_v1 = vunpack.c.l.b16 %v111_v43 }
  0x8f   :  { %v230_v53 = vpack.c.b16 %v208_v46, %v208_v46 }
  0x91   :  { %454 = vmatmul.bf16.gmra.mxu0 %v7063_v52 }
  0x93   :  { %580 = vmatmul.bf16.gmra.mxu2 %v7063_v52 }
  0x9a   :  { %7211 = vmatmul.msk.bf16.gmra.mxu1 %vm382_vm0, %v7075_v55 }
  0x9c   :  { %7222 = vmatmul.msk.bf16.gmra.mxu3 %vm382_vm0, %v7075_v55 }
  0xa1   :  { %459 = vmatmul.bf16.gmra.mxu0 %v7071_v58 }
  0xa3   :  { %585 = vmatmul.bf16.gmra.mxu2 %v7071_v58 }
  0xa7   :  { %v488_v4 = vpop.f32.mrf.mxu1 }
  0xaa   :  { %7212 = vmatmul.msk.bf16.gmra.mxu1 %vm382_vm0, %v7083_v3 }
  0xac   :  { %7223 = vmatmul.msk.bf16.gmra.mxu3 %vm382_vm0, %v7083_v3  ;;  %v1233_v3 = vunpack.c.h.b16 %v751_v0 }
  0xae   :  { %v425_v11 = vpop.f32.mrf.mxu0  ;;  %v1255_v7 = vpack.c.b16 %v1233_v3, %v1233_v3 }
  0xaf   :  { %v614_v10 = vpop.f32.mrf.mxu3  ;;  %v426_v12 = vadd.f32 %v425_v11, %v10460_v8  ;;  %v490_v13 = vpop.f32.mrf.mxu1  ;;  %v229_v11 = vpack.c.b16 %v207_v1, %v207_v1  ;;  %v7393_v1 = vld [vmem:[%s14576_s3 + $0x68] sm:$0xf0] }
  0xb1   :  { %v489_v14 = vadd.f32 %v488_v4, %v426_v12  ;;  %464 = vmatmul.bf16.gmra.mxu0 %v7079_v9  ;;  %v1298_v12 = vsel %vm964_vm1, %v1254_v6, 0 }
  0xb2   :  { %1352 = vmatpush.bf16.msra.mxu3 %v1298_v12 }
  0xb3   :  { %590 = vmatmul.bf16.gmra.mxu2 %v7079_v9  ;;  %v668_v31 = vmax.f32 %v489_v14, 0.0 }
  0xb6   :  { %v551_v18 = vpop.f32.mrf.mxu2  ;;  %v427_v23 = vpop.f32.mrf.mxu0 }
  0xb7   :  { %v552_v21 = vadd.f32 %v551_v18, %v10463_v15  ;;  %v616_v22 = vpop.f32.mrf.mxu3  ;;  %v493_v28 = vpop.f32.mrf.mxu1  ;;  %v428_v33 = vadd.f32 %v427_v23, %v10460_v8  ;;  %v7399_v23 = vld [vmem:[%s14576_s3 + $0x70] sm:$0xf] }
  0xb9   :  { %v615_v30 = vadd.f32 %v614_v10, %v552_v21  ;;  %v491_v39 = vadd.f32 %v490_v13, %v428_v33  ;;  %v1301_v13 = vsel %vm964_vm1, %v1255_v7, 0 }
  0xba   :  { %7213 = vmatmul.msk.bf16.gmra.mxu1 %vm382_vm0, %v7091_v24  ;;  %1440 = vmatpush.bf16.msra.mxu2 %v1301_v13 }
  0xbb   :  { %v669_v32 = vmax.f32 %v615_v30, 0.0  ;;  %v670_v47 = vmax.f32 %v491_v39, 0.0  ;;  %v7404_v30 = vor.u32 %v9521_v25, %v7401_v27  ;;  %v7385_v27 = vld [vmem:[%s14576_s3 + $0x58] sm:$0xf0] }
  0xbc   :  { %7224 = vmatmul.msk.bf16.gmra.mxu3 %vm382_vm0, %v7091_v24  ;;  %v9522_v24 = vld [vmem:[%s14576_s3 + $0x74] sm:$0xf0] }
  0xbd   :  { %v710_v36 = vpack.c.bf16 %v669_v32, %v668_v31  ;;  %v7400_v26 = vor.u32 %v9522_v24, %v7399_v23  ;;  %1391 = vmatpush.bf16.msra.mxu0 %v7404_v30  ;;  %v9518_v23 = vld [vmem:[%s14576_s3 + $0x54] sm:$0xf0]  ;;  %v9517_v24 = vld [vmem:[%s14576_s3 + $0x54] sm:$0xf] }
  0xbe   :  { %v553_v37 = vpop.f32.mrf.mxu2  ;;  %v430_v42 = vpop.f32.mrf.mxu0  ;;  %v7388_v30 = vor.u32 %v9517_v24, %v7385_v27 }
  0xbf   :  { %v554_v40 = vadd.f32 %v553_v37, %v10463_v15  ;;  %v619_v41 = vpop.f32.mrf.mxu3  ;;  %v495_v44 = vpop.f32.mrf.mxu1  ;;  %v1148_v50 = vunpack.c.l.b16 %v710_v36  ;;  %v1149_v51 = vunpack.c.h.b16 %v710_v36  ;;  %v431_v55 = vadd.f32 %v430_v42, %v10460_v8  ;;  %1303 = vmatpush.bf16.msra.mxu1 %v7400_v26 }
  0xc1   :  { %v617_v45 = vadd.f32 %v616_v22, %v554_v40  ;;  %469 = vmatmul.bf16.gmra.mxu0 %v7087_v38  ;;  %v494_v4 = vadd.f32 %v493_v28, %v431_v55 }
  0xc3   :  { %v671_v48 = vmax.f32 %v617_v45, 0.0  ;;  %595 = vmatmul.bf16.gmra.mxu2 %v7087_v38  ;;  %v672_v14 = vmax.f32 %v494_v4, 0.0 }
  0xc5   :  { %v10482_v49 = vpack.c.bf16 %v671_v48, %v670_v47 }
  0xc6   :  { %v556_v52 = vpop.f32.mrf.mxu2  ;;  %v432_v58 = vpop.f32.mrf.mxu0 }
  0xc7   :  { %v789_v54 = vunpack.c.h.b16 %v10482_v49  ;;  %v557_v56 = vadd.f32 %v556_v52, %v10463_v15  ;;  %v621_v57 = vpop.f32.mrf.mxu3  ;;  %v788_v59 = vunpack.c.l.b16 %v10482_v49  ;;  %v498_v60 = vpop.f32.mrf.mxu1  ;;  %v433_v5 = vadd.f32 %v432_v58, %v10460_v8  ;;  %v7391_v49 = vld [vmem:[%s14576_s3 + $0x60] sm:$0xf] }
  0xc9   :  { %v10490_v61 = vpack.c.b16 %v789_v54, %v1149_v51  ;;  %v620_v62 = vadd.f32 %v619_v41, %v557_v56  ;;  %v10492_v63 = vpack.c.b16 %v788_v59, %v1148_v50  ;;  %v496_v16 = vadd.f32 %v495_v44, %v433_v5 }
  0xca   :  { %7214 = vmatmul.msk.bf16.gmra.mxu1 %vm382_vm0, %v230_v53 }
  0xcb   :  { %v673_v9 = vmax.f32 %v620_v62, 0.0  ;;  %v674_v28 = vmax.f32 %v496_v16, 0.0 }
  0xcc   :  { %7225 = vmatmul.msk.bf16.gmra.mxu3 %vm382_vm0, %v230_v53 }
  0xcd   :  { %v712_v21 = vpack.c.bf16 %v673_v9, %v672_v14 }
  0xce   :  { %v558_v10 = vpop.f32.mrf.mxu2  ;;  %v435_v19 = vpop.f32.mrf.mxu0 }
  0xcf   :  { %v559_v17 = vadd.f32 %v558_v10, %v10463_v15  ;;  %v624_v18 = vpop.f32.mrf.mxu3  ;;  %v500_v20 = vpop.f32.mrf.mxu1  ;;  %v790_v32 = vunpack.c.l.b16 %v712_v21  ;;  %v791_v33 = vunpack.c.h.b16 %v712_v21  ;;  %v436_v37 = vadd.f32 %v435_v19, %v10460_v8 }
  0xd1   :  { %v622_v22 = vadd.f32 %v621_v57, %v559_v17  ;;  %474 = vmatmul.bf16.gmra.mxu0 %v229_v11  ;;  %v816_v43 = vpack.c.b16 %v790_v32, %v788_v59  ;;  %v817_v46 = vpack.c.b16 %v791_v33, %v789_v54  ;;  %v499_v47 = vadd.f32 %v498_v60, %v436_v37  ;;  %v9520_v54 = vld [vmem:[%s14576_s3 + $0x64] sm:$0xf0]  ;;  %v9519_v60 = vld [vmem:[%s14576_s3 + $0x64] sm:$0xf] }
  0xd2   :  { %v7392_v0 = vor.u32 %v9520_v54, %v7391_v49  ;;  %v7396_v4 = vor.u32 %v9519_v60, %v7393_v1 }
  0xd3   :  { %v675_v29 = vmax.f32 %v622_v22, 0.0  ;;  %600 = vmatmul.bf16.gmra.mxu2 %v229_v11  ;;  %v676_v52 = vmax.f32 %v499_v47, 0.0  ;;  %v7383_v22 = vld [vmem:[%s14576_s3 + $0x50] sm:$0xf]  ;;  %v7417_v47 = vld [vmem:[%s14576_s3 + $0x98] sm:$0xf0] }
  0xd4   :  { %1304 = vmatpush.bf16.msra.mxu1 %v7392_v0  ;;  %1392 = vmatpush.bf16.msra.mxu0 %v7396_v4  ;;  %v7384_v26 = vor.u32 %v9518_v23, %v7383_v22  ;;  %v7375_v4 = vld [vmem:[%s14576_s3 + $0x40] sm:$0xf] }
  0xd5   :  { %v10515_v31 = vpack.c.bf16 %v675_v29, %v674_v28 }
  0xd6   :  { %v561_v34 = vpop.f32.mrf.mxu2  ;;  %v437_v40 = vpop.f32.mrf.mxu0 }
  0xd7   :  { %v792_v35 = vunpack.c.l.b16 %v10515_v31  ;;  %v793_v36 = vunpack.c.h.b16 %v10515_v31  ;;  %v562_v38 = vadd.f32 %v561_v34, %v10463_v15  ;;  %v626_v39 = vpop.f32.mrf.mxu3  ;;  %v503_v41 = vpop.f32.mrf.mxu1  ;;  %v438_v48 = vadd.f32 %v437_v40, %v10460_v8 }
  0xd8   :  { %1305 = vmatpush.bf16.msra.mxu1 %v7384_v26  ;;  %1393 = vmatpush.bf16.msra.mxu0 %v7388_v30 }
  0xd9   :  { %v625_v42 = vadd.f32 %v624_v18, %v562_v38  ;;  %v10521_v44 = vpack.c.b16 %v792_v35, %v790_v32  ;;  %v10523_v45 = vpack.c.b16 %v793_v36, %v791_v33  ;;  %v501_v53 = vadd.f32 %v500_v20, %v438_v48 }
  0xda   :  { %979 = vmatmul.bf16.vlgmr.msrb.gmra.mxu1 %v816_v43 }
  0xdb   :  { %v677_v50 = vmax.f32 %v625_v42, 0.0  ;;  %v678_v2 = vmax.f32 %v501_v53, 0.0  ;;  %v9526_v42 = vld [vmem:[%s14576_s3 + $0x94] sm:$0xf0] }
  0xdc   :  { %7327 = vmatmul.msk.bf16.vlgmr.msrb.gmra.mxu3 %vm942_vm2, %v817_v46 }
  0xdd   :  { %v714_v59 = vpack.c.bf16 %v677_v50, %v676_v52 }
  0xde   :  { %v563_v51 = vpop.f32.mrf.mxu2  ;;  %v440_v57 = vpop.f32.mrf.mxu0 }
  0xdf   :  { %v564_v55 = vadd.f32 %v563_v51, %v10463_v15  ;;  %v629_v56 = vpop.f32.mrf.mxu3  ;;  %v505_v58 = vpop.f32.mrf.mxu1  ;;  %v794_v5 = vunpack.c.l.b16 %v714_v59  ;;  %v795_v7 = vunpack.c.h.b16 %v714_v59  ;;  %v441_v12 = vadd.f32 %v440_v57, %v10460_v8 }
  0xe1   :  { %v627_v62 = vadd.f32 %v626_v39, %v564_v55  ;;  %1067 = vmatmul.bf16.vlgmr.msrb.gmra.mxu0 %v816_v43  ;;  %v10555_v21 = vpack.c.b16 %v794_v5, %v792_v35  ;;  %v10566_v25 = vpack.c.b16 %v795_v7, %v793_v36  ;;  %v504_v28 = vadd.f32 %v503_v41, %v441_v12  ;;  %v7415_v41 = vld [vmem:[%s14576_s3 + $0x90] sm:$0xf]  ;;  %v9525_v43 = vld [vmem:[%s14576_s3 + $0x94] sm:$0xf]  ;;  %v7377_v12 = vld [vmem:[%s14576_s3 + $0x48] sm:$0xf0] }
  0xe2   :  { %v7420_v51 = vor.u32 %v9525_v43, %v7417_v47 }
  0xe3   :  { %v679_v3 = vmax.f32 %v627_v62, 0.0  ;;  %7334 = vmatmul.msk.bf16.vlgmr.msrb.gmra.mxu2 %vm942_vm2, %v817_v46  ;;  %v680_v33 = vmax.f32 %v504_v28, 0.0  ;;  %v7416_v46 = vor.u32 %v9526_v42, %v7415_v41 }
  0xe4   :  { %1441 = vmatpush.bf16.msra.mxu2 %v7420_v51  ;;  %v9513_v51 = vld [vmem:[%s14576_s3 + $0x34] sm:$0xf] }
  0xe5   :  { %v10543_v6 = vpack.c.bf16 %v679_v3, %v678_v2  ;;  %1353 = vmatpush.bf16.msra.mxu3 %v7416_v46 }
  0xe6   :  { %v566_v9 = vpop.f32.mrf.mxu2  ;;  %v442_v16 = vpop.f32.mrf.mxu0 }
  0xe7   :  { %v796_v10 = vunpack.c.l.b16 %v10543_v6  ;;  %v797_v11 = vunpack.c.h.b16 %v10543_v6  ;;  %v567_v13 = vadd.f32 %v566_v9, %v10463_v15  ;;  %v631_v14 = vpop.f32.mrf.mxu3  ;;  %v508_v17 = vpop.f32.mrf.mxu1  ;;  %v443_v29 = vadd.f32 %v442_v16, %v10460_v8 }
  0xe9   :  { %v10549_v18 = vpack.c.b16 %v796_v10, %v794_v5  ;;  %v10553_v19 = vpack.c.b16 %v797_v11, %v795_v7  ;;  %v630_v20 = vadd.f32 %v629_v56, %v567_v13  ;;  %v506_v34 = vadd.f32 %v505_v58, %v443_v29  ;;  %v9516_v5 = vld [vmem:[%s14576_s3 + $0x44] sm:$0xf0]  ;;  %v9515_v7 = vld [vmem:[%s14576_s3 + $0x44] sm:$0xf] }
  0xea   :  { %984 = vmatmul.bf16.gmra.mxu1 %v10555_v21  ;;  %v7380_v16 = vor.u32 %v9515_v7, %v7377_v12 }
  0xeb   :  { %14609 = vst [vmem:[#allocation12_spill] sm:$0xff] %v10549_v18  ;;  %v681_v31 = vmax.f32 %v630_v20, 0.0  ;;  %v682_v48 = vmax.f32 %v506_v34, 0.0 }
  0xec   :  { %14610 = vst [vmem:[#allocation13_spill] sm:$0xff] %v10553_v19  ;;  %7328 = vmatmul.msk.bf16.gmra.mxu3 %vm942_vm2, %v10566_v25  ;;  %1394 = vmatpush.bf16.msra.mxu0 %v7380_v16 }
  0xed   :  { %v716_v39 = vpack.c.bf16 %v681_v31, %v680_v33 }
  0xee   :  { %v568_v32 = vpop.f32.mrf.mxu2  ;;  %v445_v37 = vpop.f32.mrf.mxu0 }
  0xef   :  { %v569_v35 = vadd.f32 %v568_v32, %v10463_v15  ;;  %v634_v36 = vpop.f32.mrf.mxu3  ;;  %v510_v38 = vpop.f32.mrf.mxu1  ;;  %v798_v52 = vunpack.c.l.b16 %v716_v39  ;;  %v799_v55 = vunpack.c.h.b16 %v716_v39  ;;  %v446_v59 = vadd.f32 %v445_v37, %v10460_v8 }
  0xf1   :  { %v632_v40 = vadd.f32 %v631_v14, %v569_v35  ;;  %1072 = vmatmul.bf16.gmra.mxu0 %v10555_v21  ;;  %v10593_v0 = vpack.c.b16 %v798_v52, %v796_v10  ;;  %v10610_v9 = vpack.c.b16 %v799_v55, %v797_v11  ;;  %v7376_v10 = vor.u32 %v9516_v5, %v7375_v4 }
  0xf2   :  { %v509_v13 = vadd.f32 %v508_v17, %v446_v59 }
  0xf3   :  { %v683_v50 = vmax.f32 %v632_v40, 0.0  ;;  %7335 = vmatmul.msk.bf16.gmra.mxu2 %vm942_vm2, %v10566_v25  ;;  %1306 = vmatpush.bf16.msra.mxu1 %v7376_v10 }
  0xf4   :  { %v684_v11 = vmax.f32 %v509_v13, 0.0 }
  0xf5   :  { %v717_v53 = vpack.c.bf16 %v683_v50, %v682_v48  ;;  %v7367_v48 = vld [vmem:[%s14576_s3 + $0x30] sm:$0xf]  ;;  %v9514_v50 = vld [vmem:[%s14576_s3 + $0x34] sm:$0xf0] }
  0xf6   :  { %v571_v56 = vpop.f32.mrf.mxu2  ;;  %v447_v54 = vpop.f32.mrf.mxu0 }
  0xf7   :  { %v800_v57 = vunpack.c.l.b16 %v717_v53  ;;  %v801_v58 = vunpack.c.h.b16 %v717_v53  ;;  %v572_v62 = vadd.f32 %v571_v56, %v10463_v15  ;;  %v636_v49 = vpop.f32.mrf.mxu3  ;;  %v513_v60 = vpop.f32.mrf.mxu1  ;;  %v448_v14 = vadd.f32 %v447_v54, %v10460_v8 }
  0xf8   :  { %v7368_v53 = vor.u32 %v9514_v50, %v7367_v48 }
  0xf9   :  { %v10595_v1 = vpack.c.b16 %v800_v57, %v798_v52  ;;  %v10597_v2 = vpack.c.b16 %v801_v58, %v799_v55  ;;  %v635_v3 = vadd.f32 %v634_v36, %v572_v62  ;;  %v511_v22 = vadd.f32 %v510_v38, %v448_v14  ;;  %v7369_v55 = vld [vmem:[%s14576_s3 + $0x38] sm:$0xf0] }
  0xfa   :  { %989 = vmatmul.bf16.gmra.mxu1 %v10593_v0  ;;  %v7372_v59 = vor.u32 %v9513_v51, %v7369_v55  ;;  %v9511_v51 = vld [vmem:[%s14576_s3 + $0x24] sm:$0xf] }
  0xfb   :  { %v685_v20 = vmax.f32 %v635_v3, 0.0  ;;  %v686_v29 = vmax.f32 %v511_v22, 0.0  ;;  %1307 = vmatpush.bf16.msra.mxu1 %v7368_v53  ;;  %v7361_v53 = vld [vmem:[%s14576_s3 + $0x28] sm:$0xf0] }
  0xfc   :  { %7329 = vmatmul.msk.bf16.gmra.mxu3 %vm942_vm2, %v10610_v9  ;;  %1395 = vmatpush.bf16.msra.mxu0 %v7372_v59  ;;  %v7364_v55 = vor.u32 %v9511_v51, %v7361_v53 }
  0xfd   :  { %v718_v17 = vpack.c.bf16 %v685_v20, %v684_v11 }
  0xfe   :  { %v573_v6 = vpop.f32.mrf.mxu2  ;;  %v450_v26 = vpop.f32.mrf.mxu0 }
  0xff   :  { %v574_v23 = vadd.f32 %v573_v6, %v10463_v15  ;;  %v639_v24 = vpop.f32.mrf.mxu3  ;;  %v515_v27 = vpop.f32.mrf.mxu1  ;;  %v802_v31 = vunpack.c.l.b16 %v718_v17  ;;  %v803_v33 = vunpack.c.h.b16 %v718_v17  ;;  %v451_v37 = vadd.f32 %v450_v26, %v10460_v8 }
 0x100   :  { %1396 = vmatpush.bf16.msra.mxu0 %v7364_v55 }
 0x101   :  { %v637_v28 = vadd.f32 %v636_v49, %v574_v23  ;;  %1077 = vmatmul.bf16.gmra.mxu0 %v10593_v0  ;;  %v10625_v42 = vpack.c.b16 %v802_v31, %v800_v57  ;;  %v10640_v52 = vpack.c.b16 %v803_v33, %v801_v58  ;;  %v514_v56 = vadd.f32 %v513_v60, %v451_v37 }
 0x103   :  { %v687_v30 = vmax.f32 %v637_v28, 0.0  ;;  %7336 = vmatmul.msk.bf16.gmra.mxu2 %vm942_vm2, %v10610_v9  ;;  %v688_v58 = vmax.f32 %v514_v56, 0.0 }
 0x105   :  { %v719_v32 = vpack.c.bf16 %v687_v30, %v686_v29 }
 0x106   :  { %v576_v34 = vpop.f32.mrf.mxu2  ;;  %v452_v40 = vpop.f32.mrf.mxu0 }
 0x107   :  { %v804_v35 = vunpack.c.l.b16 %v719_v32  ;;  %v805_v36 = vunpack.c.h.b16 %v719_v32  ;;  %v577_v38 = vadd.f32 %v576_v34, %v10463_v15  ;;  %v641_v39 = vpop.f32.mrf.mxu3  ;;  %v518_v41 = vpop.f32.mrf.mxu1  ;;  %v453_v57 = vadd.f32 %v452_v40, %v10460_v8  ;;  %v7407_v32 = vld [vmem:[%s14576_s3 + $0x80] sm:$0xf]  ;;  %v9523_v34 = vld [vmem:[%s14576_s3 + $0x84] sm:$0xf]  ;;  %v9512_v40 = vld [vmem:[%s14576_s3 + $0x24] sm:$0xf0] }
 0x109   :  { %v10627_v43 = vpack.c.b16 %v804_v35, %v802_v31  ;;  %v10629_v46 = vpack.c.b16 %v805_v36, %v803_v33  ;;  %v640_v47 = vadd.f32 %v639_v24, %v577_v38  ;;  %v516_v54 = vadd.f32 %v515_v27, %v453_v57  ;;  %v9524_v33 = vld [vmem:[%s14576_s3 + $0x84] sm:$0xf0]  ;;  %v7409_v38 = vld [vmem:[%s14576_s3 + $0x88] sm:$0xf0] }
 0x10a   :  { %994 = vmatmul.bf16.gmra.mxu1 %v10625_v42  ;;  %v7408_v37 = vor.u32 %v9524_v33, %v7407_v32  ;;  %v9508_v32 = vld [vmem:[%s14576_s3 + $0x4] sm:$0xf0] }
 0x10b   :  { %v689_v62 = vmax.f32 %v640_v47, 0.0  ;;  %v690_v12 = vmax.f32 %v516_v54, 0.0 }
 0x10c   :  { %7330 = vmatmul.msk.bf16.gmra.mxu3 %vm942_vm2, %v10640_v52 }
 0x10d   :  { %v720_v60 = vpack.c.bf16 %v689_v62, %v688_v58  ;;  %1354 = vmatpush.bf16.msra.mxu3 %v7408_v37 }
 0x10e   :  { %v578_v49 = vpop.f32.mrf.mxu2  ;;  %v455_v5 = vpop.f32.mrf.mxu0 }
 0x10f   :  { %v579_v3 = vadd.f32 %v578_v49, %v10463_v15  ;;  %v644_v4 = vpop.f32.mrf.mxu3  ;;  %v520_v7 = vpop.f32.mrf.mxu1  ;;  %v806_v14 = vunpack.c.l.b16 %v720_v60  ;;  %v807_v20 = vunpack.c.h.b16 %v720_v60  ;;  %v456_v23 = vadd.f32 %v455_v5, %v10460_v8  ;;  %v7351_v5 = vld [vmem:[%s14576_s3 + $0x10] sm:$0xf]  ;;  %v9510_v60 = vld [vmem:[%s14576_s3 + $0x14] sm:$0xf0] }
 0x111   :  { %v642_v10 = vadd.f32 %v641_v39, %v579_v3  ;;  %1082 = vmatmul.bf16.gmra.mxu0 %v10625_v42  ;;  %v10661_v28 = vpack.c.b16 %v806_v14, %v804_v35  ;;  %v10680_v35 = vpack.c.b16 %v807_v20, %v805_v36  ;;  %v7359_v39 = vld [vmem:[%s14576_s3 + $0x20] sm:$0xf]  ;;  %v519_v47 = vadd.f32 %v518_v41, %v456_v23 }
 0x112   :  { %v7412_v36 = vor.u32 %v9523_v34, %v7409_v38  ;;  %v7360_v50 = vor.u32 %v9512_v40, %v7359_v39 }
 0x113   :  { %v691_v13 = vmax.f32 %v642_v10, 0.0  ;;  %7337 = vmatmul.msk.bf16.gmra.mxu2 %vm942_vm2, %v10640_v52  ;;  %14611 = vst [vmem:[#allocation14_spill] sm:$0xff] %v10680_v35  ;;  %v692_v57 = vmax.f32 %v519_v47, 0.0  ;;  %v9509_v10 = vld [vmem:[%s14576_s3 + $0x14] sm:$0xf] }
 0x114   :  { %1442 = vmatpush.bf16.msra.mxu2 %v7412_v36  ;;  %1308 = vmatpush.bf16.msra.mxu1 %v7360_v50 }
 0x115   :  { %v10653_v16 = vpack.c.bf16 %v691_v13, %v690_v12  ;;  %v7353_v12 = vld [vmem:[%s14576_s3 + $0x18] sm:$0xf0] }
 0x116   :  { %v581_v6 = vpop.f32.mrf.mxu2  ;;  %v457_v27 = vpop.f32.mrf.mxu0 }
 0x117   :  { %v808_v11 = vunpack.c.l.b16 %v10653_v16  ;;  %v809_v22 = vunpack.c.h.b16 %v10653_v16  ;;  %v582_v24 = vadd.f32 %v581_v6, %v10463_v15  ;;  %v646_v26 = vpop.f32.mrf.mxu3  ;;  %v10659_v17 = vpop.f32.mrf.mxu1  ;;  %v458_v48 = vadd.f32 %v457_v27, %v10460_v8  ;;  %v7345_v16 = vld [vmem:[%s14576_s3 + $0x8] sm:$0xf0] }
 0x119   :  { %v10665_v29 = vpack.c.b16 %v808_v11, %v806_v14  ;;  %v10669_v30 = vpack.c.b16 %v809_v22, %v807_v20  ;;  %v645_v31 = vadd.f32 %v644_v4, %v582_v24  ;;  %v521_v59 = vadd.f32 %v520_v7, %v458_v48 }
 0x11a   :  { %999 = vmatmul.bf16.gmra.mxu1 %v10661_v28  ;;  %v7352_v7 = vor.u32 %v9510_v60, %v7351_v5  ;;  %v7356_v20 = vor.u32 %v9509_v10, %v7353_v12 }
 0x11b   :  { %v693_v56 = vmax.f32 %v645_v31, 0.0  ;;  %v694_v13 = vmax.f32 %v521_v59, 0.0  ;;  %v7343_v31 = vld [vmem:[%s14576_s3] sm:$0xf]  ;;  %v9507_v59 = vld [vmem:[%s14576_s3 + $0x4] sm:$0xf] }
 0x11c   :  { %7331 = vmatmul.msk.bf16.gmra.mxu3 %vm942_vm2, %v10680_v35  ;;  %1309 = vmatpush.bf16.msra.mxu1 %v7352_v7  ;;  %v7344_v40 = vor.u32 %v9508_v32, %v7343_v31  ;;  %v7455_v31 = vld [vmem:[%s14576_s3 + $0x1f0] sm:$0xff] }
 0x11d   :  { %v722_v3 = vpack.c.bf16 %v693_v56, %v692_v57  ;;  %1397 = vmatpush.bf16.msra.mxu0 %v7356_v20 }
 0x11e   :  { %v583_v41 = vpop.f32.mrf.mxu2  ;;  %v460_v58 = vpop.f32.mrf.mxu0 }
 0x11f   :  { %v584_v62 = vadd.f32 %v583_v41, %v10463_v15  ;;  %v649_v49 = vpop.f32.mrf.mxu3  ;;  %v525_v54 = vpop.f32.mrf.mxu1  ;;  %v810_v6 = vunpack.c.l.b16 %v722_v3  ;;  %v811_v24 = vunpack.c.h.b16 %v722_v3 }
 0x120   :  { %1310 = vmatpush.bf16.msra.mxu1 %v7344_v40 }
 0x121   :  { %v647_v4 = vadd.f32 %v646_v26, %v584_v62  ;;  %1087 = vmatmul.bf16.gmra.mxu0 %v10661_v28  ;;  %v461_v26 = vadd.f32 %v460_v58, %v10460_v8  ;;  %v10732_v36 = vpack.c.b16 %v810_v6, %v808_v11  ;;  %v10740_v55 = vpack.c.b16 %v811_v24, %v809_v22 }
 0x122   :  { %v7348_v58 = vor.u32 %v9507_v59, %v7345_v16 }
 0x123   :  { %v695_v14 = vmax.f32 %v647_v4, 0.0  ;;  %7338 = vmatmul.msk.bf16.gmra.mxu2 %vm942_vm2, %v10680_v35  ;;  %14612 = vst [vmem:[#allocation15_spill] sm:$0xff] %v10740_v55  ;;  %v524_v41 = vadd.f32 %v10659_v17, %v461_v26 }
 0x124   :  { %1398 = vmatpush.bf16.msra.mxu0 %v7348_v58 }
 0x125   :  { %v10717_v23 = vpack.c.bf16 %v695_v14, %v694_v13  ;;  %v696_v22 = vmax.f32 %v524_v41, 0.0 }
 0x126   :  { %v586_v27 = vpop.f32.mrf.mxu2  ;;  %v462_v39 = vpop.f32.mrf.mxu0 }
 0x127   :  { %v812_v33 = vunpack.c.l.b16 %v10717_v23  ;;  %v813_v34 = vunpack.c.h.b16 %v10717_v23  ;;  %v587_v37 = vadd.f32 %v586_v27, %v10463_v15  ;;  %v651_v38 = vpop.f32.mrf.mxu3  ;;  %v463_v47 = vadd.f32 %v462_v39, %v10460_v8  ;;  %v528_v48 = vpop.f32.mrf.mxu1 }
 0x128   :  { %v1569_v39 = vunpack.c.h.b16 %v7455_v31 }
 0x129   :  { %v10734_v50 = vpack.c.b16 %v812_v33, %v810_v6  ;;  %v10736_v51 = vpack.c.b16 %v813_v34, %v811_v24  ;;  %v650_v53 = vadd.f32 %v649_v49, %v587_v37  ;;  %v526_v56 = vadd.f32 %v525_v54, %v463_v47 }
 0x12a   :  { %1004 = vmatmul.bf16.gmra.mxu1 %v10732_v36 }
 0x12b   :  { %v697_v11 = vmax.f32 %v650_v53, 0.0  ;;  %v698_v10 = vmax.f32 %v526_v56, 0.0 }
 0x12c   :  { %7332 = vmatmul.msk.bf16.gmra.mxu3 %vm942_vm2, %v10740_v55 }
 0x12d   :  { %v724_v4 = vpack.c.bf16 %v697_v11, %v696_v22 }
 0x12e   :  { %v588_v57 = vpop.f32.mrf.mxu2  ;;  %v465_v17 = vpop.f32.mrf.mxu0 }
 0x12f   :  { %v589_v62 = vadd.f32 %v588_v57, %v10463_v15  ;;  %v654_v49 = vpop.f32.mrf.mxu3  ;;  %v466_v54 = vadd.f32 %v465_v17, %v10460_v8  ;;  %v530_v3 = vpop.f32.mrf.mxu1  ;;  %v814_v12 = vunpack.c.l.b16 %v724_v4  ;;  %v815_v14 = vunpack.c.h.b16 %v724_v4  ;;  %v7514_v4 = vld [vmem:[%s14576_s3 + $0x1c0] sm:$0xf] }
 0x130   :  { %v1591_v57 = vpack.c.b16 %v1569_v39, %v1569_v39 }
 0x131   :  { %v652_v5 = vadd.f32 %v651_v38, %v589_v62  ;;  %v529_v60 = vadd.f32 %v528_v48, %v466_v54  ;;  %1092 = vmatmul.bf16.gmra.mxu0 %v10732_v36  ;;  %v1568_v38 = vunpack.c.l.b16 %v7455_v31  ;;  %v10762_v40 = vpack.c.b16 %v814_v12, %v812_v33 }
 0x132   :  { %v10768_v56 = vpack.c.b16 %v815_v14, %v813_v34  ;;  %v1619_v22 = vsel %vm964_vm1, %v1591_v57, 0 }
 0x133   :  { %v699_v7 = vmax.f32 %v652_v5, 0.0  ;;  %7339 = vmatmul.msk.bf16.gmra.mxu2 %vm942_vm2, %v10740_v55  ;;  %v1590_v11 = vpack.c.b16 %v1568_v38, %v1568_v38  ;;  %v700_v59 = vmax.f32 %v529_v60, 0.0  ;;  %v9562_v5 = vld [vmem:[%s14576_s3 + $0x1c4] sm:$0xf0]  ;;  %v9561_v60 = vld [vmem:[%s14576_s3 + $0x1c4] sm:$0xf] }
 0x134   :  { %1758 = vmatpush.bf16.msrb.mxu2 %v1619_v22 }
 0x135   :  { %v725_v13 = vpack.c.bf16 %v699_v7, %v698_v10  ;;  %v1616_v33 = vsel %vm964_vm1, %v1590_v11, 0 }
 0x136   :  { %v591_v20 = vpop.f32.mrf.mxu2  ;;  %v467_v27 = vpop.f32.mrf.mxu0  ;;  %1670 = vmatpush.bf16.msrb.mxu3 %v1616_v33  ;;  %v9559_v33 = vld [vmem:[%s14576_s3 + $0x1b4] sm:$0xf] }
 0x137   :  { %v1502_v6 = vunpack.c.l.b16 %v725_v13  ;;  %v1503_v23 = vunpack.c.h.b16 %v725_v13  ;;  %v592_v24 = vadd.f32 %v591_v20, %v10463_v15  ;;  %v656_v26 = vpop.f32.mrf.mxu3  ;;  %v468_v32 = vadd.f32 %v467_v27, %v10460_v8  ;;  %v533_v37 = vpop.f32.mrf.mxu1  ;;  %v7516_v13 = vld [vmem:[%s14576_s3 + $0x1c8] sm:$0xf0] }
 0x138   :  { %v7519_v27 = vor.u32 %v9561_v60, %v7516_v13 }
 0x139   :  { %v10764_v47 = vpack.c.b16 %v1502_v6, %v814_v12  ;;  %v10766_v48 = vpack.c.b16 %v1503_v23, %v815_v14  ;;  %v655_v53 = vadd.f32 %v654_v49, %v592_v24  ;;  %v531_v41 = vadd.f32 %v530_v3, %v468_v32 }
 0x13a   :  { %1009 = vmatmul.bf16.gmra.mxu1 %v10762_v40  ;;  %v7515_v12 = vor.u32 %v9562_v5, %v7514_v4  ;;  %1709 = vmatpush.bf16.msrb.mxu0 %v7519_v27 }
 0x13b   :  { %v701_v16 = vmax.f32 %v655_v53, 0.0  ;;  %v702_v32 = vmax.f32 %v531_v41, 0.0  ;;  %v7506_v41 = vld [vmem:[%s14576_s3 + $0x1b0] sm:$0xf] }
 0x13c   :  { %7333 = vmatmul.msk.bf16.gmra.mxu3 %vm942_vm2, %v10768_v56  ;;  %1621 = vmatpush.bf16.msrb.mxu1 %v7515_v12 }
 0x13d   :  { %v726_v62 = vpack.c.bf16 %v701_v16, %v700_v59  ;;  %v9560_v16 = vld [vmem:[%s14576_s3 + $0x1b4] sm:$0xf0] }
 0x13e   :  { %v593_v49 = vpop.f32.mrf.mxu2  ;;  %v470_v3 = vpop.f32.mrf.mxu0 }
 0x13f   :  { %v1848_v34 = vunpack.c.l.b16 %v726_v62  ;;  %v1849_v17 = vunpack.c.h.b16 %v726_v62  ;;  %v594_v58 = vadd.f32 %v593_v49, %v10463_v15  ;;  %v659_v54 = vpop.f32.mrf.mxu3  ;;  %v471_v10 = vadd.f32 %v470_v3, %v10460_v8  ;;  %v535_v7 = vpop.f32.mrf.mxu1  ;;  %v7508_v49 = vld [vmem:[%s14576_s3 + $0x1b8] sm:$0xf0] }
 0x140   :  { %v7507_v62 = vor.u32 %v9560_v16, %v7506_v41  ;;  %v7511_v5 = vor.u32 %v9559_v33, %v7508_v49 }
 0x141   :  { %v10789_v14 = vpack.c.b16 %v1848_v34, %v1502_v6  ;;  %v10791_v20 = vpack.c.b16 %v1849_v17, %v1503_v23  ;;  %v657_v24 = vadd.f32 %v656_v26, %v594_v58  ;;  %v534_v31 = vadd.f32 %v533_v37, %v471_v10  ;;  %1097 = vmatmul.bf16.gmra.mxu0 %v10762_v40 }
 0x142   :  { %1622 = vmatpush.bf16.msrb.mxu1 %v7507_v62  ;;  %1710 = vmatpush.bf16.msrb.mxu0 %v7511_v5  ;;  %v9566_v5 = vld [vmem:[%s14576_s3 + $0x1e4] sm:$0xf0] }
 0x143   :  { %14613 = vst [vmem:[#allocation16_spill] sm:$0xff] %v10789_v14  ;;  %v703_v38 = vmax.f32 %v657_v24, 0.0  ;;  %7340 = vmatmul.msk.bf16.gmra.mxu2 %vm942_vm2, %v10768_v56  ;;  %v704_v60 = vmax.f32 %v534_v31, 0.0 }
 0x144   :  { %14614 = vst [vmem:[#allocation17_spill] sm:$0xff] %v10791_v20 }
 0x145   :  { %v727_v39 = vpack.c.bf16 %v703_v38, %v702_v32 }
 0x146   :  { %v596_v53 = vpop.f32.mrf.mxu2  ;;  %v472_v59 = vpop.f32.mrf.mxu0 }
 0x147   :  { %v2194_v11 = vunpack.c.l.b16 %v727_v39  ;;  %v2195_v57 = vunpack.c.h.b16 %v727_v39  ;;  %v597_v6 = vadd.f32 %v596_v53, %v10463_v15  ;;  %v661_v23 = vpop.f32.mrf.mxu3  ;;  %v473_v26 = vadd.f32 %v472_v59, %v10460_v8  ;;  %v538_v37 = vpop.f32.mrf.mxu1 }
 0x149   :  { %v660_v22 = vadd.f32 %v659_v54, %v597_v6  ;;  %v10810_v58 = vpack.c.b16 %v2194_v11, %v1848_v34  ;;  %v10812_v3 = vpack.c.b16 %v2195_v57, %v1849_v17  ;;  %v536_v4 = vadd.f32 %v535_v7, %v473_v26  ;;  %v7498_v26 = vld [vmem:[%s14576_s3 + $0x1a0] sm:$0xf] }
 0x14a   :  { %1311 = vmatmul.bf16.vlgmr.msra.gmra.mxu1 %v10492_v63 }
 0x14b   :  { %14615 = vst [vmem:[#allocation18_spill] sm:$0xff] %v10810_v58  ;;  %v705_v10 = vmax.f32 %v660_v22, 0.0  ;;  %v706_v6 = vmax.f32 %v536_v4, 0.0  ;;  %v7530_v4 = vld [vmem:[%s14576_s3 + $0x1e0] sm:$0xf] }
 0x14c   :  { %14616 = vst [vmem:[#allocation19_spill] sm:$0xff] %v10812_v3  ;;  %7421 = vmatmul.msk.bf16.vlgmr.msra.gmra.mxu3 %vm942_vm2, %v10490_v61 }
 0x14d   :  { %v728_v54 = vpack.c.bf16 %v705_v10, %v704_v60  ;;  %v9565_v60 = vld [vmem:[%s14576_s3 + $0x1e4] sm:$0xf] }
 0x14e   :  { %v598_v12 = vpop.f32.mrf.mxu2  ;;  %v475_v17 = vpop.f32.mrf.mxu0 }
 0x14f   :  { %v2540_v13 = vunpack.c.l.b16 %v728_v54  ;;  %v2541_v24 = vunpack.c.h.b16 %v728_v54  ;;  %v599_v34 = vadd.f32 %v598_v12, %v10463_v15  ;;  %v664_v27 = vpop.f32.mrf.mxu3  ;;  %v476_v7 = vadd.f32 %v475_v17, %v10460_v8  ;;  %v540_v32 = vpop.f32.mrf.mxu1  ;;  %v9558_v8 = vld [vmem:[%s14576_s3 + $0x1a4] sm:$0xf0] }
 0x150   :  { %v7531_v54 = vor.u32 %v9566_v5, %v7530_v4 }
 0x151   :  { %v662_v31 = vadd.f32 %v661_v23, %v599_v34  ;;  %v10819_v38 = vpack.c.b16 %v2540_v13, %v2194_v11  ;;  %v10821_v39 = vpack.c.b16 %v2541_v24, %v2195_v57  ;;  %v539_v53 = vadd.f32 %v538_v37, %v476_v7  ;;  %1399 = vmatmul.bf16.vlgmr.msra.gmra.mxu0 %v10492_v63  ;;  %v9557_v57 = vld [vmem:[%s14576_s3 + $0x1a4] sm:$0xf]  ;;  %v7500_v63 = vld [vmem:[%s14576_s3 + $0x1a8] sm:$0xf0] }
 0x152   :  { %v7499_v11 = vor.u32 %v9558_v8, %v7498_v26  ;;  %v7503_v37 = vor.u32 %v9557_v57, %v7500_v63  ;;  %1671 = vmatpush.bf16.msrb.mxu3 %v7531_v54  ;;  %v7490_v57 = vld [vmem:[%s14576_s3 + $0x190] sm:$0xf]  ;;  %v9556_v63 = vld [vmem:[%s14576_s3 + $0x194] sm:$0xf0] }
 0x153   :  { %14617 = vst [vmem:[#allocation20_spill] sm:$0xff] %v10819_v38  ;;  %v707_v59 = vmax.f32 %v662_v31, 0.0  ;;  %7428 = vmatmul.msk.bf16.vlgmr.msra.gmra.mxu2 %vm942_vm2, %v10490_v61  ;;  %v708_v7 = vmax.f32 %v539_v53, 0.0 }
 0x154   :  { %14618 = vst [vmem:[#allocation21_spill] sm:$0xff] %v10821_v39  ;;  %1623 = vmatpush.bf16.msrb.mxu1 %v7499_v11  ;;  %1711 = vmatpush.bf16.msrb.mxu0 %v7503_v37  ;;  %v7491_v37 = vor.u32 %v9556_v63, %v7490_v57 }
 0x155   :  { %v729_v23 = vpack.c.bf16 %v707_v59, %v706_v6 }
 0x156   :  { %v601_v61 = vpop.f32.mrf.mxu2  ;;  %v477_v22 = vpop.f32.mrf.mxu0 }
 0x157   :  { %v2887_v41 = vunpack.c.h.b16 %v729_v23  ;;  %v602_v16 = vadd.f32 %v601_v61, %v10463_v15  ;;  %v666_v33 = vpop.f32.mrf.mxu3  ;;  %v2886_v62 = vunpack.c.l.b16 %v729_v23  ;;  %v980_v49 = vpop.f32.mrf.mxu1  ;;  %v7532_v15 = vld [vmem:[%s14576_s3 + $0x1e8] sm:$0xf0]  ;;  %v9555_v23 = vld [vmem:[%s14576_s3 + $0x194] sm:$0xf]  ;;  %v7492_v61 = vld [vmem:[%s14576_s3 + $0x198] sm:$0xf0] }
 0x158   :  { %v7535_v17 = vor.u32 %v9565_v60, %v7532_v15  ;;  %1624 = vmatpush.bf16.msrb.mxu1 %v7491_v37 }
 0x159   :  { %v665_v10 = vadd.f32 %v664_v27, %v602_v16  ;;  %v10851_v12 = vpack.c.b16 %v2886_v62, %v2540_v13  ;;  %v10853_v34 = vpack.c.b16 %v2887_v41, %v2541_v24 }
 0x15a   :  { %1316 = vmatmul.bf16.gmra.mxu1 %v10521_v44  ;;  %1759 = vmatpush.bf16.msrb.mxu2 %v7535_v17 }
 0x15b   :  { %14619 = vst [vmem:[#allocation22_spill] sm:$0xff] %v10851_v12  ;;  %v709_v32 = vmax.f32 %v665_v10, 0.0 }
 0x15c   :  { %14620 = vst [vmem:[#allocation23_spill] sm:$0xff] %v10853_v34  ;;  %7422 = vmatmul.msk.bf16.gmra.mxu3 %vm942_vm2, %v10523_v45 }
 0x15d   :  { %v730_v27 = vpack.c.bf16 %v709_v32, %v708_v7  ;;  %v7482_v7 = vld [vmem:[%s14576_s3 + $0x180] sm:$0xf]  ;;  %v9554_v32 = vld [vmem:[%s14576_s3 + $0x184] sm:$0xf0] }
 0x15e   :  { %v603_v31 = vpop.f32.mrf.mxu2  ;;  %v1068_v26 = vpop.f32.mrf.mxu0 }
 0x15f   :  { %v3233_v6 = vunpack.c.h.b16 %v730_v27  ;;  %v1024_v59 = vpop.f32.mrf.mxu3  ;;  %v3232_v8 = vunpack.c.l.b16 %v730_v27  ;;  %v982_v24 = vpop.f32.mrf.mxu1  ;;  %v9553_v27 = vld [vmem:[%s14576_s3 + $0x184] sm:$0xf]  ;;  %v7483_v31 = vor.u32 %v9554_v32, %v7482_v7  ;;  %v7474_v7 = vld [vmem:[%s14576_s3 + $0x170] sm:$0xf]  ;;  %v9552_v32 = vld [vmem:[%s14576_s3 + $0x174] sm:$0xf0] }
 0x160   :  { %v10858_v13 = vadd.f32 %v1024_v59, %v980_v49 }
 0x161   :  { %v10860_v11 = vpack.c.b16 %v3232_v8, %v2886_v62  ;;  %v10862_v53 = vpack.c.b16 %v3233_v6, %v2887_v41  ;;  %1404 = vmatmul.bf16.gmra.mxu0 %v10521_v44  ;;  %v7495_v41 = vor.u32 %v9555_v23, %v7492_v61  ;;  %v7484_v6 = vld [vmem:[%s14576_s3 + $0x188] sm:$0xf0]  ;;  %1625 = vmatpush.bf16.msrb.mxu1 %v7483_v31 }
 0x162   :  { %v7487_v59 = vor.u32 %v9553_v27, %v7484_v6  ;;  %v7475_v31 = vor.u32 %v9552_v32, %v7474_v7  ;;  %v9551_v6 = vld [vmem:[%s14576_s3 + $0x174] sm:$0xf] }
 0x163   :  { %14621 = vst [vmem:[#allocation24_spill] sm:$0xff] %v10860_v11  ;;  %7429 = vmatmul.msk.bf16.gmra.mxu2 %vm942_vm2, %v10523_v45  ;;  %1712 = vmatpush.bf16.msrb.mxu0 %v7495_v41 }
 0x164   :  { %14622 = vst [vmem:[#allocation25_spill] sm:$0xff] %v10862_v53 }
 0x165   :  { %1626 = vmatpush.bf16.msrb.mxu1 %v7475_v31 }
 0x166   :  { %v1112_v16 = vpop.f32.mrf.mxu2  ;;  %v1070_v62 = vpop.f32.mrf.mxu0 }
 0x167   :  { %v1026_v33 = vpop.f32.mrf.mxu3  ;;  %v10879_v22 = vadd.f32 %v1112_v16, %v1068_v26  ;;  %v985_v4 = vpop.f32.mrf.mxu1  ;;  %1713 = vmatpush.bf16.msrb.mxu0 %v7487_v59  ;;  %v7476_v59 = vld [vmem:[%s14576_s3 + $0x178] sm:$0xf0] }
 0x168   :  { %v10881_v49 = vadd.f32 %v1026_v33, %v982_v24 }
 0x16a   :  { %1321 = vmatmul.bf16.gmra.mxu1 %v10549_v18 }
 0x16c   :  { %7423 = vmatmul.msk.bf16.gmra.mxu3 %vm942_vm2, %v10553_v19 }
 0x16e   :  { %v1114_v5 = vpop.f32.mrf.mxu2  ;;  %v1073_v54 = vpop.f32.mrf.mxu0 }
 0x16f   :  { %v1029_v60 = vpop.f32.mrf.mxu3  ;;  %v10886_v10 = vadd.f32 %v1114_v5, %v1070_v62  ;;  %v987_v17 = vpop.f32.mrf.mxu1  ;;  %v9564_v5 = vld [vmem:[%s14576_s3 + $0x1d4] sm:$0xf0] }
 0x170   :  { %v10888_v15 = vadd.f32 %v1029_v60, %v985_v4  ;;  %v7522_v4 = vld [vmem:[%s14576_s3 + $0x1d0] sm:$0xf]  ;;  %v9563_v60 = vld [vmem:[%s14576_s3 + $0x1d4] sm:$0xf] }
 0x171   :  { %1409 = vmatmul.bf16.gmra.mxu0 %v10549_v18 }
 0x173   :  { %7430 = vmatmul.msk.bf16.gmra.mxu2 %vm942_vm2, %v10553_v19 }
 0x176   :  { %v1117_v26 = vpop.f32.mrf.mxu2  ;;  %v1075_v57 = vpop.f32.mrf.mxu0 }
 0x177   :  { %v1031_v8 = vpop.f32.mrf.mxu3  ;;  %v10905_v24 = vadd.f32 %v1117_v26, %v1073_v54  ;;  %v990_v23 = vpop.f32.mrf.mxu1  ;;  %v7523_v54 = vor.u32 %v9564_v5, %v7522_v4  ;;  %v7479_v26 = vor.u32 %v9551_v6, %v7476_v59  ;;  %v7466_v5 = vld [vmem:[%s14576_s3 + $0x160] sm:$0xf] }
 0x178   :  { %v10907_v63 = vadd.f32 %v1031_v8, %v987_v17  ;;  %v7524_v17 = vld [vmem:[%s14576_s3 + $0x1d8] sm:$0xf0] }
 0x179   :  { %v7527_v27 = vor.u32 %v9563_v60, %v7524_v17  ;;  %1672 = vmatpush.bf16.msrb.mxu3 %v7523_v54  ;;  %1714 = vmatpush.bf16.msrb.mxu0 %v7479_v26  ;;  %v9550_v60 = vld [vmem:[%s14576_s3 + $0x164] sm:$0xf0]  ;;  %v7468_v54 = vld [vmem:[%s14576_s3 + $0x168] sm:$0xf0] }
 0x17a   :  { %1326 = vmatmul.bf16.gmra.mxu1 %v10595_v1 }
 0x17b   :  { %1760 = vmatpush.bf16.msrb.mxu2 %v7527_v27 }
 0x17c   :  { %7424 = vmatmul.msk.bf16.gmra.mxu3 %vm942_vm2, %v10597_v2 }
 0x17e   :  { %v1119_v37 = vpop.f32.mrf.mxu2  ;;  %v1078_v16 = vpop.f32.mrf.mxu0 }
 0x17f   :  { %v1034_v61 = vpop.f32.mrf.mxu3  ;;  %v10912_v41 = vadd.f32 %v1119_v37, %v1075_v57  ;;  %v992_v62 = vpop.f32.mrf.mxu1 }
 0x180   :  { %v10914_v33 = vadd.f32 %v1034_v61, %v990_v23 }
 0x181   :  { %1414 = vmatmul.bf16.gmra.mxu0 %v10595_v1 }
 0x183   :  { %7431 = vmatmul.msk.bf16.gmra.mxu2 %vm942_vm2, %v10597_v2 }
 0x186   :  { %v1122_v8 = vpop.f32.mrf.mxu2  ;;  %v1080_v37 = vpop.f32.mrf.mxu0 }
 0x187   :  { %v1036_v57 = vpop.f32.mrf.mxu3  ;;  %v10943_v23 = vadd.f32 %v1122_v8, %v1078_v16  ;;  %v995_v4 = vpop.f32.mrf.mxu1  ;;  %v9549_v16 = vld [vmem:[%s14576_s3 + $0x164] sm:$0xf]  ;;  %v7458_v8 = vld [vmem:[%s14576_s3 + $0x150] sm:$0xf] }
 0x188   :  { %v10945_v61 = vadd.f32 %v1036_v57, %v992_v62  ;;  %v7467_v62 = vor.u32 %v9550_v60, %v7466_v5  ;;  %v7471_v7 = vor.u32 %v9549_v16, %v7468_v54  ;;  %v9548_v57 = vld [vmem:[%s14576_s3 + $0x154] sm:$0xf0]  ;;  %v9547_v54 = vld [vmem:[%s14576_s3 + $0x154] sm:$0xf] }
 0x189   :  { %v7459_v60 = vor.u32 %v9548_v57, %v7458_v8 }
 0x18a   :  { %1331 = vmatmul.bf16.gmra.mxu1 %v10627_v43  ;;  %1715 = vmatpush.bf16.msrb.mxu0 %v7471_v7 }
 0x18b   :  { %1627 = vmatpush.bf16.msrb.mxu1 %v7467_v62 }
 0x18c   :  { %7425 = vmatmul.msk.bf16.gmra.mxu3 %vm942_vm2, %v10629_v46 }
 0x18e   :  { %v1124_v17 = vpop.f32.mrf.mxu2  ;;  %v1083_v31 = vpop.f32.mrf.mxu0 }
 0x18f   :  { %v1039_v32 = vpop.f32.mrf.mxu3  ;;  %v10962_v27 = vadd.f32 %v1124_v17, %v1080_v37  ;;  %v997_v59 = vpop.f32.mrf.mxu1  ;;  %1628 = vmatpush.bf16.msrb.mxu1 %v7459_v60  ;;  %v7460_v17 = vld [vmem:[%s14576_s3 + $0x158] sm:$0xf0] }
 0x190   :  { %v10964_v6 = vadd.f32 %v1039_v32, %v995_v4  ;;  %v7463_v7 = vor.u32 %v9547_v54, %v7460_v17 }
 0x191   :  { %1419 = vmatmul.bf16.gmra.mxu0 %v10627_v43 }
 0x192   :  { %1716 = vmatpush.bf16.msrb.mxu0 %v7463_v7 }
 0x193   :  { %7432 = vmatmul.msk.bf16.gmra.mxu2 %vm942_vm2, %v10629_v46 }
 0x196   :  { %v1127_v26 = vpop.f32.mrf.mxu2  ;;  %v1085_v4 = vpop.f32.mrf.mxu0 }
 0x197   :  { %v1041_v37 = vpop.f32.mrf.mxu3  ;;  %v10975_v5 = vadd.f32 %v1127_v26, %v1083_v31  ;;  %v1000_v62 = vpop.f32.mrf.mxu1 }
 0x198   :  { %v10977_v16 = vadd.f32 %v1041_v37, %v997_v59  ;;  %v7570_v37 = vld [vmem:[%s14576_s3 + $0x298] sm:$0xff] }
 0x199   :  { %v1914_v60 = vunpack.c.l.b16 %v7570_v37  ;;  %v1915_v54 = vunpack.c.h.b16 %v7570_v37  ;;  %v7629_v37 = vld [vmem:[%s14576_s3 + $0x268] sm:$0xf] }
 0x19a   :  { %1336 = vmatmul.bf16.gmra.mxu1 %v10665_v29 }
 0x19b   :  { %v1936_v53 = vpack.c.b16 %v1914_v60, %v1914_v60  ;;  %v9582_v60 = vld [vmem:[%s14576_s3 + $0x26c] sm:$0xf0] }
 0x19c   :  { %7426 = vmatmul.msk.bf16.gmra.mxu3 %vm942_vm2, %v10669_v30 }
 0x19d   :  { %v1962_v34 = vsel %vm964_vm1, %v1936_v53, 0  ;;  %v7631_v53 = vld [vmem:[%s14576_s3 + $0x270] sm:$0xf0] }
 0x19e   :  { %v1129_v32 = vpop.f32.mrf.mxu2  ;;  %v1088_v26 = vpop.f32.mrf.mxu0  ;;  %2016 = vmatpush.bf16.msra.mxu3 %v1962_v34 }
 0x19f   :  { %v1044_v31 = vpop.f32.mrf.mxu3  ;;  %v10988_v59 = vadd.f32 %v1129_v32, %v1085_v4  ;;  %v1002_v57 = vpop.f32.mrf.mxu1  ;;  %v1937_v4 = vpack.c.b16 %v1915_v54, %v1915_v54 }
 0x1a0   :  { %v10990_v8 = vadd.f32 %v1044_v31, %v1000_v62 }
 0x1a1   :  { %1424 = vmatmul.bf16.gmra.mxu0 %v10665_v29  ;;  %v1965_v12 = vsel %vm964_vm1, %v1937_v4, 0 }
 0x1a2   :  { %2104 = vmatpush.bf16.msra.mxu2 %v1965_v12 }
 0x1a3   :  { %7433 = vmatmul.msk.bf16.gmra.mxu2 %vm942_vm2, %v10669_v30 }
 0x1a6   :  { %v1132_v17 = vpop.f32.mrf.mxu2  ;;  %v1090_v62 = vpop.f32.mrf.mxu0 }
 0x1a7   :  { %v1046_v32 = vpop.f32.mrf.mxu3  ;;  %v10998_v11 = vadd.f32 %v1132_v17, %v1088_v26  ;;  %v1005_v31 = vpop.f32.mrf.mxu1  ;;  %v9581_v26 = vld [vmem:[%s14576_s3 + $0x26c] sm:$0xf] }
 0x1a8   :  { %v11000_v7 = vadd.f32 %v1046_v32, %v1002_v57  ;;  %v7630_v57 = vor.u32 %v9582_v60, %v7629_v37  ;;  %v7634_v12 = vor.u32 %v9581_v26, %v7631_v53 }
 0x1aa   :  { %1341 = vmatmul.bf16.gmra.mxu1 %v10734_v50  ;;  %2055 = vmatpush.bf16.msra.mxu0 %v7634_v12 }
 0x1ab   :  { %1967 = vmatpush.bf16.msra.mxu1 %v7630_v57 }
 0x1ac   :  { %7427 = vmatmul.msk.bf16.gmra.mxu3 %vm942_vm2, %v10736_v51 }
 0x1ae   :  { %v1134_v34 = vpop.f32.mrf.mxu2  ;;  %v1093_v4 = vpop.f32.mrf.mxu0 }
 0x1af   :  { %v1049_v54 = vpop.f32.mrf.mxu3  ;;  %v11019_v17 = vadd.f32 %v1134_v34, %v1090_v62  ;;  %v1007_v37 = vpop.f32.mrf.mxu1  ;;  %v7621_v62 = vld [vmem:[%s14576_s3 + $0x258] sm:$0xf]  ;;  %v9579_v34 = vld [vmem:[%s14576_s3 + $0x25c] sm:$0xf] }
 0x1b0   :  { %v11021_v32 = vadd.f32 %v1049_v54, %v1005_v31  ;;  %v9580_v31 = vld [vmem:[%s14576_s3 + $0x25c] sm:$0xf0] }
 0x1b1   :  { %1429 = vmatmul.bf16.gmra.mxu0 %v10734_v50  ;;  %v7622_v54 = vor.u32 %v9580_v31, %v7621_v62  ;;  %v7613_v31 = vld [vmem:[%s14576_s3 + $0x248] sm:$0xf] }
 0x1b3   :  { %7434 = vmatmul.msk.bf16.gmra.mxu2 %vm942_vm2, %v10736_v51  ;;  %1968 = vmatpush.bf16.msra.mxu1 %v7622_v54 }
 0x1b6   :  { %v1137_v60 = vpop.f32.mrf.mxu2  ;;  %v1095_v39 = vpop.f32.mrf.mxu0 }
 0x1b7   :  { %v1051_v26 = vpop.f32.mrf.mxu3  ;;  %v11026_v53 = vadd.f32 %v1137_v60, %v1093_v4  ;;  %v1010_v12 = vpop.f32.mrf.mxu1  ;;  %v7623_v4 = vld [vmem:[%s14576_s3 + $0x260] sm:$0xf0] }
 0x1b8   :  { %v11028_v57 = vadd.f32 %v1051_v26, %v1007_v37  ;;  %v7626_v37 = vor.u32 %v9579_v34, %v7623_v4  ;;  %v9578_v34 = vld [vmem:[%s14576_s3 + $0x24c] sm:$0xf0] }
 0x1ba   :  { %1629 = vmatmul.bf16.vlgmr.msrb.gmra.mxu1 %v10521_v44  ;;  %2056 = vmatpush.bf16.msra.mxu0 %v7626_v37 }
 0x1bc   :  { %7536 = vmatmul.msk.bf16.vlgmr.msrb.gmra.mxu3 %vm942_vm2, %v10523_v45 }
 0x1be   :  { %v1139_v60 = vpop.f32.mrf.mxu2  ;;  %v1098_v3 = vpop.f32.mrf.mxu0 }
 0x1bf   :  { %v1054_v26 = vpop.f32.mrf.mxu3  ;;  %v11045_v38 = vadd.f32 %v1139_v60, %v1095_v39  ;;  %v1012_v62 = vpop.f32.mrf.mxu1  ;;  %v9577_v39 = vld [vmem:[%s14576_s3 + $0x24c] sm:$0xf] }
 0x1c0   :  { %v11047_v58 = vadd.f32 %v1054_v26, %v1010_v12  ;;  %v7614_v12 = vor.u32 %v9578_v34, %v7613_v31  ;;  %v7645_v31 = vld [vmem:[%s14576_s3 + $0x288] sm:$0xf]  ;;  %v9586_v34 = vld [vmem:[%s14576_s3 + $0x28c] sm:$0xf0] }
 0x1c1   :  { %1717 = vmatmul.bf16.vlgmr.msrb.gmra.mxu0 %v10521_v44  ;;  %v7615_v44 = vld [vmem:[%s14576_s3 + $0x250] sm:$0xf0] }
 0x1c2   :  { %v7618_v54 = vor.u32 %v9577_v39, %v7615_v44  ;;  %1969 = vmatpush.bf16.msra.mxu1 %v7614_v12  ;;  %v7646_v39 = vor.u32 %v9586_v34, %v7645_v31 }
 0x1c3   :  { %7543 = vmatmul.msk.bf16.vlgmr.msrb.gmra.mxu2 %vm942_vm2, %v10523_v45 }
 0x1c4   :  { %2057 = vmatpush.bf16.msra.mxu0 %v7618_v54  ;;  %2017 = vmatpush.bf16.msra.mxu3 %v7646_v39 }
 0x1c6   :  { %v1142_v4 = vpop.f32.mrf.mxu2  ;;  %v1100_v60 = vpop.f32.mrf.mxu0 }
 0x1c7   :  { %v1056_v45 = vpop.f32.mrf.mxu3  ;;  %v11064_v37 = vadd.f32 %v1142_v4, %v1098_v3  ;;  %v1312_v20 = vpop.f32.mrf.mxu1  ;;  %v9585_v3 = vld [vmem:[%s14576_s3 + $0x28c] sm:$0xf] }
 0x1c8   :  { %v11066_v26 = vadd.f32 %v1056_v45, %v1012_v62  ;;  %v1313_v14 = vadd.f32 %v1312_v20, %v10858_v13  ;;  %v7647_v62 = vld [vmem:[%s14576_s3 + $0x290] sm:$0xf0] }
 0x1c9   :  { %v7650_v20 = vor.u32 %v9585_v3, %v7647_v62  ;;  %v7605_v3 = vld [vmem:[%s14576_s3 + $0x238] sm:$0xf] }
 0x1ca   :  { %1634 = vmatmul.bf16.gmra.mxu1 %v10549_v18 }
 0x1cb   :  { %2105 = vmatpush.bf16.msra.mxu2 %v7650_v20 }
 0x1cc   :  { %7537 = vmatmul.msk.bf16.gmra.mxu3 %vm942_vm2, %v10553_v19 }
 0x1ce   :  { %v1144_v13 = vpop.f32.mrf.mxu2  ;;  %v1400_v54 = vpop.f32.mrf.mxu0 }
 0x1cf   :  { %v11084_v12 = vadd.f32 %v1144_v13, %v1100_v60  ;;  %v1356_v44 = vpop.f32.mrf.mxu3  ;;  %v1314_v45 = vpop.f32.mrf.mxu1  ;;  %v1401_v31 = vadd.f32 %v1400_v54, %v10879_v22  ;;  %v9576_v60 = vld [vmem:[%s14576_s3 + $0x23c] sm:$0xf0] }
 0x1d0   :  { %v11086_v4 = vadd.f32 %v1356_v44, %v1313_v14  ;;  %v1315_v34 = vadd.f32 %v1314_v45, %v10881_v49  ;;  %v9575_v14 = vld [vmem:[%s14576_s3 + $0x23c] sm:$0xf]  ;;  %v7606_v22 = vor.u32 %v9576_v60, %v7605_v3  ;;  %v7607_v49 = vld [vmem:[%s14576_s3 + $0x240] sm:$0xf0] }
 0x1d1   :  { %1722 = vmatmul.bf16.gmra.mxu0 %v10549_v18  ;;  %v7610_v39 = vor.u32 %v9575_v14, %v7607_v49 }
 0x1d2   :  { %1970 = vmatpush.bf16.msra.mxu1 %v7606_v22 }
 0x1d3   :  { %7544 = vmatmul.msk.bf16.gmra.mxu2 %vm942_vm2, %v10553_v19  ;;  %2058 = vmatpush.bf16.msra.mxu0 %v7610_v39 }
 0x1d6   :  { %v1444_v62 = vpop.f32.mrf.mxu2  ;;  %v1402_v44 = vpop.f32.mrf.mxu0 }
 0x1d7   :  { %v1358_v20 = vpop.f32.mrf.mxu3  ;;  %v11105_v13 = vadd.f32 %v1444_v62, %v1401_v31  ;;  %v1317_v45 = vpop.f32.mrf.mxu1  ;;  %v1403_v19 = vadd.f32 %v1402_v44, %v10886_v10  ;;  %v7597_v10 = vld [vmem:[%s14576_s3 + $0x228] sm:$0xf] }
 0x1d8   :  { %v11107_v54 = vadd.f32 %v1358_v20, %v1315_v34  ;;  %v1318_v18 = vadd.f32 %v1317_v45, %v10888_v15  ;;  %v9574_v15 = vld [vmem:[%s14576_s3 + $0x22c] sm:$0xf0] }
 0x1da   :  { %1639 = vmatmul.bf16.gmra.mxu1 %v10595_v1 }
 0x1dc   :  { %7538 = vmatmul.msk.bf16.gmra.mxu3 %vm942_vm2, %v10597_v2 }
 0x1de   :  { %v1446_v3 = vpop.f32.mrf.mxu2  ;;  %v1405_v31 = vpop.f32.mrf.mxu0 }
 0x1df   :  { %v1361_v60 = vpop.f32.mrf.mxu3  ;;  %v11114_v14 = vadd.f32 %v1446_v3, %v1403_v19  ;;  %v1319_v49 = vpop.f32.mrf.mxu1  ;;  %v1406_v34 = vadd.f32 %v1405_v31, %v10905_v24  ;;  %v9573_v19 = vld [vmem:[%s14576_s3 + $0x22c] sm:$0xf]  ;;  %v7599_v24 = vld [vmem:[%s14576_s3 + $0x230] sm:$0xf0] }
 0x1e0   :  { %v11116_v22 = vadd.f32 %v1361_v60, %v1318_v18  ;;  %v1320_v39 = vadd.f32 %v1319_v49, %v10907_v63  ;;  %v7598_v18 = vor.u32 %v9574_v15, %v7597_v10  ;;  %v7602_v63 = vor.u32 %v9573_v19, %v7599_v24 }
 0x1e1   :  { %1727 = vmatmul.bf16.gmra.mxu0 %v10595_v1 }
 0x1e2   :  { %1971 = vmatpush.bf16.msra.mxu1 %v7598_v18  ;;  %2059 = vmatpush.bf16.msra.mxu0 %v7602_v63  ;;  %v9583_v63 = vld [vmem:[%s14576_s3 + $0x27c] sm:$0xf] }
 0x1e3   :  { %7545 = vmatmul.msk.bf16.gmra.mxu2 %vm942_vm2, %v10597_v2 }
 0x1e6   :  { %v1449_v62 = vpop.f32.mrf.mxu2  ;;  %v1407_v45 = vpop.f32.mrf.mxu0 }
 0x1e7   :  { %v1363_v20 = vpop.f32.mrf.mxu3  ;;  %v11135_v44 = vadd.f32 %v1449_v62, %v1406_v34  ;;  %v1322_v60 = vpop.f32.mrf.mxu1  ;;  %v1408_v31 = vadd.f32 %v1407_v45, %v10912_v41  ;;  %v7637_v41 = vld [vmem:[%s14576_s3 + $0x278] sm:$0xf]  ;;  %v7639_v45 = vld [vmem:[%s14576_s3 + $0x280] sm:$0xf0] }
 0x1e8   :  { %v11137_v3 = vadd.f32 %v1363_v20, %v1320_v39  ;;  %v1323_v49 = vadd.f32 %v1322_v60, %v10914_v33  ;;  %v9584_v33 = vld [vmem:[%s14576_s3 + $0x27c] sm:$0xf0] }
 0x1e9   :  { %v7638_v20 = vor.u32 %v9584_v33, %v7637_v41  ;;  %v9572_v60 = vld [vmem:[%s14576_s3 + $0x21c] sm:$0xf0] }
 0x1ea   :  { %1644 = vmatmul.bf16.gmra.mxu1 %v10627_v43 }
 0x1eb   :  { %2018 = vmatpush.bf16.msra.mxu3 %v7638_v20  ;;  %v7581_v20 = vld [vmem:[%s14576_s3 + $0x208] sm:$0xf] }
 0x1ec   :  { %7539 = vmatmul.msk.bf16.gmra.mxu3 %vm942_vm2, %v10629_v46 }
 0x1ee   :  { %v1451_v10 = vpop.f32.mrf.mxu2  ;;  %v1410_v18 = vpop.f32.mrf.mxu0 }
 0x1ef   :  { %v1366_v15 = vpop.f32.mrf.mxu3  ;;  %v11144_v19 = vadd.f32 %v1451_v10, %v1408_v31  ;;  %v1324_v24 = vpop.f32.mrf.mxu1  ;;  %v1411_v39 = vadd.f32 %v1410_v18, %v10943_v23  ;;  %v7589_v23 = vld [vmem:[%s14576_s3 + $0x218] sm:$0xf]  ;;  %v7642_v31 = vor.u32 %v9583_v63, %v7639_v45  ;;  %v7591_v10 = vld [vmem:[%s14576_s3 + $0x220] sm:$0xf0] }
 0x1f0   :  { %v11146_v34 = vadd.f32 %v1366_v15, %v1323_v49  ;;  %v1325_v62 = vadd.f32 %v1324_v24, %v10945_v61  ;;  %v7590_v49 = vor.u32 %v9572_v60, %v7589_v23  ;;  %v9571_v61 = vld [vmem:[%s14576_s3 + $0x21c] sm:$0xf] }
 0x1f1   :  { %1732 = vmatmul.bf16.gmra.mxu0 %v10627_v43  ;;  %v7594_v15 = vor.u32 %v9571_v61, %v7591_v10  ;;  %2106 = vmatpush.bf16.msra.mxu2 %v7642_v31 }
 0x1f2   :  { %1972 = vmatpush.bf16.msra.mxu1 %v7590_v49 }
 0x1f3   :  { %7546 = vmatmul.msk.bf16.gmra.mxu2 %vm942_vm2, %v10629_v46  ;;  %2060 = vmatpush.bf16.msra.mxu0 %v7594_v15 }
 0x1f6   :  { %v1454_v18 = vpop.f32.mrf.mxu2  ;;  %v1412_v33 = vpop.f32.mrf.mxu0 }
 0x1f7   :  { %v1368_v24 = vpop.f32.mrf.mxu3  ;;  %v11177_v41 = vadd.f32 %v1454_v18, %v1411_v39  ;;  %v1327_v45 = vpop.f32.mrf.mxu1  ;;  %v1413_v23 = vadd.f32 %v1412_v33, %v10962_v27  ;;  %v9570_v39 = vld [vmem:[%s14576_s3 + $0x20c] sm:$0xf0] }
 0x1f8   :  { %v11179_v63 = vadd.f32 %v1368_v24, %v1325_v62  ;;  %v1328_v60 = vadd.f32 %v1327_v45, %v10964_v6  ;;  %v9569_v62 = vld [vmem:[%s14576_s3 + $0x20c] sm:$0xf]  ;;  %v7582_v27 = vor.u32 %v9570_v39, %v7581_v20  ;;  %v7583_v6 = vld [vmem:[%s14576_s3 + $0x210] sm:$0xf0] }
 0x1f9   :  { %v7586_v49 = vor.u32 %v9569_v62, %v7583_v6 }
 0x1fa   :  { %1649 = vmatmul.bf16.gmra.mxu1 %v10665_v29 }
 0x1fb   :  { %1973 = vmatpush.bf16.msra.mxu1 %v7582_v27  ;;  %2061 = vmatpush.bf16.msra.mxu0 %v7586_v49 }
 0x1fc   :  { %7540 = vmatmul.msk.bf16.gmra.mxu3 %vm942_vm2, %v10669_v30 }
 0x1fe   :  { %v1456_v31 = vpop.f32.mrf.mxu2  ;;  %v1415_v15 = vpop.f32.mrf.mxu0 }
 0x1ff   :  { %v1371_v61 = vpop.f32.mrf.mxu3  ;;  %v11198_v10 = vadd.f32 %v1456_v31, %v1413_v23  ;;  %v1329_v24 = vpop.f32.mrf.mxu1  ;;  %v1416_v33 = vadd.f32 %v1415_v15, %v10975_v5  ;;  %v7573_v23 = vld [vmem:[%s14576_s3 + $0x1f8] sm:$0xf]  ;;  %v7575_v15 = vld [vmem:[%s14576_s3 + $0x200] sm:$0xf0] }
 0x200   :  { %v11200_v18 = vadd.f32 %v1371_v61, %v1328_v60  ;;  %v1330_v45 = vadd.f32 %v1329_v24, %v10977_v16  ;;  %v9568_v60 = vld [vmem:[%s14576_s3 + $0x1fc] sm:$0xf0]  ;;  %v9567_v61 = vld [vmem:[%s14576_s3 + $0x1fc] sm:$0xf] }
 0x201   :  { %1737 = vmatmul.bf16.gmra.mxu0 %v10665_v29  ;;  %v7574_v27 = vor.u32 %v9568_v60, %v7573_v23  ;;  %v7578_v24 = vor.u32 %v9567_v61, %v7575_v15 }
 0x203   :  { %7547 = vmatmul.msk.bf16.gmra.mxu2 %vm942_vm2, %v10669_v30  ;;  %1974 = vmatpush.bf16.msra.mxu1 %v7574_v27 }
 0x204   :  { %2062 = vmatpush.bf16.msra.mxu0 %v7578_v24 }
 0x206   :  { %v1459_v20 = vpop.f32.mrf.mxu2  ;;  %v1417_v5 = vpop.f32.mrf.mxu0 }
 0x207   :  { %v1373_v39 = vpop.f32.mrf.mxu3  ;;  %v11213_v62 = vadd.f32 %v1459_v20, %v1416_v33  ;;  %v1332_v6 = vpop.f32.mrf.mxu1  ;;  %v1418_v31 = vadd.f32 %v1417_v5, %v10988_v59  ;;  %v7685_v5 = vld [vmem:[%s14576_s3 + $0x340] sm:$0xff] }
 0x208   :  { %v11215_v16 = vadd.f32 %v1373_v39, %v1330_v45  ;;  %v1333_v49 = vadd.f32 %v1332_v6, %v10990_v8  ;;  %v2260_v27 = vunpack.c.l.b16 %v7685_v5  ;;  %v2261_v6 = vunpack.c.h.b16 %v7685_v5  ;;  %v7744_v5 = vld [vmem:[%s14576_s3 + $0x310] sm:$0xf] }
 0x20a   :  { %1654 = vmatmul.bf16.gmra.mxu1 %v10734_v50  ;;  %v2282_v61 = vpack.c.b16 %v2260_v27, %v2260_v27  ;;  %v9602_v27 = vld [vmem:[%s14576_s3 + $0x314] sm:$0xf0] }
 0x20c   :  { %7541 = vmatmul.msk.bf16.gmra.mxu3 %vm942_vm2, %v10736_v51 }
 0x20e   :  { %v1461_v33 = vpop.f32.mrf.mxu2  ;;  %v1420_v8 = vpop.f32.mrf.mxu0 }
 0x20f   :  { %v1376_v45 = vpop.f32.mrf.mxu3  ;;  %v11228_v59 = vadd.f32 %v1461_v33, %v1418_v31  ;;  %v1334_v23 = vpop.f32.mrf.mxu1  ;;  %v1421_v60 = vadd.f32 %v1420_v8, %v10998_v11  ;;  %v2308_v8 = vsel %vm964_vm1, %v2282_v61, 0 }
 0x210   :  { %v11230_v20 = vadd.f32 %v1376_v45, %v1333_v49  ;;  %v1335_v39 = vadd.f32 %v1334_v23, %v11000_v7  ;;  %v2283_v49 = vpack.c.b16 %v2261_v6, %v2261_v6  ;;  %2362 = vmatpush.bf16.msrb.mxu3 %v2308_v8  ;;  %v7746_v6 = vld [vmem:[%s14576_s3 + $0x318] sm:$0xf0] }
 0x211   :  { %1742 = vmatmul.bf16.gmra.mxu0 %v10734_v50 }
 0x212   :  { %v2311_v23 = vsel %vm964_vm1, %v2283_v49, 0 }
 0x213   :  { %7548 = vmatmul.msk.bf16.gmra.mxu2 %vm942_vm2, %v10736_v51 }
 0x214   :  { %2450 = vmatpush.bf16.msrb.mxu2 %v2311_v23 }
 0x216   :  { %v1464_v31 = vpop.f32.mrf.mxu2  ;;  %v1422_v11 = vpop.f32.mrf.mxu0 }
 0x217   :  { %v1378_v15 = vpop.f32.mrf.mxu3  ;;  %v11240_v24 = vadd.f32 %v1464_v31, %v1421_v60  ;;  %v1337_v7 = vpop.f32.mrf.mxu1  ;;  %v1423_v45 = vadd.f32 %v1422_v11, %v11019_v17  ;;  %v9601_v17 = vld [vmem:[%s14576_s3 + $0x314] sm:$0xf] }
 0x218   :  { %v11242_v33 = vadd.f32 %v1378_v15, %v1335_v39  ;;  %v1338_v60 = vadd.f32 %v1337_v7, %v11021_v32  ;;  %v7745_v39 = vor.u32 %v9602_v27, %v7744_v5  ;;  %v7749_v31 = vor.u32 %v9601_v17, %v7746_v6 }
 0x21a   :  { %1659 = vmatmul.bf16.gmra.mxu1 %v10764_v47  ;;  %2401 = vmatpush.bf16.msrb.mxu0 %v7749_v31 }
 0x21b   :  { %2313 = vmatpush.bf16.msrb.mxu1 %v7745_v39 }
 0x21c   :  { %7542 = vmatmul.msk.bf16.gmra.mxu3 %vm942_vm2, %v10766_v48 }
 0x21e   :  { %v1466_v32 = vpop.f32.mrf.mxu2  ;;  %v1425_v15 = vpop.f32.mrf.mxu0 }
 0x21f   :  { %v1381_v61 = vpop.f32.mrf.mxu3  ;;  %v11263_v49 = vadd.f32 %v1466_v32, %v1423_v45  ;;  %v1339_v7 = vpop.f32.mrf.mxu1  ;;  %v1426_v8 = vadd.f32 %v1425_v15, %v11026_v53  ;;  %v7736_v53 = vld [vmem:[%s14576_s3 + $0x300] sm:$0xf]  ;;  %v9599_v32 = vld [vmem:[%s14576_s3 + $0x304] sm:$0xf] }
 0x220   :  { %v11265_v11 = vadd.f32 %v1381_v61, %v1338_v60  ;;  %v1340_v23 = vadd.f32 %v1339_v7, %v11028_v57  ;;  %v9600_v57 = vld [vmem:[%s14576_s3 + $0x304] sm:$0xf0] }
 0x221   :  { %1747 = vmatmul.bf16.gmra.mxu0 %v10764_v47  ;;  %v7737_v61 = vor.u32 %v9600_v57, %v7736_v53  ;;  %v7728_v53 = vld [vmem:[%s14576_s3 + $0x2f0] sm:$0xf] }
 0x223   :  { %7549 = vmatmul.msk.bf16.gmra.mxu2 %vm942_vm2, %v10766_v48  ;;  %2314 = vmatpush.bf16.msrb.mxu1 %v7737_v61 }
 0x226   :  { %v1469_v5 = vpop.f32.mrf.mxu2  ;;  %v1427_v17 = vpop.f32.mrf.mxu0 }
 0x227   :  { %v1383_v27 = vpop.f32.mrf.mxu3  ;;  %v11272_v39 = vadd.f32 %v1469_v5, %v1426_v8  ;;  %v1342_v6 = vpop.f32.mrf.mxu1  ;;  %v1428_v60 = vadd.f32 %v1427_v17, %v11045_v38  ;;  %v7738_v38 = vld [vmem:[%s14576_s3 + $0x308] sm:$0xf0] }
 0x228   :  { %v11274_v45 = vadd.f32 %v1383_v27, %v1340_v23  ;;  %v1343_v31 = vadd.f32 %v1342_v6, %v11047_v58  ;;  %v7741_v58 = vor.u32 %v9599_v32, %v7738_v38 }
 0x22a   :  { %1975 = vmatmul.bf16.vlgmr.msra.gmra.mxu1 %v10555_v21  ;;  %2402 = vmatpush.bf16.msrb.mxu0 %v7741_v58 }
 0x22c   :  { %7651 = vmatmul.msk.bf16.vlgmr.msra.gmra.mxu3 %vm942_vm2, %v10566_v25 }
 0x22e   :  { %v1471_v15 = vpop.f32.mrf.mxu2  ;;  %v1430_v23 = vpop.f32.mrf.mxu0 }
 0x22f   :  { %v1386_v7 = vpop.f32.mrf.mxu3  ;;  %v11293_v8 = vadd.f32 %v1471_v15, %v1428_v60  ;;  %v1344_v27 = vpop.f32.mrf.mxu1  ;;  %v1431_v17 = vadd.f32 %v1430_v23, %v11064_v37  ;;  %v9598_v60 = vld [vmem:[%s14576_s3 + $0x2f4] sm:$0xf0] }
 0x230   :  { %v11295_v5 = vadd.f32 %v1386_v7, %v1343_v31  ;;  %v1345_v6 = vadd.f32 %v1344_v27, %v11066_v26  ;;  %v9597_v31 = vld [vmem:[%s14576_s3 + $0x2f4] sm:$0xf]  ;;  %v7729_v37 = vor.u32 %v9598_v60, %v7728_v53  ;;  %v7760_v7 = vld [vmem:[%s14576_s3 + $0x330] sm:$0xf]  ;;  %v9606_v23 = vld [vmem:[%s14576_s3 + $0x334] sm:$0xf0] }
 0x231   :  { %2063 = vmatmul.bf16.vlgmr.msra.gmra.mxu0 %v10555_v21  ;;  %v7730_v21 = vld [vmem:[%s14576_s3 + $0x2f8] sm:$0xf0]  ;;  %v9605_v27 = vld [vmem:[%s14576_s3 + $0x334] sm:$0xf] }
 0x232   :  { %v7733_v26 = vor.u32 %v9597_v31, %v7730_v21  ;;  %2315 = vmatpush.bf16.msrb.mxu1 %v7729_v37 }
 0x233   :  { %7658 = vmatmul.msk.bf16.vlgmr.msra.gmra.mxu2 %vm942_vm2, %v10566_v25 }
 0x234   :  { %2403 = vmatpush.bf16.msrb.mxu0 %v7733_v26 }
 0x236   :  { %v1474_v57 = vpop.f32.mrf.mxu2  ;;  %v1432_v61 = vpop.f32.mrf.mxu0 }
 0x237   :  { %v1388_v25 = vpop.f32.mrf.mxu3  ;;  %v11314_v32 = vadd.f32 %v1474_v57, %v1431_v17  ;;  %v1433_v58 = vadd.f32 %v1432_v61, %v11084_v12  ;;  %v1630_v15 = vpop.f32.mrf.mxu1  ;;  %v7761_v17 = vor.u32 %v9606_v23, %v7760_v7  ;;  %v7762_v12 = vld [vmem:[%s14576_s3 + $0x338] sm:$0xf0]  ;;  %v9596_v61 = vld [vmem:[%s14576_s3 + $0x2e4] sm:$0xf0] }
 0x238   :  { %v11316_v38 = vadd.f32 %v1388_v25, %v1345_v6  ;;  %v7765_v6 = vor.u32 %v9605_v27, %v7762_v12  ;;  %v7720_v25 = vld [vmem:[%s14576_s3 + $0x2e0] sm:$0xf] }
 0x239   :  { %2363 = vmatpush.bf16.msrb.mxu3 %v7761_v17 }
 0x23a   :  { %1980 = vmatmul.bf16.gmra.mxu1 %v10593_v0  ;;  %2451 = vmatpush.bf16.msrb.mxu2 %v7765_v6 }
 0x23c   :  { %7652 = vmatmul.msk.bf16.gmra.mxu3 %vm942_vm2, %v10610_v9 }
 0x23e   :  { %v1476_v53 = vpop.f32.mrf.mxu2  ;;  %v1718_v37 = vpop.f32.mrf.mxu0 }
 0x23f   :  { %v11334_v60 = vadd.f32 %v1476_v53, %v1433_v58  ;;  %v1674_v31 = vpop.f32.mrf.mxu3  ;;  %v1632_v26 = vpop.f32.mrf.mxu1  ;;  %v9595_v58 = vld [vmem:[%s14576_s3 + $0x2e4] sm:$0xf] }
 0x240   :  { %v1675_v21 = vadd.f32 %v1674_v31, %v1630_v15  ;;  %v7721_v15 = vor.u32 %v9596_v61, %v7720_v25 }
 0x241   :  { %2068 = vmatmul.bf16.gmra.mxu0 %v10593_v0 }
 0x242   :  { %v11337_v57 = vadd.f32 %v1675_v21, %v11086_v4  ;;  %v7722_v4 = vld [vmem:[%s14576_s3 + $0x2e8] sm:$0xf0]  ;;  %2316 = vmatpush.bf16.msrb.mxu1 %v7721_v15 }
 0x243   :  { %7659 = vmatmul.msk.bf16.gmra.mxu2 %vm942_vm2, %v10610_v9  ;;  %v7725_v7 = vor.u32 %v9595_v58, %v7722_v4 }
 0x245   :  { %2404 = vmatpush.bf16.msrb.mxu0 %v7725_v7  ;;  %v9594_v7 = vld [vmem:[%s14576_s3 + $0x2d4] sm:$0xf0] }
 0x246   :  { %v1762_v23 = vpop.f32.mrf.mxu2  ;;  %v1720_v12 = vpop.f32.mrf.mxu0 }
 0x247   :  { %v1676_v27 = vpop.f32.mrf.mxu3  ;;  %v1763_v17 = vadd.f32 %v1762_v23, %v1718_v37  ;;  %v1635_v53 = vpop.f32.mrf.mxu1  ;;  %v9593_v23 = vld [vmem:[%s14576_s3 + $0x2d4] sm:$0xf] }
 0x248   :  { %v1677_v6 = vadd.f32 %v1676_v27, %v1632_v26 }
 0x249   :  { %v11355_v31 = vadd.f32 %v1763_v17, %v11105_v13 }
 0x24a   :  { %v11358_v21 = vadd.f32 %v1677_v6, %v11107_v54  ;;  %1985 = vmatmul.bf16.gmra.mxu1 %v10625_v42  ;;  %v7712_v54 = vld [vmem:[%s14576_s3 + $0x2d0] sm:$0xf] }
 0x24c   :  { %7653 = vmatmul.msk.bf16.gmra.mxu3 %vm942_vm2, %v10640_v52 }
 0x24e   :  { %v1764_v25 = vpop.f32.mrf.mxu2  ;;  %v1723_v15 = vpop.f32.mrf.mxu0 }
 0x24f   :  { %v1679_v61 = vpop.f32.mrf.mxu3  ;;  %v1765_v58 = vadd.f32 %v1764_v25, %v1720_v12  ;;  %v1637_v4 = vpop.f32.mrf.mxu1 }
 0x250   :  { %v1680_v37 = vadd.f32 %v1679_v61, %v1635_v53 }
 0x251   :  { %v11364_v26 = vadd.f32 %v1765_v58, %v11114_v14  ;;  %2073 = vmatmul.bf16.gmra.mxu0 %v10625_v42  ;;  %v7713_v14 = vor.u32 %v9594_v7, %v7712_v54 }
 0x252   :  { %v11367_v13 = vadd.f32 %v1680_v37, %v11116_v22  ;;  %v7714_v22 = vld [vmem:[%s14576_s3 + $0x2d8] sm:$0xf0] }
 0x253   :  { %7660 = vmatmul.msk.bf16.gmra.mxu2 %vm942_vm2, %v10640_v52  ;;  %v7717_v27 = vor.u32 %v9593_v23, %v7714_v22  ;;  %2317 = vmatpush.bf16.msrb.mxu1 %v7713_v14 }
 0x255   :  { %2405 = vmatpush.bf16.msrb.mxu0 %v7717_v27  ;;  %v9604_v27 = vld [vmem:[%s14576_s3 + $0x324] sm:$0xf0] }
 0x256   :  { %v1767_v17 = vpop.f32.mrf.mxu2  ;;  %v1725_v53 = vpop.f32.mrf.mxu0 }
 0x257   :  { %v1681_v12 = vpop.f32.mrf.mxu3  ;;  %v1768_v6 = vadd.f32 %v1767_v17, %v1723_v15  ;;  %v1640_v61 = vpop.f32.mrf.mxu1  ;;  %v9603_v17 = vld [vmem:[%s14576_s3 + $0x324] sm:$0xf] }
 0x258   :  { %v1682_v25 = vadd.f32 %v1681_v12, %v1637_v4  ;;  %v7704_v12 = vld [vmem:[%s14576_s3 + $0x2c0] sm:$0xf] }
 0x259   :  { %v11385_v58 = vadd.f32 %v1768_v6, %v11135_v44  ;;  %v9592_v6 = vld [vmem:[%s14576_s3 + $0x2c4] sm:$0xf0] }
 0x25a   :  { %v11388_v37 = vadd.f32 %v1682_v25, %v11137_v3  ;;  %1990 = vmatmul.bf16.gmra.mxu1 %v10661_v28  ;;  %v7752_v3 = vld [vmem:[%s14576_s3 + $0x320] sm:$0xf]  ;;  %v7705_v25 = vor.u32 %v9592_v6, %v7704_v12 }
 0x25c   :  { %7654 = vmatmul.msk.bf16.gmra.mxu3 %vm942_vm2, %v10680_v35  ;;  %2318 = vmatpush.bf16.msrb.mxu1 %v7705_v25 }
 0x25e   :  { %v1769_v54 = vpop.f32.mrf.mxu2  ;;  %v1728_v14 = vpop.f32.mrf.mxu0 }
 0x25f   :  { %v1684_v7 = vpop.f32.mrf.mxu3  ;;  %v1770_v23 = vadd.f32 %v1769_v54, %v1725_v53  ;;  %v1642_v15 = vpop.f32.mrf.mxu1  ;;  %v7706_v54 = vld [vmem:[%s14576_s3 + $0x2c8] sm:$0xf0] }
 0x260   :  { %v1685_v22 = vadd.f32 %v1684_v7, %v1640_v61  ;;  %v9591_v61 = vld [vmem:[%s14576_s3 + $0x2c4] sm:$0xf] }
 0x261   :  { %v11394_v4 = vadd.f32 %v1770_v23, %v11144_v19  ;;  %2078 = vmatmul.bf16.gmra.mxu0 %v10661_v28  ;;  %v7753_v19 = vor.u32 %v9604_v27, %v7752_v3  ;;  %v7709_v7 = vor.u32 %v9591_v61, %v7706_v54 }
 0x262   :  { %v11397_v44 = vadd.f32 %v1685_v22, %v11146_v34  ;;  %v7754_v34 = vld [vmem:[%s14576_s3 + $0x328] sm:$0xf0] }
 0x263   :  { %7661 = vmatmul.msk.bf16.gmra.mxu2 %vm942_vm2, %v10680_v35  ;;  %v7757_v53 = vor.u32 %v9603_v17, %v7754_v34  ;;  %2364 = vmatpush.bf16.msrb.mxu3 %v7753_v19  ;;  %v7696_v19 = vld [vmem:[%s14576_s3 + $0x2b0] sm:$0xf] }
 0x264   :  { %2406 = vmatpush.bf16.msrb.mxu0 %v7709_v7 }
 0x265   :  { %2452 = vmatpush.bf16.msrb.mxu2 %v7757_v53 }
 0x266   :  { %v1772_v23 = vpop.f32.mrf.mxu2  ;;  %v1730_v27 = vpop.f32.mrf.mxu0 }
 0x267   :  { %v1686_v22 = vpop.f32.mrf.mxu3  ;;  %v1773_v3 = vadd.f32 %v1772_v23, %v1728_v14  ;;  %v1645_v17 = vpop.f32.mrf.mxu1  ;;  %v9590_v14 = vld [vmem:[%s14576_s3 + $0x2b4] sm:$0xf0] }
 0x268   :  { %v1687_v35 = vadd.f32 %v1686_v22, %v1642_v15  ;;  %v7697_v15 = vor.u32 %v9590_v14, %v7696_v19 }
 0x269   :  { %v11427_v34 = vadd.f32 %v1773_v3, %v11177_v41  ;;  %v9589_v41 = vld [vmem:[%s14576_s3 + $0x2b4] sm:$0xf] }
 0x26a   :  { %v11430_v12 = vadd.f32 %v1687_v35, %v11179_v63  ;;  %1995 = vmatmul.bf16.gmra.mxu1 %v10732_v36  ;;  %v7698_v35 = vld [vmem:[%s14576_s3 + $0x2b8] sm:$0xf0] }
 0x26b   :  { %v7701_v6 = vor.u32 %v9589_v41, %v7698_v35  ;;  %2319 = vmatpush.bf16.msrb.mxu1 %v7697_v15 }
 0x26c   :  { %7655 = vmatmul.msk.bf16.gmra.mxu3 %vm942_vm2, %v10740_v55 }
 0x26d   :  { %2407 = vmatpush.bf16.msrb.mxu0 %v7701_v6  ;;  %v9587_v6 = vld [vmem:[%s14576_s3 + $0x2a4] sm:$0xf] }
 0x26e   :  { %v1774_v63 = vpop.f32.mrf.mxu2  ;;  %v1733_v61 = vpop.f32.mrf.mxu0 }
 0x26f   :  { %v1689_v53 = vpop.f32.mrf.mxu3  ;;  %v1775_v25 = vadd.f32 %v1774_v63, %v1730_v27  ;;  %v1647_v7 = vpop.f32.mrf.mxu1  ;;  %v7688_v27 = vld [vmem:[%s14576_s3 + $0x2a0] sm:$0xf] }
 0x270   :  { %v1690_v54 = vadd.f32 %v1689_v53, %v1645_v17  ;;  %v9588_v17 = vld [vmem:[%s14576_s3 + $0x2a4] sm:$0xf0]  ;;  %v7690_v53 = vld [vmem:[%s14576_s3 + $0x2a8] sm:$0xf0] }
 0x271   :  { %v11448_v23 = vadd.f32 %v1775_v25, %v11198_v10  ;;  %2083 = vmatmul.bf16.gmra.mxu0 %v10732_v36  ;;  %v7689_v41 = vor.u32 %v9588_v17, %v7688_v27  ;;  %v7693_v25 = vor.u32 %v9587_v6, %v7690_v53 }
 0x272   :  { %v11451_v22 = vadd.f32 %v1690_v54, %v11200_v18 }
 0x273   :  { %7662 = vmatmul.msk.bf16.gmra.mxu2 %vm942_vm2, %v10740_v55  ;;  %2320 = vmatpush.bf16.msrb.mxu1 %v7689_v41 }
 0x274   :  { %2408 = vmatpush.bf16.msrb.mxu0 %v7693_v25 }
 0x276   :  { %v1777_v3 = vpop.f32.mrf.mxu2  ;;  %v1735_v14 = vpop.f32.mrf.mxu0 }
 0x277   :  { %v1691_v19 = vpop.f32.mrf.mxu3  ;;  %v1778_v10 = vadd.f32 %v1777_v3, %v1733_v61  ;;  %v1650_v15 = vpop.f32.mrf.mxu1 }
 0x278   :  { %v1692_v18 = vadd.f32 %v1691_v19, %v1647_v7  ;;  %v7800_v19 = vld [vmem:[%s14576_s3 + $0x3e8] sm:$0xff] }
 0x279   :  { %v11463_v35 = vadd.f32 %v1778_v10, %v11213_v62  ;;  %v2606_v10 = vunpack.c.l.b16 %v7800_v19 }
 0x27a   :  { %v11466_v63 = vadd.f32 %v1692_v18, %v11215_v16  ;;  %2000 = vmatmul.bf16.gmra.mxu1 %v10762_v40 }
 0x27b   :  { %v2628_v18 = vpack.c.b16 %v2606_v10, %v2606_v10  ;;  %v14623_v10 = vld [vmem:[#allocation16_spill] sm:$0xff] }
 0x27c   :  { %7656 = vmatmul.msk.bf16.gmra.mxu3 %vm942_vm2, %v10768_v56 }
 0x27e   :  { %v1779_v62 = vpop.f32.mrf.mxu2  ;;  %v1738_v7 = vpop.f32.mrf.mxu0 }
 0x27f   :  { %v1694_v61 = vpop.f32.mrf.mxu3  ;;  %v1780_v54 = vadd.f32 %v1779_v62, %v1735_v14  ;;  %v1652_v3 = vpop.f32.mrf.mxu1  ;;  %v2607_v14 = vunpack.c.h.b16 %v7800_v19  ;;  %v2654_v62 = vsel %vm964_vm1, %v2628_v18, 0  ;;  %v7859_v19 = vld [vmem:[%s14576_s3 + $0x3b8] sm:$0xf] }
 0x280   :  { %v1695_v16 = vadd.f32 %v1694_v61, %v1650_v15  ;;  %2708 = vmatpush.bf16.msra.mxu3 %v2654_v62 }
 0x281   :  { %v11478_v27 = vadd.f32 %v1780_v54, %v11228_v59  ;;  %2088 = vmatmul.bf16.gmra.mxu0 %v10762_v40  ;;  %v2629_v15 = vpack.c.b16 %v2607_v14, %v2607_v14  ;;  %v14624_v14 = vld [vmem:[#allocation17_spill] sm:$0xff] }
 0x282   :  { %v11481_v17 = vadd.f32 %v1695_v16, %v11230_v20 }
 0x283   :  { %7663 = vmatmul.msk.bf16.gmra.mxu2 %vm942_vm2, %v10768_v56  ;;  %v2657_v61 = vsel %vm964_vm1, %v2629_v15, 0 }
 0x284   :  { %2796 = vmatpush.bf16.msra.mxu2 %v2657_v61 }
 0x286   :  { %v1782_v41 = vpop.f32.mrf.mxu2  ;;  %v1740_v53 = vpop.f32.mrf.mxu0 }
 0x287   :  { %v1696_v6 = vpop.f32.mrf.mxu3  ;;  %v1783_v59 = vadd.f32 %v1782_v41, %v1738_v7  ;;  %v1655_v20 = vpop.f32.mrf.mxu1  ;;  %v9622_v7 = vld [vmem:[%s14576_s3 + $0x3bc] sm:$0xf0] }
 0x288   :  { %v1697_v25 = vadd.f32 %v1696_v6, %v1652_v3  ;;  %v9621_v3 = vld [vmem:[%s14576_s3 + $0x3bc] sm:$0xf] }
 0x289   :  { %v11492_v54 = vadd.f32 %v1783_v59, %v11240_v24  ;;  %v7860_v24 = vor.u32 %v9622_v7, %v7859_v19 }
 0x28a   :  { %v11495_v16 = vadd.f32 %v1697_v25, %v11242_v33  ;;  %2005 = vmatmul.bf16.gmra.mxu1 %v14623_v10  ;;  %v7861_v33 = vld [vmem:[%s14576_s3 + $0x3c0] sm:$0xf0] }
 0x28b   :  { %v7864_v41 = vor.u32 %v9621_v3, %v7861_v33  ;;  %2659 = vmatpush.bf16.msra.mxu1 %v7860_v24 }
 0x28c   :  { %7657 = vmatmul.msk.bf16.gmra.mxu3 %vm942_vm2, %v14624_v14 }
 0x28d   :  { %2747 = vmatpush.bf16.msra.mxu0 %v7864_v41 }
 0x28e   :  { %v1784_v18 = vpop.f32.mrf.mxu2  ;;  %v1743_v59 = vpop.f32.mrf.mxu0 }
 0x28f   :  { %v1699_v15 = vpop.f32.mrf.mxu3  ;;  %v1785_v6 = vadd.f32 %v1784_v18, %v1740_v53  ;;  %v1657_v62 = vpop.f32.mrf.mxu1  ;;  %v9620_v18 = vld [vmem:[%s14576_s3 + $0x3ac] sm:$0xf0] }
 0x290   :  { %v1700_v25 = vadd.f32 %v1699_v15, %v1655_v20  ;;  %v9619_v15 = vld [vmem:[%s14576_s3 + $0x3ac] sm:$0xf] }
 0x291   :  { %v11513_v61 = vadd.f32 %v1785_v6, %v11263_v49  ;;  %2093 = vmatmul.bf16.gmra.mxu0 %v14623_v10  ;;  %v14625_v6 = vld [vmem:[#allocation12_spill] sm:$0xff] }
 0x292   :  { %v11516_v19 = vadd.f32 %v1700_v25, %v11265_v11  ;;  %v7851_v11 = vld [vmem:[%s14576_s3 + $0x3a8] sm:$0xf] }
 0x293   :  { %7664 = vmatmul.msk.bf16.gmra.mxu2 %vm942_vm2, %v14624_v14 }
 0x296   :  { %v1787_v7 = vpop.f32.mrf.mxu2  ;;  %v1745_v33 = vpop.f32.mrf.mxu0 }
 0x297   :  { %v1701_v3 = vpop.f32.mrf.mxu3  ;;  %v1788_v24 = vadd.f32 %v1787_v7, %v1743_v59  ;;  %v1660_v53 = vpop.f32.mrf.mxu1  ;;  %v7852_v59 = vor.u32 %v9620_v18, %v7851_v11  ;;  %v7843_v18 = vld [vmem:[%s14576_s3 + $0x398] sm:$0xf] }
 0x298   :  { %v1702_v41 = vadd.f32 %v1701_v3, %v1657_v62 }
 0x299   :  { %v11522_v20 = vadd.f32 %v1788_v24, %v11272_v39  ;;  %v7853_v39 = vld [vmem:[%s14576_s3 + $0x3b0] sm:$0xf0]  ;;  %2660 = vmatpush.bf16.msra.mxu1 %v7852_v59 }
 0x29a   :  { %v11525_v49 = vadd.f32 %v1702_v41, %v11274_v45  ;;  %2321 = vmatmul.bf16.vlgmr.msrb.gmra.mxu1 %v14625_v6  ;;  %v14626_v45 = vld [vmem:[#allocation13_spill] sm:$0xff]  ;;  %v7856_v25 = vor.u32 %v9619_v15, %v7853_v39 }
 0x29c   :  { %7766 = vmatmul.msk.bf16.vlgmr.msrb.gmra.mxu3 %vm942_vm2, %v14626_v45  ;;  %2748 = vmatpush.bf16.msra.mxu0 %v7856_v25 }
 0x29e   :  { %v1789_v62 = vpop.f32.mrf.mxu2  ;;  %v1748_v24 = vpop.f32.mrf.mxu0 }
 0x29f   :  { %v1704_v7 = vpop.f32.mrf.mxu3  ;;  %v1790_v3 = vadd.f32 %v1789_v62, %v1745_v33  ;;  %v1662_v14 = vpop.f32.mrf.mxu1  ;;  %v9618_v33 = vld [vmem:[%s14576_s3 + $0x39c] sm:$0xf0] }
 0x2a0   :  { %v1705_v41 = vadd.f32 %v1704_v7, %v1660_v53  ;;  %v7844_v53 = vor.u32 %v9618_v33, %v7843_v18  ;;  %v9626_v18 = vld [vmem:[%s14576_s3 + $0x3dc] sm:$0xf0] }
 0x2a1   :  { %v11543_v10 = vadd.f32 %v1790_v3, %v11293_v8  ;;  %2409 = vmatmul.bf16.vlgmr.msrb.gmra.mxu0 %v14625_v6  ;;  %v9617_v8 = vld [vmem:[%s14576_s3 + $0x39c] sm:$0xf] }
 0x2a2   :  { %v11546_v11 = vadd.f32 %v1705_v41, %v11295_v5  ;;  %v7845_v5 = vld [vmem:[%s14576_s3 + $0x3a0] sm:$0xf0]  ;;  %2661 = vmatpush.bf16.msra.mxu1 %v7844_v53  ;;  %v7875_v41 = vld [vmem:[%s14576_s3 + $0x3d8] sm:$0xf] }
 0x2a3   :  { %7773 = vmatmul.msk.bf16.vlgmr.msrb.gmra.mxu2 %vm942_vm2, %v14626_v45  ;;  %v7848_v15 = vor.u32 %v9617_v8, %v7845_v5 }
 0x2a5   :  { %2749 = vmatpush.bf16.msra.mxu0 %v7848_v15 }
 0x2a6   :  { %v1792_v6 = vpop.f32.mrf.mxu2  ;;  %v1750_v45 = vpop.f32.mrf.mxu0 }
 0x2a7   :  { %v1706_v59 = vpop.f32.mrf.mxu3  ;;  %v1793_v39 = vadd.f32 %v1792_v6, %v1748_v24  ;;  %v1976_v62 = vpop.f32.mrf.mxu1  ;;  %v9625_v24 = vld [vmem:[%s14576_s3 + $0x3dc] sm:$0xf] }
 0x2a8   :  { %v1707_v25 = vadd.f32 %v1706_v59, %v1662_v14  ;;  %v7876_v14 = vor.u32 %v9626_v18, %v7875_v41 }
 0x2a9   :  { %v11564_v7 = vadd.f32 %v1793_v39, %v11314_v32  ;;  %v7877_v32 = vld [vmem:[%s14576_s3 + $0x3e0] sm:$0xf0] }
 0x2aa   :  { %v11567_v3 = vadd.f32 %v1707_v25, %v11316_v38  ;;  %2326 = vmatmul.bf16.gmra.mxu1 %v10595_v1  ;;  %v7880_v38 = vor.u32 %v9625_v24, %v7877_v32  ;;  %2709 = vmatpush.bf16.msra.mxu3 %v7876_v14  ;;  %v7835_v25 = vld [vmem:[%s14576_s3 + $0x388] sm:$0xf] }
 0x2ac   :  { %7767 = vmatmul.msk.bf16.gmra.mxu3 %vm942_vm2, %v10597_v2  ;;  %2797 = vmatpush.bf16.msra.mxu2 %v7880_v38 }
 0x2ae   :  { %v1794_v33 = vpop.f32.mrf.mxu2  ;;  %v2064_v5 = vpop.f32.mrf.mxu0 }
 0x2af   :  { %v1795_v8 = vadd.f32 %v1794_v33, %v1750_v45  ;;  %v2020_v53 = vpop.f32.mrf.mxu3  ;;  %v1978_v6 = vpop.f32.mrf.mxu1  ;;  %v9616_v45 = vld [vmem:[%s14576_s3 + $0x38c] sm:$0xf0] }
 0x2b0   :  { %v2021_v15 = vadd.f32 %v2020_v53, %v1976_v62  ;;  %v7836_v62 = vor.u32 %v9616_v45, %v7835_v25 }
 0x2b1   :  { %v11585_v59 = vadd.f32 %v1795_v8, %v11334_v60  ;;  %2414 = vmatmul.bf16.gmra.mxu0 %v10595_v1  ;;  %v9615_v60 = vld [vmem:[%s14576_s3 + $0x38c] sm:$0xf] }
 0x2b2   :  { %v11588_v39 = vadd.f32 %v2021_v15, %v11337_v57  ;;  %v7837_v57 = vld [vmem:[%s14576_s3 + $0x390] sm:$0xf0]  ;;  %2662 = vmatpush.bf16.msra.mxu1 %v7836_v62 }
 0x2b3   :  { %7774 = vmatmul.msk.bf16.gmra.mxu2 %vm942_vm2, %v10597_v2  ;;  %v7840_v41 = vor.u32 %v9615_v60, %v7837_v57  ;;  %v9614_v57 = vld [vmem:[%s14576_s3 + $0x37c] sm:$0xf0] }
 0x2b5   :  { %2750 = vmatpush.bf16.msra.mxu0 %v7840_v41  ;;  %v9613_v41 = vld [vmem:[%s14576_s3 + $0x37c] sm:$0xf] }
 0x2b6   :  { %v2108_v18 = vpop.f32.mrf.mxu2  ;;  %v2066_v32 = vpop.f32.mrf.mxu0 }
 0x2b7   :  { %v2022_v24 = vpop.f32.mrf.mxu3  ;;  %v2109_v14 = vadd.f32 %v2108_v18, %v2064_v5  ;;  %v1981_v33 = vpop.f32.mrf.mxu1 }
 0x2b8   :  { %v2023_v38 = vadd.f32 %v2022_v24, %v1978_v6 }
 0x2b9   :  { %v11606_v8 = vadd.f32 %v2109_v14, %v11355_v31 }
 0x2ba   :  { %v11609_v53 = vadd.f32 %v2023_v38, %v11358_v21  ;;  %2331 = vmatmul.bf16.gmra.mxu1 %v10627_v43  ;;  %v7827_v21 = vld [vmem:[%s14576_s3 + $0x378] sm:$0xf] }
 0x2bc   :  { %7768 = vmatmul.msk.bf16.gmra.mxu3 %vm942_vm2, %v10629_v46 }
 0x2be   :  { %v2110_v15 = vpop.f32.mrf.mxu2  ;;  %v2069_v60 = vpop.f32.mrf.mxu0 }
 0x2bf   :  { %v2025_v25 = vpop.f32.mrf.mxu3  ;;  %v2111_v45 = vadd.f32 %v2110_v15, %v2066_v32  ;;  %v1983_v62 = vpop.f32.mrf.mxu1 }
 0x2c0   :  { %v2026_v5 = vadd.f32 %v2025_v25, %v1981_v33 }
 0x2c1   :  { %v11615_v6 = vadd.f32 %v2111_v45, %v11364_v26  ;;  %2419 = vmatmul.bf16.gmra.mxu0 %v10627_v43  ;;  %v7828_v26 = vor.u32 %v9614_v57, %v7827_v21 }
 0x2c2   :  { %v11618_v31 = vadd.f32 %v2026_v5, %v11367_v13  ;;  %v7829_v13 = vld [vmem:[%s14576_s3 + $0x380] sm:$0xf0] }
 0x2c3   :  { %7775 = vmatmul.msk.bf16.gmra.mxu2 %vm942_vm2, %v10629_v46  ;;  %v7832_v18 = vor.u32 %v9613_v41, %v7829_v13  ;;  %2663 = vmatpush.bf16.msra.mxu1 %v7828_v26  ;;  %v9624_v13 = vld [vmem:[%s14576_s3 + $0x3cc] sm:$0xf0] }
 0x2c5   :  { %2751 = vmatpush.bf16.msra.mxu0 %v7832_v18  ;;  %v9623_v18 = vld [vmem:[%s14576_s3 + $0x3cc] sm:$0xf] }
 0x2c6   :  { %v2113_v24 = vpop.f32.mrf.mxu2  ;;  %v2071_v38 = vpop.f32.mrf.mxu0 }
 0x2c7   :  { %v2027_v14 = vpop.f32.mrf.mxu3  ;;  %v2114_v32 = vadd.f32 %v2113_v24, %v2069_v60  ;;  %v1986_v15 = vpop.f32.mrf.mxu1  ;;  %v7819_v24 = vld [vmem:[%s14576_s3 + $0x368] sm:$0xf] }
 0x2c8   :  { %v2028_v33 = vadd.f32 %v2027_v14, %v1983_v62  ;;  %v9612_v14 = vld [vmem:[%s14576_s3 + $0x36c] sm:$0xf0] }
 0x2c9   :  { %v11636_v25 = vadd.f32 %v2114_v32, %v11385_v58 }
 0x2ca   :  { %v11639_v45 = vadd.f32 %v2028_v33, %v11388_v37  ;;  %2336 = vmatmul.bf16.gmra.mxu1 %v10665_v29  ;;  %v7867_v37 = vld [vmem:[%s14576_s3 + $0x3c8] sm:$0xf]  ;;  %v9611_v33 = vld [vmem:[%s14576_s3 + $0x36c] sm:$0xf] }
 0x2cc   :  { %7769 = vmatmul.msk.bf16.gmra.mxu3 %vm942_vm2, %v10669_v30 }
 0x2ce   :  { %v2115_v5 = vpop.f32.mrf.mxu2  ;;  %v2074_v41 = vpop.f32.mrf.mxu0 }
 0x2cf   :  { %v2030_v21 = vpop.f32.mrf.mxu3  ;;  %v2116_v57 = vadd.f32 %v2115_v5, %v2071_v38  ;;  %v1988_v60 = vpop.f32.mrf.mxu1  ;;  %v7820_v38 = vor.u32 %v9612_v14, %v7819_v24 }
 0x2d0   :  { %v2031_v26 = vadd.f32 %v2030_v21, %v1986_v15  ;;  %v7821_v15 = vld [vmem:[%s14576_s3 + $0x370] sm:$0xf0] }
 0x2d1   :  { %v11645_v62 = vadd.f32 %v2116_v57, %v11394_v4  ;;  %2424 = vmatmul.bf16.gmra.mxu0 %v10665_v29  ;;  %v7868_v4 = vor.u32 %v9624_v13, %v7867_v37  ;;  %v7824_v5 = vor.u32 %v9611_v33, %v7821_v15  ;;  %2664 = vmatpush.bf16.msra.mxu1 %v7820_v38 }
 0x2d2   :  { %v11648_v58 = vadd.f32 %v2031_v26, %v11397_v44  ;;  %v7869_v44 = vld [vmem:[%s14576_s3 + $0x3d0] sm:$0xf0] }
 0x2d3   :  { %7776 = vmatmul.msk.bf16.gmra.mxu2 %vm942_vm2, %v10669_v30  ;;  %v7872_v32 = vor.u32 %v9623_v18, %v7869_v44  ;;  %2710 = vmatpush.bf16.msra.mxu3 %v7868_v4  ;;  %v7811_v4 = vld [vmem:[%s14576_s3 + $0x358] sm:$0xf] }
 0x2d4   :  { %2752 = vmatpush.bf16.msra.mxu0 %v7824_v5 }
 0x2d5   :  { %2798 = vmatpush.bf16.msra.mxu2 %v7872_v32 }
 0x2d6   :  { %v2118_v21 = vpop.f32.mrf.mxu2  ;;  %v2076_v37 = vpop.f32.mrf.mxu0 }
 0x2d7   :  { %v2032_v57 = vpop.f32.mrf.mxu3  ;;  %v2119_v26 = vadd.f32 %v2118_v21, %v2074_v41  ;;  %v1991_v18 = vpop.f32.mrf.mxu1  ;;  %v9610_v41 = vld [vmem:[%s14576_s3 + $0x35c] sm:$0xf0] }
 0x2d8   :  { %v2033_v13 = vadd.f32 %v2032_v57, %v1988_v60  ;;  %v7812_v60 = vor.u32 %v9610_v41, %v7811_v4 }
 0x2d9   :  { %v11678_v44 = vadd.f32 %v2119_v26, %v11427_v34  ;;  %v9609_v34 = vld [vmem:[%s14576_s3 + $0x35c] sm:$0xf] }
 0x2da   :  { %v11681_v24 = vadd.f32 %v2033_v13, %v11430_v12  ;;  %2341 = vmatmul.bf16.gmra.mxu1 %v10734_v50  ;;  %v7813_v12 = vld [vmem:[%s14576_s3 + $0x360] sm:$0xf0] }
 0x2db   :  { %v7816_v32 = vor.u32 %v9609_v34, %v7813_v12  ;;  %2665 = vmatpush.bf16.msra.mxu1 %v7812_v60 }
 0x2dc   :  { %7770 = vmatmul.msk.bf16.gmra.mxu3 %vm942_vm2, %v10736_v51 }
 0x2dd   :  { %2753 = vmatpush.bf16.msra.mxu0 %v7816_v32  ;;  %v9607_v32 = vld [vmem:[%s14576_s3 + $0x34c] sm:$0xf] }
 0x2de   :  { %v2120_v14 = vpop.f32.mrf.mxu2  ;;  %v2079_v15 = vpop.f32.mrf.mxu0 }
 0x2df   :  { %v2035_v38 = vpop.f32.mrf.mxu3  ;;  %v2121_v33 = vadd.f32 %v2120_v14, %v2076_v37  ;;  %v1993_v21 = vpop.f32.mrf.mxu1  ;;  %v7803_v37 = vld [vmem:[%s14576_s3 + $0x348] sm:$0xf] }
 0x2e0   :  { %v2036_v5 = vadd.f32 %v2035_v38, %v1991_v18  ;;  %v9608_v18 = vld [vmem:[%s14576_s3 + $0x34c] sm:$0xf0]  ;;  %v7805_v38 = vld [vmem:[%s14576_s3 + $0x350] sm:$0xf0] }
 0x2e1   :  { %v11699_v57 = vadd.f32 %v2121_v33, %v11448_v23  ;;  %2429 = vmatmul.bf16.gmra.mxu0 %v10734_v50  ;;  %v7804_v34 = vor.u32 %v9608_v18, %v7803_v37  ;;  %v7808_v33 = vor.u32 %v9607_v32, %v7805_v38 }
 0x2e2   :  { %v11702_v26 = vadd.f32 %v2036_v5, %v11451_v22 }
 0x2e3   :  { %7777 = vmatmul.msk.bf16.gmra.mxu2 %vm942_vm2, %v10736_v51  ;;  %2666 = vmatpush.bf16.msra.mxu1 %v7804_v34 }
 0x2e4   :  { %2754 = vmatpush.bf16.msra.mxu0 %v7808_v33 }
 0x2e6   :  { %v2123_v13 = vpop.f32.mrf.mxu2  ;;  %v2081_v41 = vpop.f32.mrf.mxu0 }
 0x2e7   :  { %v2037_v4 = vpop.f32.mrf.mxu3  ;;  %v2124_v23 = vadd.f32 %v2123_v13, %v2079_v15  ;;  %v1996_v60 = vpop.f32.mrf.mxu1 }
 0x2e8   :  { %v2038_v22 = vadd.f32 %v2037_v4, %v1993_v21  ;;  %v7915_v4 = vld [vmem:[%s14576_s3 + $0x490] sm:$0xff] }
 0x2e9   :  { %v11714_v12 = vadd.f32 %v2124_v23, %v11463_v35  ;;  %v2952_v23 = vunpack.c.l.b16 %v7915_v4 }
 0x2ea   :  { %v11717_v14 = vadd.f32 %v2038_v22, %v11466_v63  ;;  %2346 = vmatmul.bf16.gmra.mxu1 %v10764_v47 }
 0x2eb   :  { %v2974_v22 = vpack.c.b16 %v2952_v23, %v2952_v23  ;;  %v14627_v23 = vld [vmem:[#allocation18_spill] sm:$0xff] }
 0x2ec   :  { %7771 = vmatmul.msk.bf16.gmra.mxu3 %vm942_vm2, %v10766_v48 }
 0x2ee   :  { %v2125_v35 = vpop.f32.mrf.mxu2  ;;  %v2084_v21 = vpop.f32.mrf.mxu0 }
 0x2ef   :  { %v2040_v15 = vpop.f32.mrf.mxu3  ;;  %v2126_v5 = vadd.f32 %v2125_v35, %v2081_v41  ;;  %v1998_v13 = vpop.f32.mrf.mxu1  ;;  %v2953_v41 = vunpack.c.h.b16 %v7915_v4  ;;  %v3000_v35 = vsel %vm964_vm1, %v2974_v22, 0  ;;  %v7974_v4 = vld [vmem:[%s14576_s3 + $0x460] sm:$0xf] }
 0x2f0   :  { %v2041_v63 = vadd.f32 %v2040_v15, %v1996_v60  ;;  %3054 = vmatpush.bf16.msrb.mxu3 %v3000_v35 }
 0x2f1   :  { %v11729_v37 = vadd.f32 %v2126_v5, %v11478_v27  ;;  %2434 = vmatmul.bf16.gmra.mxu0 %v10764_v47  ;;  %v2975_v60 = vpack.c.b16 %v2953_v41, %v2953_v41  ;;  %v14628_v41 = vld [vmem:[#allocation19_spill] sm:$0xff] }
 0x2f2   :  { %v11732_v18 = vadd.f32 %v2041_v63, %v11481_v17 }
 0x2f3   :  { %7778 = vmatmul.msk.bf16.gmra.mxu2 %vm942_vm2, %v10766_v48  ;;  %v3003_v15 = vsel %vm964_vm1, %v2975_v60, 0 }
 0x2f4   :  { %3142 = vmatpush.bf16.msrb.mxu2 %v3003_v15 }
 0x2f6   :  { %v2128_v34 = vpop.f32.mrf.mxu2  ;;  %v2086_v38 = vpop.f32.mrf.mxu0 }
 0x2f7   :  { %v2042_v32 = vpop.f32.mrf.mxu3  ;;  %v2129_v27 = vadd.f32 %v2128_v34, %v2084_v21  ;;  %v2001_v17 = vpop.f32.mrf.mxu1  ;;  %v9642_v21 = vld [vmem:[%s14576_s3 + $0x464] sm:$0xf0] }
 0x2f8   :  { %v2043_v33 = vadd.f32 %v2042_v32, %v1998_v13  ;;  %v9641_v13 = vld [vmem:[%s14576_s3 + $0x464] sm:$0xf] }
 0x2f9   :  { %v11743_v5 = vadd.f32 %v2129_v27, %v11492_v54  ;;  %v7975_v54 = vor.u32 %v9642_v21, %v7974_v4 }
 0x2fa   :  { %v11746_v63 = vadd.f32 %v2043_v33, %v11495_v16  ;;  %2351 = vmatmul.bf16.gmra.mxu1 %v14627_v23  ;;  %v7976_v16 = vld [vmem:[%s14576_s3 + $0x468] sm:$0xf0] }
 0x2fb   :  { %v7979_v34 = vor.u32 %v9641_v13, %v7976_v16  ;;  %3005 = vmatpush.bf16.msrb.mxu1 %v7975_v54 }
 0x2fc   :  { %7772 = vmatmul.msk.bf16.gmra.mxu3 %vm942_vm2, %v14628_v41 }
 0x2fd   :  { %3093 = vmatpush.bf16.msrb.mxu0 %v7979_v34 }
 0x2fe   :  { %v2130_v22 = vpop.f32.mrf.mxu2  ;;  %v2089_v27 = vpop.f32.mrf.mxu0 }
 0x2ff   :  { %v2045_v60 = vpop.f32.mrf.mxu3  ;;  %v2131_v32 = vadd.f32 %v2130_v22, %v2086_v38  ;;  %v2003_v35 = vpop.f32.mrf.mxu1  ;;  %v9640_v22 = vld [vmem:[%s14576_s3 + $0x454] sm:$0xf0] }
 0x300   :  { %v2046_v33 = vadd.f32 %v2045_v60, %v2001_v17  ;;  %v9639_v60 = vld [vmem:[%s14576_s3 + $0x454] sm:$0xf] }
 0x301   :  { %v11764_v15 = vadd.f32 %v2131_v32, %v11513_v61  ;;  %2439 = vmatmul.bf16.gmra.mxu0 %v14627_v23 }
 0x302   :  { %v11767_v4 = vadd.f32 %v2046_v33, %v11516_v19  ;;  %v7966_v19 = vld [vmem:[%s14576_s3 + $0x450] sm:$0xf] }
 0x303   :  { %7779 = vmatmul.msk.bf16.gmra.mxu2 %vm942_vm2, %v14628_v41  ;;  %v7967_v32 = vor.u32 %v9640_v22, %v7966_v19  ;;  %v7958_v22 = vld [vmem:[%s14576_s3 + $0x440] sm:$0xf] }
 0x305   :  { %3006 = vmatpush.bf16.msrb.mxu1 %v7967_v32 }
 0x306   :  { %v2133_v21 = vpop.f32.mrf.mxu2  ;;  %v2091_v16 = vpop.f32.mrf.mxu0 }
 0x307   :  { %v2047_v13 = vpop.f32.mrf.mxu3  ;;  %v2134_v54 = vadd.f32 %v2133_v21, %v2089_v27  ;;  %v2006_v38 = vpop.f32.mrf.mxu1 }
 0x308   :  { %v2048_v34 = vadd.f32 %v2047_v13, %v2003_v35 }
 0x309   :  { %v11773_v17 = vadd.f32 %v2134_v54, %v11522_v20  ;;  %v7968_v20 = vld [vmem:[%s14576_s3 + $0x458] sm:$0xf0] }
 0x30a   :  { %v11776_v61 = vadd.f32 %v2048_v34, %v11525_v49  ;;  %2667 = vmatmul.bf16.vlgmr.msra.gmra.mxu1 %v10593_v0  ;;  %v7971_v49 = vor.u32 %v9639_v60, %v7968_v20 }
 0x30c   :  { %7881 = vmatmul.msk.bf16.vlgmr.msra.gmra.mxu3 %vm942_vm2, %v10610_v9  ;;  %3094 = vmatpush.bf16.msrb.mxu0 %v7971_v49 }
 0x30e   :  { %v2135_v27 = vpop.f32.mrf.mxu2  ;;  %v2094_v21 = vpop.f32.mrf.mxu0 }
 0x30f   :  { %v2050_v33 = vpop.f32.mrf.mxu3  ;;  %v2136_v35 = vadd.f32 %v2135_v27, %v2091_v16  ;;  %v2008_v54 = vpop.f32.mrf.mxu1  ;;  %v9638_v16 = vld [vmem:[%s14576_s3 + $0x444] sm:$0xf0] }
 0x310   :  { %v2051_v13 = vadd.f32 %v2050_v33, %v2006_v38  ;;  %v7959_v38 = vor.u32 %v9638_v16, %v7958_v22  ;;  %v9646_v22 = vld [vmem:[%s14576_s3 + $0x484] sm:$0xf0] }
 0x311   :  { %v11794_v34 = vadd.f32 %v2136_v35, %v11543_v10  ;;  %2755 = vmatmul.bf16.vlgmr.msra.gmra.mxu0 %v10593_v0  ;;  %v9637_v10 = vld [vmem:[%s14576_s3 + $0x444] sm:$0xf]  ;;  %v7960_v0 = vld [vmem:[%s14576_s3 + $0x448] sm:$0xf0] }
 0x312   :  { %v11797_v19 = vadd.f32 %v2051_v13, %v11546_v11  ;;  %v7963_v11 = vor.u32 %v9637_v10, %v7960_v0  ;;  %3007 = vmatpush.bf16.msrb.mxu1 %v7959_v38  ;;  %v7990_v13 = vld [vmem:[%s14576_s3 + $0x480] sm:$0xf] }
 0x313   :  { %7888 = vmatmul.msk.bf16.vlgmr.msra.gmra.mxu2 %vm942_vm2, %v10610_v9 }
 0x314   :  { %3095 = vmatpush.bf16.msrb.mxu0 %v7963_v11 }
 0x316   :  { %v2138_v60 = vpop.f32.mrf.mxu2  ;;  %v2096_v20 = vpop.f32.mrf.mxu0 }
 0x317   :  { %v2052_v9 = vpop.f32.mrf.mxu3  ;;  %v2139_v32 = vadd.f32 %v2138_v60, %v2094_v21  ;;  %v2322_v27 = vpop.f32.mrf.mxu1  ;;  %v9645_v21 = vld [vmem:[%s14576_s3 + $0x484] sm:$0xf] }
 0x318   :  { %v2053_v49 = vadd.f32 %v2052_v9, %v2008_v54  ;;  %v7991_v54 = vor.u32 %v9646_v22, %v7990_v13 }
 0x319   :  { %v11815_v33 = vadd.f32 %v2139_v32, %v11564_v7  ;;  %v7992_v7 = vld [vmem:[%s14576_s3 + $0x488] sm:$0xf0] }
 0x31a   :  { %v11818_v35 = vadd.f32 %v2053_v49, %v11567_v3  ;;  %2672 = vmatmul.bf16.gmra.mxu1 %v10625_v42  ;;  %v7995_v3 = vor.u32 %v9645_v21, %v7992_v7  ;;  %3055 = vmatpush.bf16.msrb.mxu3 %v7991_v54  ;;  %v7950_v49 = vld [vmem:[%s14576_s3 + $0x430] sm:$0xf] }
 0x31c   :  { %7882 = vmatmul.msk.bf16.gmra.mxu3 %vm942_vm2, %v10640_v52  ;;  %3143 = vmatpush.bf16.msrb.mxu2 %v7995_v3 }
 0x31e   :  { %v2140_v16 = vpop.f32.mrf.mxu2  ;;  %v2410_v0 = vpop.f32.mrf.mxu0 }
 0x31f   :  { %v2141_v10 = vadd.f32 %v2140_v16, %v2096_v20  ;;  %v2366_v38 = vpop.f32.mrf.mxu3  ;;  %v2324_v60 = vpop.f32.mrf.mxu1  ;;  %v9636_v20 = vld [vmem:[%s14576_s3 + $0x434] sm:$0xf0] }
 0x320   :  { %v2367_v11 = vadd.f32 %v2366_v38, %v2322_v27  ;;  %v7951_v27 = vor.u32 %v9636_v20, %v7950_v49 }
 0x321   :  { %v11836_v9 = vadd.f32 %v2141_v10, %v11585_v59  ;;  %2760 = vmatmul.bf16.gmra.mxu0 %v10625_v42  ;;  %v9635_v59 = vld [vmem:[%s14576_s3 + $0x434] sm:$0xf] }
 0x322   :  { %v11839_v32 = vadd.f32 %v2367_v11, %v11588_v39  ;;  %v7952_v39 = vld [vmem:[%s14576_s3 + $0x438] sm:$0xf0]  ;;  %3008 = vmatpush.bf16.msrb.mxu1 %v7951_v27  ;;  %v14629_v11 = vld [vmem:[#allocation14_spill] sm:$0xff] }
 0x323   :  { %7889 = vmatmul.msk.bf16.gmra.mxu2 %vm942_vm2, %v10640_v52  ;;  %v7955_v13 = vor.u32 %v9635_v59, %v7952_v39 }
 0x325   :  { %3096 = vmatpush.bf16.msrb.mxu0 %v7955_v13  ;;  %v9634_v13 = vld [vmem:[%s14576_s3 + $0x424] sm:$0xf0] }
 0x326   :  { %v2454_v22 = vpop.f32.mrf.mxu2  ;;  %v2412_v7 = vpop.f32.mrf.mxu0 }
 0x327   :  { %v2368_v21 = vpop.f32.mrf.mxu3  ;;  %v2455_v54 = vadd.f32 %v2454_v22, %v2410_v0  ;;  %v2327_v16 = vpop.f32.mrf.mxu1  ;;  %v9633_v22 = vld [vmem:[%s14576_s3 + $0x424] sm:$0xf] }
 0x328   :  { %v2369_v3 = vadd.f32 %v2368_v21, %v2324_v60 }
 0x329   :  { %v11857_v10 = vadd.f32 %v2455_v54, %v11606_v8 }
 0x32a   :  { %v11860_v38 = vadd.f32 %v2369_v3, %v11609_v53  ;;  %2677 = vmatmul.bf16.gmra.mxu1 %v10661_v28  ;;  %v7942_v53 = vld [vmem:[%s14576_s3 + $0x420] sm:$0xf] }
 0x32c   :  { %7883 = vmatmul.msk.bf16.gmra.mxu3 %vm942_vm2, %v14629_v11 }
 0x32e   :  { %v2456_v49 = vpop.f32.mrf.mxu2  ;;  %v2415_v27 = vpop.f32.mrf.mxu0 }
 0x32f   :  { %v2371_v20 = vpop.f32.mrf.mxu3  ;;  %v2457_v59 = vadd.f32 %v2456_v49, %v2412_v7  ;;  %v2329_v39 = vpop.f32.mrf.mxu1 }
 0x330   :  { %v2372_v0 = vadd.f32 %v2371_v20, %v2327_v16 }
 0x331   :  { %v11866_v60 = vadd.f32 %v2457_v59, %v11615_v6  ;;  %2765 = vmatmul.bf16.gmra.mxu0 %v10661_v28  ;;  %v7943_v6 = vor.u32 %v9634_v13, %v7942_v53 }
 0x332   :  { %v11869_v8 = vadd.f32 %v2372_v0, %v11618_v31  ;;  %v7944_v31 = vld [vmem:[%s14576_s3 + $0x428] sm:$0xf0] }
 0x333   :  { %7890 = vmatmul.msk.bf16.gmra.mxu2 %vm942_vm2, %v14629_v11  ;;  %v7947_v21 = vor.u32 %v9633_v22, %v7944_v31  ;;  %3009 = vmatpush.bf16.msrb.mxu1 %v7943_v6 }
 0x335   :  { %3097 = vmatpush.bf16.msrb.mxu0 %v7947_v21  ;;  %v9644_v21 = vld [vmem:[%s14576_s3 + $0x474] sm:$0xf0] }
 0x336   :  { %v2459_v54 = vpop.f32.mrf.mxu2  ;;  %v2417_v16 = vpop.f32.mrf.mxu0 }
 0x337   :  { %v2373_v7 = vpop.f32.mrf.mxu3  ;;  %v2460_v3 = vadd.f32 %v2459_v54, %v2415_v27  ;;  %v2332_v20 = vpop.f32.mrf.mxu1  ;;  %v9643_v54 = vld [vmem:[%s14576_s3 + $0x474] sm:$0xf] }
 0x338   :  { %v2374_v49 = vadd.f32 %v2373_v7, %v2329_v39  ;;  %v7934_v7 = vld [vmem:[%s14576_s3 + $0x410] sm:$0xf] }
 0x339   :  { %v11887_v59 = vadd.f32 %v2460_v3, %v11636_v25  ;;  %v9632_v3 = vld [vmem:[%s14576_s3 + $0x414] sm:$0xf0] }
 0x33a   :  { %v11890_v0 = vadd.f32 %v2374_v49, %v11639_v45  ;;  %2682 = vmatmul.bf16.gmra.mxu1 %v10732_v36  ;;  %v7982_v45 = vld [vmem:[%s14576_s3 + $0x470] sm:$0xf]  ;;  %v7935_v49 = vor.u32 %v9632_v3, %v7934_v7 }
 0x33c   :  { %7884 = vmatmul.msk.bf16.gmra.mxu3 %vm942_vm2, %v10740_v55  ;;  %3010 = vmatpush.bf16.msrb.mxu1 %v7935_v49 }
 0x33e   :  { %v2461_v53 = vpop.f32.mrf.mxu2  ;;  %v2420_v6 = vpop.f32.mrf.mxu0 }
 0x33f   :  { %v2376_v13 = vpop.f32.mrf.mxu3  ;;  %v2462_v22 = vadd.f32 %v2461_v53, %v2417_v16  ;;  %v2334_v27 = vpop.f32.mrf.mxu1  ;;  %v7936_v53 = vld [vmem:[%s14576_s3 + $0x418] sm:$0xf0] }
 0x340   :  { %v2377_v31 = vadd.f32 %v2376_v13, %v2332_v20  ;;  %v9631_v20 = vld [vmem:[%s14576_s3 + $0x414] sm:$0xf] }
 0x341   :  { %v11896_v39 = vadd.f32 %v2462_v22, %v11645_v62  ;;  %2770 = vmatmul.bf16.gmra.mxu0 %v10732_v36  ;;  %v7983_v62 = vor.u32 %v9644_v21, %v7982_v45  ;;  %v7939_v13 = vor.u32 %v9631_v20, %v7936_v53 }
 0x342   :  { %v11899_v25 = vadd.f32 %v2377_v31, %v11648_v58  ;;  %v7984_v58 = vld [vmem:[%s14576_s3 + $0x478] sm:$0xf0] }
 0x343   :  { %7891 = vmatmul.msk.bf16.gmra.mxu2 %vm942_vm2, %v10740_v55  ;;  %v7987_v16 = vor.u32 %v9643_v54, %v7984_v58  ;;  %3056 = vmatpush.bf16.msrb.mxu3 %v7983_v62  ;;  %v7926_v62 = vld [vmem:[%s14576_s3 + $0x400] sm:$0xf] }
 0x344   :  { %3098 = vmatpush.bf16.msrb.mxu0 %v7939_v13 }
 0x345   :  { %3144 = vmatpush.bf16.msrb.mxu2 %v7987_v16 }
 0x346   :  { %v2464_v22 = vpop.f32.mrf.mxu2  ;;  %v2422_v21 = vpop.f32.mrf.mxu0 }
 0x347   :  { %v2378_v31 = vpop.f32.mrf.mxu3  ;;  %v2465_v45 = vadd.f32 %v2464_v22, %v2420_v6  ;;  %v2337_v54 = vpop.f32.mrf.mxu1  ;;  %v9630_v6 = vld [vmem:[%s14576_s3 + $0x404] sm:$0xf0] }
 0x348   :  { %v2379_v55 = vadd.f32 %v2378_v31, %v2334_v27  ;;  %v7927_v27 = vor.u32 %v9630_v6, %v7926_v62 }
 0x349   :  { %v11929_v58 = vadd.f32 %v2465_v45, %v11678_v44  ;;  %v9629_v44 = vld [vmem:[%s14576_s3 + $0x404] sm:$0xf] }
 0x34a   :  { %v11932_v7 = vadd.f32 %v2379_v55, %v11681_v24  ;;  %2687 = vmatmul.bf16.gmra.mxu1 %v10762_v40  ;;  %v7928_v55 = vld [vmem:[%s14576_s3 + $0x408] sm:$0xf0] }
 0x34b   :  { %v7931_v3 = vor.u32 %v9629_v44, %v7928_v55  ;;  %3011 = vmatpush.bf16.msrb.mxu1 %v7927_v27 }
 0x34c   :  { %7885 = vmatmul.msk.bf16.gmra.mxu3 %vm942_vm2, %v10768_v56 }
 0x34d   :  { %3099 = vmatpush.bf16.msrb.mxu0 %v7931_v3  ;;  %v14630_v3 = vld [vmem:[#allocation16_spill] sm:$0xff] }
 0x34e   :  { %v2466_v24 = vpop.f32.mrf.mxu2  ;;  %v2425_v20 = vpop.f32.mrf.mxu0 }
 0x34f   :  { %v2381_v16 = vpop.f32.mrf.mxu3  ;;  %v2467_v49 = vadd.f32 %v2466_v24, %v2422_v21  ;;  %v2339_v13 = vpop.f32.mrf.mxu1  ;;  %v7918_v21 = vld [vmem:[%s14576_s3 + $0x3f0] sm:$0xf] }
 0x350   :  { %v2382_v53 = vadd.f32 %v2381_v16, %v2337_v54  ;;  %v9628_v54 = vld [vmem:[%s14576_s3 + $0x3f4] sm:$0xf0]  ;;  %v14631_v16 = vld [vmem:[#allocation17_spill] sm:$0xff] }
 0x351   :  { %v11950_v22 = vadd.f32 %v2467_v49, %v11699_v57  ;;  %2775 = vmatmul.bf16.gmra.mxu0 %v10762_v40  ;;  %v7919_v44 = vor.u32 %v9628_v54, %v7918_v21  ;;  %v9627_v49 = vld [vmem:[%s14576_s3 + $0x3f4] sm:$0xf] }
 0x352   :  { %v11953_v31 = vadd.f32 %v2382_v53, %v11702_v26 }
 0x353   :  { %7892 = vmatmul.msk.bf16.gmra.mxu2 %vm942_vm2, %v10768_v56  ;;  %3012 = vmatpush.bf16.msrb.mxu1 %v7919_v44  ;;  %v8030_v44 = vld [vmem:[%s14576_s3 + $0x538] sm:$0xff] }
 0x356   :  { %v2469_v45 = vpop.f32.mrf.mxu2  ;;  %v2427_v6 = vpop.f32.mrf.mxu0 }
 0x357   :  { %v2383_v62 = vpop.f32.mrf.mxu3  ;;  %v2470_v57 = vadd.f32 %v2469_v45, %v2425_v20  ;;  %v2342_v27 = vpop.f32.mrf.mxu1  ;;  %v7920_v20 = vld [vmem:[%s14576_s3 + $0x3f8] sm:$0xf0] }
 0x358   :  { %v2384_v26 = vadd.f32 %v2383_v62, %v2339_v13  ;;  %v7923_v53 = vor.u32 %v9627_v49, %v7920_v20 }
 0x359   :  { %v11965_v55 = vadd.f32 %v2470_v57, %v11714_v12 }
 0x35a   :  { %v11968_v24 = vadd.f32 %v2384_v26, %v11717_v14  ;;  %2692 = vmatmul.bf16.gmra.mxu1 %v14630_v3  ;;  %3100 = vmatpush.bf16.msrb.mxu0 %v7923_v53  ;;  %v3299_v26 = vunpack.c.h.b16 %v8030_v44 }
 0x35c   :  { %7886 = vmatmul.msk.bf16.gmra.mxu3 %vm942_vm2, %v14631_v16  ;;  %v3321_v20 = vpack.c.b16 %v3299_v26, %v3299_v26  ;;  %v14633_v26 = vld [vmem:[#allocation21_spill] sm:$0xff] }
 0x35e   :  { %v2471_v12 = vpop.f32.mrf.mxu2  ;;  %v2430_v21 = vpop.f32.mrf.mxu0 }
 0x35f   :  { %v2386_v13 = vpop.f32.mrf.mxu3  ;;  %v2472_v45 = vadd.f32 %v2471_v12, %v2427_v6  ;;  %v2344_v54 = vpop.f32.mrf.mxu1  ;;  %v3298_v6 = vunpack.c.l.b16 %v8030_v44  ;;  %v8089_v44 = vld [vmem:[%s14576_s3 + $0x508] sm:$0xf] }
 0x360   :  { %v2387_v14 = vadd.f32 %v2386_v13, %v2342_v27 }
 0x361   :  { %v11980_v62 = vadd.f32 %v2472_v45, %v11729_v37  ;;  %2780 = vmatmul.bf16.gmra.mxu0 %v14630_v3  ;;  %v3320_v27 = vpack.c.b16 %v3298_v6, %v3298_v6  ;;  %v14632_v6 = vld [vmem:[#allocation20_spill] sm:$0xff] }
 0x362   :  { %v11983_v57 = vadd.f32 %v2387_v14, %v11732_v18  ;;  %v3349_v14 = vsel %vm964_vm1, %v3321_v20, 0 }
 0x363   :  { %7893 = vmatmul.msk.bf16.gmra.mxu2 %vm942_vm2, %v14631_v16  ;;  %v3346_v45 = vsel %vm964_vm1, %v3320_v27, 0 }
 0x364   :  { %3400 = vmatpush.bf16.msra.mxu3 %v3346_v45  ;;  %3488 = vmatpush.bf16.msra.mxu2 %v3349_v14 }
 0x366   :  { %v2474_v49 = vpop.f32.mrf.mxu2  ;;  %v2432_v12 = vpop.f32.mrf.mxu0 }
 0x367   :  { %v2388_v53 = vpop.f32.mrf.mxu3  ;;  %v2475_v37 = vadd.f32 %v2474_v49, %v2430_v21  ;;  %v2347_v18 = vpop.f32.mrf.mxu1  ;;  %v9662_v21 = vld [vmem:[%s14576_s3 + $0x50c] sm:$0xf0] }
 0x368   :  { %v2389_v13 = vadd.f32 %v2388_v53, %v2344_v54  ;;  %v9661_v54 = vld [vmem:[%s14576_s3 + $0x50c] sm:$0xf] }
 0x369   :  { %v11994_v16 = vadd.f32 %v2475_v37, %v11743_v5  ;;  %v8090_v5 = vor.u32 %v9662_v21, %v8089_v44 }
 0x36a   :  { %v11997_v3 = vadd.f32 %v2389_v13, %v11746_v63  ;;  %2697 = vmatmul.bf16.gmra.mxu1 %v14632_v6  ;;  %v8091_v63 = vld [vmem:[%s14576_s3 + $0x510] sm:$0xf0] }
 0x36b   :  { %v8094_v49 = vor.u32 %v9661_v54, %v8091_v63  ;;  %3351 = vmatpush.bf16.msra.mxu1 %v8090_v5 }
 0x36c   :  { %7887 = vmatmul.msk.bf16.gmra.mxu3 %vm942_vm2, %v14633_v26 }
 0x36d   :  { %3439 = vmatpush.bf16.msra.mxu0 %v8094_v49 }
 0x36e   :  { %v2476_v27 = vpop.f32.mrf.mxu2  ;;  %v2435_v37 = vpop.f32.mrf.mxu0 }
 0x36f   :  { %v2391_v20 = vpop.f32.mrf.mxu3  ;;  %v2477_v53 = vadd.f32 %v2476_v27, %v2432_v12  ;;  %v2349_v45 = vpop.f32.mrf.mxu1  ;;  %v9660_v27 = vld [vmem:[%s14576_s3 + $0x4fc] sm:$0xf0] }
 0x370   :  { %v2392_v13 = vadd.f32 %v2391_v20, %v2347_v18  ;;  %v9659_v20 = vld [vmem:[%s14576_s3 + $0x4fc] sm:$0xf] }
 0x371   :  { %v12015_v14 = vadd.f32 %v2477_v53, %v11764_v15  ;;  %2785 = vmatmul.bf16.gmra.mxu0 %v14632_v6 }
 0x372   :  { %v12018_v44 = vadd.f32 %v2392_v13, %v11767_v4  ;;  %v8081_v4 = vld [vmem:[%s14576_s3 + $0x4f8] sm:$0xf] }
 0x373   :  { %7894 = vmatmul.msk.bf16.gmra.mxu2 %vm942_vm2, %v14633_v26  ;;  %v8082_v53 = vor.u32 %v9660_v27, %v8081_v4  ;;  %v8073_v27 = vld [vmem:[%s14576_s3 + $0x4e8] sm:$0xf] }
 0x375   :  { %3352 = vmatpush.bf16.msra.mxu1 %v8082_v53 }
 0x376   :  { %v2479_v21 = vpop.f32.mrf.mxu2  ;;  %v2437_v63 = vpop.f32.mrf.mxu0 }
 0x377   :  { %v2393_v54 = vpop.f32.mrf.mxu3  ;;  %v2480_v5 = vadd.f32 %v2479_v21, %v2435_v37  ;;  %v2352_v12 = vpop.f32.mrf.mxu1 }
 0x378   :  { %v2394_v49 = vadd.f32 %v2393_v54, %v2349_v45 }
 0x379   :  { %v12024_v18 = vadd.f32 %v2480_v5, %v11773_v17  ;;  %v8083_v17 = vld [vmem:[%s14576_s3 + $0x500] sm:$0xf0] }
 0x37a   :  { %v12027_v15 = vadd.f32 %v2394_v49, %v11776_v61  ;;  %3013 = vmatmul.bf16.vlgmr.msrb.gmra.mxu1 %v10595_v1  ;;  %v8086_v61 = vor.u32 %v9659_v20, %v8083_v17 }
 0x37c   :  { %7996 = vmatmul.msk.bf16.vlgmr.msrb.gmra.mxu3 %vm942_vm2, %v10597_v2  ;;  %3440 = vmatpush.bf16.msra.mxu0 %v8086_v61 }
 0x37e   :  { %v2481_v37 = vpop.f32.mrf.mxu2  ;;  %v2440_v21 = vpop.f32.mrf.mxu0 }
 0x37f   :  { %v2396_v13 = vpop.f32.mrf.mxu3  ;;  %v2482_v45 = vadd.f32 %v2481_v37, %v2437_v63  ;;  %v2354_v5 = vpop.f32.mrf.mxu1  ;;  %v9658_v63 = vld [vmem:[%s14576_s3 + $0x4ec] sm:$0xf0] }
 0x380   :  { %v2397_v54 = vadd.f32 %v2396_v13, %v2352_v12  ;;  %v8074_v12 = vor.u32 %v9658_v63, %v8073_v27  ;;  %v9666_v27 = vld [vmem:[%s14576_s3 + $0x52c] sm:$0xf0] }
 0x381   :  { %v12045_v49 = vadd.f32 %v2482_v45, %v11794_v34  ;;  %3101 = vmatmul.bf16.vlgmr.msrb.gmra.mxu0 %v10595_v1  ;;  %v9657_v34 = vld [vmem:[%s14576_s3 + $0x4ec] sm:$0xf]  ;;  %v8075_v1 = vld [vmem:[%s14576_s3 + $0x4f0] sm:$0xf0] }
 0x382   :  { %v12048_v4 = vadd.f32 %v2397_v54, %v11797_v19  ;;  %v8078_v19 = vor.u32 %v9657_v34, %v8075_v1  ;;  %3353 = vmatpush.bf16.msra.mxu1 %v8074_v12  ;;  %v8105_v54 = vld [vmem:[%s14576_s3 + $0x528] sm:$0xf] }
 0x383   :  { %8003 = vmatmul.msk.bf16.vlgmr.msrb.gmra.mxu2 %vm942_vm2, %v10597_v2 }
 0x384   :  { %3441 = vmatpush.bf16.msra.mxu0 %v8078_v19 }
 0x386   :  { %v2484_v20 = vpop.f32.mrf.mxu2  ;;  %v2442_v17 = vpop.f32.mrf.mxu0 }
 0x387   :  { %v2398_v2 = vpop.f32.mrf.mxu3  ;;  %v2485_v53 = vadd.f32 %v2484_v20, %v2440_v21  ;;  %v2668_v37 = vpop.f32.mrf.mxu1  ;;  %v9665_v21 = vld [vmem:[%s14576_s3 + $0x52c] sm:$0xf] }
 0x388   :  { %v2399_v61 = vadd.f32 %v2398_v2, %v2354_v5  ;;  %v8106_v5 = vor.u32 %v9666_v27, %v8105_v54 }
 0x389   :  { %v12066_v13 = vadd.f32 %v2485_v53, %v11815_v33  ;;  %v8107_v33 = vld [vmem:[%s14576_s3 + $0x530] sm:$0xf0] }
 0x38a   :  { %v12069_v45 = vadd.f32 %v2399_v61, %v11818_v35  ;;  %3018 = vmatmul.bf16.gmra.mxu1 %v10627_v43  ;;  %v8110_v35 = vor.u32 %v9665_v21, %v8107_v33  ;;  %3401 = vmatpush.bf16.msra.mxu3 %v8106_v5  ;;  %v8065_v61 = vld [vmem:[%s14576_s3 + $0x4d8] sm:$0xf] }
 0x38c   :  { %7997 = vmatmul.msk.bf16.gmra.mxu3 %vm942_vm2, %v10629_v46  ;;  %3489 = vmatpush.bf16.msra.mxu2 %v8110_v35 }
 0x38e   :  { %v2486_v63 = vpop.f32.mrf.mxu2  ;;  %v2756_v1 = vpop.f32.mrf.mxu0 }
 0x38f   :  { %v2487_v34 = vadd.f32 %v2486_v63, %v2442_v17  ;;  %v2712_v12 = vpop.f32.mrf.mxu3  ;;  %v2670_v20 = vpop.f32.mrf.mxu1  ;;  %v9656_v17 = vld [vmem:[%s14576_s3 + $0x4dc] sm:$0xf0] }
 0x390   :  { %v2713_v19 = vadd.f32 %v2712_v12, %v2668_v37  ;;  %v8066_v37 = vor.u32 %v9656_v17, %v8065_v61 }
 0x391   :  { %v12087_v2 = vadd.f32 %v2487_v34, %v11836_v9  ;;  %3106 = vmatmul.bf16.gmra.mxu0 %v10627_v43  ;;  %v9655_v9 = vld [vmem:[%s14576_s3 + $0x4dc] sm:$0xf]  ;;  %v8067_v43 = vld [vmem:[%s14576_s3 + $0x4e0] sm:$0xf0] }
 0x392   :  { %v12090_v53 = vadd.f32 %v2713_v19, %v11839_v32  ;;  %v8070_v32 = vor.u32 %v9655_v9, %v8067_v43  ;;  %3354 = vmatpush.bf16.msra.mxu1 %v8066_v37  ;;  %v9654_v9 = vld [vmem:[%s14576_s3 + $0x4cc] sm:$0xf0]  ;;  %v9653_v37 = vld [vmem:[%s14576_s3 + $0x4cc] sm:$0xf] }
 0x393   :  { %8004 = vmatmul.msk.bf16.gmra.mxu2 %vm942_vm2, %v10629_v46 }
 0x394   :  { %3442 = vmatpush.bf16.msra.mxu0 %v8070_v32 }
 0x396   :  { %v2800_v54 = vpop.f32.mrf.mxu2  ;;  %v2758_v21 = vpop.f32.mrf.mxu0 }
 0x397   :  { %v2714_v46 = vpop.f32.mrf.mxu3  ;;  %v2801_v27 = vadd.f32 %v2800_v54, %v2756_v1  ;;  %v2673_v33 = vpop.f32.mrf.mxu1 }
 0x398   :  { %v2715_v5 = vadd.f32 %v2714_v46, %v2670_v20 }
 0x399   :  { %v12108_v35 = vadd.f32 %v2801_v27, %v11857_v10 }
 0x39a   :  { %v12111_v63 = vadd.f32 %v2715_v5, %v11860_v38  ;;  %3023 = vmatmul.bf16.gmra.mxu1 %v10665_v29  ;;  %v8057_v38 = vld [vmem:[%s14576_s3 + $0x4c8] sm:$0xf] }
 0x39c   :  { %7998 = vmatmul.msk.bf16.gmra.mxu3 %vm942_vm2, %v10669_v30 }
 0x39e   :  { %v2802_v34 = vpop.f32.mrf.mxu2  ;;  %v2761_v61 = vpop.f32.mrf.mxu0 }
 0x39f   :  { %v2717_v12 = vpop.f32.mrf.mxu3  ;;  %v2803_v19 = vadd.f32 %v2802_v34, %v2758_v21  ;;  %v2675_v17 = vpop.f32.mrf.mxu1 }
 0x3a0   :  { %v2718_v1 = vadd.f32 %v2717_v12, %v2673_v33 }
 0x3a1   :  { %v12117_v20 = vadd.f32 %v2803_v19, %v11866_v60  ;;  %3111 = vmatmul.bf16.gmra.mxu0 %v10665_v29  ;;  %v8058_v60 = vor.u32 %v9654_v9, %v8057_v38  ;;  %v8059_v29 = vld [vmem:[%s14576_s3 + $0x4d0] sm:$0xf0]  ;;  %v9664_v38 = vld [vmem:[%s14576_s3 + $0x51c] sm:$0xf0]  ;;  %v9663_v9 = vld [vmem:[%s14576_s3 + $0x51c] sm:$0xf] }
 0x3a2   :  { %v12120_v10 = vadd.f32 %v2718_v1, %v11869_v8  ;;  %v8062_v8 = vor.u32 %v9653_v37, %v8059_v29  ;;  %v9652_v37 = vld [vmem:[%s14576_s3 + $0x4bc] sm:$0xf0] }
 0x3a3   :  { %8005 = vmatmul.msk.bf16.gmra.mxu2 %vm942_vm2, %v10669_v30  ;;  %3355 = vmatpush.bf16.msra.mxu1 %v8058_v60 }
 0x3a4   :  { %3443 = vmatpush.bf16.msra.mxu0 %v8062_v8  ;;  %v9651_v8 = vld [vmem:[%s14576_s3 + $0x4bc] sm:$0xf] }
 0x3a6   :  { %v2805_v43 = vpop.f32.mrf.mxu2  ;;  %v2763_v46 = vpop.f32.mrf.mxu0 }
 0x3a7   :  { %v2719_v32 = vpop.f32.mrf.mxu3  ;;  %v2806_v54 = vadd.f32 %v2805_v43, %v2761_v61  ;;  %v2678_v21 = vpop.f32.mrf.mxu1 }
 0x3a8   :  { %v2720_v27 = vadd.f32 %v2719_v32, %v2675_v17 }
 0x3a9   :  { %v12138_v5 = vadd.f32 %v2806_v54, %v11887_v59 }
 0x3aa   :  { %v12141_v33 = vadd.f32 %v2720_v27, %v11890_v0  ;;  %3028 = vmatmul.bf16.gmra.mxu1 %v10734_v50  ;;  %v8097_v0 = vld [vmem:[%s14576_s3 + $0x518] sm:$0xf] }
 0x3ac   :  { %7999 = vmatmul.msk.bf16.gmra.mxu3 %vm942_vm2, %v10736_v51 }
 0x3ae   :  { %v2807_v30 = vpop.f32.mrf.mxu2  ;;  %v2766_v19 = vpop.f32.mrf.mxu0 }
 0x3af   :  { %v2722_v34 = vpop.f32.mrf.mxu3  ;;  %v2808_v12 = vadd.f32 %v2807_v30, %v2763_v46  ;;  %v2680_v61 = vpop.f32.mrf.mxu1 }
 0x3b0   :  { %v2723_v1 = vadd.f32 %v2722_v34, %v2678_v21 }
 0x3b1   :  { %v12147_v17 = vadd.f32 %v2808_v12, %v11896_v39  ;;  %3116 = vmatmul.bf16.gmra.mxu0 %v10734_v50  ;;  %v8098_v39 = vor.u32 %v9664_v38, %v8097_v0  ;;  %v8099_v50 = vld [vmem:[%s14576_s3 + $0x520] sm:$0xf0] }
 0x3b2   :  { %v12150_v59 = vadd.f32 %v2723_v1, %v11899_v25  ;;  %v8049_v25 = vld [vmem:[%s14576_s3 + $0x4b8] sm:$0xf]  ;;  %v8102_v60 = vor.u32 %v9663_v9, %v8099_v50  ;;  %v8041_v1 = vld [vmem:[%s14576_s3 + $0x4a8] sm:$0xf] }
 0x3b3   :  { %8006 = vmatmul.msk.bf16.gmra.mxu2 %vm942_vm2, %v10736_v51  ;;  %v8050_v29 = vor.u32 %v9652_v37, %v8049_v25  ;;  %v8051_v51 = vld [vmem:[%s14576_s3 + $0x4c0] sm:$0xf0]  ;;  %3402 = vmatpush.bf16.msra.mxu3 %v8098_v39 }
 0x3b4   :  { %v8054_v43 = vor.u32 %v9651_v8, %v8051_v51  ;;  %3490 = vmatpush.bf16.msra.mxu2 %v8102_v60  ;;  %v8033_v51 = vld [vmem:[%s14576_s3 + $0x498] sm:$0xf] }
 0x3b5   :  { %3356 = vmatpush.bf16.msra.mxu1 %v8050_v29 }
 0x3b6   :  { %v2810_v32 = vpop.f32.mrf.mxu2  ;;  %v2768_v27 = vpop.f32.mrf.mxu0  ;;  %3444 = vmatpush.bf16.msra.mxu0 %v8054_v43  ;;  %v9648_v43 = vld [vmem:[%s14576_s3 + $0x49c] sm:$0xf0] }
 0x3b7   :  { %v2724_v54 = vpop.f32.mrf.mxu3  ;;  %v2811_v46 = vadd.f32 %v2810_v32, %v2766_v19  ;;  %v2683_v30 = vpop.f32.mrf.mxu1  ;;  %v9650_v19 = vld [vmem:[%s14576_s3 + $0x4ac] sm:$0xf0] }
 0x3b8   :  { %v2725_v21 = vadd.f32 %v2724_v54, %v2680_v61  ;;  %v8042_v61 = vor.u32 %v9650_v19, %v8041_v1 }
 0x3b9   :  { %v12180_v34 = vadd.f32 %v2811_v46, %v11929_v58  ;;  %v9649_v58 = vld [vmem:[%s14576_s3 + $0x4ac] sm:$0xf]  ;;  %v8034_v46 = vor.u32 %v9648_v43, %v8033_v51  ;;  %v14634_v43 = vld [vmem:[#allocation22_spill] sm:$0xff] }
 0x3ba   :  { %v12183_v12 = vadd.f32 %v2725_v21, %v11932_v7  ;;  %3033 = vmatmul.bf16.gmra.mxu1 %v10764_v47  ;;  %v8043_v7 = vld [vmem:[%s14576_s3 + $0x4b0] sm:$0xf0]  ;;  %v9647_v21 = vld [vmem:[%s14576_s3 + $0x49c] sm:$0xf] }
 0x3bb   :  { %v8046_v38 = vor.u32 %v9649_v58, %v8043_v7  ;;  %3357 = vmatpush.bf16.msra.mxu1 %v8042_v61 }
 0x3bc   :  { %8000 = vmatmul.msk.bf16.gmra.mxu3 %vm942_vm2, %v10766_v48 }
 0x3bd   :  { %3445 = vmatpush.bf16.msra.mxu0 %v8046_v38 }
 0x3be   :  { %v2812_v0 = vpop.f32.mrf.mxu2  ;;  %v2771_v50 = vpop.f32.mrf.mxu0 }
 0x3bf   :  { %v2727_v9 = vpop.f32.mrf.mxu3  ;;  %v2813_v39 = vadd.f32 %v2812_v0, %v2768_v27  ;;  %v2685_v37 = vpop.f32.mrf.mxu1  ;;  %3358 = vmatpush.bf16.msra.mxu1 %v8034_v46 }
 0x3c0   :  { %v2728_v25 = vadd.f32 %v2727_v9, %v2683_v30  ;;  %v8035_v30 = vld [vmem:[%s14576_s3 + $0x4a0] sm:$0xf0]  ;;  %s7001_s3 = sshll.u32 %s14586_s13, 4  ;;  %s7002_s3 = int_to_ptr.hbm [resolvable:$true] %s7001_s3 }
 0x3c1   :  { %v12201_v60 = vadd.f32 %v2813_v39, %v11950_v22  ;;  %3121 = vmatmul.bf16.gmra.mxu0 %v10764_v47  ;;  %v8038_v1 = vor.u32 %v9647_v21, %v8035_v30 }
 0x3c2   :  { %v12204_v29 = vadd.f32 %v2728_v25, %v11953_v31 }
 0x3c3   :  { %8007 = vmatmul.msk.bf16.gmra.mxu2 %vm942_vm2, %v10766_v48  ;;  %3446 = vmatpush.bf16.msra.mxu0 %v8038_v1 }
 0x3c6   :  { %v2815_v8 = vpop.f32.mrf.mxu2  ;;  %v2773_v54 = vpop.f32.mrf.mxu0 }
 0x3c7   :  { %v2729_v32 = vpop.f32.mrf.mxu3  ;;  %v2816_v22 = vadd.f32 %v2815_v8, %v2771_v50  ;;  %v2688_v27 = vpop.f32.mrf.mxu1 }
 0x3c8   :  { %v2730_v31 = vadd.f32 %v2729_v32, %v2685_v37 }
 0x3c9   :  { %v12216_v47 = vadd.f32 %v2816_v22, %v11965_v55 }
 0x3ca   :  { %v12219_v48 = vadd.f32 %v2730_v31, %v11968_v24  ;;  %3038 = vmatmul.bf16.gmra.mxu1 %v14627_v23 }
 0x3cc   :  { %8001 = vmatmul.msk.bf16.gmra.mxu3 %vm942_vm2, %v14628_v41 }
 0x3ce   :  { %v2817_v55 = vpop.f32.mrf.mxu2  ;;  %v2776_v61 = vpop.f32.mrf.mxu0 }
 0x3cf   :  { %v2732_v19 = vpop.f32.mrf.mxu3  ;;  %v2818_v58 = vadd.f32 %v2817_v55, %v2773_v54  ;;  %v2690_v7 = vpop.f32.mrf.mxu1 }
 0x3d0   :  { %v2733_v24 = vadd.f32 %v2732_v19, %v2688_v27 }
 0x3d1   :  { %v12231_v0 = vadd.f32 %v2818_v58, %v11980_v62  ;;  %3126 = vmatmul.bf16.gmra.mxu0 %v14627_v23 }
 0x3d2   :  { %v12234_v38 = vadd.f32 %v2733_v24, %v11983_v57  ;;  %v14635_v57 = vld [vmem:[#allocation23_spill] sm:$0xff] }
 0x3d3   :  { %8008 = vmatmul.msk.bf16.gmra.mxu2 %vm942_vm2, %v14628_v41 }
 0x3d6   :  { %v2820_v9 = vpop.f32.mrf.mxu2  ;;  %v2778_v25 = vpop.f32.mrf.mxu0 }
 0x3d7   :  { %v2734_v39 = vpop.f32.mrf.mxu3  ;;  %v2821_v50 = vadd.f32 %v2820_v9, %v2776_v61  ;;  %v2693_v8 = vpop.f32.mrf.mxu1 }
 0x3d8   :  { %v2735_v37 = vadd.f32 %v2734_v39, %v2690_v7 }
 0x3d9   :  { %v12240_v51 = vadd.f32 %v2821_v50, %v11994_v16 }
 0x3da   :  { %v12243_v62 = vadd.f32 %v2735_v37, %v11997_v3  ;;  %3043 = vmatmul.bf16.gmra.mxu1 %v14634_v43 }
 0x3dc   :  { %8002 = vmatmul.msk.bf16.gmra.mxu3 %vm942_vm2, %v14635_v57 }
 0x3de   :  { %v2822_v23 = vpop.f32.mrf.mxu2  ;;  %v2781_v22 = vpop.f32.mrf.mxu0 }
 0x3df   :  { %v2737_v32 = vpop.f32.mrf.mxu3  ;;  %v2823_v41 = vadd.f32 %v2822_v23, %v2778_v25  ;;  %v2695_v46 = vpop.f32.mrf.mxu1 }
 0x3e0   :  { %v2738_v54 = vadd.f32 %v2737_v32, %v2693_v8 }
 0x3e1   :  { %v12249_v31 = vadd.f32 %v2823_v41, %v12015_v14  ;;  %3131 = vmatmul.bf16.gmra.mxu0 %v14634_v43 }
 0x3e2   :  { %v12252_v16 = vadd.f32 %v2738_v54, %v12018_v44  ;;  %v9722_v54 = vld [vmem:[%s14578_s5 + $0x1b4] sm:$0xf0] }
 0x3e3   :  { %8009 = vmatmul.msk.bf16.gmra.mxu2 %vm942_vm2, %v14635_v57 }
 0x3e6   :  { %v2825_v3 = vpop.f32.mrf.mxu2  ;;  %v2783_v30 = vpop.f32.mrf.mxu0 }
 0x3e7   :  { %v2739_v27 = vpop.f32.mrf.mxu3  ;;  %v2826_v21 = vadd.f32 %v2825_v3, %v2781_v22  ;;  %v2698_v55 = vpop.f32.mrf.mxu1 }
 0x3e8   :  { %v2740_v1 = vadd.f32 %v2739_v27, %v2695_v46 }
 0x3e9   :  { %v12258_v19 = vadd.f32 %v2826_v21, %v12024_v18 }
 0x3ea   :  { %v12261_v14 = vadd.f32 %v2740_v1, %v12027_v15  ;;  %3359 = vmatmul.bf16.vlgmr.msra.gmra.mxu1 %v10625_v42 }
 0x3ec   :  { %8111 = vmatmul.msk.bf16.vlgmr.msra.gmra.mxu3 %vm942_vm2, %v10640_v52 }
 0x3ee   :  { %v2827_v44 = vpop.f32.mrf.mxu2  ;;  %v2786_v24 = vpop.f32.mrf.mxu0 }
 0x3ef   :  { %v2742_v58 = vpop.f32.mrf.mxu3  ;;  %v2828_v61 = vadd.f32 %v2827_v44, %v2783_v30  ;;  %v2700_v9 = vpop.f32.mrf.mxu1 }
 0x3f0   :  { %v2743_v7 = vadd.f32 %v2742_v58, %v2698_v55  ;;  %v14639_v58 = vld [vmem:[#allocation15_spill] sm:$0xff] }
 0x3f1   :  { %v12267_v39 = vadd.f32 %v2828_v61, %v12045_v49  ;;  %3447 = vmatmul.bf16.vlgmr.msra.gmra.mxu0 %v10625_v42  ;;  %v8211_v61 = vld [vmem:[%s14578_s5 + $0x150] sm:$0xf] }
 0x3f2   :  { %v12270_v18 = vadd.f32 %v2743_v7, %v12048_v4 }
 0x3f3   :  { %14636 = vst [vmem:[#allocation12_spill] sm:$0xff] %v12267_v39  ;;  %8118 = vmatmul.msk.bf16.vlgmr.msra.gmra.mxu2 %vm942_vm2, %v10640_v52 }
 0x3f6   :  { %v2830_v15 = vpop.f32.mrf.mxu2  ;;  %v2788_v37 = vpop.f32.mrf.mxu0 }
 0x3f7   :  { %v2744_v50 = vpop.f32.mrf.mxu3  ;;  %v2831_v25 = vadd.f32 %v2830_v15, %v2786_v24  ;;  %v3014_v43 = vpop.f32.mrf.mxu1  ;;  %v9710_v24 = vld [vmem:[%s14578_s5 + $0x154] sm:$0xf0] }
 0x3f8   :  { %v2745_v8 = vadd.f32 %v2744_v50, %v2700_v9  ;;  %v8212_v7 = vor.u32 %v9710_v24, %v8211_v61 }
 0x3f9   :  { %v12276_v57 = vadd.f32 %v2831_v25, %v12066_v13 }
 0x3fa   :  { %v12279_v49 = vadd.f32 %v2745_v8, %v12069_v45  ;;  %3364 = vmatmul.bf16.gmra.mxu1 %v10661_v28  ;;  %v8259_v45 = vld [vmem:[%s14578_s5 + $0x1b0] sm:$0xf] }
 0x3fb   :  { %v8260_v46 = vor.u32 %v9722_v54, %v8259_v45  ;;  %3888 = vmatpush.bf16.msrb.mxu1 %v8212_v7 }
 0x3fc   :  { %14637 = vst [vmem:[#allocation13_spill] sm:$0xff] %v12279_v49  ;;  %8112 = vmatmul.msk.bf16.gmra.mxu3 %vm942_vm2, %v14629_v11 }
 0x3fd   :  { %3924 = vmatpush.bf16.msrb.mxu3 %v8260_v46  ;;  %v9719_v46 = vld [vmem:[%s14578_s5 + $0x1a4] sm:$0xf] }
 0x3fe   :  { %v2832_v42 = vpop.f32.mrf.mxu2  ;;  %v3102_v23 = vpop.f32.mrf.mxu0 }
 0x3ff   :  { %v2833_v4 = vadd.f32 %v2832_v42, %v2788_v37  ;;  %v3058_v52 = vpop.f32.mrf.mxu3  ;;  %v3016_v41 = vpop.f32.mrf.mxu1 }
 0x400   :  { %v3059_v32 = vadd.f32 %v3058_v52, %v3014_v43 }
 0x401   :  { %v12285_v22 = vadd.f32 %v2833_v4, %v12087_v2  ;;  %3452 = vmatmul.bf16.gmra.mxu0 %v10661_v28  ;;  %v9721_v2 = vld [vmem:[%s14578_s5 + $0x1b4] sm:$0xf]  ;;  %v8261_v28 = vld [vmem:[%s14578_s5 + $0x1b8] sm:$0xf0] }
 0x402   :  { %v12288_v13 = vadd.f32 %v3059_v32, %v12090_v53  ;;  %v8264_v53 = vor.u32 %v9721_v2, %v8261_v28 }
 0x403   :  { %14638 = vst [vmem:[#allocation18_spill] sm:$0xff] %v12285_v22  ;;  %8119 = vmatmul.msk.bf16.gmra.mxu2 %vm942_vm2, %v14629_v11 }
 0x404   :  { %3992 = vmatpush.bf16.msrb.mxu2 %v8264_v53  ;;  %v9708_v53 = vld [vmem:[%s14578_s5 + $0x144] sm:$0xf0] }
 0x406   :  { %v3146_v3 = vpop.f32.mrf.mxu2  ;;  %v3104_v21 = vpop.f32.mrf.mxu0 }
 0x407   :  { %v3060_v11 = vpop.f32.mrf.mxu3  ;;  %v3147_v27 = vadd.f32 %v3146_v3, %v3102_v23  ;;  %v3019_v1 = vpop.f32.mrf.mxu1 }
 0x408   :  { %v3061_v30 = vadd.f32 %v3060_v11, %v3016_v41 }
 0x409   :  { %v12306_v55 = vadd.f32 %v3147_v27, %v12108_v35  ;;  %v9709_v35 = vld [vmem:[%s14578_s5 + $0x154] sm:$0xf]  ;;  %v9707_v27 = vld [vmem:[%s14578_s5 + $0x144] sm:$0xf] }
 0x40a   :  { %v12309_v44 = vadd.f32 %v3061_v30, %v12111_v63  ;;  %3369 = vmatmul.bf16.gmra.mxu1 %v10732_v36  ;;  %v8213_v63 = vld [vmem:[%s14578_s5 + $0x158] sm:$0xf0] }
 0x40b   :  { %v8216_v15 = vor.u32 %v9709_v35, %v8213_v63 }
 0x40c   :  { %8113 = vmatmul.msk.bf16.gmra.mxu3 %vm942_vm2, %v14639_v58 }
 0x40d   :  { %3956 = vmatpush.bf16.msrb.mxu0 %v8216_v15 }
 0x40e   :  { %v3148_v9 = vpop.f32.mrf.mxu2  ;;  %v3107_v37 = vpop.f32.mrf.mxu0 }
 0x40f   :  { %v3063_v50 = vpop.f32.mrf.mxu3  ;;  %v3149_v25 = vadd.f32 %v3148_v9, %v3104_v21  ;;  %v3021_v43 = vpop.f32.mrf.mxu1  ;;  %v8205_v21 = vld [vmem:[%s14578_s5 + $0x148] sm:$0xf0] }
 0x410   :  { %v3064_v8 = vadd.f32 %v3063_v50, %v3019_v1  ;;  %v8208_v30 = vor.u32 %v9707_v27, %v8205_v21  ;;  %v8187_v27 = vld [vmem:[%s14578_s5 + $0x120] sm:$0xf]  ;;  %v9704_v21 = vld [vmem:[%s14578_s5 + $0x124] sm:$0xf0] }
 0x411   :  { %v12327_v42 = vadd.f32 %v3149_v25, %v12117_v20  ;;  %3457 = vmatmul.bf16.gmra.mxu0 %v10732_v36  ;;  %v9720_v36 = vld [vmem:[%s14578_s5 + $0x1a4] sm:$0xf0] }
 0x412   :  { %v12330_v4 = vadd.f32 %v3064_v8, %v12120_v10  ;;  %v8251_v10 = vld [vmem:[%s14578_s5 + $0x1a0] sm:$0xf]  ;;  %3957 = vmatpush.bf16.msrb.mxu0 %v8208_v30  ;;  %v9703_v30 = vld [vmem:[%s14578_s5 + $0x124] sm:$0xf] }
 0x413   :  { %8120 = vmatmul.msk.bf16.gmra.mxu2 %vm942_vm2, %v14639_v58  ;;  %v8252_v28 = vor.u32 %v9720_v36, %v8251_v10  ;;  %v8245_v36 = vld [vmem:[%s14578_s5 + $0x198] sm:$0xf0] }
 0x415   :  { %3925 = vmatpush.bf16.msrb.mxu3 %v8252_v28 }
 0x416   :  { %v3151_v52 = vpop.f32.mrf.mxu2  ;;  %v3109_v41 = vpop.f32.mrf.mxu0 }
 0x417   :  { %v3065_v23 = vpop.f32.mrf.mxu3  ;;  %v3152_v32 = vadd.f32 %v3151_v52, %v3107_v37  ;;  %v3024_v54 = vpop.f32.mrf.mxu1 }
 0x418   :  { %v3066_v45 = vadd.f32 %v3065_v23, %v3021_v43  ;;  %v14641_v23 = vld [vmem:[#allocation17_spill] sm:$0xff] }
 0x419   :  { %v12336_v2 = vadd.f32 %v3152_v32, %v12138_v5  ;;  %v8253_v5 = vld [vmem:[%s14578_s5 + $0x1a8] sm:$0xf0] }
 0x41a   :  { %v12339_v20 = vadd.f32 %v3066_v45, %v12141_v33  ;;  %3374 = vmatmul.bf16.gmra.mxu1 %v10762_v40  ;;  %v8203_v33 = vld [vmem:[%s14578_s5 + $0x140] sm:$0xf]  ;;  %v8256_v3 = vor.u32 %v9719_v46, %v8253_v5  ;;  %v9718_v45 = vld [vmem:[%s14578_s5 + $0x194] sm:$0xf0] }
 0x41b   :  { %v8204_v11 = vor.u32 %v9708_v53, %v8203_v33 }
 0x41c   :  { %8114 = vmatmul.msk.bf16.gmra.mxu3 %vm942_vm2, %v10768_v56  ;;  %3993 = vmatpush.bf16.msrb.mxu2 %v8256_v3 }
 0x41d   :  { %3889 = vmatpush.bf16.msrb.mxu1 %v8204_v11 }
 0x41e   :  { %v3153_v1 = vpop.f32.mrf.mxu2  ;;  %v3112_v24 = vpop.f32.mrf.mxu0 }
 0x41f   :  { %v3068_v58 = vpop.f32.mrf.mxu3  ;;  %v3154_v61 = vadd.f32 %v3153_v1, %v3109_v41  ;;  %v12368_v7 = vpop.f32.mrf.mxu1  ;;  %v8243_v41 = vld [vmem:[%s14578_s5 + $0x190] sm:$0xf]  ;;  %v8188_v1 = vor.u32 %v9704_v21, %v8187_v27 }
 0x420   :  { %v3069_v35 = vadd.f32 %v3068_v58, %v3024_v54  ;;  %v9717_v54 = vld [vmem:[%s14578_s5 + $0x194] sm:$0xf]  ;;  %v8244_v10 = vor.u32 %v9718_v45, %v8243_v41 }
 0x421   :  { %v12371_v63 = vadd.f32 %v3154_v61, %v12147_v17  ;;  %3462 = vmatmul.bf16.gmra.mxu0 %v10762_v40  ;;  %v8195_v17 = vld [vmem:[%s14578_s5 + $0x130] sm:$0xf]  ;;  %v9706_v40 = vld [vmem:[%s14578_s5 + $0x134] sm:$0xf0]  ;;  %v8248_v28 = vor.u32 %v9717_v54, %v8245_v36 }
 0x422   :  { %v12374_v9 = vadd.f32 %v3069_v35, %v12150_v59  ;;  %v14640_v59 = vld [vmem:[#allocation16_spill] sm:$0xff]  ;;  %v8196_v52 = vor.u32 %v9706_v40, %v8195_v17  ;;  %3926 = vmatpush.bf16.msrb.mxu3 %v8244_v10  ;;  %v8179_v10 = vld [vmem:[%s14578_s5 + $0x110] sm:$0xf]  ;;  %v9702_v36 = vld [vmem:[%s14578_s5 + $0x114] sm:$0xf0] }
 0x423   :  { %8121 = vmatmul.msk.bf16.gmra.mxu2 %vm942_vm2, %v10768_v56  ;;  %v9705_v56 = vld [vmem:[%s14578_s5 + $0x134] sm:$0xf]  ;;  %v8235_v17 = vld [vmem:[%s14578_s5 + $0x180] sm:$0xf]  ;;  %v9716_v40 = vld [vmem:[%s14578_s5 + $0x184] sm:$0xf0] }
 0x424   :  { %3890 = vmatpush.bf16.msrb.mxu1 %v8196_v52  ;;  %3994 = vmatpush.bf16.msrb.mxu2 %v8248_v28  ;;  %v9701_v28 = vld [vmem:[%s14578_s5 + $0x114] sm:$0xf] }
 0x426   :  { %v3156_v15 = vpop.f32.mrf.mxu2  ;;  %v12381_v37 = vpop.f32.mrf.mxu0 }
 0x427   :  { %v12379_v50 = vpop.f32.mrf.mxu3  ;;  %v3157_v25 = vadd.f32 %v3156_v15, %v3112_v24  ;;  %v3029_v8 = vpop.f32.mrf.mxu1 }
 0x428   :  { %3891 = vmatpush.bf16.msrb.mxu1 %v8188_v1 }
 0x429   :  { %v12384_v43 = vadd.f32 %v3157_v25, %v12180_v34  ;;  %v8197_v34 = vld [vmem:[%s14578_s5 + $0x138] sm:$0xf0] }
 0x42a   :  { %3379 = vmatmul.bf16.gmra.mxu1 %v14640_v59  ;;  %v8200_v32 = vor.u32 %v9705_v56, %v8197_v34  ;;  %v9715_v56 = vld [vmem:[%s14578_s5 + $0x184] sm:$0xf] }
 0x42c   :  { %8115 = vmatmul.msk.bf16.gmra.mxu3 %vm942_vm2, %v14641_v23  ;;  %3958 = vmatpush.bf16.msrb.mxu0 %v8200_v32 }
 0x42e   :  { %v12413_v46 = vpop.f32.mrf.mxu2  ;;  %v3117_v33 = vpop.f32.mrf.mxu0 }
 0x42f   :  { %v3073_v5 = vpop.f32.mrf.mxu3  ;;  %v12415_v3 = vpop.f32.mrf.mxu1 }
 0x430   :  { %v3074_v53 = vadd.f32 %v3073_v5, %v3029_v8  ;;  %v8180_v5 = vor.u32 %v9702_v36, %v8179_v10  ;;  %v8171_v10 = vld [vmem:[%s14578_s5 + $0x100] sm:$0xf]  ;;  %v9700_v36 = vld [vmem:[%s14578_s5 + $0x104] sm:$0xf0] }
 0x431   :  { %3467 = vmatmul.bf16.gmra.mxu0 %v14640_v59  ;;  %v8236_v59 = vor.u32 %v9716_v40, %v8235_v17 }
 0x432   :  { %v12418_v11 = vadd.f32 %v3074_v53, %v12204_v29  ;;  %v8189_v29 = vld [vmem:[%s14578_s5 + $0x128] sm:$0xf0]  ;;  %3892 = vmatpush.bf16.msrb.mxu1 %v8180_v5 }
 0x433   :  { %8122 = vmatmul.msk.bf16.gmra.mxu2 %vm942_vm2, %v14641_v23  ;;  %v8192_v58 = vor.u32 %v9703_v30, %v8189_v29  ;;  %3927 = vmatpush.bf16.msrb.mxu3 %v8236_v59  ;;  %v14642_v29 = vld [vmem:[#allocation24_spill] sm:$0xff]  ;;  %v9714_v59 = vld [vmem:[%s14578_s5 + $0x174] sm:$0xf0] }
 0x435   :  { %3959 = vmatpush.bf16.msrb.mxu0 %v8192_v58 }
 0x436   :  { %v3161_v61 = vpop.f32.mrf.mxu2  ;;  %v12437_v15 = vpop.f32.mrf.mxu0 }
 0x437   :  { %v12435_v24 = vpop.f32.mrf.mxu3  ;;  %v3162_v35 = vadd.f32 %v3161_v61, %v3117_v33  ;;  %v3034_v25 = vpop.f32.mrf.mxu1 }
 0x439   :  { %v12440_v8 = vadd.f32 %v3162_v35, %v12216_v47  ;;  %v8237_v47 = vld [vmem:[%s14578_s5 + $0x188] sm:$0xf0] }
 0x43a   :  { %3384 = vmatmul.bf16.gmra.mxu1 %v14632_v6  ;;  %v8240_v52 = vor.u32 %v9715_v56, %v8237_v47  ;;  %v8227_v56 = vld [vmem:[%s14578_s5 + $0x170] sm:$0xf]  ;;  %v9713_v47 = vld [vmem:[%s14578_s5 + $0x174] sm:$0xf] }
 0x43c   :  { %8116 = vmatmul.msk.bf16.gmra.mxu3 %vm942_vm2, %v14633_v26  ;;  %3995 = vmatpush.bf16.msrb.mxu2 %v8240_v52 }
 0x43e   :  { %v12457_v34 = vpop.f32.mrf.mxu2  ;;  %v3122_v32 = vpop.f32.mrf.mxu0 }
 0x43f   :  { %v3078_v23 = vpop.f32.mrf.mxu3  ;;  %v12459_v45 = vpop.f32.mrf.mxu1 }
 0x440   :  { %v3079_v41 = vadd.f32 %v3078_v23, %v3034_v25 }
 0x441   :  { %3472 = vmatmul.bf16.gmra.mxu0 %v14632_v6  ;;  %v8181_v6 = vld [vmem:[%s14578_s5 + $0x118] sm:$0xf0] }
 0x442   :  { %v12462_v54 = vadd.f32 %v3079_v41, %v12234_v38  ;;  %v8184_v38 = vor.u32 %v9701_v28, %v8181_v6  ;;  %v8229_v41 = vld [vmem:[%s14578_s5 + $0x178] sm:$0xf0]  ;;  %v8172_v6 = vor.u32 %v9700_v36, %v8171_v10  ;;  %v9698_v10 = vld [vmem:[%s14578_s5 + $0xf4] sm:$0xf0] }
 0x443   :  { %8123 = vmatmul.msk.bf16.gmra.mxu2 %vm942_vm2, %v14633_v26  ;;  %v14643_v26 = vld [vmem:[#allocation25_spill] sm:$0xff]  ;;  %v8232_v5 = vor.u32 %v9713_v47, %v8229_v41 }
 0x444   :  { %3960 = vmatpush.bf16.msrb.mxu0 %v8184_v38  ;;  %v9699_v38 = vld [vmem:[%s14578_s5 + $0x104] sm:$0xf]  ;;  %3893 = vmatpush.bf16.msrb.mxu1 %v8172_v6  ;;  %v8163_v41 = vld [vmem:[%s14578_s5 + $0xf0] sm:$0xf] }
 0x445   :  { %3996 = vmatpush.bf16.msrb.mxu2 %v8232_v5  ;;  %v8164_v36 = vor.u32 %v9698_v10, %v8163_v41  ;;  %v9712_v5 = vld [vmem:[%s14578_s5 + $0x164] sm:$0xf0]  ;;  %v8155_v10 = vld [vmem:[%s14578_s5 + $0xe0] sm:$0xf] }
 0x446   :  { %v3166_v33 = vpop.f32.mrf.mxu2  ;;  %v12481_v21 = vpop.f32.mrf.mxu0 }
 0x447   :  { %v12479_v53 = vpop.f32.mrf.mxu3  ;;  %v3167_v27 = vadd.f32 %v3166_v33, %v3122_v32  ;;  %v3039_v30 = vpop.f32.mrf.mxu1  ;;  %v8228_v32 = vor.u32 %v9714_v59, %v8227_v56  ;;  %v8173_v33 = vld [vmem:[%s14578_s5 + $0x108] sm:$0xf0] }
 0x448   :  { %3894 = vmatpush.bf16.msrb.mxu1 %v8164_v36  ;;  %v9695_v36 = vld [vmem:[%s14578_s5 + $0xe4] sm:$0xf] }
 0x449   :  { %v12484_v1 = vadd.f32 %v3167_v27, %v12240_v51  ;;  %3928 = vmatpush.bf16.msrb.mxu3 %v8228_v32 }
 0x44a   :  { %3389 = vmatmul.bf16.gmra.mxu1 %v14642_v29 }
 0x44c   :  { %8117 = vmatmul.msk.bf16.gmra.mxu3 %vm942_vm2, %v14643_v26 }
 0x44e   :  { %v12489_v58 = vpop.f32.mrf.mxu2  ;;  %v3127_v35 = vpop.f32.mrf.mxu0 }
 0x44f   :  { %v3083_v61 = vpop.f32.mrf.mxu3  ;;  %v12491_v17 = vpop.f32.mrf.mxu1 }
 0x450   :  { %v3084_v25 = vadd.f32 %v3083_v61, %v3039_v30  ;;  %v8176_v30 = vor.u32 %v9699_v38, %v8173_v33  ;;  %v9711_v33 = vld [vmem:[%s14578_s5 + $0x164] sm:$0xf] }
 0x451   :  { %3477 = vmatmul.bf16.gmra.mxu0 %v14642_v29 }
 0x452   :  { %v12494_v40 = vadd.f32 %v3084_v25, %v12252_v16  ;;  %3961 = vmatpush.bf16.msrb.mxu0 %v8176_v30  ;;  %v8221_v30 = vld [vmem:[%s14578_s5 + $0x168] sm:$0xf0] }
 0x453   :  { %8124 = vmatmul.msk.bf16.gmra.mxu2 %vm942_vm2, %v14643_v26 }
 0x456   :  { %v3171_v51 = vpop.f32.mrf.mxu2  ;;  %v12510_v23 = vpop.f32.mrf.mxu0 }
 0x457   :  { %v12508_v16 = vpop.f32.mrf.mxu3  ;;  %v3172_v52 = vadd.f32 %v3171_v51, %v3127_v35  ;;  %v3044_v28 = vpop.f32.mrf.mxu1 }
 0x459   :  { %v12528_v27 = vadd.f32 %v3172_v52, %v12258_v19 }
 0x45e   :  { %v12530_v29 = vpop.f32.mrf.mxu2  ;;  %v3132_v61 = vpop.f32.mrf.mxu0 }
 0x45f   :  { %v3088_v26 = vpop.f32.mrf.mxu3  ;;  %v12532_v25 = vpop.f32.mrf.mxu1 }
 0x460   :  { %v3089_v35 = vadd.f32 %v3088_v26, %v3044_v28  ;;  %14644 = vst [vmem:[#allocation19_spill] sm:$0xff] %v12532_v25  ;;  %v8165_v28 = vld [vmem:[%s14578_s5 + $0xf8] sm:$0xf0] }
 0x462   :  { %v12535_v51 = vadd.f32 %v3089_v35, %v12270_v18  ;;  %v9697_v18 = vld [vmem:[%s14578_s5 + $0xf4] sm:$0xf] }
 0x463   :  { %v8168_v6 = vor.u32 %v9697_v18, %v8165_v28  ;;  %v9696_v18 = vld [vmem:[%s14578_s5 + $0xe4] sm:$0xf0] }
 0x464   :  { %14645 = vst [vmem:[#allocation14_spill] sm:$0xff] %v12535_v51  ;;  %v8156_v28 = vor.u32 %v9696_v18, %v8155_v10  ;;  %v8381_v18 = vld [vmem:[%s14578_s5 + $0xd0] sm:$0xf] }
 0x465   :  { %3962 = vmatpush.bf16.msrb.mxu0 %v8168_v6 }
 0x466   :  { %v3176_v56 = vpop.f32.mrf.mxu2  ;;  %v12539_v47 = vpop.f32.mrf.mxu0  ;;  %3895 = vmatpush.bf16.msrb.mxu1 %v8156_v28 }
 0x467   :  { %v12537_v59 = vpop.f32.mrf.mxu3  ;;  %v3177_v19 = vadd.f32 %v3176_v56, %v3132_v61  ;;  %14647 = vst [vmem:[#allocation21_spill] sm:$0xff] %v12539_v47  ;;  %v3360_v52 = vpop.f32.mrf.mxu1  ;;  %v8224_v61 = vor.u32 %v9711_v33, %v8221_v30 }
 0x468   :  { %14646 = vst [vmem:[#allocation20_spill] sm:$0xff] %v12537_v59 }
 0x469   :  { %v12542_v32 = vadd.f32 %v3177_v19, %v12276_v57  ;;  %v8219_v57 = vld [vmem:[%s14578_s5 + $0x160] sm:$0xf]  ;;  %3997 = vmatpush.bf16.msrb.mxu2 %v8224_v61 }
 0x46a   :  { %v8220_v38 = vor.u32 %v9712_v5, %v8219_v57  ;;  %v8157_v57 = vld [vmem:[%s14578_s5 + $0xe8] sm:$0xf0]  ;;  %v3555_v5 = vld [vmem:[%s14577_s4] sm:$0x3] }
 0x46b   :  { %14648 = vst [vmem:[#allocation22_spill] sm:$0xff] %v12542_v32  ;;  %v8160_v6 = vor.u32 %v9695_v36, %v8157_v57  ;;  %v12588_v30 = vperm.slane %v3555_v5, 1  ;;  %v8383_v57 = vld [vmem:[%s14578_s5 + $0xd8] sm:$0xf0] }
 0x46c   :  { %3929 = vmatpush.bf16.msrb.mxu3 %v8220_v38  ;;  %v12586_v38 = vperm.slane %v3555_v5, 0 }
 0x46d   :  { %3963 = vmatpush.bf16.msrb.mxu0 %v8160_v6 }
 0x46e   :  { %v12568_v26 = vpop.f32.mrf.mxu2  ;;  %v3448_v56 = vpop.f32.mrf.mxu0 }
 0x46f   :  { %14649 = vst [vmem:[#allocation23_spill] sm:$0xff] %v12568_v26  ;;  %v3404_v35 = vpop.f32.mrf.mxu3  ;;  %v3362_v41 = vpop.f32.mrf.mxu1 }
 0x470   :  { %v3405_v19 = vadd.f32 %v3404_v35, %v3360_v52 }
 0x472   :  { %v3527_v52 = vadd.f32 %v3405_v19, %v12288_v13  ;;  %v9694_v13 = vld [vmem:[%s14578_s5 + $0xd4] sm:$0xf0]  ;;  %v9693_v19 = vld [vmem:[%s14578_s5 + $0xd4] sm:$0xf] }
 0x473   :  { %v8382_v28 = vor.u32 %v9694_v13, %v8381_v18 }
 0x475   :  { %4233 = vmatpush.bf16.msra.mxu3 %v8382_v28 }
 0x476   :  { %v3492_v33 = vpop.f32.mrf.mxu2  ;;  %v3450_v10 = vpop.f32.mrf.mxu0 }
 0x477   :  { %v3406_v61 = vpop.f32.mrf.mxu3  ;;  %v3493_v35 = vadd.f32 %v3492_v33, %v3448_v56  ;;  %v3365_v36 = vpop.f32.mrf.mxu1  ;;  %v3561_v56 = vadd.f32 %v12586_v38, %v3527_v52  ;;  %v8386_v33 = vor.u32 %v9693_v19, %v8383_v57  ;;  %v8333_v52 = vld [vmem:[%s14578_s5 + $0x70] sm:$0xf] }
 0x478   :  { %v3407_v5 = vadd.f32 %v3406_v61, %v3362_v41 }
 0x479   :  { %v3528_v6 = vadd.f32 %v3493_v35, %v12306_v55  ;;  %4301 = vmatpush.bf16.msra.mxu2 %v8386_v33  ;;  %v3589_v26 = vmax.f32 %v3561_v56, 0.0  ;;  %v8373_v56 = vld [vmem:[%s14578_s5 + $0xc0] sm:$0xf] }
 0x47a   :  { %v3529_v47 = vadd.f32 %v3407_v5, %v12309_v44  ;;  %v9682_v44 = vld [vmem:[%s14578_s5 + $0x74] sm:$0xf0]  ;;  %v9692_v5 = vld [vmem:[%s14578_s5 + $0xc4] sm:$0xf0] }
 0x47b   :  { %v3562_v22 = vadd.f32 %v12588_v30, %v3528_v6 }
 0x47c   :  { %v3563_v41 = vadd.f32 %v12586_v38, %v3529_v47 }
 0x47d   :  { %v3590_v49 = vmax.f32 %v3562_v22, 0.0  ;;  %v8334_v22 = vor.u32 %v9682_v44, %v8333_v52  ;;  %v9680_v52 = vld [vmem:[%s14578_s5 + $0x64] sm:$0xf0] }
 0x47e   :  { %v3494_v32 = vpop.f32.mrf.mxu2  ;;  %v3453_v25 = vpop.f32.mrf.mxu0 }
 0x47f   :  { %v3617_v18 = vpack.c.bf16 %v3590_v49, %v3589_v26  ;;  %v3409_v13 = vpop.f32.mrf.mxu3  ;;  %v3495_v59 = vadd.f32 %v3494_v32, %v3450_v10  ;;  %v3367_v39 = vpop.f32.mrf.mxu1  ;;  %v9681_v49 = vld [vmem:[%s14578_s5 + $0x74] sm:$0xf]  ;;  %v8335_v32 = vld [vmem:[%s14578_s5 + $0x78] sm:$0xf0]  ;;  %4197 = vmatpush.bf16.msra.mxu1 %v8334_v22  ;;  %v3591_v26 = vmax.f32 %v3563_v41, 0.0  ;;  %v8374_v41 = vor.u32 %v9692_v5, %v8373_v56 }
 0x480   :  { %v3410_v51 = vadd.f32 %v3409_v13, %v3365_v36 }
 0x481   :  { %v3530_v55 = vadd.f32 %v3495_v59, %v12327_v42  ;;  %v8338_v42 = vor.u32 %v9681_v49, %v8335_v32  ;;  %v4025_v10 = vunpack.c.l.b16 %v3617_v18  ;;  %v8327_v32 = vld [vmem:[%s14578_s5 + $0x68] sm:$0xf0]  ;;  %4234 = vmatpush.bf16.msra.mxu3 %v8374_v41 }
 0x482   :  { %v3531_v59 = vadd.f32 %v3410_v51, %v12330_v4  ;;  %v9691_v4 = vld [vmem:[%s14578_s5 + $0xc4] sm:$0xf]  ;;  %v4026_v51 = vunpack.c.h.b16 %v3617_v18 }
 0x483   :  { %v3564_v47 = vadd.f32 %v12588_v30, %v3530_v55  ;;  %4265 = vmatpush.bf16.msra.mxu0 %v8338_v42  ;;  %v8325_v55 = vld [vmem:[%s14578_s5 + $0x60] sm:$0xf] }
 0x484   :  { %v3565_v6 = vadd.f32 %v12586_v38, %v3531_v59 }
 0x485   :  { %v3592_v61 = vmax.f32 %v3564_v47, 0.0  ;;  %v8326_v47 = vor.u32 %v9680_v52, %v8325_v55 }
 0x486   :  { %v3497_v35 = vpop.f32.mrf.mxu2  ;;  %v3455_v57 = vpop.f32.mrf.mxu0 }
 0x487   :  { %v3618_v19 = vpack.c.bf16 %v3592_v61, %v3591_v26  ;;  %v3411_v36 = vpop.f32.mrf.mxu3  ;;  %v3498_v28 = vadd.f32 %v3497_v35, %v3453_v25  ;;  %v3370_v13 = vpop.f32.mrf.mxu1  ;;  %v8375_v25 = vld [vmem:[%s14578_s5 + $0xc8] sm:$0xf0]  ;;  %4198 = vmatpush.bf16.msra.mxu1 %v8326_v47  ;;  %v9678_v47 = vld [vmem:[%s14578_s5 + $0x54] sm:$0xf0] }
 0x488   :  { %v3412_v33 = vadd.f32 %v3411_v36, %v3367_v39  ;;  %v8378_v22 = vor.u32 %v9691_v4, %v8375_v25  ;;  %v9679_v39 = vld [vmem:[%s14578_s5 + $0x64] sm:$0xf] }
 0x489   :  { %v3698_v44 = vunpack.c.l.b16 %v3618_v19  ;;  %v3699_v49 = vunpack.c.h.b16 %v3618_v19  ;;  %v3532_v18 = vadd.f32 %v3498_v28, %v12336_v2  ;;  %v8330_v42 = vor.u32 %v9679_v39, %v8327_v32 }
 0x48a   :  { %4302 = vmatpush.bf16.msra.mxu2 %v8378_v22  ;;  %v3593_v2 = vmax.f32 %v3565_v6, 0.0  ;;  %v3533_v35 = vadd.f32 %v3412_v33, %v12339_v20 }
 0x48b   :  { %v12648_v59 = vpack.c.b16 %v3699_v49, %v4026_v51  ;;  %v3566_v26 = vadd.f32 %v12588_v30, %v3532_v18  ;;  %v12651_v61 = vpack.c.b16 %v3698_v44, %v4025_v10  ;;  %4266 = vmatpush.bf16.msra.mxu0 %v8330_v42 }
 0x48c   :  { %v3567_v51 = vadd.f32 %v12586_v38, %v3533_v35  ;;  %v8319_v35 = vld [vmem:[%s14578_s5 + $0x58] sm:$0xf0] }
 0x48d   :  { %v3594_v19 = vmax.f32 %v3566_v26, 0.0 }
 0x48e   :  { %v3499_v36 = vpop.f32.mrf.mxu2  ;;  %v3458_v4 = vpop.f32.mrf.mxu0  ;;  %v3595_v33 = vmax.f32 %v3567_v51, 0.0 }
 0x48f   :  { %v3619_v28 = vpack.c.bf16 %v3594_v19, %v3593_v2  ;;  %v3414_v56 = vpop.f32.mrf.mxu3  ;;  %v3500_v5 = vadd.f32 %v3499_v36, %v3455_v57  ;;  %v3372_v25 = vpop.f32.mrf.mxu1  ;;  %v3071_v57 = vadd.f32 %v12379_v50, %v12368_v7  ;;  %v9677_v7 = vld [vmem:[%s14578_s5 + $0x54] sm:$0xf]  ;;  %v8365_v19 = vld [vmem:[%s14578_s5 + $0xb0] sm:$0xf]  ;;  %v9690_v36 = vld [vmem:[%s14578_s5 + $0xb4] sm:$0xf0] }
 0x490   :  { %v3415_v41 = vadd.f32 %v3414_v56, %v3370_v13 }
 0x491   :  { %v3700_v55 = vunpack.c.l.b16 %v3619_v28  ;;  %v3701_v52 = vunpack.c.h.b16 %v3619_v28  ;;  %v3534_v10 = vadd.f32 %v3500_v5, %v12371_v63  ;;  %v3191_v51 = vadd.f32 %v3071_v57, %v12183_v12 }
 0x492   :  { %v3535_v20 = vadd.f32 %v3415_v41, %v12374_v9  ;;  %v8317_v9 = vld [vmem:[%s14578_s5 + $0x50] sm:$0xf]  ;;  %v9689_v41 = vld [vmem:[%s14578_s5 + $0xb4] sm:$0xf] }
 0x493   :  { %v3718_v18 = vpack.c.b16 %v3700_v55, %v3698_v44  ;;  %v3719_v22 = vpack.c.b16 %v3701_v52, %v3699_v49  ;;  %v3568_v6 = vadd.f32 %v12588_v30, %v3534_v10  ;;  %v8318_v2 = vor.u32 %v9678_v47, %v8317_v9 }
 0x494   :  { %v3569_v50 = vadd.f32 %v12586_v38, %v3535_v20  ;;  %v8366_v10 = vor.u32 %v9690_v36, %v8365_v19 }
 0x495   :  { %v3596_v39 = vmax.f32 %v3568_v6, 0.0  ;;  %3896 = vmatmul.bf16.vlgmr.msrb.gmra.mxu1 %v3718_v18  ;;  %8265 = vmatmul.msk.bf16.vlgmr.msrb.gmra.mxu3 %vm382_vm0, %v3719_v22 }
 0x496   :  { %3964 = vmatmul.bf16.vlgmr.msrb.gmra.mxu0 %v3718_v18  ;;  %8270 = vmatmul.msk.bf16.vlgmr.msrb.gmra.mxu2 %vm382_vm0, %v3719_v22  ;;  %v3502_v13 = vpop.f32.mrf.mxu2  ;;  %v3460_v49 = vpop.f32.mrf.mxu0  ;;  %v3159_v22 = vadd.f32 %v12413_v46, %v12381_v37 }
 0x497   :  { %v3620_v32 = vpack.c.bf16 %v3596_v39, %v3595_v33  ;;  %v3416_v63 = vpop.f32.mrf.mxu3  ;;  %v3503_v44 = vadd.f32 %v3502_v13, %v3458_v4  ;;  %v3375_v26 = vpop.f32.mrf.mxu1  ;;  %v8322_v4 = vor.u32 %v9677_v7, %v8319_v35  ;;  %4199 = vmatpush.bf16.msra.mxu1 %v8318_v2  ;;  %4235 = vmatpush.bf16.msra.mxu3 %v8366_v10  ;;  %v3597_v33 = vmax.f32 %v3569_v50, 0.0  ;;  %v8309_v50 = vld [vmem:[%s14578_s5 + $0x40] sm:$0xf]  ;;  %v9688_v35 = vld [vmem:[%s14578_s5 + $0xa4] sm:$0xf0] }
 0x498   :  { %v3417_v42 = vadd.f32 %v3416_v63, %v3372_v25  ;;  %v8367_v25 = vld [vmem:[%s14578_s5 + $0xb8] sm:$0xf0]  ;;  %v3192_v12 = vadd.f32 %v3159_v22, %v12201_v60  ;;  %v9675_v60 = vld [vmem:[%s14578_s5 + $0x44] sm:$0xf]  ;;  %v8357_v2 = vld [vmem:[%s14578_s5 + $0xa0] sm:$0xf] }
 0x499   :  { %v3536_v28 = vadd.f32 %v3503_v44, %v12384_v43  ;;  %v3702_v56 = vunpack.c.l.b16 %v3620_v32  ;;  %v3703_v5 = vunpack.c.h.b16 %v3620_v32  ;;  %v8370_v18 = vor.u32 %v9689_v41, %v8367_v25  ;;  %4267 = vmatpush.bf16.msra.mxu0 %v8322_v4  ;;  %v9687_v41 = vld [vmem:[%s14578_s5 + $0xa4] sm:$0xf]  ;;  %v8359_v25 = vld [vmem:[%s14578_s5 + $0xa8] sm:$0xf0] }
 0x49a   :  { %v3537_v39 = vadd.f32 %v3417_v42, %v3191_v51  ;;  %v9676_v42 = vld [vmem:[%s14578_s5 + $0x44] sm:$0xf0]  ;;  %v8358_v10 = vor.u32 %v9688_v35, %v8357_v2 }
 0x49b   :  { %v3570_v43 = vadd.f32 %v12588_v30, %v3536_v28  ;;  %v12692_v6 = vpack.c.b16 %v3702_v56, %v3700_v55  ;;  %v12694_v20 = vpack.c.b16 %v3703_v5, %v3701_v52  ;;  %4303 = vmatpush.bf16.msra.mxu2 %v8370_v18  ;;  %v8362_v18 = vor.u32 %v9687_v41, %v8359_v25 }
 0x49c   :  { %v3571_v47 = vadd.f32 %v12586_v38, %v3537_v39  ;;  %4236 = vmatpush.bf16.msra.mxu3 %v8358_v10 }
 0x49d   :  { %v3598_v13 = vmax.f32 %v3570_v43, 0.0 }
 0x49e   :  { %v3504_v32 = vpop.f32.mrf.mxu2  ;;  %v3463_v9 = vpop.f32.mrf.mxu0  ;;  %v3599_v22 = vmax.f32 %v3571_v47, 0.0 }
 0x49f   :  { %v3621_v57 = vpack.c.bf16 %v3598_v13, %v3597_v33  ;;  %v3419_v63 = vpop.f32.mrf.mxu3  ;;  %v3505_v44 = vadd.f32 %v3504_v32, %v3460_v49  ;;  %v3377_v46 = vpop.f32.mrf.mxu1  ;;  %v8310_v49 = vor.u32 %v9676_v42, %v8309_v50  ;;  %v8301_v32 = vld [vmem:[%s14578_s5 + $0x30] sm:$0xf]  ;;  %4304 = vmatpush.bf16.msra.mxu2 %v8362_v18 }
 0x4a0   :  { %v3420_v37 = vadd.f32 %v3419_v63, %v3375_v26  ;;  %v8311_v26 = vld [vmem:[%s14578_s5 + $0x48] sm:$0xf0] }
 0x4a1   :  { %v3704_v55 = vunpack.c.l.b16 %v3621_v57  ;;  %v3705_v7 = vunpack.c.h.b16 %v3621_v57  ;;  %v3538_v52 = vadd.f32 %v3505_v44, %v3192_v12  ;;  %v8314_v4 = vor.u32 %v9675_v60, %v8311_v26  ;;  %4200 = vmatpush.bf16.msra.mxu1 %v8310_v49 }
 0x4a2   :  { %v3539_v51 = vadd.f32 %v3420_v37, %v12418_v11  ;;  %v3164_v60 = vadd.f32 %v12457_v34, %v12437_v15 }
 0x4a3   :  { %v3572_v19 = vadd.f32 %v12588_v30, %v3538_v52  ;;  %v12717_v36 = vpack.c.b16 %v3704_v55, %v3702_v56  ;;  %v12719_v28 = vpack.c.b16 %v3705_v7, %v3703_v5  ;;  %v3076_v56 = vadd.f32 %v12435_v24, %v12415_v3  ;;  %4268 = vmatpush.bf16.msra.mxu0 %v8314_v4  ;;  %v9674_v3 = vld [vmem:[%s14578_s5 + $0x34] sm:$0xf0]  ;;  %v9673_v24 = vld [vmem:[%s14578_s5 + $0x34] sm:$0xf] }
 0x4a4   :  { %v3573_v12 = vadd.f32 %v12586_v38, %v3539_v51  ;;  %v8302_v44 = vor.u32 %v9674_v3, %v8301_v32  ;;  %v3196_v4 = vadd.f32 %v3164_v60, %v12231_v0  ;;  %v9685_v0 = vld [vmem:[%s14578_s5 + $0x94] sm:$0xf] }
 0x4a5   :  { %v3600_v43 = vmax.f32 %v3572_v19, 0.0  ;;  %3901 = vmatmul.bf16.gmra.mxu1 %v12717_v36  ;;  %8266 = vmatmul.msk.bf16.gmra.mxu3 %vm382_vm0, %v12719_v28  ;;  %v3195_v42 = vadd.f32 %v3076_v56, %v12219_v48 }
 0x4a6   :  { %3969 = vmatmul.bf16.gmra.mxu0 %v12717_v36  ;;  %8271 = vmatmul.msk.bf16.gmra.mxu2 %vm382_vm0, %v12719_v28  ;;  %v3507_v5 = vpop.f32.mrf.mxu2  ;;  %v3465_v13 = vpop.f32.mrf.mxu0  ;;  %v3601_v35 = vmax.f32 %v3573_v12, 0.0  ;;  %v8295_v12 = vld [vmem:[%s14578_s5 + $0x28] sm:$0xf0] }
 0x4a7   :  { %v3622_v11 = vpack.c.bf16 %v3600_v43, %v3599_v22  ;;  %v3421_v33 = vpop.f32.mrf.mxu3  ;;  %v3508_v39 = vadd.f32 %v3507_v5, %v3463_v9  ;;  %v3380_v63 = vpop.f32.mrf.mxu1  ;;  %v8303_v9 = vld [vmem:[%s14578_s5 + $0x38] sm:$0xf0]  ;;  %4201 = vmatpush.bf16.msra.mxu1 %v8302_v44  ;;  %v9686_v43 = vld [vmem:[%s14578_s5 + $0x94] sm:$0xf0] }
 0x4a8   :  { %v3422_v57 = vadd.f32 %v3421_v33, %v3377_v46  ;;  %v8306_v50 = vor.u32 %v9673_v24, %v8303_v9  ;;  %v8351_v5 = vld [vmem:[%s14578_s5 + $0x98] sm:$0xf0]  ;;  %v9672_v33 = vld [vmem:[%s14578_s5 + $0x24] sm:$0xf0]  ;;  %v9671_v24 = vld [vmem:[%s14578_s5 + $0x24] sm:$0xf] }
 0x4a9   :  { %v3540_v37 = vadd.f32 %v3508_v39, %v12440_v8  ;;  %v3706_v47 = vunpack.c.l.b16 %v3622_v11  ;;  %v3707_v52 = vunpack.c.h.b16 %v3622_v11  ;;  %v8293_v11 = vld [vmem:[%s14578_s5 + $0x20] sm:$0xf]  ;;  %v8354_v3 = vor.u32 %v9685_v0, %v8351_v5 }
 0x4aa   :  { %4269 = vmatpush.bf16.msra.mxu0 %v8306_v50  ;;  %v3541_v2 = vadd.f32 %v3422_v57, %v3195_v42  ;;  %v8294_v57 = vor.u32 %v9672_v33, %v8293_v11  ;;  %v8341_v33 = vld [vmem:[%s14578_s5 + $0x80] sm:$0xf] }
 0x4ab   :  { %v3574_v46 = vadd.f32 %v12588_v30, %v3540_v37  ;;  %v12754_v49 = vpack.c.b16 %v3706_v47, %v3704_v55  ;;  %v12756_v26 = vpack.c.b16 %v3707_v52, %v3705_v7  ;;  %v8349_v7 = vld [vmem:[%s14578_s5 + $0x90] sm:$0xf]  ;;  %4305 = vmatpush.bf16.msra.mxu2 %v8354_v3 }
 0x4ac   :  { %v3575_v10 = vadd.f32 %v12586_v38, %v3541_v2  ;;  %v8350_v56 = vor.u32 %v9686_v43, %v8349_v7  ;;  %4202 = vmatpush.bf16.msra.mxu1 %v8294_v57 }
 0x4ad   :  { %v3602_v19 = vmax.f32 %v3574_v46, 0.0 }
 0x4ae   :  { %v3509_v8 = vpop.f32.mrf.mxu2  ;;  %v3468_v51 = vpop.f32.mrf.mxu0  ;;  %4237 = vmatpush.bf16.msra.mxu3 %v8350_v56  ;;  %v3603_v44 = vmax.f32 %v3575_v10, 0.0  ;;  %v8285_v10 = vld [vmem:[%s14578_s5 + $0x10] sm:$0xf] }
 0x4af   :  { %v3623_v41 = vpack.c.bf16 %v3602_v19, %v3601_v35  ;;  %v3424_v25 = vpop.f32.mrf.mxu3  ;;  %v3510_v48 = vadd.f32 %v3509_v8, %v3465_v13  ;;  %v3382_v15 = vpop.f32.mrf.mxu1 }
 0x4b0   :  { %v3425_v55 = vadd.f32 %v3424_v25, %v3380_v63  ;;  %v8298_v63 = vor.u32 %v9671_v24, %v8295_v12 }
 0x4b1   :  { %v3708_v34 = vunpack.c.l.b16 %v3623_v41  ;;  %v3709_v18 = vunpack.c.h.b16 %v3623_v41  ;;  %v3542_v22 = vadd.f32 %v3510_v48, %v3196_v4  ;;  %v3169_v4 = vadd.f32 %v12489_v58, %v12481_v21 }
 0x4b2   :  { %v3543_v9 = vadd.f32 %v3425_v55, %v12462_v54  ;;  %4270 = vmatpush.bf16.msra.mxu0 %v8298_v63  ;;  %v8343_v63 = vld [vmem:[%s14578_s5 + $0x88] sm:$0xf0] }
 0x4b3   :  { %v3576_v39 = vadd.f32 %v12588_v30, %v3542_v22  ;;  %v12779_v13 = vpack.c.b16 %v3708_v34, %v3706_v47  ;;  %v12781_v32 = vpack.c.b16 %v3709_v18, %v3707_v52  ;;  %v3081_v47 = vadd.f32 %v12479_v53, %v12459_v45 }
 0x4b4   :  { %v3577_v2 = vadd.f32 %v12586_v38, %v3543_v9  ;;  %v3200_v22 = vadd.f32 %v3169_v4, %v12249_v31  ;;  %v9683_v31 = vld [vmem:[%s14578_s5 + $0x84] sm:$0xf]  ;;  %v9668_v9 = vld [vmem:[%s14578_s5 + $0x4] sm:$0xf0]  ;;  %v9750_v4 = vld [vmem:[%s14578_s5 + $0x294] sm:$0xf0] }
 0x4b5   :  { %v3604_v37 = vmax.f32 %v3576_v39, 0.0  ;;  %3906 = vmatmul.bf16.gmra.mxu1 %v12779_v13  ;;  %8267 = vmatmul.msk.bf16.gmra.mxu3 %vm382_vm0, %v12781_v32  ;;  %v3199_v53 = vadd.f32 %v3081_v47, %v12243_v62  ;;  %v9669_v62 = vld [vmem:[%s14578_s5 + $0x14] sm:$0xf]  ;;  %v9684_v39 = vld [vmem:[%s14578_s5 + $0x84] sm:$0xf0] }
 0x4b6   :  { %3974 = vmatmul.bf16.gmra.mxu0 %v12779_v13  ;;  %8272 = vmatmul.msk.bf16.gmra.mxu2 %vm382_vm0, %v12781_v32  ;;  %v3512_v52 = vpop.f32.mrf.mxu2  ;;  %v3470_v46 = vpop.f32.mrf.mxu0  ;;  %v3605_v21 = vmax.f32 %v3577_v2, 0.0  ;;  %v8342_v57 = vor.u32 %v9684_v39, %v8341_v33 }
 0x4b7   :  { %v3624_v50 = vpack.c.bf16 %v3604_v37, %v3603_v44  ;;  %v3426_v42 = vpop.f32.mrf.mxu3  ;;  %v3513_v60 = vadd.f32 %v3512_v52, %v3468_v51  ;;  %v3385_v8 = vpop.f32.mrf.mxu1  ;;  %v8277_v44 = vld [vmem:[%s14578_s5] sm:$0xf]  ;;  %v8346_v37 = vor.u32 %v9683_v31, %v8343_v63  ;;  %v9667_v52 = vld [vmem:[%s14578_s5 + $0x4] sm:$0xf] }
 0x4b8   :  { %v3427_v54 = vadd.f32 %v3426_v42, %v3382_v15  ;;  %v8278_v47 = vor.u32 %v9668_v9, %v8277_v44  ;;  %4238 = vmatpush.bf16.msra.mxu3 %v8342_v57  ;;  %v8525_v57 = vld [vmem:[%s14578_s5 + $0x288] sm:$0xf0] }
 0x4b9   :  { %v3544_v35 = vadd.f32 %v3513_v60, %v12484_v1  ;;  %v3710_v19 = vunpack.c.l.b16 %v3624_v50  ;;  %v3711_v45 = vunpack.c.h.b16 %v3624_v50  ;;  %v9670_v1 = vld [vmem:[%s14578_s5 + $0x14] sm:$0xf0]  ;;  %v8279_v50 = vld [vmem:[%s14578_s5 + $0x8] sm:$0xf0]  ;;  %4306 = vmatpush.bf16.msra.mxu2 %v8346_v37 }
 0x4ba   :  { %v3545_v51 = vadd.f32 %v3427_v54, %v3199_v53  ;;  %v8286_v15 = vor.u32 %v9670_v1, %v8285_v10  ;;  %v8282_v54 = vor.u32 %v9667_v52, %v8279_v50  ;;  %v14650_v50 = vld [vmem:[#allocation12_spill] sm:$0xff] }
 0x4bb   :  { %v3578_v41 = vadd.f32 %v12588_v30, %v3544_v35  ;;  %v12804_v25 = vpack.c.b16 %v3710_v19, %v3708_v34  ;;  %v12806_v48 = vpack.c.b16 %v3711_v45, %v3709_v18  ;;  %v8287_v34 = vld [vmem:[%s14578_s5 + $0x18] sm:$0xf0] }
 0x4bc   :  { %v8290_v55 = vor.u32 %v9669_v62, %v8287_v34  ;;  %4203 = vmatpush.bf16.msra.mxu1 %v8286_v15  ;;  %v3579_v56 = vadd.f32 %v12586_v38, %v3545_v51  ;;  %v8483_v62 = vld [vmem:[%s14578_s5 + $0x230] sm:$0xf]  ;;  %v9738_v34 = vld [vmem:[%s14578_s5 + $0x234] sm:$0xf0] }
 0x4bd   :  { %v3606_v58 = vmax.f32 %v3578_v41, 0.0 }
 0x4be   :  { %v3514_v18 = vpop.f32.mrf.mxu2  ;;  %v3473_v11 = vpop.f32.mrf.mxu0  ;;  %4271 = vmatpush.bf16.msra.mxu0 %v8290_v55  ;;  %v3607_v53 = vmax.f32 %v3579_v56, 0.0  ;;  %v8485_v55 = vld [vmem:[%s14578_s5 + $0x238] sm:$0xf0]  ;;  %v8523_v56 = vld [vmem:[%s14578_s5 + $0x280] sm:$0xf] }
 0x4bf   :  { %v12821_v7 = vpack.c.bf16 %v3606_v58, %v3605_v21  ;;  %v3429_v43 = vpop.f32.mrf.mxu3  ;;  %v3515_v0 = vadd.f32 %v3514_v18, %v3470_v46  ;;  %v3387_v35 = vpop.f32.mrf.mxu1  ;;  %v9737_v18 = vld [vmem:[%s14578_s5 + $0x234] sm:$0xf] }
 0x4c0   :  { %v3430_v5 = vadd.f32 %v3429_v43, %v3385_v8  ;;  %4204 = vmatpush.bf16.msra.mxu1 %v8278_v47  ;;  %v8488_v31 = vor.u32 %v9737_v18, %v8485_v55 }
 0x4c1   :  { %v3712_v3 = vunpack.c.l.b16 %v12821_v7  ;;  %v3713_v24 = vunpack.c.h.b16 %v12821_v7  ;;  %v3546_v12 = vadd.f32 %v3515_v0, %v3200_v22  ;;  %v8484_v0 = vor.u32 %v9738_v34, %v8483_v62  ;;  %v14653_v62 = vld [vmem:[#allocation20_spill] sm:$0xff] }
 0x4c2   :  { %v3547_v2 = vadd.f32 %v3430_v5, %v12494_v40  ;;  %v8531_v40 = vld [vmem:[%s14578_s5 + $0x290] sm:$0xf]  ;;  %4272 = vmatpush.bf16.msra.mxu0 %v8282_v54  ;;  %v9748_v5 = vld [vmem:[%s14578_s5 + $0x284] sm:$0xf0] }
 0x4c3   :  { %v3580_v42 = vadd.f32 %v12588_v30, %v3546_v12  ;;  %v12851_v60 = vpack.c.b16 %v3712_v3, %v3710_v19  ;;  %v12853_v46 = vpack.c.b16 %v3713_v24, %v3711_v45  ;;  %v3086_v19 = vadd.f32 %v12508_v16, %v12491_v17  ;;  %v9749_v17 = vld [vmem:[%s14578_s5 + $0x294] sm:$0xf]  ;;  %v8533_v16 = vld [vmem:[%s14578_s5 + $0x298] sm:$0xf0]  ;;  %v9736_v34 = vld [vmem:[%s14578_s5 + $0x224] sm:$0xf0] }
 0x4c4   :  { %v8532_v1 = vor.u32 %v9750_v4, %v8531_v40  ;;  %v3581_v21 = vadd.f32 %v12586_v38, %v3547_v2  ;;  %v8536_v15 = vor.u32 %v9749_v17, %v8533_v16  ;;  %v8524_v12 = vor.u32 %v9748_v5, %v8523_v56  ;;  %4511 = vmatpush.bf16.msrb.mxu1 %v8484_v0  ;;  %v14652_v16 = vld [vmem:[#allocation19_spill] sm:$0xff]  ;;  %v8477_v0 = vld [vmem:[%s14578_s5 + $0x228] sm:$0xf0]  ;;  %v8467_v56 = vld [vmem:[%s14578_s5 + $0x210] sm:$0xf] }
 0x4c5   :  { %v3608_v8 = vmax.f32 %v3580_v42, 0.0  ;;  %3911 = vmatmul.bf16.gmra.mxu1 %v12851_v60  ;;  %8268 = vmatmul.msk.bf16.gmra.mxu3 %vm382_vm0, %v12853_v46  ;;  %v3203_v33 = vadd.f32 %v3086_v19, %v12261_v14 }
 0x4c6   :  { %3979 = vmatmul.bf16.gmra.mxu0 %v12851_v60  ;;  %8273 = vmatmul.msk.bf16.gmra.mxu2 %vm382_vm0, %v12853_v46  ;;  %v3517_v45 = vpop.f32.mrf.mxu2  ;;  %v3475_v39 = vpop.f32.mrf.mxu0  ;;  %v3609_v14 = vmax.f32 %v3581_v21, 0.0  ;;  %v3091_v21 = vadd.f32 %v14653_v62, %v14652_v16 }
 0x4c7   :  { %v3626_v41 = vpack.c.bf16 %v3608_v8, %v3607_v53  ;;  %v3431_v51 = vpop.f32.mrf.mxu3  ;;  %v3518_v10 = vadd.f32 %v3517_v45, %v3473_v11  ;;  %4547 = vmatpush.bf16.msrb.mxu3 %v8532_v1  ;;  %v9747_v11 = vld [vmem:[%s14578_s5 + $0x284] sm:$0xf]  ;;  %4615 = vmatpush.bf16.msrb.mxu2 %v8536_v15  ;;  %v14651_v45 = vld [vmem:[#allocation14_spill] sm:$0xff]  ;;  %v8475_v15 = vld [vmem:[%s14578_s5 + $0x220] sm:$0xf] }
 0x4c8   :  { %v3432_v58 = vadd.f32 %v3431_v51, %v3387_v35  ;;  %v8528_v37 = vor.u32 %v9747_v11, %v8525_v57  ;;  %4579 = vmatpush.bf16.msrb.mxu0 %v8488_v31  ;;  %v8469_v31 = vld [vmem:[%s14578_s5 + $0x218] sm:$0xf0]  ;;  %v14654_v57 = vld [vmem:[#allocation22_spill] sm:$0xff] }
 0x4c9   :  { %v3548_v22 = vadd.f32 %v3518_v10, %v12528_v27  ;;  %v3714_v7 = vunpack.c.l.b16 %v3626_v41  ;;  %v3715_v43 = vunpack.c.h.b16 %v3626_v41  ;;  %v3174_v27 = vadd.f32 %v12530_v29, %v12510_v23  ;;  %v3390_v29 = vpop.f32.mrf.mxu1 }
 0x4ca   :  { %v3549_v47 = vadd.f32 %v3432_v58, %v3203_v33 }
 0x4cb   :  { %v3582_v63 = vadd.f32 %v12588_v30, %v3548_v22  ;;  %v12906_v44 = vpack.c.b16 %v3714_v7, %v3712_v3  ;;  %v12908_v9 = vpack.c.b16 %v3715_v43, %v3713_v24  ;;  %4548 = vmatpush.bf16.msrb.mxu3 %v8524_v12  ;;  %4616 = vmatpush.bf16.msrb.mxu2 %v8528_v37 }
 0x4cc   :  { %v3204_v42 = vadd.f32 %v3174_v27, %v14650_v50  ;;  %v3583_v3 = vadd.f32 %v12586_v38, %v3549_v47  ;;  %v9734_v27 = vld [vmem:[%s14578_s5 + $0x214] sm:$0xf0] }
 0x4cd   :  { %v3610_v23 = vmax.f32 %v3582_v63, 0.0  ;;  %v8468_v37 = vor.u32 %v9734_v27, %v8467_v56  ;;  %v9746_v47 = vld [vmem:[%s14578_s5 + $0x274] sm:$0xf0]  ;;  %v9744_v27 = vld [vmem:[%s14578_s5 + $0x264] sm:$0xf0] }
 0x4ce   :  { %v3519_v52 = vpop.f32.mrf.mxu2  ;;  %v3478_v10 = vpop.f32.mrf.mxu0  ;;  %v3611_v1 = vmax.f32 %v3583_v3, 0.0  ;;  %v14657_v3 = vld [vmem:[#allocation23_spill] sm:$0xff] }
 0x4cf   :  { %v3627_v54 = vpack.c.bf16 %v3610_v23, %v3609_v14  ;;  %v3434_v2 = vpop.f32.mrf.mxu3  ;;  %v3520_v35 = vadd.f32 %v3519_v52, %v3475_v39  ;;  %v9733_v39 = vld [vmem:[%s14578_s5 + $0x214] sm:$0xf]  ;;  %v8515_v14 = vld [vmem:[%s14578_s5 + $0x270] sm:$0xf] }
 0x4d0   :  { %v3435_v53 = vadd.f32 %v3434_v2, %v3390_v29  ;;  %v9745_v23 = vld [vmem:[%s14578_s5 + $0x274] sm:$0xf]  ;;  %v14655_v52 = vld [vmem:[#allocation13_spill] sm:$0xff]  ;;  %v8517_v2 = vld [vmem:[%s14578_s5 + $0x278] sm:$0xf0] }
 0x4d1   :  { %v3716_v24 = vunpack.c.l.b16 %v3627_v54  ;;  %v3717_v8 = vunpack.c.h.b16 %v3627_v54  ;;  %v3550_v19 = vadd.f32 %v3520_v35, %v3204_v42  ;;  %v3392_v11 = vpop.f32.mrf.mxu1  ;;  %v3207_v50 = vadd.f32 %v3091_v21, %v14655_v52  ;;  %v8451_v52 = vld [vmem:[%s14578_s5 + $0x1f0] sm:$0xf] }
 0x4d2   :  { %v3551_v40 = vadd.f32 %v3435_v53, %v14651_v45  ;;  %v8472_v42 = vor.u32 %v9733_v39, %v8469_v31  ;;  %v8516_v54 = vor.u32 %v9746_v47, %v8515_v14  ;;  %v14656_v53 = vld [vmem:[#allocation21_spill] sm:$0xff] }
 0x4d3   :  { %v3584_v4 = vadd.f32 %v12588_v30, %v3550_v19  ;;  %v12914_v41 = vpack.c.b16 %v3716_v24, %v3714_v7  ;;  %v12916_v51 = vpack.c.b16 %v3717_v8, %v3715_v43  ;;  %v8476_v7 = vor.u32 %v9736_v34, %v8475_v15  ;;  %v9735_v43 = vld [vmem:[%s14578_s5 + $0x224] sm:$0xf] }
 0x4d4   :  { %v3585_v5 = vadd.f32 %v12586_v38, %v3551_v40  ;;  %v8480_v33 = vor.u32 %v9735_v43, %v8477_v0  ;;  %v3179_v19 = vadd.f32 %v14657_v3, %v14656_v53  ;;  %v8520_v40 = vor.u32 %v9745_v23, %v8517_v2  ;;  %4549 = vmatpush.bf16.msrb.mxu3 %v8516_v54  ;;  %v8453_v2 = vld [vmem:[%s14578_s5 + $0x1f8] sm:$0xf0]  ;;  %v8499_v53 = vld [vmem:[%s14578_s5 + $0x250] sm:$0xf]  ;;  %v9742_v3 = vld [vmem:[%s14578_s5 + $0x254] sm:$0xf0] }
 0x4d5   :  { %v3612_v17 = vmax.f32 %v3584_v4, 0.0  ;;  %3916 = vmatmul.bf16.gmra.mxu1 %v12914_v41  ;;  %8269 = vmatmul.msk.bf16.gmra.mxu3 %vm382_vm0, %v12916_v51 }
 0x4d6   :  { %3984 = vmatmul.bf16.gmra.mxu0 %v12914_v41  ;;  %8274 = vmatmul.msk.bf16.gmra.mxu2 %vm382_vm0, %v12916_v51  ;;  %v3522_v58 = vpop.f32.mrf.mxu2  ;;  %v3480_v62 = vpop.f32.mrf.mxu0 }
 0x4d7   :  { %v3628_v18 = vpack.c.bf16 %v3612_v17, %v3611_v1  ;;  %v3436_v55 = vpop.f32.mrf.mxu3  ;;  %v3523_v22 = vadd.f32 %v3522_v58, %v3478_v10  ;;  %4512 = vmatpush.bf16.msrb.mxu1 %v8476_v7  ;;  %4580 = vmatpush.bf16.msrb.mxu0 %v8480_v33  ;;  %v3613_v1 = vmax.f32 %v3585_v5, 0.0  ;;  %v14658_v58 = vld [vmem:[#allocation18_spill] sm:$0xff] }
 0x4d8   :  { %v3437_v12 = vadd.f32 %v3436_v55, %v3392_v11  ;;  %4617 = vmatpush.bf16.msrb.mxu2 %v8520_v40  ;;  %v3208_v15 = vadd.f32 %v3179_v19, %v14658_v58  ;;  %v9731_v11 = vld [vmem:[%s14578_s5 + $0x204] sm:$0xf]  ;;  %v9741_v19 = vld [vmem:[%s14578_s5 + $0x254] sm:$0xf]  ;;  %v8501_v40 = vld [vmem:[%s14578_s5 + $0x258] sm:$0xf0] }
 0x4d9   :  { %v3552_v63 = vadd.f32 %v3523_v22, %v14654_v57  ;;  %v4363_v29 = vunpack.c.l.b16 %v3628_v18  ;;  %v4364_v35 = vunpack.c.h.b16 %v3628_v18  ;;  %v9743_v57 = vld [vmem:[%s14578_s5 + $0x264] sm:$0xf]  ;;  %v8445_v58 = vld [vmem:[%s14578_s5 + $0x1e8] sm:$0xf0] }
 0x4da   :  { %v3553_v17 = vadd.f32 %v3437_v12, %v3207_v50  ;;  %v9730_v50 = vld [vmem:[%s14578_s5 + $0x1f4] sm:$0xf0] }
 0x4db   :  { %v3586_v45 = vadd.f32 %v12588_v30, %v3552_v63  ;;  %v12968_v4 = vpack.c.b16 %v4363_v29, %v3716_v24  ;;  %v12970_v10 = vpack.c.b16 %v4364_v35, %v3717_v8  ;;  %4513 = vmatpush.bf16.msrb.mxu1 %v8468_v37  ;;  %4581 = vmatpush.bf16.msrb.mxu0 %v8472_v42  ;;  %v8509_v63 = vld [vmem:[%s14578_s5 + $0x268] sm:$0xf0]  ;;  %v9729_v42 = vld [vmem:[%s14578_s5 + $0x1f4] sm:$0xf] }
 0x4dc   :  { %v3587_v55 = vadd.f32 %v12586_v38, %v3553_v17  ;;  %v8459_v38 = vld [vmem:[%s14578_s5 + $0x200] sm:$0xf]  ;;  %v8512_v37 = vor.u32 %v9743_v57, %v8509_v63  ;;  %v8452_v54 = vor.u32 %v9730_v50, %v8451_v52  ;;  %v9728_v17 = vld [vmem:[%s14578_s5 + $0x1e4] sm:$0xf0]  ;;  %v8681_v63 = vld [vmem:[%s14578_s5 + $0x370] sm:$0xf] }
 0x4dd   :  { %v3614_v16 = vmax.f32 %v3586_v45, 0.0  ;;  %v8500_v45 = vor.u32 %v9742_v3, %v8499_v53  ;;  %v8683_v52 = vld [vmem:[%s14578_s5 + $0x378] sm:$0xf0] }
 0x4de   :  { %v3524_v21 = vpop.f32.mrf.mxu2  ;;  %v3615_v56 = vmax.f32 %v3587_v55, 0.0  ;;  %4618 = vmatpush.bf16.msrb.mxu2 %v8512_v37  ;;  %v9725_v55 = vld [vmem:[%s14578_s5 + $0x1d4] sm:$0xf]  ;;  %v9778_v37 = vld [vmem:[%s14578_s5 + $0x374] sm:$0xf0] }
 0x4df   :  { %v3629_v34 = vpack.c.bf16 %v3614_v16, %v3613_v1  ;;  %v3525_v18 = vadd.f32 %v3524_v21, %v3480_v62  ;;  %v8443_v1 = vld [vmem:[%s14578_s5 + $0x1e0] sm:$0xf]  ;;  %v8504_v16 = vor.u32 %v9741_v19, %v8501_v40  ;;  %v9727_v21 = vld [vmem:[%s14578_s5 + $0x1e4] sm:$0xf]  ;;  %v8633_v19 = vld [vmem:[%s14578_s5 + $0x310] sm:$0xf] }
 0x4e0   :  { %v8444_v62 = vor.u32 %v9728_v17, %v8443_v1  ;;  %v9765_v40 = vld [vmem:[%s14578_s5 + $0x314] sm:$0xf]  ;;  %v8635_v17 = vld [vmem:[%s14578_s5 + $0x318] sm:$0xf0] }
 0x4e1   :  { %v4698_v22 = vunpack.c.h.b16 %v3629_v34  ;;  %v3554_v24 = vadd.f32 %v3525_v18, %v3208_v15  ;;  %v4697_v7 = vunpack.c.l.b16 %v3629_v34  ;;  %v8448_v15 = vor.u32 %v9727_v21, %v8445_v58  ;;  %v8435_v34 = vld [vmem:[%s14578_s5 + $0x1d0] sm:$0xf]  ;;  %v9726_v18 = vld [vmem:[%s14578_s5 + $0x1d4] sm:$0xf0] }
 0x4e2   :  { %4619 = vmatpush.bf16.msrb.mxu2 %v8504_v16  ;;  %v8638_v16 = vor.u32 %v9765_v40, %v8635_v17  ;;  %v9774_v40 = vld [vmem:[%s14578_s5 + $0x354] sm:$0xf0] }
 0x4e3   :  { %v3588_v8 = vadd.f32 %v12588_v30, %v3554_v24  ;;  %v12975_v43 = vpack.c.b16 %v4697_v7, %v4363_v29  ;;  %v12977_v0 = vpack.c.b16 %v4698_v22, %v4364_v35  ;;  %v9732_v30 = vld [vmem:[%s14578_s5 + $0x204] sm:$0xf0]  ;;  %v8456_v35 = vor.u32 %v9729_v42, %v8453_v2  ;;  %v8437_v24 = vld [vmem:[%s14578_s5 + $0x1d8] sm:$0xf0] }
 0x4e4   :  { %v8460_v33 = vor.u32 %v9732_v30, %v8459_v38  ;;  %v8493_v30 = vld [vmem:[%s14578_s5 + $0x248] sm:$0xf0] }
 0x4e5   :  { %v3616_v5 = vmax.f32 %v3588_v8, 0.0  ;;  %4205 = vmatmul.bf16.vlgmr.msra.gmra.mxu1 %v12651_v61  ;;  %8387 = vmatmul.msk.bf16.vlgmr.msra.gmra.mxu3 %vm382_vm0, %v12648_v59  ;;  %v8491_v8 = vld [vmem:[%s14578_s5 + $0x240] sm:$0xf] }
 0x4e6   :  { %4273 = vmatmul.bf16.vlgmr.msra.gmra.mxu0 %v12651_v61  ;;  %8392 = vmatmul.msk.bf16.vlgmr.msra.gmra.mxu2 %vm382_vm0, %v12648_v59  ;;  %v8461_v61 = vld [vmem:[%s14578_s5 + $0x208] sm:$0xf0]  ;;  %v8507_v59 = vld [vmem:[%s14578_s5 + $0x260] sm:$0xf] }
 0x4e7   :  { %v3630_v39 = vpack.c.bf16 %v3616_v5, %v3615_v56  ;;  %v8464_v31 = vor.u32 %v9731_v11, %v8461_v61  ;;  %v8508_v12 = vor.u32 %v9744_v27, %v8507_v59  ;;  %4514 = vmatpush.bf16.msrb.mxu1 %v8460_v33  ;;  %v9740_v56 = vld [vmem:[%s14578_s5 + $0x244] sm:$0xf0]  ;;  %v9739_v5 = vld [vmem:[%s14578_s5 + $0x244] sm:$0xf]  ;;  %v8427_v33 = vld [vmem:[%s14578_s5 + $0x1c0] sm:$0xf] }
 0x4e8   :  { %v8492_v38 = vor.u32 %v9740_v56, %v8491_v8  ;;  %v8496_v11 = vor.u32 %v9739_v5, %v8493_v30  ;;  %v9724_v61 = vld [vmem:[%s14578_s5 + $0x1c4] sm:$0xf0]  ;;  %v9723_v59 = vld [vmem:[%s14578_s5 + $0x1c4] sm:$0xf]  ;;  %v8675_v8 = vld [vmem:[%s14578_s5 + $0x368] sm:$0xf0] }
 0x4e9   :  { %v5031_v14 = vunpack.c.l.b16 %v3630_v39  ;;  %v5032_v47 = vunpack.c.h.b16 %v3630_v39  ;;  %4582 = vmatpush.bf16.msrb.mxu0 %v8464_v31  ;;  %4550 = vmatpush.bf16.msrb.mxu3 %v8508_v12  ;;  %v8428_v27 = vor.u32 %v9724_v61, %v8427_v33  ;;  %v8429_v39 = vld [vmem:[%s14578_s5 + $0x1c8] sm:$0xf0]  ;;  %v8625_v5 = vld [vmem:[%s14578_s5 + $0x300] sm:$0xf]  ;;  %v9763_v30 = vld [vmem:[%s14578_s5 + $0x304] sm:$0xf] }
 0x4ea   :  { %4620 = vmatpush.bf16.msrb.mxu2 %v8496_v11  ;;  %v8432_v12 = vor.u32 %v9723_v59, %v8429_v39  ;;  %v8627_v33 = vld [vmem:[%s14578_s5 + $0x308] sm:$0xf0] }
 0x4eb   :  { %v13009_v23 = vpack.c.b16 %v5031_v14, %v4697_v7  ;;  %v13011_v29 = vpack.c.b16 %v5032_v47, %v4698_v22  ;;  %4515 = vmatpush.bf16.msrb.mxu1 %v8452_v54  ;;  %v8436_v22 = vor.u32 %v9726_v18, %v8435_v34  ;;  %v8440_v7 = vor.u32 %v9725_v55, %v8437_v24  ;;  %v9777_v14 = vld [vmem:[%s14578_s5 + $0x374] sm:$0xf]  ;;  %v8673_v55 = vld [vmem:[%s14578_s5 + $0x360] sm:$0xf]  ;;  %v9775_v24 = vld [vmem:[%s14578_s5 + $0x364] sm:$0xf] }
 0x4ec   :  { %v8682_v47 = vor.u32 %v9778_v37, %v8681_v63  ;;  %v8686_v42 = vor.u32 %v9777_v14, %v8683_v52  ;;  %v8678_v56 = vor.u32 %v9775_v24, %v8675_v8  ;;  %v8630_v59 = vor.u32 %v9763_v30, %v8627_v33  ;;  %v8617_v63 = vld [vmem:[%s14578_s5 + $0x2f0] sm:$0xf]  ;;  %v9762_v37 = vld [vmem:[%s14578_s5 + $0x2f4] sm:$0xf0]  ;;  %v9761_v14 = vld [vmem:[%s14578_s5 + $0x2f4] sm:$0xf] }
 0x4ed   :  { %4583 = vmatpush.bf16.msrb.mxu0 %v8456_v35  ;;  %4551 = vmatpush.bf16.msrb.mxu3 %v8500_v45  ;;  %v9766_v45 = vld [vmem:[%s14578_s5 + $0x314] sm:$0xf0]  ;;  %v8619_v52 = vld [vmem:[%s14578_s5 + $0x2f8] sm:$0xf0]  ;;  %v9772_v30 = vld [vmem:[%s14578_s5 + $0x344] sm:$0xf0] }
 0x4ee   :  { %4949 = vmatpush.bf16.msra.mxu2 %v8686_v42  ;;  %v8634_v1 = vor.u32 %v9766_v45, %v8633_v19  ;;  %v8665_v45 = vld [vmem:[%s14578_s5 + $0x350] sm:$0xf] }
 0x4ef   :  { %4516 = vmatpush.bf16.msrb.mxu1 %v8444_v62 }
 0x4f1   :  { %4584 = vmatpush.bf16.msrb.mxu0 %v8448_v15  ;;  %4552 = vmatpush.bf16.msrb.mxu3 %v8492_v38  ;;  %v9764_v38 = vld [vmem:[%s14578_s5 + $0x304] sm:$0xf0] }
 0x4f2   :  { %4950 = vmatpush.bf16.msra.mxu2 %v8678_v56  ;;  %v8626_v11 = vor.u32 %v9764_v38, %v8625_v5  ;;  %v8611_v5 = vld [vmem:[%s14578_s5 + $0x2e8] sm:$0xf0]  ;;  %v8657_v38 = vld [vmem:[%s14578_s5 + $0x340] sm:$0xf] }
 0x4f3   :  { %4517 = vmatpush.bf16.msrb.mxu1 %v8436_v22  ;;  %v9776_v22 = vld [vmem:[%s14578_s5 + $0x364] sm:$0xf0]  ;;  %v8658_v33 = vor.u32 %v9772_v30, %v8657_v38  ;;  %v9755_v38 = vld [vmem:[%s14578_s5 + $0x2c4] sm:$0xf]  ;;  %v8595_v30 = vld [vmem:[%s14578_s5 + $0x2c8] sm:$0xf0] }
 0x4f5   :  { %4210 = vmatmul.bf16.gmra.mxu1 %v12692_v6  ;;  %8388 = vmatmul.msk.bf16.gmra.mxu3 %vm382_vm0, %v12694_v20 }
 0x4f6   :  { %4278 = vmatmul.bf16.gmra.mxu0 %v12692_v6  ;;  %8393 = vmatmul.msk.bf16.gmra.mxu2 %vm382_vm0, %v12694_v20 }
 0x4f7   :  { %4585 = vmatpush.bf16.msrb.mxu0 %v8440_v7  ;;  %4518 = vmatpush.bf16.msrb.mxu1 %v8428_v27  ;;  %v8674_v7 = vor.u32 %v9776_v22, %v8673_v55 }
 0x4f8   :  { %4881 = vmatpush.bf16.msra.mxu3 %v8682_v47  ;;  %v8618_v47 = vor.u32 %v9762_v37, %v8617_v63 }
 0x4fb   :  { %4586 = vmatpush.bf16.msrb.mxu0 %v8432_v12  ;;  %4845 = vmatpush.bf16.msra.mxu1 %v8634_v1  ;;  %v9773_v1 = vld [vmem:[%s14578_s5 + $0x354] sm:$0xf] }
 0x4fc   :  { %4882 = vmatpush.bf16.msra.mxu3 %v8674_v7  ;;  %v8609_v7 = vld [vmem:[%s14578_s5 + $0x2e0] sm:$0xf] }
 0x4ff   :  { %4913 = vmatpush.bf16.msra.mxu0 %v8638_v16  ;;  %4846 = vmatpush.bf16.msra.mxu1 %v8626_v11  ;;  %v8666_v16 = vor.u32 %v9774_v40, %v8665_v45 }
 0x501   :  { %4883 = vmatpush.bf16.msra.mxu3 %v8666_v16 }
 0x503   :  { %4914 = vmatpush.bf16.msra.mxu0 %v8630_v59  ;;  %4847 = vmatpush.bf16.msra.mxu1 %v8618_v47  ;;  %v8659_v59 = vld [vmem:[%s14578_s5 + $0x348] sm:$0xf0] }
 0x505   :  { %4215 = vmatmul.bf16.gmra.mxu1 %v12754_v49  ;;  %8389 = vmatmul.msk.bf16.gmra.mxu3 %vm382_vm0, %v12756_v26 }
 0x506   :  { %4283 = vmatmul.bf16.gmra.mxu0 %v12754_v49  ;;  %8394 = vmatmul.msk.bf16.gmra.mxu2 %vm382_vm0, %v12756_v26 }
 0x507   :  { %4884 = vmatpush.bf16.msra.mxu3 %v8658_v33 }
 0x512   :  { %v3897_v31 = vpop.f32.mrf.mxu1 }
 0x513   :  { %v3965_v57 = vpop.f32.mrf.mxu0 }
 0x515   :  { %4220 = vmatmul.bf16.gmra.mxu1 %v12804_v25  ;;  %8390 = vmatmul.msk.bf16.gmra.mxu3 %vm382_vm0, %v12806_v48 }
 0x516   :  { %4288 = vmatmul.bf16.gmra.mxu0 %v12804_v25  ;;  %8395 = vmatmul.msk.bf16.gmra.mxu2 %vm382_vm0, %v12806_v48 }
 0x518   :  { %v3931_v50 = vpop.f32.mrf.mxu3 }
 0x519   :  { %v13115_v54 = vadd.f32 %v3931_v50, %v3897_v31  ;;  %v3999_v2 = vpop.f32.mrf.mxu2  ;;  %v8622_v50 = vor.u32 %v9761_v14, %v8619_v52  ;;  %v8601_v52 = vld [vmem:[%s14578_s5 + $0x2d0] sm:$0xf] }
 0x51a   :  { %v13117_v35 = vadd.f32 %v3999_v2, %v3965_v57  ;;  %v3899_v53 = vpop.f32.mrf.mxu1 }
 0x51b   :  { %v3967_v3 = vpop.f32.mrf.mxu0  ;;  %4915 = vmatpush.bf16.msra.mxu0 %v8622_v50  ;;  %v9758_v50 = vld [vmem:[%s14578_s5 + $0x2d4] sm:$0xf0] }
 0x520   :  { %v3933_v62 = vpop.f32.mrf.mxu3 }
 0x521   :  { %v13131_v21 = vadd.f32 %v3933_v62, %v3899_v53  ;;  %v4001_v58 = vpop.f32.mrf.mxu2  ;;  %v8667_v62 = vld [vmem:[%s14578_s5 + $0x358] sm:$0xf0] }
 0x522   :  { %v13133_v15 = vadd.f32 %v4001_v58, %v3967_v3  ;;  %v3902_v34 = vpop.f32.mrf.mxu1  ;;  %v8670_v58 = vor.u32 %v9773_v1, %v8667_v62 }
 0x523   :  { %v3970_v18 = vpop.f32.mrf.mxu0 }
 0x524   :  { %4951 = vmatpush.bf16.msra.mxu2 %v8670_v58 }
 0x525   :  { %4225 = vmatmul.bf16.gmra.mxu1 %v12906_v44  ;;  %8391 = vmatmul.msk.bf16.gmra.mxu3 %vm382_vm0, %v12908_v9 }
 0x526   :  { %4293 = vmatmul.bf16.gmra.mxu0 %v12906_v44  ;;  %8396 = vmatmul.msk.bf16.gmra.mxu2 %vm382_vm0, %v12908_v9 }
 0x528   :  { %v3936_v61 = vpop.f32.mrf.mxu3 }
 0x529   :  { %v13165_v27 = vadd.f32 %v3936_v61, %v3902_v34  ;;  %v4004_v39 = vpop.f32.mrf.mxu2  ;;  %v9771_v61 = vld [vmem:[%s14578_s5 + $0x344] sm:$0xf] }
 0x52a   :  { %v13167_v31 = vadd.f32 %v4004_v39, %v3970_v18  ;;  %v3904_v12 = vpop.f32.mrf.mxu1  ;;  %v8662_v39 = vor.u32 %v9771_v61, %v8659_v59 }
 0x52b   :  { %v3972_v57 = vpop.f32.mrf.mxu0 }
 0x52c   :  { %4952 = vmatpush.bf16.msra.mxu2 %v8662_v39 }
 0x530   :  { %v3938_v42 = vpop.f32.mrf.mxu3 }
 0x531   :  { %v13181_v2 = vadd.f32 %v3938_v42, %v3904_v12  ;;  %v4006_v53 = vpop.f32.mrf.mxu2  ;;  %v9757_v42 = vld [vmem:[%s14578_s5 + $0x2d4] sm:$0xf] }
 0x532   :  { %v13183_v3 = vadd.f32 %v4006_v53, %v3972_v57  ;;  %v3907_v19 = vpop.f32.mrf.mxu1  ;;  %v8602_v53 = vor.u32 %v9758_v50, %v8601_v52  ;;  %v9753_v52 = vld [vmem:[%s14578_s5 + $0x2b4] sm:$0xf] }
 0x533   :  { %v3975_v17 = vpop.f32.mrf.mxu0 }
 0x535   :  { %4519 = vmatmul.bf16.vlgmr.msrb.gmra.mxu1 %v12692_v6  ;;  %8537 = vmatmul.msk.bf16.vlgmr.msrb.gmra.mxu3 %vm382_vm0, %v12694_v20 }
 0x536   :  { %4587 = vmatmul.bf16.vlgmr.msrb.gmra.mxu0 %v12692_v6  ;;  %8542 = vmatmul.msk.bf16.vlgmr.msrb.gmra.mxu2 %vm382_vm0, %v12694_v20  ;;  %v9760_v6 = vld [vmem:[%s14578_s5 + $0x2e4] sm:$0xf0]  ;;  %v9759_v20 = vld [vmem:[%s14578_s5 + $0x2e4] sm:$0xf] }
 0x537   :  { %v8610_v56 = vor.u32 %v9760_v6, %v8609_v7  ;;  %v8614_v11 = vor.u32 %v9759_v20, %v8611_v5  ;;  %v8651_v6 = vld [vmem:[%s14578_s5 + $0x338] sm:$0xf0]  ;;  %v8593_v20 = vld [vmem:[%s14578_s5 + $0x2c0] sm:$0xf] }
 0x538   :  { %v3941_v34 = vpop.f32.mrf.mxu3 }
 0x539   :  { %v13203_v18 = vadd.f32 %v3941_v34, %v3907_v19  ;;  %v4009_v55 = vpop.f32.mrf.mxu2  ;;  %4848 = vmatpush.bf16.msra.mxu1 %v8610_v56  ;;  %4916 = vmatpush.bf16.msra.mxu0 %v8614_v11  ;;  %v8603_v19 = vld [vmem:[%s14578_s5 + $0x2d8] sm:$0xf0]  ;;  %v8649_v34 = vld [vmem:[%s14578_s5 + $0x330] sm:$0xf]  ;;  %v8598_v11 = vor.u32 %v9755_v38, %v8595_v30  ;;  %v9751_v38 = vld [vmem:[%s14578_s5 + $0x2a4] sm:$0xf] }
 0x53a   :  { %v13205_v22 = vadd.f32 %v4009_v55, %v3975_v17  ;;  %v3909_v24 = vpop.f32.mrf.mxu1  ;;  %v8606_v45 = vor.u32 %v9757_v42, %v8603_v19  ;;  %v9770_v55 = vld [vmem:[%s14578_s5 + $0x334] sm:$0xf0]  ;;  %v8587_v42 = vld [vmem:[%s14578_s5 + $0x2b8] sm:$0xf0] }
 0x53b   :  { %v3977_v8 = vpop.f32.mrf.mxu0  ;;  %v8650_v7 = vor.u32 %v9770_v55, %v8649_v34  ;;  %v8590_v19 = vor.u32 %v9753_v52, %v8587_v42  ;;  %v9768_v34 = vld [vmem:[%s14578_s5 + $0x324] sm:$0xf0]  ;;  %v9767_v55 = vld [vmem:[%s14578_s5 + $0x324] sm:$0xf]  ;;  %v8831_v42 = vld [vmem:[%s14578_s5 + $0x450] sm:$0xf] }
 0x53d   :  { %4849 = vmatpush.bf16.msra.mxu1 %v8602_v53  ;;  %4917 = vmatpush.bf16.msra.mxu0 %v8606_v45 }
 0x53e   :  { %4885 = vmatpush.bf16.msra.mxu3 %v8650_v7 }
 0x540   :  { %v3943_v12 = vpop.f32.mrf.mxu3 }
 0x541   :  { %v13231_v57 = vadd.f32 %v3943_v12, %v3909_v24  ;;  %v4011_v63 = vpop.f32.mrf.mxu2  ;;  %v9769_v24 = vld [vmem:[%s14578_s5 + $0x334] sm:$0xf]  ;;  %4918 = vmatpush.bf16.msra.mxu0 %v8598_v11 }
 0x542   :  { %v13233_v37 = vadd.f32 %v4011_v63, %v3977_v8  ;;  %v3912_v14 = vpop.f32.mrf.mxu1  ;;  %v9756_v8 = vld [vmem:[%s14578_s5 + $0x2c4] sm:$0xf0]  ;;  %v8654_v56 = vor.u32 %v9769_v24, %v8651_v6  ;;  %v8643_v6 = vld [vmem:[%s14578_s5 + $0x328] sm:$0xf0] }
 0x543   :  { %v3980_v47 = vpop.f32.mrf.mxu0  ;;  %v8594_v5 = vor.u32 %v9756_v8, %v8593_v20  ;;  %v8646_v20 = vor.u32 %v9767_v55, %v8643_v6 }
 0x544   :  { %4953 = vmatpush.bf16.msra.mxu2 %v8654_v56  ;;  %v8577_v56 = vld [vmem:[%s14578_s5 + $0x2a0] sm:$0xf] }
 0x545   :  { %4524 = vmatmul.bf16.gmra.mxu1 %v12754_v49  ;;  %8538 = vmatmul.msk.bf16.gmra.mxu3 %vm382_vm0, %v12756_v26 }
 0x546   :  { %4592 = vmatmul.bf16.gmra.mxu0 %v12754_v49  ;;  %8543 = vmatmul.msk.bf16.gmra.mxu2 %vm382_vm0, %v12756_v26 }
 0x547   :  { %4850 = vmatpush.bf16.msra.mxu1 %v8594_v5  ;;  %4919 = vmatpush.bf16.msra.mxu0 %v8590_v19  ;;  %v9752_v5 = vld [vmem:[%s14578_s5 + $0x2a4] sm:$0xf0]  ;;  %v8833_v19 = vld [vmem:[%s14578_s5 + $0x458] sm:$0xf0] }
 0x548   :  { %v3946_v40 = vpop.f32.mrf.mxu3  ;;  %4954 = vmatpush.bf16.msra.mxu2 %v8646_v20 }
 0x549   :  { %v13253_v1 = vadd.f32 %v3946_v40, %v3912_v14  ;;  %v4014_v17 = vpop.f32.mrf.mxu2  ;;  %v8585_v14 = vld [vmem:[%s14578_s5 + $0x2b0] sm:$0xf] }
 0x54a   :  { %v13255_v16 = vadd.f32 %v4014_v17, %v3980_v47  ;;  %v3914_v62 = vpop.f32.mrf.mxu1  ;;  %v9754_v47 = vld [vmem:[%s14578_s5 + $0x2b4] sm:$0xf0] }
 0x54b   :  { %v3982_v58 = vpop.f32.mrf.mxu0  ;;  %v8586_v50 = vor.u32 %v9754_v47, %v8585_v14 }
 0x54d   :  { %4851 = vmatpush.bf16.msra.mxu1 %v8586_v50 }
 0x550   :  { %v3948_v33 = vpop.f32.mrf.mxu3 }
 0x551   :  { %v13281_v61 = vadd.f32 %v3948_v33, %v3914_v62  ;;  %v4016_v59 = vpop.f32.mrf.mxu2  ;;  %v8578_v33 = vor.u32 %v9752_v5, %v8577_v56  ;;  %v9794_v56 = vld [vmem:[%s14578_s5 + $0x3f4] sm:$0xf0]  ;;  %v9793_v5 = vld [vmem:[%s14578_s5 + $0x3f4] sm:$0xf] }
 0x552   :  { %v13283_v39 = vadd.f32 %v4016_v59, %v3982_v58  ;;  %v3917_v12 = vpop.f32.mrf.mxu1  ;;  %v8641_v58 = vld [vmem:[%s14578_s5 + $0x320] sm:$0xf]  ;;  %v8579_v59 = vld [vmem:[%s14578_s5 + $0x2a8] sm:$0xf0] }
 0x553   :  { %v3985_v63 = vpop.f32.mrf.mxu0  ;;  %v8642_v7 = vor.u32 %v9768_v34, %v8641_v58  ;;  %v8582_v14 = vor.u32 %v9751_v38, %v8579_v59  ;;  %4852 = vmatpush.bf16.msra.mxu1 %v8578_v33 }
 0x555   :  { %4529 = vmatmul.bf16.gmra.mxu1 %v12804_v25  ;;  %8539 = vmatmul.msk.bf16.gmra.mxu3 %vm382_vm0, %v12806_v48 }
 0x556   :  { %4597 = vmatmul.bf16.gmra.mxu0 %v12804_v25  ;;  %8544 = vmatmul.msk.bf16.gmra.mxu2 %vm382_vm0, %v12806_v48 }
 0x557   :  { %4886 = vmatpush.bf16.msra.mxu3 %v8642_v7  ;;  %4920 = vmatpush.bf16.msra.mxu0 %v8582_v14 }
 0x558   :  { %v3951_v53 = vpop.f32.mrf.mxu3 }
 0x559   :  { %v13303_v45 = vadd.f32 %v3951_v53, %v3917_v12  ;;  %v4019_v40 = vpop.f32.mrf.mxu2 }
 0x55a   :  { %v13305_v17 = vadd.f32 %v4019_v40, %v3985_v63  ;;  %v3919_v62 = vpop.f32.mrf.mxu1 }
 0x55b   :  { %v3987_v24 = vpop.f32.mrf.mxu0 }
 0x560   :  { %v3953_v8 = vpop.f32.mrf.mxu3 }
 0x561   :  { %v13328_v30 = vadd.f32 %v3953_v8, %v3919_v62  ;;  %v4021_v11 = vpop.f32.mrf.mxu2  ;;  %v8783_v8 = vld [vmem:[%s14578_s5 + $0x3f0] sm:$0xf] }
 0x562   :  { %v13333_v12 = vadd.f32 %v4021_v11, %v3987_v24  ;;  %v4206_v63 = vpop.f32.mrf.mxu1  ;;  %v8784_v38 = vor.u32 %v9794_v56, %v8783_v8 }
 0x563   :  { %v4207_v47 = vadd.f32 %v4206_v63, %v13115_v54  ;;  %v4274_v52 = vpop.f32.mrf.mxu0  ;;  %v9806_v54 = vld [vmem:[%s14578_s5 + $0x454] sm:$0xf0] }
 0x564   :  { %v4275_v50 = vadd.f32 %v4274_v52, %v13117_v35  ;;  %v9805_v35 = vld [vmem:[%s14578_s5 + $0x454] sm:$0xf]  ;;  %v8832_v53 = vor.u32 %v9806_v54, %v8831_v42  ;;  %5179 = vmatpush.bf16.msrb.mxu1 %v8784_v38  ;;  %v8823_v42 = vld [vmem:[%s14578_s5 + $0x440] sm:$0xf]  ;;  %v9804_v54 = vld [vmem:[%s14578_s5 + $0x444] sm:$0xf0] }
 0x565   :  { %4534 = vmatmul.bf16.gmra.mxu1 %v12906_v44  ;;  %8540 = vmatmul.msk.bf16.gmra.mxu3 %vm382_vm0, %v12908_v9  ;;  %v8836_v62 = vor.u32 %v9805_v35, %v8833_v19  ;;  %v9803_v35 = vld [vmem:[%s14578_s5 + $0x444] sm:$0xf]  ;;  %v8775_v19 = vld [vmem:[%s14578_s5 + $0x3e0] sm:$0xf] }
 0x566   :  { %4602 = vmatmul.bf16.gmra.mxu0 %v12906_v44  ;;  %8545 = vmatmul.msk.bf16.gmra.mxu2 %vm382_vm0, %v12908_v9 }
 0x567   :  { %5215 = vmatpush.bf16.msrb.mxu3 %v8832_v53  ;;  %5283 = vmatpush.bf16.msrb.mxu2 %v8836_v62  ;;  %v9791_v62 = vld [vmem:[%s14578_s5 + $0x3e4] sm:$0xf] }
 0x568   :  { %v4240_v40 = vpop.f32.mrf.mxu3 }
 0x569   :  { %v13355_v58 = vadd.f32 %v4240_v40, %v4207_v47  ;;  %v4308_v34 = vpop.f32.mrf.mxu2  ;;  %v9792_v40 = vld [vmem:[%s14578_s5 + $0x3e4] sm:$0xf0] }
 0x56a   :  { %v13357_v55 = vadd.f32 %v4308_v34, %v4275_v50  ;;  %v4208_v24 = vpop.f32.mrf.mxu1  ;;  %v8776_v34 = vor.u32 %v9792_v40, %v8775_v19 }
 0x56b   :  { %v4209_v7 = vadd.f32 %v4208_v24, %v13131_v21  ;;  %v4276_v6 = vpop.f32.mrf.mxu0  ;;  %v8785_v21 = vld [vmem:[%s14578_s5 + $0x3f8] sm:$0xf0]  ;;  %v8777_v24 = vld [vmem:[%s14578_s5 + $0x3e8] sm:$0xf0] }
 0x56c   :  { %v4277_v20 = vadd.f32 %v4276_v6, %v13133_v15  ;;  %v8788_v11 = vor.u32 %v9793_v5, %v8785_v21  ;;  %v8780_v6 = vor.u32 %v9791_v62, %v8777_v24  ;;  %5180 = vmatpush.bf16.msrb.mxu1 %v8776_v34  ;;  %v8817_v34 = vld [vmem:[%s14578_s5 + $0x438] sm:$0xf0] }
 0x56e   :  { %5247 = vmatpush.bf16.msrb.mxu0 %v8788_v11 }
 0x570   :  { %v4242_v15 = vpop.f32.mrf.mxu3 }
 0x571   :  { %v13373_v33 = vadd.f32 %v4242_v15, %v4209_v7  ;;  %v4310_v59 = vpop.f32.mrf.mxu2  ;;  %v8767_v15 = vld [vmem:[%s14578_s5 + $0x3d0] sm:$0xf] }
 0x572   :  { %v13375_v63 = vadd.f32 %v4310_v59, %v4277_v20  ;;  %v4211_v14 = vpop.f32.mrf.mxu1  ;;  %5248 = vmatpush.bf16.msrb.mxu0 %v8780_v6  ;;  %v9790_v59 = vld [vmem:[%s14578_s5 + $0x3d4] sm:$0xf0] }
 0x573   :  { %v4212_v47 = vadd.f32 %v4211_v14, %v13165_v27  ;;  %v4279_v52 = vpop.f32.mrf.mxu0  ;;  %v8824_v27 = vor.u32 %v9804_v54, %v8823_v42  ;;  %v9789_v14 = vld [vmem:[%s14578_s5 + $0x3d4] sm:$0xf] }
 0x574   :  { %v4280_v50 = vadd.f32 %v4279_v52, %v13167_v31  ;;  %v8825_v31 = vld [vmem:[%s14578_s5 + $0x448] sm:$0xf0] }
 0x575   :  { %4539 = vmatmul.bf16.gmra.mxu1 %v12968_v4  ;;  %8541 = vmatmul.msk.bf16.gmra.mxu3 %vm382_vm0, %v12970_v10  ;;  %v8828_v53 = vor.u32 %v9803_v35, %v8825_v31  ;;  %v9802_v31 = vld [vmem:[%s14578_s5 + $0x434] sm:$0xf0] }
 0x576   :  { %4607 = vmatmul.bf16.gmra.mxu0 %v12968_v4  ;;  %8546 = vmatmul.msk.bf16.gmra.mxu2 %vm382_vm0, %v12970_v10 }
 0x577   :  { %5216 = vmatpush.bf16.msrb.mxu3 %v8824_v27  ;;  %5284 = vmatpush.bf16.msrb.mxu2 %v8828_v53  ;;  %v8815_v27 = vld [vmem:[%s14578_s5 + $0x430] sm:$0xf]  ;;  %v9801_v53 = vld [vmem:[%s14578_s5 + $0x434] sm:$0xf] }
 0x578   :  { %v4245_v7 = vpop.f32.mrf.mxu3  ;;  %v8816_v62 = vor.u32 %v9802_v31, %v8815_v27 }
 0x579   :  { %v13409_v20 = vadd.f32 %v4245_v7, %v4212_v47  ;;  %v4313_v8 = vpop.f32.mrf.mxu2  ;;  %v8768_v47 = vor.u32 %v9790_v59, %v8767_v15  ;;  %v8820_v7 = vor.u32 %v9801_v53, %v8817_v34  ;;  %v8761_v59 = vld [vmem:[%s14578_s5 + $0x3c8] sm:$0xf0]  ;;  %v8751_v34 = vld [vmem:[%s14578_s5 + $0x3b0] sm:$0xf] }
 0x57a   :  { %v13411_v56 = vadd.f32 %v4313_v8, %v4280_v50  ;;  %v4213_v5 = vpop.f32.mrf.mxu1 }
 0x57b   :  { %v4214_v38 = vadd.f32 %v4213_v5, %v13181_v2  ;;  %v4281_v21 = vpop.f32.mrf.mxu0  ;;  %v8769_v2 = vld [vmem:[%s14578_s5 + $0x3d8] sm:$0xf0]  ;;  %5181 = vmatpush.bf16.msrb.mxu1 %v8768_v47  ;;  %5217 = vmatpush.bf16.msrb.mxu3 %v8816_v62 }
 0x57c   :  { %v4282_v11 = vadd.f32 %v4281_v21, %v13183_v3  ;;  %v8772_v52 = vor.u32 %v9789_v14, %v8769_v2  ;;  %5285 = vmatpush.bf16.msrb.mxu2 %v8820_v7  ;;  %v8807_v2 = vld [vmem:[%s14578_s5 + $0x420] sm:$0xf]  ;;  %v9785_v7 = vld [vmem:[%s14578_s5 + $0x3b4] sm:$0xf] }
 0x57e   :  { %5249 = vmatpush.bf16.msrb.mxu0 %v8772_v52  ;;  %v9800_v52 = vld [vmem:[%s14578_s5 + $0x424] sm:$0xf0] }
 0x580   :  { %v4247_v3 = vpop.f32.mrf.mxu3 }
 0x581   :  { %v13427_v50 = vadd.f32 %v4247_v3, %v4214_v38  ;;  %v4315_v42 = vpop.f32.mrf.mxu2  ;;  %v8759_v38 = vld [vmem:[%s14578_s5 + $0x3c0] sm:$0xf]  ;;  %v8808_v3 = vor.u32 %v9800_v52, %v8807_v2  ;;  %v9784_v2 = vld [vmem:[%s14578_s5 + $0x3a4] sm:$0xf0] }
 0x582   :  { %v13429_v54 = vadd.f32 %v4315_v42, %v4282_v11  ;;  %v4216_v35 = vpop.f32.mrf.mxu1  ;;  %v8809_v42 = vld [vmem:[%s14578_s5 + $0x428] sm:$0xf0] }
 0x583   :  { %v4217_v19 = vadd.f32 %v4216_v35, %v13203_v18  ;;  %v4284_v40 = vpop.f32.mrf.mxu0  ;;  %5218 = vmatpush.bf16.msrb.mxu3 %v8808_v3  ;;  %v9783_v3 = vld [vmem:[%s14578_s5 + $0x3a4] sm:$0xf] }
 0x584   :  { %v4285_v24 = vadd.f32 %v4284_v40, %v13205_v22 }
 0x585   :  { %4853 = vmatmul.bf16.vlgmr.msra.gmra.mxu1 %v12717_v36  ;;  %8687 = vmatmul.msk.bf16.vlgmr.msra.gmra.mxu3 %vm382_vm0, %v12719_v28 }
 0x586   :  { %4921 = vmatmul.bf16.vlgmr.msra.gmra.mxu0 %v12717_v36  ;;  %8692 = vmatmul.msk.bf16.vlgmr.msra.gmra.mxu2 %vm382_vm0, %v12719_v28  ;;  %v9788_v36 = vld [vmem:[%s14578_s5 + $0x3c4] sm:$0xf0]  ;;  %v9787_v28 = vld [vmem:[%s14578_s5 + $0x3c4] sm:$0xf] }
 0x587   :  { %v8760_v15 = vor.u32 %v9788_v36, %v8759_v38  ;;  %v8764_v47 = vor.u32 %v9787_v28, %v8761_v59 }
 0x588   :  { %v4250_v18 = vpop.f32.mrf.mxu3 }
 0x589   :  { %v13451_v6 = vadd.f32 %v4250_v18, %v4217_v19  ;;  %v4318_v8 = vpop.f32.mrf.mxu2  ;;  %5182 = vmatpush.bf16.msrb.mxu1 %v8760_v15  ;;  %5250 = vmatpush.bf16.msrb.mxu0 %v8764_v47 }
 0x58a   :  { %v13453_v5 = vadd.f32 %v4318_v8, %v4285_v24  ;;  %v4218_v22 = vpop.f32.mrf.mxu1  ;;  %v9786_v24 = vld [vmem:[%s14578_s5 + $0x3b4] sm:$0xf0] }
 0x58b   :  { %v4219_v21 = vadd.f32 %v4218_v22, %v13231_v57  ;;  %v4286_v11 = vpop.f32.mrf.mxu0  ;;  %v9799_v57 = vld [vmem:[%s14578_s5 + $0x424] sm:$0xf]  ;;  %v8752_v8 = vor.u32 %v9786_v24, %v8751_v34 }
 0x58c   :  { %v4287_v14 = vadd.f32 %v4286_v11, %v13233_v37  ;;  %v8812_v37 = vor.u32 %v9799_v57, %v8809_v42  ;;  %v8745_v42 = vld [vmem:[%s14578_s5 + $0x3a8] sm:$0xf0] }
 0x58d   :  { %5183 = vmatpush.bf16.msrb.mxu1 %v8752_v8 }
 0x58e   :  { %5286 = vmatpush.bf16.msrb.mxu2 %v8812_v37  ;;  %v8748_v37 = vor.u32 %v9783_v3, %v8745_v42 }
 0x590   :  { %v4252_v35 = vpop.f32.mrf.mxu3 }
 0x591   :  { %v13481_v27 = vadd.f32 %v4252_v35, %v4219_v21  ;;  %v4320_v31 = vpop.f32.mrf.mxu2 }
 0x592   :  { %v13483_v53 = vadd.f32 %v4320_v31, %v4287_v14  ;;  %v4221_v19 = vpop.f32.mrf.mxu1  ;;  %v9797_v14 = vld [vmem:[%s14578_s5 + $0x414] sm:$0xf] }
 0x593   :  { %v4222_v40 = vadd.f32 %v4221_v19, %v13253_v1  ;;  %v4289_v62 = vpop.f32.mrf.mxu0  ;;  %v8753_v1 = vld [vmem:[%s14578_s5 + $0x3b8] sm:$0xf0] }
 0x594   :  { %v4290_v18 = vadd.f32 %v4289_v62, %v13255_v16  ;;  %v8756_v22 = vor.u32 %v9785_v7, %v8753_v1 }
 0x595   :  { %4858 = vmatmul.bf16.gmra.mxu1 %v12779_v13  ;;  %8688 = vmatmul.msk.bf16.gmra.mxu3 %vm382_vm0, %v12781_v32 }
 0x596   :  { %4926 = vmatmul.bf16.gmra.mxu0 %v12779_v13  ;;  %8693 = vmatmul.msk.bf16.gmra.mxu2 %vm382_vm0, %v12781_v32  ;;  %v8799_v13 = vld [vmem:[%s14578_s5 + $0x410] sm:$0xf]  ;;  %v9798_v32 = vld [vmem:[%s14578_s5 + $0x414] sm:$0xf0] }
 0x597   :  { %5251 = vmatpush.bf16.msrb.mxu0 %v8756_v22  ;;  %v8800_v47 = vor.u32 %v9798_v32, %v8799_v13  ;;  %v8791_v13 = vld [vmem:[%s14578_s5 + $0x400] sm:$0xf]  ;;  %v9796_v32 = vld [vmem:[%s14578_s5 + $0x404] sm:$0xf0] }
 0x598   :  { %v4255_v38 = vpop.f32.mrf.mxu3 }
 0x599   :  { %v13505_v16 = vadd.f32 %v4255_v38, %v4222_v40  ;;  %v4323_v36 = vpop.f32.mrf.mxu2  ;;  %5219 = vmatpush.bf16.msrb.mxu3 %v8800_v47  ;;  %v8792_v47 = vor.u32 %v9796_v32, %v8791_v13 }
 0x59a   :  { %v13507_v28 = vadd.f32 %v4323_v36, %v4290_v18  ;;  %v4223_v21 = vpop.f32.mrf.mxu1  ;;  %v8735_v18 = vld [vmem:[%s14578_s5 + $0x390] sm:$0xf] }
 0x59b   :  { %v4224_v11 = vadd.f32 %v4223_v21, %v13281_v61  ;;  %v4291_v15 = vpop.f32.mrf.mxu0  ;;  %v8801_v61 = vld [vmem:[%s14578_s5 + $0x418] sm:$0xf0]  ;;  %5252 = vmatpush.bf16.msrb.mxu0 %v8748_v37  ;;  %v8729_v37 = vld [vmem:[%s14578_s5 + $0x388] sm:$0xf0] }
 0x59c   :  { %v4292_v59 = vadd.f32 %v4291_v15, %v13283_v39  ;;  %v8743_v39 = vld [vmem:[%s14578_s5 + $0x3a0] sm:$0xf]  ;;  %v8804_v52 = vor.u32 %v9797_v14, %v8801_v61  ;;  %v9795_v14 = vld [vmem:[%s14578_s5 + $0x404] sm:$0xf] }
 0x59d   :  { %v8744_v57 = vor.u32 %v9784_v2, %v8743_v39  ;;  %5220 = vmatpush.bf16.msrb.mxu3 %v8792_v47  ;;  %v8727_v39 = vld [vmem:[%s14578_s5 + $0x380] sm:$0xf]  ;;  %v9780_v2 = vld [vmem:[%s14578_s5 + $0x384] sm:$0xf0] }
 0x59e   :  { %5287 = vmatpush.bf16.msrb.mxu2 %v8804_v52  ;;  %v9779_v52 = vld [vmem:[%s14578_s5 + $0x384] sm:$0xf]  ;;  %v8728_v42 = vor.u32 %v9780_v2, %v8727_v39 }
 0x59f   :  { %5184 = vmatpush.bf16.msrb.mxu1 %v8744_v57 }
 0x5a0   :  { %v4257_v35 = vpop.f32.mrf.mxu3 }
 0x5a1   :  { %v13535_v31 = vadd.f32 %v4257_v35, %v4224_v11  ;;  %v4325_v19 = vpop.f32.mrf.mxu2 }
 0x5a2   :  { %v13537_v40 = vadd.f32 %v4325_v19, %v4292_v59  ;;  %v4226_v62 = vpop.f32.mrf.mxu1 }
 0x5a3   :  { %v4227_v34 = vadd.f32 %v4226_v62, %v13303_v45  ;;  %v4294_v24 = vpop.f32.mrf.mxu0  ;;  %v9782_v45 = vld [vmem:[%s14578_s5 + $0x394] sm:$0xf0]  ;;  %v8732_v62 = vor.u32 %v9779_v52, %v8729_v37 }
 0x5a4   :  { %v4295_v7 = vadd.f32 %v4294_v24, %v13305_v17  ;;  %v9781_v17 = vld [vmem:[%s14578_s5 + $0x394] sm:$0xf]  ;;  %v8736_v8 = vor.u32 %v9782_v45, %v8735_v18 }
 0x5a5   :  { %4863 = vmatmul.bf16.gmra.mxu1 %v12851_v60  ;;  %8689 = vmatmul.msk.bf16.gmra.mxu3 %vm382_vm0, %v12853_v46 }
 0x5a6   :  { %4931 = vmatmul.bf16.gmra.mxu0 %v12851_v60  ;;  %8694 = vmatmul.msk.bf16.gmra.mxu2 %vm382_vm0, %v12853_v46  ;;  %v8737_v60 = vld [vmem:[%s14578_s5 + $0x398] sm:$0xf0] }
 0x5a7   :  { %v8740_v22 = vor.u32 %v9781_v17, %v8737_v60  ;;  %5185 = vmatpush.bf16.msrb.mxu1 %v8736_v8 }
 0x5a8   :  { %v4260_v1 = vpop.f32.mrf.mxu3 }
 0x5a9   :  { %v13559_v46 = vadd.f32 %v4260_v1, %v4227_v34  ;;  %v4328_v38 = vpop.f32.mrf.mxu2  ;;  %5253 = vmatpush.bf16.msrb.mxu0 %v8740_v22 }
 0x5aa   :  { %v13561_v36 = vadd.f32 %v4328_v38, %v4295_v7  ;;  %v4228_v21 = vpop.f32.mrf.mxu1 }
 0x5ab   :  { %v4229_v11 = vadd.f32 %v4228_v21, %v13328_v30  ;;  %v4296_v15 = vpop.f32.mrf.mxu0  ;;  %v8793_v30 = vld [vmem:[%s14578_s5 + $0x408] sm:$0xf0]  ;;  %5186 = vmatpush.bf16.msrb.mxu1 %v8728_v42 }
 0x5ac   :  { %v4297_v59 = vadd.f32 %v4296_v15, %v13333_v12  ;;  %v8796_v61 = vor.u32 %v9795_v14, %v8793_v30 }
 0x5ad   :  { %5254 = vmatpush.bf16.msrb.mxu0 %v8732_v62 }
 0x5ae   :  { %5288 = vmatpush.bf16.msrb.mxu2 %v8796_v61 }
 0x5b0   :  { %v4262_v12 = vpop.f32.mrf.mxu3 }
 0x5b1   :  { %v13586_v57 = vadd.f32 %v4262_v12, %v4229_v11  ;;  %v4330_v3 = vpop.f32.mrf.mxu2 }
 0x5b2   :  { %v13591_v35 = vadd.f32 %v4330_v3, %v4297_v59  ;;  %v4520_v19 = vpop.f32.mrf.mxu1 }
 0x5b3   :  { %14659 = vst [vmem:[#allocation15_spill] sm:$0xff] %v13586_v57  ;;  %v4588_v34 = vpop.f32.mrf.mxu0 }
 0x5b4   :  { %14660 = vst [vmem:[#allocation16_spill] sm:$0xff] %v13591_v35 }
 0x5b5   :  { %4868 = vmatmul.bf16.gmra.mxu1 %v12914_v41  ;;  %8690 = vmatmul.msk.bf16.gmra.mxu3 %vm382_vm0, %v12916_v51 }
 0x5b6   :  { %4936 = vmatmul.bf16.gmra.mxu0 %v12914_v41  ;;  %8695 = vmatmul.msk.bf16.gmra.mxu2 %vm382_vm0, %v12916_v51 }
 0x5b8   :  { %v4554_v24 = vpop.f32.mrf.mxu3 }
 0x5b9   :  { %v4555_v7 = vadd.f32 %v4554_v24, %v4520_v19  ;;  %v4622_v18 = vpop.f32.mrf.mxu2 }
 0x5ba   :  { %v4623_v45 = vadd.f32 %v4622_v18, %v4588_v34  ;;  %v4522_v17 = vpop.f32.mrf.mxu1 }
 0x5bb   :  { %v13600_v8 = vadd.f32 %v4555_v7, %v13355_v58  ;;  %v4590_v60 = vpop.f32.mrf.mxu0 }
 0x5bc   :  { %v13603_v1 = vadd.f32 %v4623_v45, %v13357_v55 }
 0x5c0   :  { %v4556_v22 = vpop.f32.mrf.mxu3 }
 0x5c1   :  { %v4557_v38 = vadd.f32 %v4556_v22, %v4522_v17  ;;  %v4624_v21 = vpop.f32.mrf.mxu2 }
 0x5c2   :  { %v4625_v11 = vadd.f32 %v4624_v21, %v4590_v60  ;;  %v4525_v41 = vpop.f32.mrf.mxu1 }
 0x5c3   :  { %v13606_v15 = vadd.f32 %v4557_v38, %v13373_v33  ;;  %v4593_v51 = vpop.f32.mrf.mxu0 }
 0x5c4   :  { %v13609_v59 = vadd.f32 %v4625_v11, %v13375_v63 }
 0x5c5   :  { %4873 = vmatmul.bf16.gmra.mxu1 %v12975_v43  ;;  %8691 = vmatmul.msk.bf16.gmra.mxu3 %vm382_vm0, %v12977_v0 }
 0x5c6   :  { %4941 = vmatmul.bf16.gmra.mxu0 %v12975_v43  ;;  %8696 = vmatmul.msk.bf16.gmra.mxu2 %vm382_vm0, %v12977_v0 }
 0x5c8   :  { %v4559_v58 = vpop.f32.mrf.mxu3 }
 0x5c9   :  { %v4560_v55 = vadd.f32 %v4559_v58, %v4525_v41  ;;  %v4627_v13 = vpop.f32.mrf.mxu2 }
 0x5ca   :  { %v4628_v32 = vadd.f32 %v4627_v13, %v4593_v51  ;;  %v4527_v33 = vpop.f32.mrf.mxu1 }
 0x5cb   :  { %v13618_v14 = vadd.f32 %v4560_v55, %v13409_v20  ;;  %v4595_v63 = vpop.f32.mrf.mxu0 }
 0x5cc   :  { %v13621_v47 = vadd.f32 %v4628_v32, %v13411_v56 }
 0x5d0   :  { %v4561_v30 = vpop.f32.mrf.mxu3 }
 0x5d1   :  { %v4562_v61 = vadd.f32 %v4561_v30, %v4527_v33  ;;  %v4629_v12 = vpop.f32.mrf.mxu2  ;;  %v9826_v30 = vld [vmem:[#allocation5 + $0x98] sm:$0xff] }
 0x5d2   :  { %v4630_v39 = vadd.f32 %v4629_v12, %v4595_v63  ;;  %v4530_v43 = vpop.f32.mrf.mxu1  ;;  %5576 = vmatpush.bf16.msra.mxu3 %v9826_v30 }
 0x5d3   :  { %v13624_v2 = vadd.f32 %v4562_v61, %v13427_v50  ;;  %v4598_v0 = vpop.f32.mrf.mxu0 }
 0x5d4   :  { %v13627_v52 = vadd.f32 %v4630_v39, %v13429_v54 }
 0x5d5   :  { %5187 = vmatmul.bf16.vlgmr.msrb.gmra.mxu1 %v12754_v49  ;;  %8837 = vmatmul.msk.bf16.vlgmr.msrb.gmra.mxu3 %vm382_vm0, %v12756_v26 }
 0x5d6   :  { %5255 = vmatmul.bf16.vlgmr.msrb.gmra.mxu0 %v12754_v49  ;;  %8842 = vmatmul.msk.bf16.vlgmr.msrb.gmra.mxu2 %vm382_vm0, %v12756_v26 }
 0x5d8   :  { %v4564_v20 = vpop.f32.mrf.mxu3 }
 0x5d9   :  { %v4565_v56 = vadd.f32 %v4564_v20, %v4530_v43  ;;  %v4632_v3 = vpop.f32.mrf.mxu2 }
 0x5da   :  { %v4633_v42 = vadd.f32 %v4632_v3, %v4598_v0  ;;  %v4532_v50 = vpop.f32.mrf.mxu1 }
 0x5db   :  { %v13636_v37 = vadd.f32 %v4565_v56, %v13451_v6  ;;  %v4600_v54 = vpop.f32.mrf.mxu0  ;;  %v9824_v56 = vld [vmem:[#allocation5 + $0x88] sm:$0xff] }
 0x5dc   :  { %v13639_v19 = vadd.f32 %v4633_v42, %v13453_v5  ;;  %5541 = vmatpush.bf16.msra.mxu1 %v9824_v56 }
 0x5e0   :  { %v4566_v62 = vpop.f32.mrf.mxu3 }
 0x5e1   :  { %v4567_v34 = vadd.f32 %v4566_v62, %v4532_v50  ;;  %v4634_v24 = vpop.f32.mrf.mxu2  ;;  %v9823_v50 = vld [vmem:[#allocation5 + $0x80] sm:$0xff] }
 0x5e2   :  { %v4635_v7 = vadd.f32 %v4634_v24, %v4600_v54  ;;  %v4535_v49 = vpop.f32.mrf.mxu1  ;;  %5542 = vmatpush.bf16.msra.mxu1 %v9823_v50 }
 0x5e3   :  { %v13642_v18 = vadd.f32 %v4567_v34, %v13481_v27  ;;  %v4603_v26 = vpop.f32.mrf.mxu0 }
 0x5e4   :  { %v13645_v45 = vadd.f32 %v4635_v7, %v13483_v53 }
 0x5e5   :  { %5192 = vmatmul.bf16.gmra.mxu1 %v12804_v25  ;;  %8838 = vmatmul.msk.bf16.gmra.mxu3 %vm382_vm0, %v12806_v48 }
 0x5e6   :  { %5260 = vmatmul.bf16.gmra.mxu0 %v12804_v25  ;;  %8843 = vmatmul.msk.bf16.gmra.mxu2 %vm382_vm0, %v12806_v48 }
 0x5e8   :  { %v4569_v6 = vpop.f32.mrf.mxu3 }
 0x5e9   :  { %v4570_v5 = vadd.f32 %v4569_v6, %v4535_v49  ;;  %v4637_v17 = vpop.f32.mrf.mxu2 }
 0x5ea   :  { %v4638_v60 = vadd.f32 %v4637_v17, %v4603_v26  ;;  %v13653_v27 = vpop.f32.mrf.mxu1 }
 0x5eb   :  { %v13656_v22 = vadd.f32 %v4570_v5, %v13505_v16  ;;  %v13658_v53 = vpop.f32.mrf.mxu0  ;;  %v9822_v5 = vld [vmem:[#allocation5 + $0x78] sm:$0xff] }
 0x5ec   :  { %v13661_v38 = vadd.f32 %v4638_v60, %v13507_v28  ;;  %5543 = vmatpush.bf16.msra.mxu1 %v9822_v5 }
 0x5f0   :  { %v13663_v21 = vpop.f32.mrf.mxu3 }
 0x5f1   :  { %v13665_v25 = vpop.f32.mrf.mxu2 }
 0x5f2   :  { %v4540_v11 = vpop.f32.mrf.mxu1 }
 0x5f3   :  { %v4608_v48 = vpop.f32.mrf.mxu0 }
 0x5f5   :  { %5197 = vmatmul.bf16.gmra.mxu1 %v12906_v44  ;;  %8839 = vmatmul.msk.bf16.gmra.mxu3 %vm382_vm0, %v12908_v9 }
 0x5f6   :  { %5265 = vmatmul.bf16.gmra.mxu0 %v12906_v44  ;;  %8844 = vmatmul.msk.bf16.gmra.mxu2 %vm382_vm0, %v12908_v9 }
 0x5f8   :  { %v4574_v16 = vpop.f32.mrf.mxu3 }
 0x5f9   :  { %v4575_v41 = vadd.f32 %v4574_v16, %v4540_v11  ;;  %v4642_v28 = vpop.f32.mrf.mxu2 }
 0x5fa   :  { %v4643_v51 = vadd.f32 %v4642_v28, %v4608_v48  ;;  %v13673_v58 = vpop.f32.mrf.mxu1  ;;  %v9821_v28 = vld [vmem:[#allocation5 + $0x70] sm:$0xff] }
 0x5fb   :  { %v13676_v55 = vadd.f32 %v4575_v41, %v13559_v46  ;;  %v13678_v13 = vpop.f32.mrf.mxu0  ;;  %5544 = vmatpush.bf16.msra.mxu1 %v9821_v28  ;;  %v9808_v28 = vld [vmem:[#allocation5 + $0x8] sm:$0xff] }
 0x5fc   :  { %v13681_v32 = vadd.f32 %v4643_v51, %v13561_v36  ;;  %v9825_v51 = vld [vmem:[#allocation5 + $0x90] sm:$0xff] }
 0x5fd   :  { %5577 = vmatpush.bf16.msra.mxu3 %v9825_v51 }
 0x600   :  { %v13683_v33 = vpop.f32.mrf.mxu3 }
 0x601   :  { %v13685_v44 = vpop.f32.mrf.mxu2 }
 0x602   :  { %v4854_v63 = vpop.f32.mrf.mxu1 }
 0x603   :  { %v4922_v9 = vpop.f32.mrf.mxu0 }
 0x605   :  { %5202 = vmatmul.bf16.gmra.mxu1 %v12968_v4  ;;  %8840 = vmatmul.msk.bf16.gmra.mxu3 %vm382_vm0, %v12970_v10 }
 0x606   :  { %5270 = vmatmul.bf16.gmra.mxu0 %v12968_v4  ;;  %8845 = vmatmul.msk.bf16.gmra.mxu2 %vm382_vm0, %v12970_v10 }
 0x608   :  { %v4888_v46 = vpop.f32.mrf.mxu3 }
 0x609   :  { %v4889_v36 = vadd.f32 %v4888_v46, %v4854_v63  ;;  %v4956_v61 = vpop.f32.mrf.mxu2  ;;  %v9814_v63 = vld [vmem:[#allocation5 + $0x38] sm:$0xff] }
 0x60a   :  { %v4957_v12 = vadd.f32 %v4956_v61, %v4922_v9  ;;  %v13693_v39 = vpop.f32.mrf.mxu1  ;;  %5686 = vmatpush.bf16.msra.mxu0 %v9814_v63  ;;  %v9813_v61 = vld [vmem:[#allocation5 + $0x30] sm:$0xff] }
 0x60b   :  { %v13696_v43 = vadd.f32 %v4889_v36, %v13600_v8  ;;  %v13698_v0 = vpop.f32.mrf.mxu0 }
 0x60c   :  { %v13701_v20 = vadd.f32 %v4957_v12, %v13603_v1  ;;  %v9812_v12 = vld [vmem:[#allocation5 + $0x28] sm:$0xff] }
 0x60e   :  { %5687 = vmatpush.bf16.msra.mxu0 %v9813_v61 }
 0x610   :  { %v13703_v4 = vpop.f32.mrf.mxu3 }
 0x611   :  { %v13705_v10 = vpop.f32.mrf.mxu2 }
 0x612   :  { %v4859_v3 = vpop.f32.mrf.mxu1  ;;  %5688 = vmatpush.bf16.msra.mxu0 %v9812_v12  ;;  %v9807_v12 = vld [vmem:[#allocation5] sm:$0xff] }
 0x613   :  { %v4927_v42 = vpop.f32.mrf.mxu0 }
 0x615   :  { %5207 = vmatmul.bf16.gmra.mxu1 %v13009_v23  ;;  %8841 = vmatmul.msk.bf16.gmra.mxu3 %vm382_vm0, %v13011_v29 }
 0x616   :  { %5275 = vmatmul.bf16.gmra.mxu0 %v13009_v23  ;;  %8846 = vmatmul.msk.bf16.gmra.mxu2 %vm382_vm0, %v13011_v29 }
 0x618   :  { %v4893_v8 = vpop.f32.mrf.mxu3 }
 0x619   :  { %v4894_v1 = vadd.f32 %v4893_v8, %v4859_v3  ;;  %v4961_v54 = vpop.f32.mrf.mxu2 }
 0x61a   :  { %v4962_v62 = vadd.f32 %v4961_v54, %v4927_v42  ;;  %v13713_v34 = vpop.f32.mrf.mxu1  ;;  %v9811_v54 = vld [vmem:[#allocation5 + $0x20] sm:$0xff] }
 0x61b   :  { %v13716_v24 = vadd.f32 %v4894_v1, %v13618_v14  ;;  %v13718_v7 = vpop.f32.mrf.mxu0  ;;  %5689 = vmatpush.bf16.msra.mxu0 %v9811_v54 }
 0x61c   :  { %v13721_v49 = vadd.f32 %v4962_v62, %v13621_v47 }
 0x620   :  { %v13723_v26 = vpop.f32.mrf.mxu3 }
 0x621   :  { %v13725_v23 = vpop.f32.mrf.mxu2 }
 0x622   :  { %v4864_v29 = vpop.f32.mrf.mxu1 }
 0x623   :  { %v4932_v6 = vpop.f32.mrf.mxu0 }
 0x628   :  { %v4898_v17 = vpop.f32.mrf.mxu3 }
 0x629   :  { %v4899_v60 = vadd.f32 %v4898_v17, %v4864_v29  ;;  %v4966_v11 = vpop.f32.mrf.mxu2  ;;  %v9810_v29 = vld [vmem:[#allocation5 + $0x18] sm:$0xff] }
 0x62a   :  { %v4967_v48 = vadd.f32 %v4966_v11, %v4932_v6  ;;  %v13727_v16 = vpop.f32.mrf.mxu1  ;;  %5690 = vmatpush.bf16.msra.mxu0 %v9810_v29  ;;  %v9809_v11 = vld [vmem:[#allocation5 + $0x10] sm:$0xff] }
 0x62b   :  { %v13730_v14 = vadd.f32 %v4899_v60, %v13636_v37  ;;  %v13732_v41 = vpop.f32.mrf.mxu0  ;;  %v9820_v37 = vld [vmem:[#allocation5 + $0x68] sm:$0xff] }
 0x62c   :  { %v13735_v47 = vadd.f32 %v4967_v48, %v13639_v19  ;;  %5545 = vmatpush.bf16.msra.mxu1 %v9820_v37  ;;  %v9819_v48 = vld [vmem:[#allocation5 + $0x60] sm:$0xff] }
 0x62e   :  { %5691 = vmatpush.bf16.msra.mxu0 %v9809_v11 }
 0x630   :  { %v13737_v9 = vpop.f32.mrf.mxu3  ;;  %5546 = vmatpush.bf16.msra.mxu1 %v9819_v48 }
 0x631   :  { %v13739_v30 = vpop.f32.mrf.mxu2 }
 0x632   :  { %v4869_v46 = vpop.f32.mrf.mxu1  ;;  %5692 = vmatpush.bf16.msra.mxu0 %v9808_v28 }
 0x633   :  { %v4937_v36 = vpop.f32.mrf.mxu0 }
 0x636   :  { %5693 = vmatpush.bf16.msra.mxu0 %v9807_v12 }
 0x638   :  { %v4903_v56 = vpop.f32.mrf.mxu3 }
 0x639   :  { %v4904_v19 = vadd.f32 %v4903_v56, %v4869_v46  ;;  %v4971_v3 = vpop.f32.mrf.mxu2  ;;  %v9815_v56 = vld [vmem:[#allocation5 + $0x40] sm:$0xff] }
 0x63a   :  { %v4972_v42 = vadd.f32 %v4971_v3, %v4937_v36  ;;  %v13741_v50 = vpop.f32.mrf.mxu1  ;;  %v9818_v3 = vld [vmem:[#allocation5 + $0x58] sm:$0xff] }
 0x63b   :  { %v13744_v8 = vadd.f32 %v4904_v19, %v13656_v22  ;;  %v13746_v1 = vpop.f32.mrf.mxu0  ;;  %v9816_v22 = vld [vmem:[#allocation5 + $0x48] sm:$0xff]  ;;  %5547 = vmatpush.bf16.msra.mxu1 %v9818_v3  ;;  %v4891_v3 = vadd.f32 %v13703_v4, %v13693_v39 }
 0x63c   :  { %v13749_v62 = vadd.f32 %v4972_v42, %v13661_v38  ;;  %5721 = vmatpush.bf16.msra.mxu2 %v9816_v22 }
 0x640   :  { %v13751_v6 = vpop.f32.mrf.mxu3  ;;  %5722 = vmatpush.bf16.msra.mxu2 %v9815_v56  ;;  %v9836_v56 = vld [vmem:[#allocation5 + $0xe8] sm:$0xff] }
 0x641   :  { %v13753_v5 = vpop.f32.mrf.mxu2  ;;  %5869 = vmatpush.bf16.msrb.mxu3 %v9836_v56 }
 0x642   :  { %v4874_v17 = vpop.f32.mrf.mxu1 }
 0x643   :  { %v4942_v60 = vpop.f32.mrf.mxu0 }
 0x648   :  { %v4908_v51 = vpop.f32.mrf.mxu3 }
 0x649   :  { %v4909_v63 = vadd.f32 %v4908_v51, %v4874_v17  ;;  %v4976_v46 = vpop.f32.mrf.mxu2 }
 0x64a   :  { %v4977_v38 = vadd.f32 %v4976_v46, %v4942_v60  ;;  %v13755_v36 = vpop.f32.mrf.mxu1  ;;  %v9817_v60 = vld [vmem:[#allocation5 + $0x50] sm:$0xff] }
 0x64b   :  { %v13758_v61 = vadd.f32 %v4909_v63, %v13676_v55  ;;  %v13760_v37 = vpop.f32.mrf.mxu0  ;;  %5548 = vmatpush.bf16.msra.mxu1 %v9817_v60  ;;  %v5335_v55 = vld [vmem:[%s14579_s6] sm:$0x3] }
 0x64c   :  { %14661 = vst [vmem:[#allocation17_spill] sm:$0xff] %v13760_v37  ;;  %v13763_v19 = vadd.f32 %v4977_v38, %v13681_v32  ;;  %v13772_v32 = vperm.slane %v5335_v55, 0  ;;  %v13774_v51 = vperm.slane %v5335_v55, 1  ;;  %v9834_v37 = vld [vmem:[#allocation5 + $0xd8] sm:$0xff] }
 0x64f   :  { %5834 = vmatpush.bf16.msrb.mxu1 %v9834_v37  ;;  %v4896_v37 = vadd.f32 %v13723_v26, %v13713_v34 }
 0x650   :  { %v13765_v42 = vpop.f32.mrf.mxu3 }
 0x651   :  { %v13767_v54 = vpop.f32.mrf.mxu2 }
 0x652   :  { %14662 = vst [vmem:[#allocation24_spill] sm:$0xff] %v13767_v54  ;;  %v5188_v29 = vpop.f32.mrf.mxu1 }
 0x653   :  { %v5256_v17 = vpop.f32.mrf.mxu0 }
 0x658   :  { %v5222_v11 = vpop.f32.mrf.mxu3 }
 0x659   :  { %v5223_v48 = vadd.f32 %v5222_v11, %v5188_v29  ;;  %v5290_v22 = vpop.f32.mrf.mxu2  ;;  %v4959_v29 = vadd.f32 %v13705_v10, %v13698_v0 }
 0x65a   :  { %v5291_v28 = vadd.f32 %v5290_v22, %v5256_v17  ;;  %v5190_v63 = vpop.f32.mrf.mxu1 }
 0x65b   :  { %v5315_v46 = vadd.f32 %v5223_v48, %v13696_v43  ;;  %v5258_v38 = vpop.f32.mrf.mxu0  ;;  %v4983_v43 = vadd.f32 %v4891_v3, %v13606_v15 }
 0x65c   :  { %v5316_v12 = vadd.f32 %v5291_v28, %v13701_v20  ;;  %v4984_v20 = vadd.f32 %v4959_v29, %v13609_v59 }
 0x65d   :  { %v5341_v60 = vadd.f32 %v13772_v32, %v5315_v46 }
 0x65e   :  { %v5342_v11 = vadd.f32 %v13774_v51, %v5316_v12 }
 0x65f   :  { %v5361_v17 = vmax.f32 %v5341_v60, 0.0 }
 0x660   :  { %v5362_v55 = vmax.f32 %v5342_v11, 0.0  ;;  %v5224_v22 = vpop.f32.mrf.mxu3 }
 0x661   :  { %v5225_v48 = vadd.f32 %v5224_v22, %v5190_v63  ;;  %v5292_v35 = vpop.f32.mrf.mxu2 }
 0x662   :  { %v5381_v28 = vpack.c.bf16 %v5362_v55, %v5361_v17  ;;  %v5293_v57 = vadd.f32 %v5292_v35, %v5258_v38  ;;  %v5193_v39 = vpop.f32.mrf.mxu1 }
 0x663   :  { %v5317_v4 = vadd.f32 %v5225_v48, %v4983_v43  ;;  %v5261_v46 = vpop.f32.mrf.mxu0  ;;  %v9833_v43 = vld [vmem:[#allocation5 + $0xd0] sm:$0xff]  ;;  %v4964_v48 = vadd.f32 %v13725_v23, %v13718_v7 }
 0x664   :  { %v5318_v54 = vadd.f32 %v5293_v57, %v4984_v20  ;;  %v5600_v29 = vunpack.c.l.b16 %v5381_v28  ;;  %v5601_v17 = vunpack.c.h.b16 %v5381_v28  ;;  %5835 = vmatpush.bf16.msrb.mxu1 %v9833_v43 }
 0x665   :  { %v5343_v0 = vadd.f32 %v13772_v32, %v5317_v4 }
 0x666   :  { %v5344_v10 = vadd.f32 %v13774_v51, %v5318_v54 }
 0x667   :  { %v5363_v12 = vmax.f32 %v5343_v0, 0.0  ;;  %v4988_v0 = vadd.f32 %v4964_v48, %v13627_v52 }
 0x668   :  { %v5364_v56 = vmax.f32 %v5344_v10, 0.0  ;;  %v5227_v60 = vpop.f32.mrf.mxu3 }
 0x669   :  { %v5228_v15 = vadd.f32 %v5227_v60, %v5193_v39  ;;  %v5295_v63 = vpop.f32.mrf.mxu2 }
 0x66a   :  { %v5382_v3 = vpack.c.bf16 %v5364_v56, %v5363_v12  ;;  %v5296_v11 = vadd.f32 %v5295_v63, %v5261_v46  ;;  %v5195_v59 = vpop.f32.mrf.mxu1  ;;  %v4987_v46 = vadd.f32 %v4896_v37, %v13624_v2 }
 0x66b   :  { %v5319_v35 = vadd.f32 %v5228_v15, %v13716_v24  ;;  %v5263_v38 = vpop.f32.mrf.mxu0 }
 0x66c   :  { %v5440_v57 = vunpack.c.l.b16 %v5382_v3  ;;  %v5441_v55 = vunpack.c.h.b16 %v5382_v3  ;;  %v5320_v22 = vadd.f32 %v5296_v11, %v13721_v49  ;;  %v9832_v3 = vld [vmem:[#allocation5 + $0xc8] sm:$0xff] }
 0x66d   :  { %v5345_v54 = vadd.f32 %v13772_v32, %v5319_v35  ;;  %5836 = vmatpush.bf16.msrb.mxu1 %v9832_v3 }
 0x66e   :  { %v5603_v20 = vpack.c.b16 %v5441_v55, %v5601_v17  ;;  %v5346_v39 = vadd.f32 %v13774_v51, %v5320_v22  ;;  %v5602_v24 = vpack.c.b16 %v5440_v57, %v5600_v29 }
 0x66f   :  { %v5365_v28 = vmax.f32 %v5345_v54, 0.0 }
 0x670   :  { %v5366_v4 = vmax.f32 %v5346_v39, 0.0  ;;  %5694 = vmatmul.bf16.vlgmr.msra.gmra.mxu0 %v5602_v24  ;;  %8931 = vmatmul.msk.bf16.vlgmr.msra.gmra.mxu2 %vm5528_vm3, %v5603_v20  ;;  %v5229_v49 = vpop.f32.mrf.mxu3  ;;  %v9831_v24 = vld [vmem:[#allocation5 + $0xc0] sm:$0xff] }
 0x671   :  { %v5230_v34 = vadd.f32 %v5229_v49, %v5195_v59  ;;  %v5297_v26 = vpop.f32.mrf.mxu2  ;;  %v4969_v49 = vadd.f32 %v13739_v30, %v13732_v41  ;;  %5837 = vmatpush.bf16.msrb.mxu1 %v9831_v24 }
 0x672   :  { %v5383_v10 = vpack.c.bf16 %v5366_v4, %v5365_v28  ;;  %v5298_v12 = vadd.f32 %v5297_v26, %v5263_v38  ;;  %v5198_v7 = vpop.f32.mrf.mxu1  ;;  %v9835_v28 = vld [vmem:[#allocation5 + $0xe0] sm:$0xff]  ;;  %v4901_v4 = vadd.f32 %v13737_v9, %v13727_v16 }
 0x673   :  { %v5321_v23 = vadd.f32 %v5230_v34, %v4987_v46  ;;  %v5266_v56 = vpop.f32.mrf.mxu0  ;;  %5870 = vmatpush.bf16.msrb.mxu3 %v9835_v28  ;;  %v4906_v28 = vadd.f32 %v13751_v6, %v13741_v50 }
 0x674   :  { %v5442_v60 = vunpack.c.l.b16 %v5383_v10  ;;  %v5443_v15 = vunpack.c.h.b16 %v5383_v10  ;;  %v5322_v63 = vadd.f32 %v5298_v12, %v4988_v0  ;;  %v4991_v41 = vadd.f32 %v4901_v4, %v13642_v18 }
 0x675   :  { %v5347_v11 = vadd.f32 %v13772_v32, %v5321_v23  ;;  %v4992_v10 = vadd.f32 %v4969_v49, %v13645_v45 }
 0x676   :  { %v5456_v29 = vpack.c.b16 %v5442_v60, %v5440_v57  ;;  %v5457_v35 = vpack.c.b16 %v5443_v15, %v5441_v55  ;;  %v5348_v17 = vadd.f32 %v13774_v51, %v5322_v63 }
 0x677   :  { %v5367_v2 = vmax.f32 %v5347_v11, 0.0  ;;  %v9830_v11 = vld [vmem:[#allocation5 + $0xb8] sm:$0xff] }
 0x678   :  { %v5368_v59 = vmax.f32 %v5348_v17, 0.0  ;;  %5549 = vmatmul.bf16.vlgmr.msra.gmra.mxu1 %v5456_v29  ;;  %8887 = vmatmul.msk.bf16.vlgmr.msra.gmra.mxu3 %vm5528_vm3, %v5457_v35  ;;  %v5232_v52 = vpop.f32.mrf.mxu3 }
 0x679   :  { %v5233_v38 = vadd.f32 %v5232_v52, %v5198_v7  ;;  %v5300_v22 = vpop.f32.mrf.mxu2  ;;  %5838 = vmatpush.bf16.msrb.mxu1 %v9830_v11 }
 0x67a   :  { %v5384_v43 = vpack.c.bf16 %v5368_v59, %v5367_v2  ;;  %v5301_v37 = vadd.f32 %v5300_v22, %v5266_v56  ;;  %v5200_v54 = vpop.f32.mrf.mxu1 }
 0x67b   :  { %v5323_v48 = vadd.f32 %v5233_v38, %v13730_v14  ;;  %v5268_v20 = vpop.f32.mrf.mxu0 }
 0x67c   :  { %v5445_v39 = vunpack.c.h.b16 %v5384_v43  ;;  %v5324_v57 = vadd.f32 %v5301_v37, %v13735_v47  ;;  %v5444_v55 = vunpack.c.l.b16 %v5384_v43  ;;  %v4572_v37 = vadd.f32 %v13663_v21, %v13653_v27 }
 0x67d   :  { %v5349_v46 = vadd.f32 %v13772_v32, %v5323_v48  ;;  %v9829_v48 = vld [vmem:[#allocation5 + $0xb0] sm:$0xff]  ;;  %v4974_v27 = vadd.f32 %v13753_v5, %v13746_v1 }
 0x67e   :  { %v5350_v34 = vadd.f32 %v13774_v51, %v5324_v57  ;;  %v13810_v26 = vpack.c.b16 %v5444_v55, %v5442_v60  ;;  %v13812_v14 = vpack.c.b16 %v5445_v39, %v5443_v15  ;;  %5839 = vmatpush.bf16.msrb.mxu1 %v9829_v48  ;;  %v14664_v48 = vld [vmem:[#allocation24_spill] sm:$0xff] }
 0x67f   :  { %v5369_v47 = vmax.f32 %v5349_v46, 0.0  ;;  %v9828_v46 = vld [vmem:[#allocation5 + $0xa8] sm:$0xff] }
 0x680   :  { %v5370_v0 = vmax.f32 %v5350_v34, 0.0  ;;  %5699 = vmatmul.bf16.gmra.mxu0 %v13810_v26  ;;  %8932 = vmatmul.msk.bf16.gmra.mxu2 %vm5528_vm3, %v13812_v14  ;;  %v5234_v16 = vpop.f32.mrf.mxu3 }
 0x681   :  { %v5235_v9 = vadd.f32 %v5234_v16, %v5200_v54  ;;  %v5302_v30 = vpop.f32.mrf.mxu2 }
 0x682   :  { %v5385_v12 = vpack.c.bf16 %v5370_v0, %v5369_v47  ;;  %v5303_v7 = vadd.f32 %v5302_v30, %v5268_v20  ;;  %v5203_v23 = vpop.f32.mrf.mxu1  ;;  %v4640_v20 = vadd.f32 %v13665_v25, %v13658_v53  ;;  %v4661_v25 = vadd.f32 %v4572_v37, %v13535_v31  ;;  %5840 = vmatpush.bf16.msrb.mxu1 %v9828_v46  ;;  %v9827_v0 = vld [vmem:[#allocation5 + $0xa0] sm:$0xff] }
 0x683   :  { %v5325_v56 = vadd.f32 %v5235_v9, %v4991_v41  ;;  %v5271_v60 = vpop.f32.mrf.mxu0 }
 0x684   :  { %v5447_v15 = vunpack.c.h.b16 %v5385_v12  ;;  %v5326_v63 = vadd.f32 %v5303_v7, %v4992_v10  ;;  %v5446_v3 = vunpack.c.l.b16 %v5385_v12  ;;  %v4662_v34 = vadd.f32 %v4640_v20, %v13537_v40 }
 0x685   :  { %v5351_v29 = vadd.f32 %v13772_v32, %v5325_v56  ;;  %v4995_v47 = vadd.f32 %v4906_v28, %v4661_v25 }
 0x686   :  { %v5352_v35 = vadd.f32 %v13774_v51, %v5326_v63  ;;  %v5458_v17 = vpack.c.b16 %v5446_v3, %v5444_v55  ;;  %v5459_v2 = vpack.c.b16 %v5447_v15, %v5445_v39  ;;  %v4996_v16 = vadd.f32 %v4974_v27, %v4662_v34  ;;  %5841 = vmatpush.bf16.msrb.mxu1 %v9827_v0 }
 0x687   :  { %v5371_v18 = vmax.f32 %v5351_v29, 0.0 }
 0x688   :  { %v5372_v59 = vmax.f32 %v5352_v35, 0.0  ;;  %5554 = vmatmul.bf16.gmra.mxu1 %v5458_v17  ;;  %8888 = vmatmul.msk.bf16.gmra.mxu3 %vm5528_vm3, %v5459_v2  ;;  %v5237_v45 = vpop.f32.mrf.mxu3 }
 0x689   :  { %v5238_v52 = vadd.f32 %v5237_v45, %v5203_v23  ;;  %v5305_v38 = vpop.f32.mrf.mxu2  ;;  %v4645_v45 = vadd.f32 %v13685_v44, %v13678_v13  ;;  %v14666_v13 = vld [vmem:[#allocation16_spill] sm:$0xff] }
 0x68a   :  { %v5386_v22 = vpack.c.bf16 %v5372_v59, %v5371_v18  ;;  %v5306_v43 = vadd.f32 %v5305_v38, %v5271_v60  ;;  %v5205_v55 = vpop.f32.mrf.mxu1  ;;  %v4577_v18 = vadd.f32 %v13683_v33, %v13673_v58 }
 0x68b   :  { %v5327_v54 = vadd.f32 %v5238_v52, %v13744_v8  ;;  %v5273_v49 = vpop.f32.mrf.mxu0  ;;  %v4666_v44 = vadd.f32 %v4645_v45, %v14666_v13 }
 0x68c   :  { %v5449_v39 = vunpack.c.h.b16 %v5386_v22  ;;  %v5328_v57 = vadd.f32 %v5306_v43, %v13749_v62  ;;  %v5448_v24 = vunpack.c.l.b16 %v5386_v22  ;;  %v4911_v43 = vadd.f32 %v13765_v42, %v13755_v36 }
 0x68d   :  { %v5353_v4 = vadd.f32 %v13772_v32, %v5327_v54  ;;  %v14663_v54 = vld [vmem:[#allocation17_spill] sm:$0xff] }
 0x68e   :  { %v5354_v21 = vadd.f32 %v13774_v51, %v5328_v57  ;;  %v13834_v8 = vpack.c.b16 %v5448_v24, %v5446_v3  ;;  %v13836_v53 = vpack.c.b16 %v5449_v39, %v5447_v15  ;;  %v4979_v20 = vadd.f32 %v14664_v48, %v14663_v54 }
 0x68f   :  { %v5373_v62 = vmax.f32 %v5353_v4, 0.0 }
 0x690   :  { %v5374_v50 = vmax.f32 %v5354_v21, 0.0  ;;  %5704 = vmatmul.bf16.gmra.mxu0 %v13834_v8  ;;  %8933 = vmatmul.msk.bf16.gmra.mxu2 %vm5528_vm3, %v13836_v53  ;;  %v5239_v6 = vpop.f32.mrf.mxu3  ;;  %v5000_v46 = vadd.f32 %v4979_v20, %v4666_v44 }
 0x691   :  { %v5240_v1 = vadd.f32 %v5239_v6, %v5205_v55  ;;  %v5307_v5 = vpop.f32.mrf.mxu2 }
 0x692   :  { %v5387_v41 = vpack.c.bf16 %v5374_v50, %v5373_v62  ;;  %v5308_v9 = vadd.f32 %v5307_v5, %v5273_v49  ;;  %v5208_v23 = vpop.f32.mrf.mxu1 }
 0x693   :  { %v5329_v30 = vadd.f32 %v5240_v1, %v4995_v47  ;;  %v5276_v63 = vpop.f32.mrf.mxu0 }
 0x694   :  { %v5451_v31 = vunpack.c.h.b16 %v5387_v41  ;;  %v5330_v10 = vadd.f32 %v5308_v9, %v4996_v16  ;;  %v5450_v12 = vunpack.c.l.b16 %v5387_v41 }
 0x695   :  { %v5355_v40 = vadd.f32 %v13772_v32, %v5329_v30 }
 0x696   :  { %v5356_v7 = vadd.f32 %v13774_v51, %v5330_v10  ;;  %v5460_v56 = vpack.c.b16 %v5450_v12, %v5448_v24  ;;  %v5461_v60 = vpack.c.b16 %v5451_v31, %v5449_v39 }
 0x697   :  { %v5375_v15 = vmax.f32 %v5355_v40, 0.0 }
 0x698   :  { %v5376_v3 = vmax.f32 %v5356_v7, 0.0  ;;  %5559 = vmatmul.bf16.gmra.mxu1 %v5460_v56  ;;  %8889 = vmatmul.msk.bf16.gmra.mxu3 %vm5528_vm3, %v5461_v60  ;;  %v5242_v11 = vpop.f32.mrf.mxu3 }
 0x699   :  { %v5243_v29 = vadd.f32 %v5242_v11, %v5208_v23  ;;  %v5310_v35 = vpop.f32.mrf.mxu2 }
 0x69a   :  { %v5388_v17 = vpack.c.bf16 %v5376_v3, %v5375_v15  ;;  %v5311_v2 = vadd.f32 %v5310_v35, %v5276_v63 }
 0x69b   :  { %v5331_v59 = vadd.f32 %v5243_v29, %v13758_v61  ;;  %v14665_v61 = vld [vmem:[#allocation15_spill] sm:$0xff]  ;;  %v5278_v28 = vpop.f32.mrf.mxu0 }
 0x69c   :  { %v5453_v52 = vunpack.c.h.b16 %v5388_v17  ;;  %v5332_v38 = vadd.f32 %v5311_v2, %v13763_v19  ;;  %v5452_v22 = vunpack.c.l.b16 %v5388_v17  ;;  %v4665_v57 = vadd.f32 %v4577_v18, %v14665_v61  ;;  %v5210_v19 = vpop.f32.mrf.mxu1 }
 0x69d   :  { %v5357_v37 = vadd.f32 %v13772_v32, %v5331_v59 }
 0x69e   :  { %v5358_v39 = vadd.f32 %v13774_v51, %v5332_v38  ;;  %v5608_v58 = vpack.c.b16 %v5452_v22, %v5450_v12  ;;  %v5609_v33 = vpack.c.b16 %v5453_v52, %v5451_v31  ;;  %v4999_v42 = vadd.f32 %v4911_v43, %v4665_v57 }
 0x69f   :  { %v5377_v55 = vmax.f32 %v5357_v37, 0.0 }
 0x6a0   :  { %v5378_v24 = vmax.f32 %v5358_v39, 0.0  ;;  %5709 = vmatmul.bf16.gmra.mxu0 %v5608_v58  ;;  %8934 = vmatmul.msk.bf16.gmra.mxu2 %vm5528_vm3, %v5609_v33  ;;  %v5244_v36 = vpop.f32.mrf.mxu3 }
 0x6a1   :  { %v5245_v4 = vadd.f32 %v5244_v36, %v5210_v19  ;;  %v5312_v49 = vpop.f32.mrf.mxu2 }
 0x6a2   :  { %v5389_v27 = vpack.c.bf16 %v5378_v24, %v5377_v55  ;;  %v5313_v21 = vadd.f32 %v5312_v49, %v5278_v28  ;;  %v13881_v55 = vld [vmem:[%s14581_s8] ss:$0 sm:$0xff]  ;;  %s10077_s8 = smov 112  }
 0x6a3   :  { %v5333_v25 = vadd.f32 %v5245_v4, %v4999_v42 }
 0x6a4   :  { %v5455_v62 = vunpack.c.h.b16 %v5389_v27  ;;  %v5334_v34 = vadd.f32 %v5313_v21, %v5000_v46  ;;  %v5454_v50 = vunpack.c.l.b16 %v5389_v27 }
 0x6a5   :  { %v5359_v6 = vadd.f32 %v13772_v32, %v5333_v25 }
 0x6a6   :  { %v5360_v47 = vadd.f32 %v13774_v51, %v5334_v34  ;;  %v5462_v1 = vpack.c.b16 %v5454_v50, %v5452_v22  ;;  %v5463_v5 = vpack.c.b16 %v5455_v62, %v5453_v52 }
 0x6a7   :  { %v5379_v0 = vmax.f32 %v5359_v6, 0.0 }
 0x6a8   :  { %v5380_v16 = vmax.f32 %v5360_v47, 0.0  ;;  %5564 = vmatmul.bf16.gmra.mxu1 %v5462_v1  ;;  %8890 = vmatmul.msk.bf16.gmra.mxu3 %vm5528_vm3, %v5463_v5 }
 0x6aa   :  { %v5390_v41 = vpack.c.bf16 %v5380_v16, %v5379_v0 }
 0x6ac   :  { %v5767_v9 = vunpack.c.h.b16 %v5390_v41  ;;  %v5766_v30 = vunpack.c.l.b16 %v5390_v41 }
 0x6ae   :  { %v5768_v31 = vpack.c.b16 %v5766_v30, %v5454_v50  ;;  %v5769_v10 = vpack.c.b16 %v5767_v9, %v5455_v62 }
 0x6b8   :  { %5842 = vmatmul.bf16.vlgmr.msrb.gmra.mxu1 %v13810_v26  ;;  %8975 = vmatmul.msk.bf16.vlgmr.msrb.gmra.mxu3 %vm5528_vm3, %v13812_v14 }
 0x6c8   :  { %5847 = vmatmul.bf16.gmra.mxu1 %v13834_v8  ;;  %8976 = vmatmul.msk.bf16.gmra.mxu3 %vm5528_vm3, %v13836_v53 }
 0x6d8   :  { %5852 = vmatmul.bf16.gmra.mxu1 %v5608_v58  ;;  %8977 = vmatmul.msk.bf16.gmra.mxu3 %vm5528_vm3, %v5609_v33 }
 0x6e8   :  { %5857 = vmatmul.bf16.gmra.mxu1 %v5768_v31  ;;  %8978 = vmatmul.msk.bf16.gmra.mxu3 %vm5528_vm3, %v5769_v10 }
 0x6ed   :  { %v5695_v17 = vpop.f32.mrf.mxu0 }
 0x6f3   :  { %v5724_v18 = vpop.f32.mrf.mxu2 }
 0x6f5   :  { %v5550_v32 = vpop.f32.mrf.mxu1  ;;  %v5697_v52 = vpop.f32.mrf.mxu0 }
 0x6fb   :  { %v5579_v51 = vpop.f32.mrf.mxu3  ;;  %v5726_v43 = vpop.f32.mrf.mxu2 }
 0x6fc   :  { %v5580_v12 = vadd.f32 %v5579_v51, %v5550_v32 }
 0x6fd   :  { %v5552_v40 = vpop.f32.mrf.mxu1  ;;  %v5700_v48 = vpop.f32.mrf.mxu0 }
 0x6fe   :  { %v5696_v54 = vadd.f32 %v5695_v17, %v5580_v12 }
 0x700   :  { %v5725_v61 = vadd.f32 %v5724_v18, %v5696_v54  ;;  %v9065_v54 = vld [vmem:[%s14582_s9 + $0xa8] sm:$0xf] }
 0x703   :  { %v5581_v7 = vpop.f32.mrf.mxu3  ;;  %v5729_v33 = vpop.f32.mrf.mxu2 }
 0x704   :  { %v5582_v26 = vadd.f32 %v5581_v7, %v5552_v40 }
 0x705   :  { %v5555_v23 = vpop.f32.mrf.mxu1  ;;  %v5702_v36 = vpop.f32.mrf.mxu0 }
 0x706   :  { %v5698_v58 = vadd.f32 %v5697_v52, %v5582_v26 }
 0x708   :  { %v5727_v44 = vadd.f32 %v5726_v43, %v5698_v58 }
 0x70b   :  { %v5584_v56 = vpop.f32.mrf.mxu3  ;;  %v5731_v49 = vpop.f32.mrf.mxu2 }
 0x70c   :  { %v5585_v14 = vadd.f32 %v5584_v56, %v5555_v23 }
 0x70d   :  { %v5557_v60 = vpop.f32.mrf.mxu1  ;;  %v5705_v47 = vpop.f32.mrf.mxu0 }
 0x70e   :  { %v5701_v25 = vadd.f32 %v5700_v48, %v5585_v14  ;;  %v9859_v48 = vld [vmem:[%s14582_s9 + $0xb0] sm:$0xf0] }
 0x70f   :  { %v9066_v58 = vor.u32 %v9859_v48, %v9065_v54 }
 0x710   :  { %v5730_v5 = vadd.f32 %v5729_v33, %v5701_v25  ;;  %v9882_v33 = vld [vmem:[%s14582_s9 + $0x16c] sm:$0xf]  ;;  %v9151_v25 = vld [vmem:[%s14582_s9 + $0x15c] sm:$0xf0] }
 0x711   :  { %6596 = vmatpush.bf16.msrb.mxu0 %v9066_v58  ;;  %v9870_v58 = vld [vmem:[%s14582_s9 + $0x10c] sm:$0xf] }
 0x713   :  { %v5586_v8 = vpop.f32.mrf.mxu3  ;;  %v5734_v41 = vpop.f32.mrf.mxu2 }
 0x714   :  { %v5587_v62 = vadd.f32 %v5586_v8, %v5557_v60 }
 0x715   :  { %v5560_v15 = vpop.f32.mrf.mxu1  ;;  %v5707_v12 = vpop.f32.mrf.mxu0 }
 0x716   :  { %v5703_v1 = vadd.f32 %v5702_v36, %v5587_v62  ;;  %v9041_v62 = vld [vmem:[%s14582_s9 + $0x78] sm:$0xf] }
 0x718   :  { %v5732_v9 = vadd.f32 %v5731_v49, %v5703_v1  ;;  %v9858_v1 = vld [vmem:[%s14582_s9 + $0xac] sm:$0xf] }
 0x71b   :  { %v5589_v63 = vpop.f32.mrf.mxu3  ;;  %v5736_v14 = vpop.f32.mrf.mxu2 }
 0x71c   :  { %v5590_v53 = vadd.f32 %v5589_v63, %v5560_v15 }
 0x71d   :  { %v5562_v3 = vpop.f32.mrf.mxu1 }
 0x71e   :  { %v5706_v23 = vadd.f32 %v5705_v47, %v5590_v53  ;;  %v9161_v53 = vld [vmem:[%s14582_s9 + $0x168] sm:$0xf] }
 0x720   :  { %v5735_v63 = vadd.f32 %v5734_v41, %v5706_v23  ;;  %v9125_v41 = vld [vmem:[%s14582_s9 + $0x120] sm:$0xf] }
 0x721   :  { %v9055_v23 = vld [vmem:[%s14582_s9 + $0x9c] sm:$0xf0] }
 0x723   :  { %v5591_v11 = vpop.f32.mrf.mxu3 }
 0x724   :  { %v5592_v29 = vadd.f32 %v5591_v11, %v5562_v3 }
 0x725   :  { %v5565_v35 = vpop.f32.mrf.mxu1 }
 0x726   :  { %v5708_v15 = vadd.f32 %v5707_v12, %v5592_v29  ;;  %v9883_v29 = vld [vmem:[%s14582_s9 + $0x170] sm:$0xf0]  ;;  %v9850_v12 = vld [vmem:[%s14582_s9 + $0x68] sm:$0xf0] }
 0x727   :  { %v9162_v43 = vor.u32 %v9883_v29, %v9161_v53  ;;  %v9017_v29 = vld [vmem:[%s14582_s9 + $0x48] sm:$0xf] }
 0x728   :  { %v5737_v17 = vadd.f32 %v5736_v14, %v5708_v15  ;;  %v9127_v15 = vld [vmem:[%s14582_s9 + $0x12c] sm:$0xf0] }
 0x729   :  { %6609 = vmatpush.bf16.msrb.mxu2 %v9162_v43  ;;  %v9043_v43 = vld [vmem:[%s14582_s9 + $0x84] sm:$0xf0] }
 0x72b   :  { %v5594_v2 = vpop.f32.mrf.mxu3 }
 0x72c   :  { %v13872_v59 = vadd.f32 %v5594_v2, %v5565_v35  ;;  %v5710_v35 = vpop.f32.mrf.mxu0 }
 0x72d   :  { %v13874_v45 = vpop.f32.mrf.mxu1 }
 0x733   :  { %v13876_v38 = vpop.f32.mrf.mxu3 }
 0x735   :  { %v5843_v22 = vpop.f32.mrf.mxu1 }
 0x73b   :  { %v5872_v37 = vpop.f32.mrf.mxu3 }
 0x73c   :  { %v5873_v39 = vadd.f32 %v5872_v37, %v5843_v22  ;;  %v9149_v22 = vld [vmem:[%s14582_s9 + $0x150] sm:$0xf]  ;;  %v9880_v37 = vld [vmem:[%s14582_s9 + $0x158] sm:$0xf0] }
 0x73d   :  { %v5845_v20 = vpop.f32.mrf.mxu1 }
 0x73e   :  { %v5892_v57 = vadd.f32 %v5873_v39, %v5725_v61 }
 0x740   :  { %v5904_v42 = vadd.f32 %v13881_v55, %v5892_v57  ;;  %v9150_v57 = vor.u32 %v9880_v37, %v9149_v22  ;;  %v9847_v22 = vld [vmem:[%s14582_s9 + $0x50] sm:$0xf0] }
 0x742   :  { %v5912_v46 = vmax.f32 %v5904_v42, 0.0  ;;  %v9137_v42 = vld [vmem:[%s14582_s9 + $0x138] sm:$0xf]  ;;  %6610 = vmatpush.bf16.msrb.mxu2 %v9150_v57 }
 0x743   :  { %v5874_v13 = vpop.f32.mrf.mxu3 }
 0x744   :  { %v5875_v24 = vadd.f32 %v5874_v13, %v5845_v20  ;;  %v5739_v20 = vpop.f32.mrf.mxu2  ;;  %v9163_v13 = vld [vmem:[%s14582_s9 + $0x174] sm:$0xf0] }
 0x745   :  { %v5848_v19 = vpop.f32.mrf.mxu1 }
 0x746   :  { %v5893_v28 = vadd.f32 %v5875_v24, %v5727_v44  ;;  %v9053_v44 = vld [vmem:[%s14582_s9 + $0x90] sm:$0xf]  ;;  %v9856_v24 = vld [vmem:[%s14582_s9 + $0x98] sm:$0xf0] }
 0x747   :  { %v9054_v49 = vor.u32 %v9856_v24, %v9053_v44  ;;  %v9018_v44 = vor.u32 %v9847_v22, %v9017_v29  ;;  %v9849_v24 = vld [vmem:[%s14582_s9 + $0x64] sm:$0xf]  ;;  %v9928_v29 = vld [vmem:[%s14582_s9 + $0x2d8] sm:$0xf0] }
 0x748   :  { %v5905_v4 = vadd.f32 %v13881_v55, %v5893_v28  ;;  %v9877_v28 = vld [vmem:[%s14582_s9 + $0x140] sm:$0xf0] }
 0x749   :  { %6597 = vmatpush.bf16.msrb.mxu0 %v9054_v49 }
 0x74a   :  { %v5913_v27 = vmax.f32 %v5905_v4, 0.0  ;;  %v9166_v4 = vor.u32 %v9882_v33, %v9163_v13  ;;  %v9115_v33 = vld [vmem:[%s14582_s9 + $0x114] sm:$0xf0]  ;;  %v9868_v13 = vld [vmem:[%s14582_s9 + $0xf8] sm:$0xf0] }
 0x74b   :  { %v5877_v21 = vpop.f32.mrf.mxu3 }
 0x74c   :  { %v13885_v34 = vmax.f32 %v5912_v46, %v5913_v27  ;;  %v5878_v6 = vadd.f32 %v5877_v21, %v5848_v19  ;;  %v5597_v46 = vadd.f32 %v13876_v38, %v13874_v45  ;;  %v9879_v21 = vld [vmem:[%s14582_s9 + $0x154] sm:$0xf]  ;;  %6661 = vmatpush.bf16.msra.mxu3 %v9166_v4  ;;  %v9853_v45 = vld [vmem:[%s14582_s9 + $0x80] sm:$0xf0]  ;;  %v9138_v38 = vor.u32 %v9877_v28, %v9137_v42  ;;  %v9844_v42 = vld [vmem:[%s14582_s9 + $0x38] sm:$0xf0] }
 0x74d   :  { %v5850_v50 = vpop.f32.mrf.mxu1  ;;  %v9154_v47 = vor.u32 %v9879_v21, %v9151_v25  ;;  %v9118_v4 = vor.u32 %v9870_v58, %v9115_v33  ;;  %v9103_v21 = vld [vmem:[%s14582_s9 + $0xfc] sm:$0xf0]  ;;  %v9846_v25 = vld [vmem:[%s14582_s9 + $0x4c] sm:$0xf]  ;;  %v9157_v33 = vld [vmem:[%s14582_s9 + $0x158] sm:$0xf] }
 0x74e   :  { %v5894_v0 = vadd.f32 %v5878_v6, %v5730_v5  ;;  %v9067_v5 = vld [vmem:[%s14582_s9 + $0xb4] sm:$0xf0]  ;;  %6611 = vmatpush.bf16.msrb.mxu2 %v9138_v38 }
 0x750   :  { %v5906_v32 = vadd.f32 %v13881_v55, %v5894_v0  ;;  %v5712_v0 = vpop.f32.mrf.mxu0  ;;  %6662 = vmatpush.bf16.msra.mxu3 %v9154_v47  ;;  %v9089_v47 = vld [vmem:[%s14582_s9 + $0xd8] sm:$0xf] }
 0x752   :  { %v5914_v40 = vmax.f32 %v5906_v32, 0.0  ;;  %v5713_v32 = vadd.f32 %v5712_v0, %v5597_v46  ;;  %v9867_v46 = vld [vmem:[%s14582_s9 + $0xf4] sm:$0xf] }
 0x753   :  { %v5879_v16 = vpop.f32.mrf.mxu3  ;;  %v9106_v0 = vor.u32 %v9867_v46, %v9103_v21 }
 0x754   :  { %v5880_v30 = vadd.f32 %v5879_v16, %v5850_v50  ;;  %v5711_v50 = vadd.f32 %v5710_v35, %v13872_v59  ;;  %v9876_v59 = vld [vmem:[%s14582_s9 + $0x13c] sm:$0xf]  ;;  %v9871_v35 = vld [vmem:[%s14582_s9 + $0x110] sm:$0xf0] }
 0x755   :  { %v5853_v31 = vpop.f32.mrf.mxu1 }
 0x756   :  { %v5895_v10 = vadd.f32 %v5880_v30, %v5732_v9  ;;  %v9874_v9 = vld [vmem:[%s14582_s9 + $0x128] sm:$0xf0]  ;;  %v9042_v30 = vor.u32 %v9853_v45, %v9041_v62  ;;  %v9865_v45 = vld [vmem:[%s14582_s9 + $0xe0] sm:$0xf0] }
 0x757   :  { %v9126_v14 = vor.u32 %v9874_v9, %v9125_v41  ;;  %v9864_v41 = vld [vmem:[%s14582_s9 + $0xdc] sm:$0xf]  ;;  %v9090_v9 = vor.u32 %v9865_v45, %v9089_v47 }
 0x758   :  { %v5907_v51 = vadd.f32 %v13881_v55, %v5895_v10  ;;  %v9139_v10 = vld [vmem:[%s14582_s9 + $0x144] sm:$0xf0]  ;;  %6598 = vmatpush.bf16.msrb.mxu0 %v9042_v30 }
 0x759   :  { %6612 = vmatpush.bf16.msrb.mxu2 %v9126_v14  ;;  %v9091_v30 = vld [vmem:[%s14582_s9 + $0xe4] sm:$0xf0]  ;;  %v9838_v14 = vld [vmem:[%s14582_s9 + $0x8] sm:$0xf0] }
 0x75a   :  { %v5915_v7 = vmax.f32 %v5907_v51, 0.0  ;;  %v9029_v51 = vld [vmem:[%s14582_s9 + $0x60] sm:$0xf] }
 0x75b   :  { %v5882_v26 = vpop.f32.mrf.mxu3 }
 0x75c   :  { %v13889_v56 = vmax.f32 %v5914_v40, %v5915_v7  ;;  %v5883_v60 = vadd.f32 %v5882_v26, %v5853_v31  ;;  %v9070_v31 = vor.u32 %v9858_v1, %v9067_v5  ;;  %v9855_v40 = vld [vmem:[%s14582_s9 + $0x94] sm:$0xf]  ;;  %v5740_v7 = vadd.f32 %v5739_v20, %v5711_v50  ;;  %v8993_v1 = vld [vmem:[%s14582_s9 + $0x18] sm:$0xf]  ;;  %v9841_v5 = vld [vmem:[%s14582_s9 + $0x20] sm:$0xf0] }
 0x75d   :  { %v5855_v8 = vpop.f32.mrf.mxu1  ;;  %v9142_v26 = vor.u32 %v9876_v59, %v9139_v10  ;;  %v9007_v10 = vld [vmem:[%s14582_s9 + $0x3c] sm:$0xf0] }
 0x75e   :  { %5928 = vrot.lane.b32.xlu0 %v13889_v56, %s10077_s8  ;;  %v5896_v3 = vadd.f32 %v5883_v60, %v5735_v63  ;;  %6648 = vmatpush.bf16.msra.mxu1 %v9070_v31  ;;  %v9058_v60 = vor.u32 %v9855_v40, %v9055_v23  ;;  %v5741_v63 = vpop.f32.mrf.mxu2  ;;  %v9843_v31 = vld [vmem:[%s14582_s9 + $0x34] sm:$0xf]  ;;  %v9353_v40 = vld [vmem:[%s14582_s9 + $0x2e8] sm:$0xf]  ;;  %v9094_v23 = vor.u32 %v9864_v41, %v9091_v30  ;;  %v9293_v30 = vld [vmem:[%s14582_s9 + $0x270] sm:$0xf] }
 0x75f   :  { %6663 = vmatpush.bf16.msra.mxu3 %v9142_v26  ;;  %v8981_v26 = vld [vmem:[%s14582_s9] sm:$0xf] }
 0x760   :  { %v5908_v18 = vadd.f32 %v13881_v55, %v5896_v3  ;;  %v8982_v22 = vor.u32 %v9838_v14, %v8981_v26  ;;  %v9895_v14 = vld [vmem:[%s14582_s9 + $0x1d0] sm:$0xf0] }
 0x762   :  { %v5916_v19 = vmax.f32 %v5908_v18, 0.0  ;;  %6649 = vmatpush.bf16.msra.mxu1 %v9058_v60  ;;  %v9257_v60 = vld [vmem:[%s14582_s9 + $0x228] sm:$0xf] }
 0x763   :  { %v5884_v11 = vpop.f32.mrf.mxu3 }
 0x764   :  { %v5885_v2 = vadd.f32 %v5884_v11, %v5855_v8  ;;  %v9873_v8 = vld [vmem:[%s14582_s9 + $0x124] sm:$0xf]  ;;  %v9113_v11 = vld [vmem:[%s14582_s9 + $0x108] sm:$0xf] }
 0x765   :  { %v5858_v61 = vpop.f32.mrf.mxu1  ;;  %v9130_v54 = vor.u32 %v9873_v8, %v9127_v15  ;;  %v9114_v20 = vor.u32 %v9871_v35, %v9113_v11  ;;  %v9907_v8 = vld [vmem:[%s14582_s9 + $0x230] sm:$0xf0]  ;;  %v9010_v15 = vor.u32 %v9843_v31, %v9007_v10  ;;  %v9079_v11 = vld [vmem:[%s14582_s9 + $0xcc] sm:$0xf0]  ;;  %v9916_v31 = vld [vmem:[%s14582_s9 + $0x278] sm:$0xf0] }
 0x766   :  { %v5897_v52 = vadd.f32 %v5885_v2, %v5737_v17  ;;  %5922 = vrot.lane.b32.xlu0 %v13885_v34, %s10077_s8  ;;  %v9030_v17 = vor.u32 %v9850_v12, %v9029_v51  ;;  %v9852_v2 = vld [vmem:[%s14582_s9 + $0x7c] sm:$0xf]  ;;  %v9862_v51 = vld [vmem:[%s14582_s9 + $0xc8] sm:$0xf0]  ;;  %v8994_v12 = vor.u32 %v9841_v5, %v8993_v1  ;;  %v9169_v35 = vld [vmem:[%s14582_s9 + $0x170] sm:$0xf]  ;;  %v9294_v10 = vor.u32 %v9916_v31, %v9293_v30 }
 0x767   :  { %v9046_v48 = vor.u32 %v9852_v2, %v9043_v43  ;;  %6664 = vmatpush.bf16.msra.mxu3 %v9130_v54  ;;  %6613 = vmatpush.bf16.msrb.mxu2 %v9114_v20  ;;  %v9884_v2 = vld [vmem:[%s14582_s9 + $0x178] sm:$0xf0]  ;;  %v9258_v43 = vor.u32 %v9907_v8, %v9257_v60  ;;  %v9329_v54 = vld [vmem:[%s14582_s9 + $0x2b8] sm:$0xf]  ;;  %v9245_v20 = vld [vmem:[%s14582_s9 + $0x210] sm:$0xf] }
 0x768   :  { %v5909_v39 = vadd.f32 %v13881_v55, %v5897_v52  ;;  %v5742_v52 = vadd.f32 %v5741_v63, %v5713_v32  ;;  %6599 = vmatpush.bf16.msrb.mxu0 %v9030_v17  ;;  %v9077_v32 = vld [vmem:[%s14582_s9 + $0xc0] sm:$0xf]  ;;  %v9898_v1 = vld [vmem:[%s14582_s9 + $0x1e8] sm:$0xf0]  ;;  %v9281_v60 = vld [vmem:[%s14582_s9 + $0x258] sm:$0xf] }
 0x769   :  { %6650 = vmatpush.bf16.msra.mxu1 %v9046_v48  ;;  %v9078_v63 = vor.u32 %v9862_v51, %v9077_v32  ;;  %v9170_v48 = vor.u32 %v9884_v2, %v9169_v35  ;;  %v9061_v32 = vld [vmem:[%s14582_s9 + $0x98] sm:$0xf]  ;;  %v9857_v51 = vld [vmem:[%s14582_s9 + $0xa0] sm:$0xf0]  ;;  %v9121_v35 = vld [vmem:[%s14582_s9 + $0x110] sm:$0xf] }
 0x76a   :  { %v5917_v36 = vmax.f32 %v5909_v39, 0.0  ;;  %v9101_v39 = vld [vmem:[%s14582_s9 + $0xf0] sm:$0xf]  ;;  %v9872_v2 = vld [vmem:[%s14582_s9 + $0x118] sm:$0xf0] }
 0x76b   :  { %v5887_v27 = vpop.f32.mrf.mxu3  ;;  %6665 = vmatpush.bf16.msra.mxu3 %v9118_v4  ;;  %v9233_v4 = vld [vmem:[%s14582_s9 + $0x1f8] sm:$0xf] }
 0x76c   :  { %v13945_v6 = vmax.f32 %v5916_v19, %v5917_v36  ;;  %v5888_v16 = vadd.f32 %v5887_v27, %v5858_v61  ;;  %v9031_v19 = vld [vmem:[%s14582_s9 + $0x6c] sm:$0xf0]  ;;  %v9102_v27 = vor.u32 %v9868_v13, %v9101_v39  ;;  %6600 = vmatpush.bf16.msrb.mxu0 %v9018_v44  ;;  %v9904_v39 = vld [vmem:[%s14582_s9 + $0x218] sm:$0xf0]  ;;  %v9837_v13 = vld [vmem:[%s14582_s9 + $0x4] sm:$0xf] }
 0x76d   :  { %v5860_v18 = vpop.f32.mrf.mxu1  ;;  %v9005_v36 = vld [vmem:[%s14582_s9 + $0x30] sm:$0xf]  ;;  %v9034_v49 = vor.u32 %v9849_v24, %v9031_v19  ;;  %v9925_v24 = vld [vmem:[%s14582_s9 + $0x2c0] sm:$0xf0] }
 0x76e   :  { %v5898_v3 = vadd.f32 %v5888_v16, %v5740_v7  ;;  %v9006_v38 = vor.u32 %v9844_v42, %v9005_v36  ;;  %6614 = vmatpush.bf16.msrb.mxu2 %v9102_v27  ;;  %v9931_v7 = vld [vmem:[%s14582_s9 + $0x2f0] sm:$0xf0]  ;;  %v8983_v44 = vld [vmem:[%s14582_s9 + $0xc] sm:$0xf0]  ;;  %v9860_v36 = vld [vmem:[%s14582_s9 + $0xb8] sm:$0xf0]  ;;  %v9246_v42 = vor.u32 %v9904_v39, %v9245_v20  ;;  %v9330_v27 = vor.u32 %v9925_v24, %v9329_v54 }
 0x76f   :  { %6651 = vmatpush.bf16.msra.mxu1 %v9034_v49  ;;  %6666 = vmatpush.bf16.msra.mxu3 %v9106_v0  ;;  %v9354_v17 = vor.u32 %v9931_v7, %v9353_v40  ;;  %v9073_v19 = vld [vmem:[%s14582_s9 + $0xb0] sm:$0xf]  ;;  %v9901_v49 = vld [vmem:[%s14582_s9 + $0x200] sm:$0xf0]  ;;  %v8986_v46 = vor.u32 %v9837_v13, %v8983_v44  ;;  %v9305_v0 = vld [vmem:[%s14582_s9 + $0x288] sm:$0xf]  ;;  %v9062_v40 = vor.u32 %v9857_v51, %v9061_v32 }
 0x770   :  { %v5910_v57 = vadd.f32 %v13881_v55, %v5898_v3  ;;  %6601 = vmatpush.bf16.msrb.mxu0 %v9006_v38  ;;  %v9861_v3 = vld [vmem:[%s14582_s9 + $0xc4] sm:$0xf]  ;;  %v9074_v21 = vor.u32 %v9860_v36, %v9073_v19  ;;  %v9234_v47 = vor.u32 %v9901_v49, %v9233_v4  ;;  %v9221_v38 = vld [vmem:[%s14582_s9 + $0x1e0] sm:$0xf]  ;;  %v9875_v7 = vld [vmem:[%s14582_s9 + $0x130] sm:$0xf0] }
 0x771   :  { %v9222_v41 = vor.u32 %v9898_v1, %v9221_v38  ;;  %v9037_v54 = vld [vmem:[%s14582_s9 + $0x68] sm:$0xf]  ;;  %v9109_v20 = vld [vmem:[%s14582_s9 + $0xf8] sm:$0xf]  ;;  %v9025_v44 = vld [vmem:[%s14582_s9 + $0x50] sm:$0xf] }
 0x772   :  { %v5918_v62 = vmax.f32 %v5910_v57, 0.0  ;;  %6615 = vmatpush.bf16.msrb.mxu2 %v9090_v9  ;;  %v9881_v57 = vld [vmem:[%s14582_s9 + $0x160] sm:$0xf0]  ;;  %v9848_v24 = vld [vmem:[%s14582_s9 + $0x58] sm:$0xf0] }
 0x773   :  { %v5889_v53 = vpop.f32.mrf.mxu3  ;;  %6667 = vmatpush.bf16.msra.mxu3 %v9094_v23  ;;  %v9209_v23 = vld [vmem:[%s14582_s9 + $0x1c8] sm:$0xf]  ;;  %v9097_v19 = vld [vmem:[%s14582_s9 + $0xe0] sm:$0xf]  ;;  %v9026_v36 = vor.u32 %v9848_v24, %v9025_v44  ;;  %v9886_v49 = vld [vmem:[%s14582_s9 + $0x188] sm:$0xf0] }
 0x774   :  { %v5890_v37 = vadd.f32 %v5889_v53, %v5860_v18  ;;  %6602 = vmatpush.bf16.msrb.mxu0 %v8994_v12  ;;  %v9840_v18 = vld [vmem:[%s14582_s9 + $0x1c] sm:$0xf]  ;;  %v9341_v53 = vld [vmem:[%s14582_s9 + $0x2d0] sm:$0xf]  ;;  %v9133_v12 = vld [vmem:[%s14582_s9 + $0x128] sm:$0xf]  ;;  %v9210_v8 = vor.u32 %v9895_v14, %v9209_v23 }
 0x775   :  { %v9134_v26 = vor.u32 %v9875_v7, %v9133_v12  ;;  %v9173_v4 = vld [vmem:[%s14582_s9 + $0x180] sm:$0xf]  ;;  %v8989_v1 = vld [vmem:[%s14582_s9 + $0x8] sm:$0xf]  ;;  %v9927_v32 = vld [vmem:[%s14582_s9 + $0x2d4] sm:$0xf] }
 0x776   :  { %v5899_v61 = vadd.f32 %v5890_v37, %v5742_v52  ;;  %v8995_v52 = vld [vmem:[%s14582_s9 + $0x24] sm:$0xf0]  ;;  %v9082_v37 = vor.u32 %v9861_v3, %v9079_v11  ;;  %6616 = vmatpush.bf16.msrb.mxu2 %v9078_v63  ;;  %v9049_v3 = vld [vmem:[%s14582_s9 + $0x80] sm:$0xf]  ;;  %v9854_v11 = vld [vmem:[%s14582_s9 + $0x88] sm:$0xf0] }
 0x777   :  { %v8998_v58 = vor.u32 %v9840_v18, %v8995_v52  ;;  %v9122_v18 = vor.u32 %v9872_v2, %v9121_v35  ;;  %v9197_v52 = vld [vmem:[%s14582_s9 + $0x1b0] sm:$0xf]  ;;  %v9343_v51 = vld [vmem:[%s14582_s9 + $0x2dc] sm:$0xf0]  ;;  %v9924_v7 = vld [vmem:[%s14582_s9 + $0x2bc] sm:$0xf] }
 0x778   :  { %v5911_v28 = vadd.f32 %v13881_v55, %v5899_v61  ;;  %v9019_v55 = vld [vmem:[%s14582_s9 + $0x54] sm:$0xf0]  ;;  %v9342_v61 = vor.u32 %v9928_v29, %v9341_v53  ;;  %6603 = vmatpush.bf16.msrb.mxu0 %v8982_v22  ;;  %6668 = vmatpush.bf16.msra.mxu3 %v9082_v37  ;;  %v9892_v53 = vld [vmem:[%s14582_s9 + $0x1b8] sm:$0xf0]  ;;  %v9269_v29 = vld [vmem:[%s14582_s9 + $0x240] sm:$0xf]  ;;  %v9346_v12 = vor.u32 %v9927_v32, %v9343_v51 }
 0x779   :  { %v9022_v16 = vor.u32 %v9846_v25, %v9019_v55  ;;  %v9145_v25 = vld [vmem:[%s14582_s9 + $0x140] sm:$0xf]  ;;  %v9878_v55 = vld [vmem:[%s14582_s9 + $0x148] sm:$0xf0]  ;;  %v9198_v22 = vor.u32 %v9892_v53, %v9197_v52  ;;  %v9900_v2 = vld [vmem:[%s14582_s9 + $0x1fc] sm:$0xf] }
 0x77a   :  { %v5919_v50 = vmax.f32 %v5911_v28, 0.0  ;;  %6635 = vmatpush.bf16.msra.mxu2 %v9354_v17  ;;  %v9158_v28 = vor.u32 %v9881_v57, %v9157_v33  ;;  %v9146_v45 = vor.u32 %v9878_v55, %v9145_v25  ;;  %v9050_v17 = vor.u32 %v9854_v11, %v9049_v3  ;;  %v9889_v57 = vld [vmem:[%s14582_s9 + $0x1a0] sm:$0xf0]  ;;  %v9085_v25 = vld [vmem:[%s14582_s9 + $0xc8] sm:$0xf] }
 0x77b   :  { %6652 = vmatpush.bf16.msra.mxu1 %v9022_v16  ;;  %v9919_v16 = vld [vmem:[%s14582_s9 + $0x290] sm:$0xf0]  ;;  %v9247_v3 = vld [vmem:[%s14582_s9 + $0x21c] sm:$0xf0]  ;;  %v9921_v11 = vld [vmem:[%s14582_s9 + $0x2a4] sm:$0xf] }
 0x77c   :  { %v14054_v59 = vmax.f32 %v5918_v62, %v5919_v50  ;;  %6622 = vmatpush.bf16.msra.mxu0 %v9258_v43  ;;  %6713 = vmatpush.bf16.msrb.mxu3 %v9170_v48  ;;  %v9317_v62 = vld [vmem:[%s14582_s9 + $0x2a0] sm:$0xf]  ;;  %v9922_v50 = vld [vmem:[%s14582_s9 + $0x2a8] sm:$0xf0]  ;;  %v9306_v9 = vor.u32 %v9919_v16, %v9305_v0  ;;  %v9851_v48 = vld [vmem:[%s14582_s9 + $0x70] sm:$0xf0] }
 0x77d   :  { %v9318_v5 = vor.u32 %v9922_v50, %v9317_v62  ;;  %v9910_v43 = vld [vmem:[%s14582_s9 + $0x248] sm:$0xf0]  ;;  %v9038_v39 = vor.u32 %v9851_v48, %v9037_v54  ;;  %v9863_v62 = vld [vmem:[%s14582_s9 + $0xd0] sm:$0xf0]  ;;  %v9307_v53 = vld [vmem:[%s14582_s9 + $0x294] sm:$0xf0] }
 0x77e   :  { %5940 = vrot.lane.b32.xlu1 %v14054_v59, %s10077_s8  ;;  %6636 = vmatpush.bf16.msra.mxu2 %v9342_v61  ;;  %v9270_v37 = vor.u32 %v9910_v43, %v9269_v29  ;;  %v9185_v61 = vld [vmem:[%s14582_s9 + $0x198] sm:$0xf]  ;;  %v9086_v50 = vor.u32 %v9863_v62, %v9085_v25  ;;  %v9930_v16 = vld [vmem:[%s14582_s9 + $0x2ec] sm:$0xf]  ;;  %v9897_v43 = vld [vmem:[%s14582_s9 + $0x1e4] sm:$0xf] }
 0x77f   :  { %6653 = vmatpush.bf16.msra.mxu1 %v9010_v15  ;;  %v9913_v15 = vld [vmem:[%s14582_s9 + $0x260] sm:$0xf0]  ;;  %v9186_v13 = vor.u32 %v9889_v57, %v9185_v61  ;;  %v9918_v52 = vld [vmem:[%s14582_s9 + $0x28c] sm:$0xf]  ;;  %v9915_v54 = vld [vmem:[%s14582_s9 + $0x274] sm:$0xf] }
 0x780   :  { %6623 = vmatpush.bf16.msra.mxu0 %v9246_v42  ;;  %6714 = vmatpush.bf16.msrb.mxu3 %v9158_v28  ;;  %v9282_v63 = vor.u32 %v9913_v15, %v9281_v60  ;;  %v9866_v42 = vld [vmem:[%s14582_s9 + $0xe8] sm:$0xf0]  ;;  %v9903_v15 = vld [vmem:[%s14582_s9 + $0x214] sm:$0xf]  ;;  %v9295_v48 = vld [vmem:[%s14582_s9 + $0x27c] sm:$0xf0] }
 0x781   :  { %v9098_v28 = vor.u32 %v9866_v42, %v9097_v19  ;;  %v9250_v35 = vor.u32 %v9903_v15, %v9247_v3  ;;  %v9912_v61 = vld [vmem:[%s14582_s9 + $0x25c] sm:$0xf]  ;;  %v9283_v57 = vld [vmem:[%s14582_s9 + $0x264] sm:$0xf0]  ;;  %v9891_v24 = vld [vmem:[%s14582_s9 + $0x1b4] sm:$0xf] }
 0x782   :  { %6637 = vmatpush.bf16.msra.mxu2 %v9330_v27  ;;  %v9013_v27 = vld [vmem:[%s14582_s9 + $0x38] sm:$0xf]  ;;  %v9286_v44 = vor.u32 %v9912_v61, %v9283_v57  ;;  %v9199_v19 = vld [vmem:[%s14582_s9 + $0x1bc] sm:$0xf0]  ;;  %v9271_v42 = vld [vmem:[%s14582_s9 + $0x24c] sm:$0xf0] }
 0x783   :  { %6654 = vmatpush.bf16.msra.mxu1 %v8998_v58  ;;  %v9869_v58 = vld [vmem:[%s14582_s9 + $0x100] sm:$0xf0]  ;;  %v9920_v15 = vld [vmem:[%s14582_s9 + $0x298] sm:$0xf0]  ;;  %v9193_v61 = vld [vmem:[%s14582_s9 + $0x1a0] sm:$0xf] }
 0x784   :  { %6624 = vmatpush.bf16.msra.mxu0 %v9234_v47  ;;  %6715 = vmatpush.bf16.msrb.mxu3 %v9146_v45  ;;  %v9110_v33 = vor.u32 %v9869_v58, %v9109_v20  ;;  %v9001_v47 = vld [vmem:[%s14582_s9 + $0x20] sm:$0xf]  ;;  %v9842_v45 = vld [vmem:[%s14582_s9 + $0x28] sm:$0xf0] }
 0x785   :  { %v9002_v38 = vor.u32 %v9842_v45, %v9001_v47  ;;  %v9894_v58 = vld [vmem:[%s14582_s9 + $0x1cc] sm:$0xf]  ;;  %v9349_v47 = vld [vmem:[%s14582_s9 + $0x2d8] sm:$0xf] }
 0x786   :  { %5934 = vrot.lane.b32.xlu1 %v13945_v6, %s10077_s8  ;;  %6638 = vmatpush.bf16.msra.mxu2 %v9318_v5  ;;  %v9839_v5 = vld [vmem:[%s14582_s9 + $0x10] sm:$0xf0]  ;;  %v9890_v57 = vld [vmem:[%s14582_s9 + $0x1a8] sm:$0xf0] }
 0x787   :  { %6655 = vmatpush.bf16.msra.mxu1 %v8986_v46  ;;  %v9174_v46 = vor.u32 %v9886_v49, %v9173_v4  ;;  %v8990_v0 = vor.u32 %v9839_v5, %v8989_v1  ;;  %v9361_v49 = vld [vmem:[%s14582_s9 + $0x2f0] sm:$0xf]  ;;  %v9885_v1 = vld [vmem:[%s14582_s9 + $0x184] sm:$0xf] }
 0x788   :  { %6625 = vmatpush.bf16.msra.mxu0 %v9222_v41  ;;  %6716 = vmatpush.bf16.msrb.mxu3 %v9134_v26  ;;  %v9355_v41 = vld [vmem:[%s14582_s9 + $0x2f4] sm:$0xf0]  ;;  %v9331_v26 = vld [vmem:[%s14582_s9 + $0x2c4] sm:$0xf0] }
 0x789   :  { %v9358_v31 = vor.u32 %v9930_v16, %v9355_v41  ;;  %v9265_v16 = vld [vmem:[%s14582_s9 + $0x230] sm:$0xf]  ;;  %v9908_v41 = vld [vmem:[%s14582_s9 + $0x238] sm:$0xf0] }
 0x78a   :  { %6639 = vmatpush.bf16.msra.mxu2 %v9306_v9  ;;  %v9266_v32 = vor.u32 %v9908_v41, %v9265_v16  ;;  %v9944_v41 = vld [vmem:[%s14584_s11 + $0x58] sm:$0xff] }
 0x78b   :  { %6700 = vmatpush.bf16.msrb.mxu1 %v9074_v21  ;;  %v9845_v21 = vld [vmem:[%s14582_s9 + $0x40] sm:$0xf0] }
 0x78c   :  { %6626 = vmatpush.bf16.msra.mxu0 %v9210_v8  ;;  %6717 = vmatpush.bf16.msrb.mxu3 %v9122_v18  ;;  %v9014_v55 = vor.u32 %v9845_v21, %v9013_v27  ;;  %v9334_v8 = vor.u32 %v9924_v7, %v9331_v26  ;;  %v9235_v18 = vld [vmem:[%s14582_s9 + $0x204] sm:$0xf0]  ;;  %v9888_v27 = vld [vmem:[%s14582_s9 + $0x19c] sm:$0xf] }
 0x78d   :  { %v9238_v29 = vor.u32 %v9900_v2, %v9235_v18  ;;  %v9187_v21 = vld [vmem:[%s14582_s9 + $0x1a4] sm:$0xf0] }
 0x78e   :  { %6640 = vmatpush.bf16.msra.mxu2 %v9294_v10  ;;  %v9325_v7 = vld [vmem:[%s14582_s9 + $0x2a8] sm:$0xf] }
 0x78f   :  { %6701 = vmatpush.bf16.msrb.mxu1 %v9062_v40  ;;  %v9906_v40 = vld [vmem:[%s14582_s9 + $0x22c] sm:$0xf] }
 0x790   :  { %6627 = vmatpush.bf16.msra.mxu0 %v9198_v22  ;;  %6718 = vmatpush.bf16.msrb.mxu3 %v9110_v33  ;;  %v9310_v22 = vor.u32 %v9918_v52, %v9307_v53  ;;  %v9211_v33 = vld [vmem:[%s14582_s9 + $0x1d4] sm:$0xf0]  ;;  %v9217_v52 = vld [vmem:[%s14582_s9 + $0x1d0] sm:$0xf]  ;;  %v9896_v53 = vld [vmem:[%s14582_s9 + $0x1d8] sm:$0xf0] }
 0x792   :  { %6641 = vmatpush.bf16.msra.mxu2 %v9282_v63 }
 0x793   :  { %6702 = vmatpush.bf16.msrb.mxu1 %v9050_v17 }
 0x794   :  { %6628 = vmatpush.bf16.msra.mxu0 %v9186_v13  ;;  %6719 = vmatpush.bf16.msrb.mxu3 %v9098_v28  ;;  %v9214_v13 = vor.u32 %v9894_v58, %v9211_v33  ;;  %v9202_v28 = vor.u32 %v9891_v24, %v9199_v19  ;;  %v9887_v24 = vld [vmem:[%s14582_s9 + $0x190] sm:$0xf0] }
 0x796   :  { %6642 = vmatpush.bf16.msra.mxu2 %v9270_v37  ;;  %v9223_v37 = vld [vmem:[%s14582_s9 + $0x1ec] sm:$0xf0] }
 0x797   :  { %6703 = vmatpush.bf16.msrb.mxu1 %v9038_v39  ;;  %v9226_v20 = vor.u32 %v9897_v43, %v9223_v37  ;;  %v9298_v39 = vor.u32 %v9915_v54, %v9295_v48  ;;  %v9218_v43 = vor.u32 %v9896_v53, %v9217_v52  ;;  %v9205_v54 = vld [vmem:[%s14582_s9 + $0x1b8] sm:$0xf]  ;;  %v9893_v48 = vld [vmem:[%s14582_s9 + $0x1c0] sm:$0xf0] }
 0x798   :  { %6629 = vmatpush.bf16.msra.mxu0 %v9174_v46  ;;  %6720 = vmatpush.bf16.msrb.mxu3 %v9086_v50  ;;  %v9932_v46 = vld [vmem:[%s14582_s9 + $0x2f8] sm:$0xf0]  ;;  %v9190_v50 = vor.u32 %v9888_v27, %v9187_v21  ;;  %v9206_v58 = vor.u32 %v9893_v48, %v9205_v54  ;;  %v9935_v27 = vld [vmem:[%s14584_s11 + $0x10] sm:$0xff] }
 0x799   :  { %v9362_v62 = vor.u32 %v9932_v46, %v9361_v49  ;;  %v9936_v49 = vld [vmem:[%s14584_s11 + $0x18] sm:$0xff]  ;;  %v9947_v21 = vld [vmem:[%s14584_s11 + $0x70] sm:$0xff] }
 0x79a   :  { %v9948_v46 = vld [vmem:[%s14584_s11 + $0x78] sm:$0xff] }
 0x79b   :  { %6704 = vmatpush.bf16.msrb.mxu1 %v9026_v36  ;;  %v9909_v36 = vld [vmem:[%s14582_s9 + $0x244] sm:$0xf] }
 0x79c   :  { %v9274_v4 = vor.u32 %v9909_v36, %v9271_v42  ;;  %v9940_v36 = vld [vmem:[%s14584_s11 + $0x38] sm:$0xff]  ;;  %v9939_v42 = vld [vmem:[%s14584_s11 + $0x30] sm:$0xff] }
 0x79f   :  { %6705 = vmatpush.bf16.msrb.mxu1 %v9014_v55 }
 0x7a3   :  { %6706 = vmatpush.bf16.msrb.mxu1 %v9002_v38  ;;  %v9929_v38 = vld [vmem:[%s14582_s9 + $0x2e0] sm:$0xf0] }
 0x7a4   :  { %v9350_v5 = vor.u32 %v9929_v38, %v9349_v47  ;;  %v9934_v47 = vld [vmem:[%s14584_s11 + $0x8] sm:$0xff]  ;;  %v9933_v38 = vld [vmem:[%s14584_s11] sm:$0xff] }
 0x7a7   :  { %6707 = vmatpush.bf16.msrb.mxu1 %v8990_v0 }
 0x7d0   :  { %v5929_v9 = vpop.permute.xlu0 %5928 }
 0x7d1   :  { %v5931_v30 = vmax.f32 %v13889_v56, %v5929_v9  ;;  %v9259_v56 = vld [vmem:[%s14582_s9 + $0x234] sm:$0xf0]  ;;  %v9337_v9 = vld [vmem:[%s14582_s9 + $0x2c0] sm:$0xf] }
 0x7d2   :  { %v9262_v60 = vor.u32 %v9906_v40, %v9259_v56  ;;  %v9905_v56 = vld [vmem:[%s14582_s9 + $0x220] sm:$0xf0] }
 0x7d3   :  { %v5945_v10 = vpack.c.bf16 %v5931_v30, %v5931_v30  ;;  %v9926_v30 = vld [vmem:[%s14582_s9 + $0x2c8] sm:$0xf0] }
 0x7d4   :  { %v9338_v51 = vor.u32 %v9926_v30, %v9337_v9  ;;  %v9956_v9 = vld [vmem:[%s14584_s11 + $0xb8] sm:$0xff]  ;;  %v9943_v30 = vld [vmem:[%s14584_s11 + $0x50] sm:$0xff] }
 0x7d5   :  { %6617 = vmatmul.bf16.vlgmr.msrb.gmra.mxu2 %v5945_v10  ;;  %6669 = vmatmul.bf16.vlgmr.msra.gmra.mxu3 %v5945_v10 }
 0x7d6   :  { %6687 = vmatpush.bf16.msrb.mxu2 %v9358_v31  ;;  %6967 = vmatpush.bf16.msra.mxu3 %v9948_v46 }
 0x7d8   :  { %v5923_v23 = vpop.permute.xlu0 %5922 }
 0x7d9   :  { %v5925_v14 = vmax.f32 %v13885_v34, %v5923_v23  ;;  %v9319_v34 = vld [vmem:[%s14582_s9 + $0x2ac] sm:$0xf0] }
 0x7da   :  { %6688 = vmatpush.bf16.msrb.mxu2 %v9346_v12  ;;  %v9322_v17 = vor.u32 %v9921_v11, %v9319_v34  ;;  %v9253_v12 = vld [vmem:[%s14582_s9 + $0x218] sm:$0xf]  ;;  %v9229_v11 = vld [vmem:[%s14582_s9 + $0x1e8] sm:$0xf]  ;;  %v9899_v34 = vld [vmem:[%s14582_s9 + $0x1f0] sm:$0xf0]  ;;  %6968 = vmatpush.bf16.msra.mxu3 %v9947_v21 }
 0x7db   :  { %v5944_v63 = vpack.c.bf16 %v5925_v14, %v5925_v14  ;;  %v9254_v26 = vor.u32 %v9905_v56, %v9253_v12  ;;  %v9241_v14 = vld [vmem:[%s14582_s9 + $0x200] sm:$0xf]  ;;  %v9230_v2 = vor.u32 %v9899_v34, %v9229_v11  ;;  %v9954_v12 = vld [vmem:[%s14584_s11 + $0xa8] sm:$0xff] }
 0x7dc   :  { %v9941_v56 = vld [vmem:[%s14584_s11 + $0x40] sm:$0xff]  ;;  %v9950_v11 = vld [vmem:[%s14584_s11 + $0x88] sm:$0xff] }
 0x7dd   :  { %6604 = vmatmul.bf16.vlgmr.msrb.gmra.mxu0 %v5944_v63  ;;  %6656 = vmatmul.bf16.vlgmr.msra.gmra.mxu1 %v5944_v63 }
 0x7de   :  { %6674 = vmatpush.bf16.msrb.mxu0 %v9262_v60  ;;  %6689 = vmatpush.bf16.msrb.mxu2 %v9334_v8  ;;  %v9902_v60 = vld [vmem:[%s14582_s9 + $0x208] sm:$0xf0]  ;;  %v9313_v8 = vld [vmem:[%s14582_s9 + $0x290] sm:$0xf] }
 0x7df   :  { %v9314_v3 = vor.u32 %v9920_v15, %v9313_v8  ;;  %6954 = vmatpush.bf16.msra.mxu1 %v9940_v36  ;;  %v9951_v8 = vld [vmem:[%s14584_s11 + $0x90] sm:$0xff] }
 0x7e2   :  { %6675 = vmatpush.bf16.msrb.mxu0 %v9250_v35  ;;  %6690 = vmatpush.bf16.msrb.mxu2 %v9322_v17  ;;  %v9301_v35 = vld [vmem:[%s14582_s9 + $0x278] sm:$0xf]  ;;  %v9917_v17 = vld [vmem:[%s14582_s9 + $0x280] sm:$0xf0] }
 0x7e3   :  { %v9302_v18 = vor.u32 %v9917_v17, %v9301_v35  ;;  %6955 = vmatpush.bf16.msra.mxu1 %v9939_v42  ;;  %v9949_v17 = vld [vmem:[%s14584_s11 + $0x80] sm:$0xff] }
 0x7e5   :  { %6721 = vmatmul.bf16.vlgmr.msrb.gmra.mxu3 %v5945_v10 }
 0x7e6   :  { %6676 = vmatpush.bf16.msrb.mxu0 %v9238_v29  ;;  %6691 = vmatpush.bf16.msrb.mxu2 %v9310_v22  ;;  %v9289_v29 = vld [vmem:[%s14582_s9 + $0x260] sm:$0xf]  ;;  %v9914_v22 = vld [vmem:[%s14582_s9 + $0x268] sm:$0xf0] }
 0x7e7   :  { %v9290_v37 = vor.u32 %v9914_v22, %v9289_v29 }
 0x7ea   :  { %6677 = vmatpush.bf16.msrb.mxu0 %v9226_v20  ;;  %6692 = vmatpush.bf16.msrb.mxu2 %v9298_v39  ;;  %v9277_v20 = vld [vmem:[%s14582_s9 + $0x248] sm:$0xf]  ;;  %v9911_v39 = vld [vmem:[%s14582_s9 + $0x250] sm:$0xf0] }
 0x7eb   :  { %v9278_v33 = vor.u32 %v9911_v39, %v9277_v20 }
 0x7ed   :  { %6708 = vmatmul.bf16.vlgmr.msrb.gmra.mxu1 %v5944_v63  ;;  %v9242_v63 = vor.u32 %v9902_v60, %v9241_v14  ;;  %v9952_v14 = vld [vmem:[%s14584_s11 + $0x98] sm:$0xff] }
 0x7ee   :  { %6678 = vmatpush.bf16.msrb.mxu0 %v9214_v13  ;;  %6693 = vmatpush.bf16.msrb.mxu2 %v9286_v44  ;;  %v9194_v13 = vor.u32 %v9890_v57, %v9193_v61  ;;  %v9181_v44 = vld [vmem:[%s14582_s9 + $0x188] sm:$0xf] }
 0x7ef   :  { %v9182_v19 = vor.u32 %v9887_v24, %v9181_v44 }
 0x7f0   :  { %v5941_v25 = vpop.permute.xlu1 %5940 }
 0x7f1   :  { %v5943_v55 = vmax.f32 %v14054_v59, %v5941_v25  ;;  %v9175_v59 = vld [vmem:[%s14582_s9 + $0x18c] sm:$0xf0] }
 0x7f2   :  { %6679 = vmatpush.bf16.msrb.mxu0 %v9202_v28  ;;  %6694 = vmatpush.bf16.msrb.mxu2 %v9274_v4  ;;  %v9178_v0 = vor.u32 %v9885_v1, %v9175_v59  ;;  %v9938_v28 = vld [vmem:[%s14584_s11 + $0x28] sm:$0xff]  ;;  %v9937_v4 = vld [vmem:[%s14584_s11 + $0x20] sm:$0xff] }
 0x7f3   :  { %v14396_v45 = vpack.c.bf16 %v5943_v55, %v5943_v55  ;;  %6956 = vmatpush.bf16.msra.mxu1 %v9938_v28  ;;  %v9945_v1 = vld [vmem:[%s14584_s11 + $0x60] sm:$0xff] }
 0x7f5   :  { %6643 = vmatmul.bf16.vlgmr.msra.gmra.mxu2 %v14396_v45 }
 0x7f6   :  { %6739 = vmatpush.bf16.msra.mxu2 %v9362_v62  ;;  %6680 = vmatpush.bf16.msrb.mxu0 %v9190_v50 }
 0x7f7   :  { %6957 = vmatpush.bf16.msra.mxu1 %v9937_v4 }
 0x7f8   :  { %v5935_v31 = vpop.permute.xlu1 %5934 }
 0x7f9   :  { %v5937_v10 = vmax.f32 %v13945_v6, %v5935_v31  ;;  %v9923_v6 = vld [vmem:[%s14582_s9 + $0x2b0] sm:$0xf0] }
 0x7fa   :  { %6740 = vmatpush.bf16.msra.mxu2 %v9350_v5  ;;  %6681 = vmatpush.bf16.msrb.mxu0 %v9178_v0  ;;  %v9326_v23 = vor.u32 %v9923_v6, %v9325_v7  ;;  %v9955_v31 = vld [vmem:[%s14584_s11 + $0xb0] sm:$0xff]  ;;  %v9953_v7 = vld [vmem:[%s14584_s11 + $0xa0] sm:$0xff] }
 0x7fb   :  { %v5946_v40 = vpack.c.bf16 %v5937_v10, %v5937_v10  ;;  %6958 = vmatpush.bf16.msra.mxu1 %v9936_v49 }
 0x7fd   :  { %6630 = vmatmul.bf16.vlgmr.msra.gmra.mxu0 %v5946_v40 }
 0x7fe   :  { %6726 = vmatpush.bf16.msra.mxu0 %v9266_v32  ;;  %6741 = vmatpush.bf16.msra.mxu2 %v9338_v51  ;;  %v9942_v51 = vld [vmem:[%s14584_s11 + $0x48] sm:$0xff] }
 0x7ff   :  { %6959 = vmatpush.bf16.msra.mxu1 %v9935_v27 }
 0x802   :  { %6727 = vmatpush.bf16.msra.mxu0 %v9254_v26  ;;  %6742 = vmatpush.bf16.msra.mxu2 %v9326_v23 }
 0x803   :  { %6960 = vmatpush.bf16.msra.mxu1 %v9934_v47 }
 0x805   :  { %6695 = vmatmul.bf16.vlgmr.msrb.gmra.mxu2 %v14396_v45 }
 0x806   :  { %6728 = vmatpush.bf16.msra.mxu0 %v9242_v63  ;;  %6743 = vmatpush.bf16.msra.mxu2 %v9314_v3 }
 0x807   :  { %6961 = vmatpush.bf16.msra.mxu1 %v9933_v38 }
 0x80a   :  { %6729 = vmatpush.bf16.msra.mxu0 %v9230_v2  ;;  %6744 = vmatpush.bf16.msra.mxu2 %v9302_v18 }
 0x80d   :  { %6682 = vmatmul.bf16.vlgmr.msrb.gmra.mxu0 %v5946_v40 }
 0x80e   :  { %6730 = vmatpush.bf16.msra.mxu0 %v9218_v43  ;;  %6745 = vmatpush.bf16.msra.mxu2 %v9290_v37 }
 0x812   :  { %6731 = vmatpush.bf16.msra.mxu0 %v9206_v58  ;;  %6746 = vmatpush.bf16.msra.mxu2 %v9278_v33 }
 0x815   :  { %6747 = vmatmul.bf16.vlgmr.msra.gmra.mxu2 %v14396_v45  ;;  %v9946_v45 = vld [vmem:[%s14584_s11 + $0x68] sm:$0xff]  ;;  %s10078_s11 = smov [#allocation8]  }
 0x816   :  { %6732 = vmatpush.bf16.msra.mxu0 %v9194_v13  ;;  %6969 = vmatpush.bf16.msra.mxu3 %v9946_v45  ;;  %s6999_s17 = sshll.u32 %s10078_s11, 4  ;;  %s7000_s17 = int_to_ptr.vmem [resolvable:$true] %s6999_s17 }
 0x81a   :  { %6733 = vmatpush.bf16.msra.mxu0 %v9182_v19  ;;  %6970 = vmatpush.bf16.msra.mxu3 %v9945_v1 }
 0x81d   :  { %6734 = vmatmul.bf16.vlgmr.msra.gmra.mxu0 %v5946_v40  ;;  %v6076_v40 = vld [vmem:[%s14583_s10] sm:$0x7] }
 0x81e   :  { %6971 = vmatpush.bf16.msra.mxu3 %v9944_v41  ;;  %6980 = vmatpush.bf16.msrb.mxu0 %v9956_v9  ;;  %v6078_v26 = vperm.slane %v6076_v40, 0  ;;  %v6079_v52 = vperm.slane %v6076_v40, 1  ;;  %v6080_v33 = vperm.slane %v6076_v40, 2 }
 0x822   :  { %6972 = vmatpush.bf16.msra.mxu3 %v9943_v30  ;;  %6981 = vmatpush.bf16.msrb.mxu0 %v9955_v31 }
 0x826   :  { %6973 = vmatpush.bf16.msra.mxu3 %v9942_v51  ;;  %6982 = vmatpush.bf16.msrb.mxu0 %v9954_v12 }
 0x82a   :  { %6974 = vmatpush.bf16.msra.mxu3 %v9941_v56  ;;  %6983 = vmatpush.bf16.msrb.mxu0 %v9953_v7 }
 0x82e   :  { %6984 = vmatpush.bf16.msrb.mxu0 %v9952_v14 }
 0x832   :  { %6985 = vmatpush.bf16.msrb.mxu0 %v9951_v8 }
 0x836   :  { %6986 = vmatpush.bf16.msrb.mxu0 %v9950_v11 }
 0x83a   :  { %6987 = vmatpush.bf16.msrb.mxu0 %v9949_v17 }
 0x858   :  { %v6618_v25 = vpop.f32.mrf.mxu2  ;;  %v6670_v55 = vpop.f32.mrf.mxu3 }
 0x85a   :  { %v6605_v62 = vpop.f32.mrf.mxu0  ;;  %v6657_v50 = vpop.f32.mrf.mxu1 }
 0x85b   :  { %v6606_v60 = vadd.f32 %v6605_v62, %v6078_v26  ;;  %v6658_v22 = vadd.f32 %v6657_v50, %v6079_v52 }
 0x85d   :  { %v6619_v63 = vadd.f32 %v6618_v25, %v6606_v60  ;;  %v6671_v37 = vadd.f32 %v6670_v55, %v6658_v22  ;;  %v9967_v55 = vld [vmem:[#allocation7] ss:$0 sm:$0xff] }
 0x860   :  { %v6620_v59 = vpop.f32.mrf.mxu2  ;;  %v6672_v5 = vpop.f32.mrf.mxu3 }
 0x862   :  { %v6607_v0 = vpop.f32.mrf.mxu0  ;;  %v6659_v16 = vpop.f32.mrf.mxu1 }
 0x868   :  { %v6722_v10 = vpop.f32.mrf.mxu3 }
 0x86a   :  { %v6709_v32 = vpop.f32.mrf.mxu1 }
 0x86b   :  { %v6710_v13 = vadd.f32 %v6709_v32, %v6080_v33 }
 0x86d   :  { %v6723_v24 = vadd.f32 %v6722_v10, %v6710_v13 }
 0x870   :  { %v6724_v6 = vpop.f32.mrf.mxu3 }
 0x872   :  { %v6711_v23 = vpop.f32.mrf.mxu1 }
 0x878   :  { %v6644_v15 = vpop.f32.mrf.mxu2 }
 0x87a   :  { %v6631_v3 = vpop.f32.mrf.mxu0 }
 0x87b   :  { %v6632_v34 = vadd.f32 %v6631_v3, %v6619_v63 }
 0x87d   :  { %v6645_v35 = vadd.f32 %v6644_v15, %v6632_v34 }
 0x87f   :  { %v6752_v2 = vmax.f32 %v6645_v35, 0.0 }
 0x880   :  { %v6646_v18 = vpop.f32.mrf.mxu2 }
 0x881   :  { %v6755_v53 = vpack.c.bf16 %v6752_v2, %v6752_v2 }
 0x882   :  { %v6633_v29 = vpop.f32.mrf.mxu0 }
 0x883   :  { %6962 = vmatmul.bf16.vlgmr.msra.gmra.mxu1 %v6755_v53 }
 0x888   :  { %v6696_v43 = vpop.f32.mrf.mxu2 }
 0x88a   :  { %v6683_v54 = vpop.f32.mrf.mxu0 }
 0x88b   :  { %v6684_v48 = vadd.f32 %v6683_v54, %v6671_v37 }
 0x88d   :  { %v6697_v20 = vadd.f32 %v6696_v43, %v6684_v48 }
 0x88f   :  { %v6753_v39 = vmax.f32 %v6697_v20, 0.0 }
 0x890   :  { %v6698_v58 = vpop.f32.mrf.mxu2 }
 0x891   :  { %v6756_v61 = vpack.c.bf16 %v6753_v39, %v6753_v39 }
 0x892   :  { %v6685_v57 = vpop.f32.mrf.mxu0 }
 0x893   :  { %6975 = vmatmul.bf16.vlgmr.msra.gmra.mxu3 %v6756_v61 }
 0x898   :  { %v6748_v44 = vpop.f32.mrf.mxu2 }
 0x89a   :  { %v6735_v19 = vpop.f32.mrf.mxu0 }
 0x89b   :  { %v6736_v36 = vadd.f32 %v6735_v19, %v6723_v24 }
 0x89d   :  { %v6749_v42 = vadd.f32 %v6748_v44, %v6736_v36 }
 0x89f   :  { %v6754_v28 = vmax.f32 %v6749_v42, 0.0 }
 0x8a0   :  { %v6750_v4 = vpop.f32.mrf.mxu2 }
 0x8a1   :  { %v6757_v49 = vpack.c.bf16 %v6754_v28, %v6754_v28 }
 0x8a2   :  { %v6737_v46 = vpop.f32.mrf.mxu0 }
 0x8a3   :  { %6988 = vmatmul.bf16.vlgmr.msrb.gmra.mxu0 %v6757_v49 }
 0x900   :  { %v6963_v27 = vpop.f32.mrf.mxu1 }
 0x901   :  { %v6964_v62 = vadd.f32 %v9967_v55, %v6963_v27 }
 0x908   :  { %v6965_v21 = vpop.f32.mrf.mxu1 }
 0x916   :  { %v6976_v25 = vpop.f32.mrf.mxu3 }
 0x917   :  { %v6977_v47 = vadd.f32 %v6976_v25, %v6964_v62 }
 0x91e   :  { %v6978_v50 = vpop.f32.mrf.mxu3 }
 0x920   :  { %v6989_v45 = vpop.f32.mrf.mxu0 }
 0x921   :  { %v6990_v38 = vadd.f32 %v6989_v45, %v6977_v47 }
 0x923   :  { %6993 = vst [vmem:[#allocation8] sm:$0xff] %v6990_v38 }
 0x924   :  { %7004 = dma.vmem_to_hbm [thread:$0]  %s7000_s17, 128, %s7002_s3, [#allocation4]  }
 0x928   :  { %v6991_v1 = vpop.f32.mrf.mxu0 }
 0x929   :  { %10068 = dma.done.wait [#allocation4], 128  }
 0x92a   :  { %10069 = vsyncadd [#allocation4], 4294967168 }
 0x92b   :  { %7009 = vsyncpa [#allocation3], 1 }
 0x92c   :  { %7010 = vsyncpa [#allocation6], 1 }
 0x92d   :  { %7011 = vsyncpa [#allocation4], 1 }

</bundles_post_ra>
